<compile_context>
chip_gen: v7x
topology: tpu7x:2x2x1
jax: 0.10.0
libtpu: 0.0.40
codegen_flags: <defaults>
</compile_context>

<pallas_src>
import functools
import math

import jax
import jax.numpy as jnp
from jax.experimental import pallas as pl
from jax.experimental.pallas import tpu as pltpu

EMBED = 3              # embedding_size
HIDDEN = 4 * EMBED     # FFN hidden width
BLOCK_SIZE = 8         # sequence length T
DROPOUT_RATE = 0.1
_KEEP_SCALE = 1.0 / (1.0 - DROPOUT_RATE)
_DROPOUT_THRESHOLD = int(round(DROPOUT_RATE * 2 ** 32))   # integer keep-threshold on raw bits
_LN_EPS = 1e-5

# Packed-parameter layout: every weight stored (fan_in, fan_out), flattened row-major into one
# f32 SMEM vector (one descriptor instead of 13 padded 2-D SMEM refs).
_PARAM_LAYOUT = (
    ("wk", (EMBED, EMBED)), ("wq", (EMBED, EMBED)), ("wv", (EMBED, EMBED)),
    ("wp", (EMBED, EMBED)), ("bp", (EMBED,)),
    ("w1", (EMBED, HIDDEN)), ("b1", (HIDDEN,)),
    ("w2", (HIDDEN, EMBED)), ("b2", (EMBED,)),
    ("g1", (EMBED,)), ("be1", (EMBED,)), ("g2", (EMBED,)), ("be2", (EMBED,)),
)
_PARAM_SIZE = sum(math.prod(s) for _, s in _PARAM_LAYOUT)


def _block_kernel(x_ref, par_ref, seed_ref, o_ref, *, training, lane_tile):
    C, T = EMBED, BLOCK_SIZE
    tb = o_ref.shape[-1]                               # lanes (batch) in this grid step
    sub = lane_tile if (tb % lane_tile == 0) else tb   # compute sub-slice width
    n_sub = tb // sub

    if training:
        # Independent dropout streams per batch tile (TPU hardware PRNG).
        pltpu.prng_seed(seed_ref[0], pl.program_id(0))

    # ---- unpack the flat SMEM parameter vector into Python lists of scalars ----------------
    prm = {}
    off = 0
    for name, shape in _PARAM_LAYOUT:
        if len(shape) == 1:
            prm[name] = [par_ref[off + i] for i in range(shape[0])]
            off += shape[0]
        else:
            rows, cols = shape
            prm[name] = [[par_ref[off + i * cols + j] for j in range(cols)]
                         for i in range(rows)]
            off += rows * cols

    scale = float(C) ** -0.5

    def rand_keep(shape):
        bits = pltpu.bitcast(pltpu.prng_random_bits(shape), jnp.uint32)
        return bits >= _DROPOUT_THRESHOLD               # P(keep) = 1 - rate, single compare

    def drop(v, keep):
        return jnp.where(keep, v * _KEEP_SCALE, 0.0)

    def linear(xs, w, b=None):
        # y[o] = sum_i w[i][o] * x[i] (+ b[o])  -- VPU broadcast-FMAs, no MXU.
        n_in, n_out = len(w), len(w[0])
        out = []
        for o in range(n_out):
            acc = xs[0] * w[0][o]
            for i in range(1, n_in):
                acc = acc + xs[i] * w[i][o]
            if b is not None:
                acc = acc + b[o]
            out.append(acc)
        return out

    def layernorm(xs, g, b):
        n = len(xs)
        mu = xs[0]
        for c in range(1, n):
            mu = mu + xs[c]
        mu = mu * (1.0 / n)
        d = [xc - mu for xc in xs]
        var = d[0] * d[0]
        for c in range(1, n):
            var = var + d[c] * d[c]
        var = var * (1.0 / n)
        inv = jax.lax.rsqrt(var + _LN_EPS)
        return [d[c] * inv * g[c] + b[c] for c in range(n)]

    def attention_add(src, res, lanes):
        """o_ref[:, :, lanes] = res + dropout(proj(causal_attn(src))), fused per query row.

        No concatenates and no 24 live (1, N) rows: projection, dropout and residual add
        happen row-by-row, and each finished row is stored straight into the output block,
        which doubles as the VMEM working buffer."""
        k = linear(src, prm["wk"])
        q = linear(src, prm["wq"])
        v = linear(src, prm["wv"])
        if training:
            aw_keep = rand_keep((T * T, sub))           # attention-weight dropout (bulk draw)
            py_keep = rand_keep((T * C, sub))           # post-projection dropout (bulk draw)
        for t in range(T):
            # Scores of query t against keys 0..t.  The causal mask is realized by the static
            # key slice [:t+1] (sublane axis = key position): no -inf masking, no captured
            # boolean constants, ~half the softmax work.
            s = q[0][t:t + 1, :] * k[0][:t + 1, :]
            for h in range(1, C):
                s = s + q[h][t:t + 1, :] * k[h][:t + 1, :]
            s = s * scale
            m = jnp.max(s, axis=0, keepdims=True)
            e = jnp.exp(s - m)
            denom = jnp.sum(e, axis=0, keepdims=True)
            # TODO(synk): on hardware pl.reciprocal(denom, approx=True) would move this divide
            # onto the EUP slot; exact divide kept for interpret / non-Mosaic lowering safety.
            aw = e * (1.0 / denom)
            if training:
                aw = drop(aw, aw_keep[t * T:t * T + t + 1, :])
            att = [jnp.sum(aw * v[h][:t + 1, :], axis=0, keepdims=True) for h in range(C)]
            for o in range(C):
                y = att[0] * prm["wp"][0][o]
                for h in range(1, C):
                    y = y + att[h] * prm["wp"][h][o]
                y = y + prm["bp"][o]
                if training:
                    y = drop(y, py_keep[t * C + o:t * C + o + 1, :])
                o_ref[o, t:t + 1, lanes] = (res[o][t:t + 1, :] + y).astype(o_ref.dtype)

    def ffn(xs):
        hid = linear(xs, prm["w1"], prm["b1"])
        hid = [jnp.maximum(hc, 0.0) for hc in hid]       # ReLU
        y = linear(hid, prm["w2"], prm["b2"])
        if training:
            keep = rand_keep((C * T, sub))
            y = [drop(y[c], keep[c * T:(c + 1) * T, :]) for c in range(C)]
        return y

    def process(lanes):
        x1 = [x_ref[c, :, lanes] for c in range(C)]      # (T, sub) slabs, batch on lanes
        attention_add(x1, x1, lanes)                     # x2 = x1 + MHA(x1)        -> o_ref
        x2 = [o_ref[c, :, lanes] for c in range(C)]
        y = ffn(x2)                                      # x3 = x2 + FFN(x2)
        x3 = [x2[c] + y[c] for c in range(C)]
        attention_add(layernorm(x3, prm["g1"], prm["be1"]), x3, lanes)   # x4       -> o_ref
        x4 = [o_ref[c, :, lanes] for c in range(C)]
        y = ffn(layernorm(x4, prm["g2"], prm["be2"]))    # out = x4 + FFN(LN2(x4))
        for c in range(C):
            o_ref[c, :, lanes] = (x4[c] + y[c]).astype(o_ref.dtype)

    # Static sub-slice loop over the lane (batch) axis: offsets are compile-time constants
    # (128-aligned, so no dynamic minormost indexing), and every iteration flushes all of its
    # results to o_ref, so unrolling does not grow the live-vreg working set.
    for j in range(n_sub):
        process(slice(j * sub, (j + 1) * sub))


def pack_params(params):
    """Pack the 13 tiny parameter tensors into one flat f32 vector (single SMEM descriptor)."""
    flat = jnp.concatenate([jnp.asarray(params[name], jnp.float32).reshape(-1)
                            for name, _ in _PARAM_LAYOUT])
    assert flat.shape == (_PARAM_SIZE,)
    return flat


def _pick_tiles(B, batch_tile, lane_tile):
    """Pick (padded batch, per-step tile): big DMA tiles; >=2 grid steps when possible (v7x)."""
    batch_tile = max(lane_tile, (batch_tile // lane_tile) * lane_tile)
    if B > lane_tile and B % lane_tile:
        bpad = pl.cdiv(B, lane_tile) * lane_tile         # keep lane sub-slices aligned
    else:
        bpad = B
    if bpad > batch_tile:
        tb = batch_tile
        bpad = pl.cdiv(bpad, tb) * tb
    elif bpad >= 2 * lane_tile and bpad % (2 * lane_tile) == 0:
        tb = bpad // 2        # exactly 2 grid steps -> both v7x TensorCores get work, no pad
    else:
        tb = bpad
    return bpad, tb


@functools.partial(jax.jit, static_argnames=("training", "batch_tile", "lane_tile"))
def block_forward_channel_major(x_cm, packed_params, seed=0, *, training=False,
                                batch_tile=1024, lane_tile=256):
    """Native entry point: x_cm is channel-major (C, T, B).

    Keeping activations in this layout across a stack of Blocks avoids any HBM transpose
    around the kernel (the batch axis stays on the 128-lane axis end to end)."""
    C, T, B = x_cm.shape
    assert C == EMBED and T == BLOCK_SIZE
    bpad, tb = _pick_tiles(B, batch_tile, lane_tile)
    if bpad != B:
        x_cm = jnp.pad(x_cm, ((0, 0), (0, 0), (0, bpad - B)))

    block = pl.BlockSpec((C, T, tb), lambda i: (0, 0, i))
    smem = pl.BlockSpec(memory_space=pltpu.MemorySpace.SMEM)
    seed_arr = jnp.asarray(seed, jnp.int32).reshape((1,))

    out = pl.pallas_call(
        functools.partial(_block_kernel, training=training, lane_tile=lane_tile),
        grid=(bpad // tb,),
        in_specs=[block, smem, smem],
        out_specs=block,
        out_shape=jax.ShapeDtypeStruct((C, T, bpad), x_cm.dtype),
        compiler_params=pltpu.CompilerParams(
            dimension_semantics=("parallel",)),          # independent batch tiles
    )(x_cm, packed_params, seed_arr)

    return out[:, :, :B] if bpad != B else out


@functools.partial(jax.jit, static_argnames=("training", "batch_tile", "lane_tile"))
def block_forward(x, params, seed=0, *, training=False, batch_tile=1024, lane_tile=256):
    """(B, T, C) compatibility wrapper around the channel-major kernel.

    The two transposes here are boundary-only costs: in a stacked model transpose once,
    keep (C, T, B) between Blocks, and call block_forward_channel_major directly."""
    B, T, C = x.shape
    packed = pack_params(params) if isinstance(params, dict) else params
    x_cm = jnp.transpose(x, (2, 1, 0))
    y_cm = block_forward_channel_major(x_cm, packed, seed, training=training,
                                       batch_tile=batch_tile, lane_tile=lane_tile)
    return jnp.transpose(y_cm, (2, 1, 0))


def init_params(key):
    """torch.nn defaults: Linear ~ U(-1/sqrt(fan_in), 1/sqrt(fan_in)); LayerNorm gamma=1, beta=0.
    Weights are stored (fan_in, fan_out), so the kernel / reference compute x @ W."""
    ks = jax.random.split(key, 9)
    b3 = 1.0 / math.sqrt(EMBED)
    b12 = 1.0 / math.sqrt(HIDDEN)
    u = lambda k, shape, bound: jax.random.uniform(k, shape, jnp.float32, -bound, bound)
    return dict(
        wk=u(ks[0], (EMBED, EMBED), b3),
        wq=u(ks[1], (EMBED, EMBED), b3),
        wv=u(ks[2], (EMBED, EMBED), b3),
        wp=u(ks[3], (EMBED, EMBED), b3),
        bp=u(ks[4], (EMBED,), b3),
        w1=u(ks[5], (EMBED, HIDDEN), b3),
        b1=u(ks[6], (HIDDEN,), b3),
        w2=u(ks[7], (HIDDEN, EMBED), b12),
        b2=u(ks[8], (EMBED,), b12),
        g1=jnp.ones((EMBED,), jnp.float32),
        be1=jnp.zeros((EMBED,), jnp.float32),
        g2=jnp.ones((EMBED,), jnp.float32),
        be2=jnp.zeros((EMBED,), jnp.float32),
    )


def block_forward_ref(x, p):
    """Pure-JAX eval-mode reference of the PyTorch Block (dropout = identity in eval)."""
    T = x.shape[1]

    def ln(v, g, b):
        mu = v.mean(-1, keepdims=True)
        var = ((v - mu) ** 2).mean(-1, keepdims=True)
        return (v - mu) * jax.lax.rsqrt(var + _LN_EPS) * g + b

    def mha(v):
        k = v @ p["wk"]; q = v @ p["wq"]; val = v @ p["wv"]
        att = jnp.einsum("btd,bsd->bts", q, k) * (EMBED ** -0.5)
        mask = jnp.tril(jnp.ones((T, T), dtype=bool))
        att = jnp.where(mask, att, -jnp.inf)
        att = jax.nn.softmax(att, axis=-1)
        y = jnp.einsum("bts,bsd->btd", att, val)
        return y @ p["wp"] + p["bp"]

    def ffn(v):
        h = jnp.maximum(v @ p["w1"] + p["b1"], 0.0)
        return h @ p["w2"] + p["b2"]

    x = x + mha(x)
    x = x + ffn(x)
    x = x + mha(ln(x, p["g1"], p["be1"]))
    x = x + ffn(ln(x, p["g2"], p["be2"]))
    return x


if __name__ == "__main__":
    key = jax.random.PRNGKey(0)
    kx, kb, kp = jax.random.split(key, 3)
    params = init_params(kp)

    # Tiny batch: single grid step / single lane sub-slice path.
    x_small = jax.random.normal(kx, (2, BLOCK_SIZE, EMBED), jnp.float32)
    y_small = jax.block_until_ready(block_forward(x_small, params, training=False))
    assert y_small.shape == x_small.shape
    err_small = float(jnp.max(jnp.abs(y_small - block_forward_ref(x_small, params))))
    assert err_small < 1e-3, f"small-batch mismatch vs reference: {err_small}"

    # Larger batch: 2 parallel grid steps x 2 static 256-lane sub-slices per step.
    x_big = jax.random.normal(kb, (1024, BLOCK_SIZE, EMBED), jnp.float32)
    y_big = jax.block_until_ready(block_forward(x_big, params, training=False))
    err_big = float(jnp.max(jnp.abs(y_big - block_forward_ref(x_big, params))))
    assert err_big < 1e-3, f"large-batch mismatch vs reference: {err_big}"

    # TODO(synk): training-mode dropout (training=True) uses the TPU hardware PRNG
    # (pltpu.prng_seed / prng_random_bits, bulk draws + integer threshold); it is implemented
    # above but not validated against a fixed-mask reference and not exercised in this demo.
    print("KERNEL_OK")
</pallas_src>

<mosaic_0001>
module attributes {stable_mosaic.version = 11 : i64} {
  func.func @_block_kernel(%arg0: i32, %arg1: memref<3x8x2xf32, #tpu.memory_space<vmem>>, %arg2: memref<138xf32, #tpu.memory_space<smem>>, %arg3: memref<1xi32, #tpu.memory_space<smem>>, %arg4: memref<3x8x2xf32, #tpu.memory_space<vmem>>) attributes {dimension_semantics = [#tpu.dimension_semantics<parallel>], iteration_bounds = array<i64: 1>, scalar_prefetch = 0 : i64, scratch_operands = 0 : i64, tpu.core_type = #tpu.core_type<tc>, window_params = [{transform_indices = @transform_0, window_bounds = array<i64: 3, 8, 2>}, {transform_indices = @transform_1, window_bounds = array<i64: 138>}, {transform_indices = @transform_2, window_bounds = array<i64: 1>}, {transform_indices = @transform_3, window_bounds = array<i64: 3, 8, 2>}]} {
    %c0 = arith.constant 0 : index
    %0 = memref.load %arg2[%c0] : memref<138xf32, #tpu.memory_space<smem>>
    %c1 = arith.constant 1 : index
    %1 = memref.load %arg2[%c1] : memref<138xf32, #tpu.memory_space<smem>>
    %c2 = arith.constant 2 : index
    %2 = memref.load %arg2[%c2] : memref<138xf32, #tpu.memory_space<smem>>
    %c3 = arith.constant 3 : index
    %3 = memref.load %arg2[%c3] : memref<138xf32, #tpu.memory_space<smem>>
    %c4 = arith.constant 4 : index
    %4 = memref.load %arg2[%c4] : memref<138xf32, #tpu.memory_space<smem>>
    %c5 = arith.constant 5 : index
    %5 = memref.load %arg2[%c5] : memref<138xf32, #tpu.memory_space<smem>>
    %c6 = arith.constant 6 : index
    %6 = memref.load %arg2[%c6] : memref<138xf32, #tpu.memory_space<smem>>
    %c7 = arith.constant 7 : index
    %7 = memref.load %arg2[%c7] : memref<138xf32, #tpu.memory_space<smem>>
    %c8 = arith.constant 8 : index
    %8 = memref.load %arg2[%c8] : memref<138xf32, #tpu.memory_space<smem>>
    %c9 = arith.constant 9 : index
    %9 = memref.load %arg2[%c9] : memref<138xf32, #tpu.memory_space<smem>>
    %c10 = arith.constant 10 : index
    %10 = memref.load %arg2[%c10] : memref<138xf32, #tpu.memory_space<smem>>
    %c11 = arith.constant 11 : index
    %11 = memref.load %arg2[%c11] : memref<138xf32, #tpu.memory_space<smem>>
    %c12 = arith.constant 12 : index
    %12 = memref.load %arg2[%c12] : memref<138xf32, #tpu.memory_space<smem>>
    %c13 = arith.constant 13 : index
    %13 = memref.load %arg2[%c13] : memref<138xf32, #tpu.memory_space<smem>>
    %c14 = arith.constant 14 : index
    %14 = memref.load %arg2[%c14] : memref<138xf32, #tpu.memory_space<smem>>
    %c15 = arith.constant 15 : index
    %15 = memref.load %arg2[%c15] : memref<138xf32, #tpu.memory_space<smem>>
    %c16 = arith.constant 16 : index
    %16 = memref.load %arg2[%c16] : memref<138xf32, #tpu.memory_space<smem>>
    %c17 = arith.constant 17 : index
    %17 = memref.load %arg2[%c17] : memref<138xf32, #tpu.memory_space<smem>>
    %c18 = arith.constant 18 : index
    %18 = memref.load %arg2[%c18] : memref<138xf32, #tpu.memory_space<smem>>
    %c19 = arith.constant 19 : index
    %19 = memref.load %arg2[%c19] : memref<138xf32, #tpu.memory_space<smem>>
    %c20 = arith.constant 20 : index
    %20 = memref.load %arg2[%c20] : memref<138xf32, #tpu.memory_space<smem>>
    %c21 = arith.constant 21 : index
    %21 = memref.load %arg2[%c21] : memref<138xf32, #tpu.memory_space<smem>>
    %c22 = arith.constant 22 : index
    %22 = memref.load %arg2[%c22] : memref<138xf32, #tpu.memory_space<smem>>
    %c23 = arith.constant 23 : index
    %23 = memref.load %arg2[%c23] : memref<138xf32, #tpu.memory_space<smem>>
    %c24 = arith.constant 24 : index
    %24 = memref.load %arg2[%c24] : memref<138xf32, #tpu.memory_space<smem>>
    %c25 = arith.constant 25 : index
    %25 = memref.load %arg2[%c25] : memref<138xf32, #tpu.memory_space<smem>>
    %c26 = arith.constant 26 : index
    %26 = memref.load %arg2[%c26] : memref<138xf32, #tpu.memory_space<smem>>
    %c27 = arith.constant 27 : index
    %27 = memref.load %arg2[%c27] : memref<138xf32, #tpu.memory_space<smem>>
    %c28 = arith.constant 28 : index
    %28 = memref.load %arg2[%c28] : memref<138xf32, #tpu.memory_space<smem>>
    %c29 = arith.constant 29 : index
    %29 = memref.load %arg2[%c29] : memref<138xf32, #tpu.memory_space<smem>>
    %c30 = arith.constant 30 : index
    %30 = memref.load %arg2[%c30] : memref<138xf32, #tpu.memory_space<smem>>
    %c31 = arith.constant 31 : index
    %31 = memref.load %arg2[%c31] : memref<138xf32, #tpu.memory_space<smem>>
    %c32 = arith.constant 32 : index
    %32 = memref.load %arg2[%c32] : memref<138xf32, #tpu.memory_space<smem>>
    %c33 = arith.constant 33 : index
    %33 = memref.load %arg2[%c33] : memref<138xf32, #tpu.memory_space<smem>>
    %c34 = arith.constant 34 : index
    %34 = memref.load %arg2[%c34] : memref<138xf32, #tpu.memory_space<smem>>
    %c35 = arith.constant 35 : index
    %35 = memref.load %arg2[%c35] : memref<138xf32, #tpu.memory_space<smem>>
    %c36 = arith.constant 36 : index
    %36 = memref.load %arg2[%c36] : memref<138xf32, #tpu.memory_space<smem>>
    %c37 = arith.constant 37 : index
    %37 = memref.load %arg2[%c37] : memref<138xf32, #tpu.memory_space<smem>>
    %c38 = arith.constant 38 : index
    %38 = memref.load %arg2[%c38] : memref<138xf32, #tpu.memory_space<smem>>
    %c39 = arith.constant 39 : index
    %39 = memref.load %arg2[%c39] : memref<138xf32, #tpu.memory_space<smem>>
    %c40 = arith.constant 40 : index
    %40 = memref.load %arg2[%c40] : memref<138xf32, #tpu.memory_space<smem>>
    %c41 = arith.constant 41 : index
    %41 = memref.load %arg2[%c41] : memref<138xf32, #tpu.memory_space<smem>>
    %c42 = arith.constant 42 : index
    %42 = memref.load %arg2[%c42] : memref<138xf32, #tpu.memory_space<smem>>
    %c43 = arith.constant 43 : index
    %43 = memref.load %arg2[%c43] : memref<138xf32, #tpu.memory_space<smem>>
    %c44 = arith.constant 44 : index
    %44 = memref.load %arg2[%c44] : memref<138xf32, #tpu.memory_space<smem>>
    %c45 = arith.constant 45 : index
    %45 = memref.load %arg2[%c45] : memref<138xf32, #tpu.memory_space<smem>>
    %c46 = arith.constant 46 : index
    %46 = memref.load %arg2[%c46] : memref<138xf32, #tpu.memory_space<smem>>
    %c47 = arith.constant 47 : index
    %47 = memref.load %arg2[%c47] : memref<138xf32, #tpu.memory_space<smem>>
    %c48 = arith.constant 48 : index
    %48 = memref.load %arg2[%c48] : memref<138xf32, #tpu.memory_space<smem>>
    %c49 = arith.constant 49 : index
    %49 = memref.load %arg2[%c49] : memref<138xf32, #tpu.memory_space<smem>>
    %c50 = arith.constant 50 : index
    %50 = memref.load %arg2[%c50] : memref<138xf32, #tpu.memory_space<smem>>
    %c51 = arith.constant 51 : index
    %51 = memref.load %arg2[%c51] : memref<138xf32, #tpu.memory_space<smem>>
    %c52 = arith.constant 52 : index
    %52 = memref.load %arg2[%c52] : memref<138xf32, #tpu.memory_space<smem>>
    %c53 = arith.constant 53 : index
    %53 = memref.load %arg2[%c53] : memref<138xf32, #tpu.memory_space<smem>>
    %c54 = arith.constant 54 : index
    %54 = memref.load %arg2[%c54] : memref<138xf32, #tpu.memory_space<smem>>
    %c55 = arith.constant 55 : index
    %55 = memref.load %arg2[%c55] : memref<138xf32, #tpu.memory_space<smem>>
    %c56 = arith.constant 56 : index
    %56 = memref.load %arg2[%c56] : memref<138xf32, #tpu.memory_space<smem>>
    %c57 = arith.constant 57 : index
    %57 = memref.load %arg2[%c57] : memref<138xf32, #tpu.memory_space<smem>>
    %c58 = arith.constant 58 : index
    %58 = memref.load %arg2[%c58] : memref<138xf32, #tpu.memory_space<smem>>
    %c59 = arith.constant 59 : index
    %59 = memref.load %arg2[%c59] : memref<138xf32, #tpu.memory_space<smem>>
    %c60 = arith.constant 60 : index
    %60 = memref.load %arg2[%c60] : memref<138xf32, #tpu.memory_space<smem>>
    %c61 = arith.constant 61 : index
    %61 = memref.load %arg2[%c61] : memref<138xf32, #tpu.memory_space<smem>>
    %c62 = arith.constant 62 : index
    %62 = memref.load %arg2[%c62] : memref<138xf32, #tpu.memory_space<smem>>
    %c63 = arith.constant 63 : index
    %63 = memref.load %arg2[%c63] : memref<138xf32, #tpu.memory_space<smem>>
    %c64 = arith.constant 64 : index
    %64 = memref.load %arg2[%c64] : memref<138xf32, #tpu.memory_space<smem>>
    %c65 = arith.constant 65 : index
    %65 = memref.load %arg2[%c65] : memref<138xf32, #tpu.memory_space<smem>>
    %c66 = arith.constant 66 : index
    %66 = memref.load %arg2[%c66] : memref<138xf32, #tpu.memory_space<smem>>
    %c67 = arith.constant 67 : index
    %67 = memref.load %arg2[%c67] : memref<138xf32, #tpu.memory_space<smem>>
    %c68 = arith.constant 68 : index
    %68 = memref.load %arg2[%c68] : memref<138xf32, #tpu.memory_space<smem>>
    %c69 = arith.constant 69 : index
    %69 = memref.load %arg2[%c69] : memref<138xf32, #tpu.memory_space<smem>>
    %c70 = arith.constant 70 : index
    %70 = memref.load %arg2[%c70] : memref<138xf32, #tpu.memory_space<smem>>
    %c71 = arith.constant 71 : index
    %71 = memref.load %arg2[%c71] : memref<138xf32, #tpu.memory_space<smem>>
    %c72 = arith.constant 72 : index
    %72 = memref.load %arg2[%c72] : memref<138xf32, #tpu.memory_space<smem>>
    %c73 = arith.constant 73 : index
    %73 = memref.load %arg2[%c73] : memref<138xf32, #tpu.memory_space<smem>>
    %c74 = arith.constant 74 : index
    %74 = memref.load %arg2[%c74] : memref<138xf32, #tpu.memory_space<smem>>
    %c75 = arith.constant 75 : index
    %75 = memref.load %arg2[%c75] : memref<138xf32, #tpu.memory_space<smem>>
    %c76 = arith.constant 76 : index
    %76 = memref.load %arg2[%c76] : memref<138xf32, #tpu.memory_space<smem>>
    %c77 = arith.constant 77 : index
    %77 = memref.load %arg2[%c77] : memref<138xf32, #tpu.memory_space<smem>>
    %c78 = arith.constant 78 : index
    %78 = memref.load %arg2[%c78] : memref<138xf32, #tpu.memory_space<smem>>
    %c79 = arith.constant 79 : index
    %79 = memref.load %arg2[%c79] : memref<138xf32, #tpu.memory_space<smem>>
    %c80 = arith.constant 80 : index
    %80 = memref.load %arg2[%c80] : memref<138xf32, #tpu.memory_space<smem>>
    %c81 = arith.constant 81 : index
    %81 = memref.load %arg2[%c81] : memref<138xf32, #tpu.memory_space<smem>>
    %c82 = arith.constant 82 : index
    %82 = memref.load %arg2[%c82] : memref<138xf32, #tpu.memory_space<smem>>
    %c83 = arith.constant 83 : index
    %83 = memref.load %arg2[%c83] : memref<138xf32, #tpu.memory_space<smem>>
    %c84 = arith.constant 84 : index
    %84 = memref.load %arg2[%c84] : memref<138xf32, #tpu.memory_space<smem>>
    %c85 = arith.constant 85 : index
    %85 = memref.load %arg2[%c85] : memref<138xf32, #tpu.memory_space<smem>>
    %c86 = arith.constant 86 : index
    %86 = memref.load %arg2[%c86] : memref<138xf32, #tpu.memory_space<smem>>
    %c87 = arith.constant 87 : index
    %87 = memref.load %arg2[%c87] : memref<138xf32, #tpu.memory_space<smem>>
    %c88 = arith.constant 88 : index
    %88 = memref.load %arg2[%c88] : memref<138xf32, #tpu.memory_space<smem>>
    %c89 = arith.constant 89 : index
    %89 = memref.load %arg2[%c89] : memref<138xf32, #tpu.memory_space<smem>>
    %c90 = arith.constant 90 : index
    %90 = memref.load %arg2[%c90] : memref<138xf32, #tpu.memory_space<smem>>
    %c91 = arith.constant 91 : index
    %91 = memref.load %arg2[%c91] : memref<138xf32, #tpu.memory_space<smem>>
    %c92 = arith.constant 92 : index
    %92 = memref.load %arg2[%c92] : memref<138xf32, #tpu.memory_space<smem>>
    %c93 = arith.constant 93 : index
    %93 = memref.load %arg2[%c93] : memref<138xf32, #tpu.memory_space<smem>>
    %c94 = arith.constant 94 : index
    %94 = memref.load %arg2[%c94] : memref<138xf32, #tpu.memory_space<smem>>
    %c95 = arith.constant 95 : index
    %95 = memref.load %arg2[%c95] : memref<138xf32, #tpu.memory_space<smem>>
    %c96 = arith.constant 96 : index
    %96 = memref.load %arg2[%c96] : memref<138xf32, #tpu.memory_space<smem>>
    %c97 = arith.constant 97 : index
    %97 = memref.load %arg2[%c97] : memref<138xf32, #tpu.memory_space<smem>>
    %c98 = arith.constant 98 : index
    %98 = memref.load %arg2[%c98] : memref<138xf32, #tpu.memory_space<smem>>
    %c99 = arith.constant 99 : index
    %99 = memref.load %arg2[%c99] : memref<138xf32, #tpu.memory_space<smem>>
    %c100 = arith.constant 100 : index
    %100 = memref.load %arg2[%c100] : memref<138xf32, #tpu.memory_space<smem>>
    %c101 = arith.constant 101 : index
    %101 = memref.load %arg2[%c101] : memref<138xf32, #tpu.memory_space<smem>>
    %c102 = arith.constant 102 : index
    %102 = memref.load %arg2[%c102] : memref<138xf32, #tpu.memory_space<smem>>
    %c103 = arith.constant 103 : index
    %103 = memref.load %arg2[%c103] : memref<138xf32, #tpu.memory_space<smem>>
    %c104 = arith.constant 104 : index
    %104 = memref.load %arg2[%c104] : memref<138xf32, #tpu.memory_space<smem>>
    %c105 = arith.constant 105 : index
    %105 = memref.load %arg2[%c105] : memref<138xf32, #tpu.memory_space<smem>>
    %c106 = arith.constant 106 : index
    %106 = memref.load %arg2[%c106] : memref<138xf32, #tpu.memory_space<smem>>
    %c107 = arith.constant 107 : index
    %107 = memref.load %arg2[%c107] : memref<138xf32, #tpu.memory_space<smem>>
    %c108 = arith.constant 108 : index
    %108 = memref.load %arg2[%c108] : memref<138xf32, #tpu.memory_space<smem>>
    %c109 = arith.constant 109 : index
    %109 = memref.load %arg2[%c109] : memref<138xf32, #tpu.memory_space<smem>>
    %c110 = arith.constant 110 : index
    %110 = memref.load %arg2[%c110] : memref<138xf32, #tpu.memory_space<smem>>
    %c111 = arith.constant 111 : index
    %111 = memref.load %arg2[%c111] : memref<138xf32, #tpu.memory_space<smem>>
    %c112 = arith.constant 112 : index
    %112 = memref.load %arg2[%c112] : memref<138xf32, #tpu.memory_space<smem>>
    %c113 = arith.constant 113 : index
    %113 = memref.load %arg2[%c113] : memref<138xf32, #tpu.memory_space<smem>>
    %c114 = arith.constant 114 : index
    %114 = memref.load %arg2[%c114] : memref<138xf32, #tpu.memory_space<smem>>
    %c115 = arith.constant 115 : index
    %115 = memref.load %arg2[%c115] : memref<138xf32, #tpu.memory_space<smem>>
    %c116 = arith.constant 116 : index
    %116 = memref.load %arg2[%c116] : memref<138xf32, #tpu.memory_space<smem>>
    %c117 = arith.constant 117 : index
    %117 = memref.load %arg2[%c117] : memref<138xf32, #tpu.memory_space<smem>>
    %c118 = arith.constant 118 : index
    %118 = memref.load %arg2[%c118] : memref<138xf32, #tpu.memory_space<smem>>
    %c119 = arith.constant 119 : index
    %119 = memref.load %arg2[%c119] : memref<138xf32, #tpu.memory_space<smem>>
    %c120 = arith.constant 120 : index
    %120 = memref.load %arg2[%c120] : memref<138xf32, #tpu.memory_space<smem>>
    %c121 = arith.constant 121 : index
    %121 = memref.load %arg2[%c121] : memref<138xf32, #tpu.memory_space<smem>>
    %c122 = arith.constant 122 : index
    %122 = memref.load %arg2[%c122] : memref<138xf32, #tpu.memory_space<smem>>
    %c123 = arith.constant 123 : index
    %123 = memref.load %arg2[%c123] : memref<138xf32, #tpu.memory_space<smem>>
    %c124 = arith.constant 124 : index
    %124 = memref.load %arg2[%c124] : memref<138xf32, #tpu.memory_space<smem>>
    %c125 = arith.constant 125 : index
    %125 = memref.load %arg2[%c125] : memref<138xf32, #tpu.memory_space<smem>>
    %c126 = arith.constant 126 : index
    %126 = memref.load %arg2[%c126] : memref<138xf32, #tpu.memory_space<smem>>
    %c127 = arith.constant 127 : index
    %127 = memref.load %arg2[%c127] : memref<138xf32, #tpu.memory_space<smem>>
    %c128 = arith.constant 128 : index
    %128 = memref.load %arg2[%c128] : memref<138xf32, #tpu.memory_space<smem>>
    %c129 = arith.constant 129 : index
    %129 = memref.load %arg2[%c129] : memref<138xf32, #tpu.memory_space<smem>>
    %c130 = arith.constant 130 : index
    %130 = memref.load %arg2[%c130] : memref<138xf32, #tpu.memory_space<smem>>
    %c131 = arith.constant 131 : index
    %131 = memref.load %arg2[%c131] : memref<138xf32, #tpu.memory_space<smem>>
    %c132 = arith.constant 132 : index
    %132 = memref.load %arg2[%c132] : memref<138xf32, #tpu.memory_space<smem>>
    %c133 = arith.constant 133 : index
    %133 = memref.load %arg2[%c133] : memref<138xf32, #tpu.memory_space<smem>>
    %c134 = arith.constant 134 : index
    %134 = memref.load %arg2[%c134] : memref<138xf32, #tpu.memory_space<smem>>
    %c135 = arith.constant 135 : index
    %135 = memref.load %arg2[%c135] : memref<138xf32, #tpu.memory_space<smem>>
    %c136 = arith.constant 136 : index
    %136 = memref.load %arg2[%c136] : memref<138xf32, #tpu.memory_space<smem>>
    %c137 = arith.constant 137 : index
    %137 = memref.load %arg2[%c137] : memref<138xf32, #tpu.memory_space<smem>>
    %c0_0 = arith.constant 0 : index
    %c0_1 = arith.constant 0 : index
    %c0_2 = arith.constant 0 : index
    %138 = vector.load %arg1[%c0_0, %c0_1, %c0_2] : memref<3x8x2xf32, #tpu.memory_space<vmem>>, vector<1x8x2xf32>
    %139 = vector.shape_cast %138 : vector<1x8x2xf32> to vector<8x2xf32>
    %c1_3 = arith.constant 1 : index
    %c0_4 = arith.constant 0 : index
    %c0_5 = arith.constant 0 : index
    %140 = vector.load %arg1[%c1_3, %c0_4, %c0_5] : memref<3x8x2xf32, #tpu.memory_space<vmem>>, vector<1x8x2xf32>
    %141 = vector.shape_cast %140 : vector<1x8x2xf32> to vector<8x2xf32>
    %c2_6 = arith.constant 2 : index
    %c0_7 = arith.constant 0 : index
    %c0_8 = arith.constant 0 : index
    %142 = vector.load %arg1[%c2_6, %c0_7, %c0_8] : memref<3x8x2xf32, #tpu.memory_space<vmem>>, vector<1x8x2xf32>
    %143 = vector.shape_cast %142 : vector<1x8x2xf32> to vector<8x2xf32>
    %144 = vector.broadcast %0 : f32 to vector<8x2xf32>
    %145 = arith.mulf %139, %144 : vector<8x2xf32>
    %146 = vector.broadcast %3 : f32 to vector<8x2xf32>
    %147 = arith.mulf %141, %146 : vector<8x2xf32>
    %148 = arith.addf %145, %147 : vector<8x2xf32>
    %149 = vector.broadcast %6 : f32 to vector<8x2xf32>
    %150 = arith.mulf %143, %149 : vector<8x2xf32>
    %151 = arith.addf %148, %150 : vector<8x2xf32>
    %152 = vector.broadcast %1 : f32 to vector<8x2xf32>
    %153 = arith.mulf %139, %152 : vector<8x2xf32>
    %154 = vector.broadcast %4 : f32 to vector<8x2xf32>
    %155 = arith.mulf %141, %154 : vector<8x2xf32>
    %156 = arith.addf %153, %155 : vector<8x2xf32>
    %157 = vector.broadcast %7 : f32 to vector<8x2xf32>
    %158 = arith.mulf %143, %157 : vector<8x2xf32>
    %159 = arith.addf %156, %158 : vector<8x2xf32>
    %160 = vector.broadcast %2 : f32 to vector<8x2xf32>
    %161 = arith.mulf %139, %160 : vector<8x2xf32>
    %162 = vector.broadcast %5 : f32 to vector<8x2xf32>
    %163 = arith.mulf %141, %162 : vector<8x2xf32>
    %164 = arith.addf %161, %163 : vector<8x2xf32>
    %165 = vector.broadcast %8 : f32 to vector<8x2xf32>
    %166 = arith.mulf %143, %165 : vector<8x2xf32>
    %167 = arith.addf %164, %166 : vector<8x2xf32>
    %168 = vector.broadcast %9 : f32 to vector<8x2xf32>
    %169 = arith.mulf %139, %168 : vector<8x2xf32>
    %170 = vector.broadcast %12 : f32 to vector<8x2xf32>
    %171 = arith.mulf %141, %170 : vector<8x2xf32>
    %172 = arith.addf %169, %171 : vector<8x2xf32>
    %173 = vector.broadcast %15 : f32 to vector<8x2xf32>
    %174 = arith.mulf %143, %173 : vector<8x2xf32>
    %175 = arith.addf %172, %174 : vector<8x2xf32>
    %176 = vector.broadcast %10 : f32 to vector<8x2xf32>
    %177 = arith.mulf %139, %176 : vector<8x2xf32>
    %178 = vector.broadcast %13 : f32 to vector<8x2xf32>
    %179 = arith.mulf %141, %178 : vector<8x2xf32>
    %180 = arith.addf %177, %179 : vector<8x2xf32>
    %181 = vector.broadcast %16 : f32 to vector<8x2xf32>
    %182 = arith.mulf %143, %181 : vector<8x2xf32>
    %183 = arith.addf %180, %182 : vector<8x2xf32>
    %184 = vector.broadcast %11 : f32 to vector<8x2xf32>
    %185 = arith.mulf %139, %184 : vector<8x2xf32>
    %186 = vector.broadcast %14 : f32 to vector<8x2xf32>
    %187 = arith.mulf %141, %186 : vector<8x2xf32>
    %188 = arith.addf %185, %187 : vector<8x2xf32>
    %189 = vector.broadcast %17 : f32 to vector<8x2xf32>
    %190 = arith.mulf %143, %189 : vector<8x2xf32>
    %191 = arith.addf %188, %190 : vector<8x2xf32>
    %192 = vector.broadcast %18 : f32 to vector<8x2xf32>
    %193 = arith.mulf %139, %192 : vector<8x2xf32>
    %194 = vector.broadcast %21 : f32 to vector<8x2xf32>
    %195 = arith.mulf %141, %194 : vector<8x2xf32>
    %196 = arith.addf %193, %195 : vector<8x2xf32>
    %197 = vector.broadcast %24 : f32 to vector<8x2xf32>
    %198 = arith.mulf %143, %197 : vector<8x2xf32>
    %199 = arith.addf %196, %198 : vector<8x2xf32>
    %200 = vector.broadcast %19 : f32 to vector<8x2xf32>
    %201 = arith.mulf %139, %200 : vector<8x2xf32>
    %202 = vector.broadcast %22 : f32 to vector<8x2xf32>
    %203 = arith.mulf %141, %202 : vector<8x2xf32>
    %204 = arith.addf %201, %203 : vector<8x2xf32>
    %205 = vector.broadcast %25 : f32 to vector<8x2xf32>
    %206 = arith.mulf %143, %205 : vector<8x2xf32>
    %207 = arith.addf %204, %206 : vector<8x2xf32>
    %208 = vector.broadcast %20 : f32 to vector<8x2xf32>
    %209 = arith.mulf %139, %208 : vector<8x2xf32>
    %210 = vector.broadcast %23 : f32 to vector<8x2xf32>
    %211 = arith.mulf %141, %210 : vector<8x2xf32>
    %212 = arith.addf %209, %211 : vector<8x2xf32>
    %213 = vector.broadcast %26 : f32 to vector<8x2xf32>
    %214 = arith.mulf %143, %213 : vector<8x2xf32>
    %215 = arith.addf %212, %214 : vector<8x2xf32>
    %216 = vector.extract_strided_slice %175 {offsets = [0, 0], sizes = [1, 2], strides = [1, 1]} : vector<8x2xf32> to vector<1x2xf32>
    %217 = vector.extract_strided_slice %151 {offsets = [0, 0], sizes = [1, 2], strides = [1, 1]} : vector<8x2xf32> to vector<1x2xf32>
    %218 = arith.mulf %216, %217 : vector<1x2xf32>
    %219 = vector.extract_strided_slice %183 {offsets = [0, 0], sizes = [1, 2], strides = [1, 1]} : vector<8x2xf32> to vector<1x2xf32>
    %220 = vector.extract_strided_slice %159 {offsets = [0, 0], sizes = [1, 2], strides = [1, 1]} : vector<8x2xf32> to vector<1x2xf32>
    %221 = arith.mulf %219, %220 : vector<1x2xf32>
    %222 = arith.addf %218, %221 : vector<1x2xf32>
    %223 = vector.extract_strided_slice %191 {offsets = [0, 0], sizes = [1, 2], strides = [1, 1]} : vector<8x2xf32> to vector<1x2xf32>
    %224 = vector.extract_strided_slice %167 {offsets = [0, 0], sizes = [1, 2], strides = [1, 1]} : vector<8x2xf32> to vector<1x2xf32>
    %225 = arith.mulf %223, %224 : vector<1x2xf32>
    %226 = arith.addf %222, %225 : vector<1x2xf32>
    %cst = arith.constant 0.577350259 : f32
    %227 = vector.broadcast %cst : f32 to vector<1x2xf32>
    %228 = arith.mulf %226, %227 : vector<1x2xf32>
    %cst_9 = arith.constant dense<0xFF800000> : vector<2xf32>
    %229 = vector.multi_reduction <maximumf>, %228, %cst_9 [0] : vector<1x2xf32> to vector<2xf32>
    %230 = vector.shape_cast %229 : vector<2xf32> to vector<1x2xf32>
    %231 = arith.subf %228, %230 : vector<1x2xf32>
    %232 = math.exp %231 : vector<1x2xf32>
    %cst_10 = arith.constant dense<0.000000e+00> : vector<2xf32>
    %233 = vector.multi_reduction <add>, %232, %cst_10 [0] : vector<1x2xf32> to vector<2xf32>
    %234 = vector.shape_cast %233 : vector<2xf32> to vector<1x2xf32>
    %cst_11 = arith.constant 1.000000e+00 : f32
    %235 = vector.broadcast %cst_11 : f32 to vector<1x2xf32>
    %236 = arith.divf %235, %234 : vector<1x2xf32>
    %237 = arith.mulf %232, %236 : vector<1x2xf32>
    %238 = vector.extract_strided_slice %199 {offsets = [0, 0], sizes = [1, 2], strides = [1, 1]} : vector<8x2xf32> to vector<1x2xf32>
    %239 = arith.mulf %237, %238 : vector<1x2xf32>
    %cst_12 = arith.constant dense<0.000000e+00> : vector<2xf32>
    %240 = vector.multi_reduction <add>, %239, %cst_12 [0] : vector<1x2xf32> to vector<2xf32>
    %241 = vector.shape_cast %240 : vector<2xf32> to vector<1x2xf32>
    %242 = vector.extract_strided_slice %207 {offsets = [0, 0], sizes = [1, 2], strides = [1, 1]} : vector<8x2xf32> to vector<1x2xf32>
    %243 = arith.mulf %237, %242 : vector<1x2xf32>
    %cst_13 = arith.constant dense<0.000000e+00> : vector<2xf32>
    %244 = vector.multi_reduction <add>, %243, %cst_13 [0] : vector<1x2xf32> to vector<2xf32>
    %245 = vector.shape_cast %244 : vector<2xf32> to vector<1x2xf32>
    %246 = vector.extract_strided_slice %215 {offsets = [0, 0], sizes = [1, 2], strides = [1, 1]} : vector<8x2xf32> to vector<1x2xf32>
    %247 = arith.mulf %237, %246 : vector<1x2xf32>
    %cst_14 = arith.constant dense<0.000000e+00> : vector<2xf32>
    %248 = vector.multi_reduction <add>, %247, %cst_14 [0] : vector<1x2xf32> to vector<2xf32>
    %249 = vector.shape_cast %248 : vector<2xf32> to vector<1x2xf32>
    %250 = vector.broadcast %27 : f32 to vector<1x2xf32>
    %251 = arith.mulf %241, %250 : vector<1x2xf32>
    %252 = vector.broadcast %30 : f32 to vector<1x2xf32>
    %253 = arith.mulf %245, %252 : vector<1x2xf32>
    %254 = arith.addf %251, %253 : vector<1x2xf32>
    %255 = vector.broadcast %33 : f32 to vector<1x2xf32>
    %256 = arith.mulf %249, %255 : vector<1x2xf32>
    %257 = arith.addf %254, %256 : vector<1x2xf32>
    %258 = vector.broadcast %36 : f32 to vector<1x2xf32>
    %259 = arith.addf %257, %258 : vector<1x2xf32>
    %260 = vector.extract_strided_slice %139 {offsets = [0, 0], sizes = [1, 2], strides = [1, 1]} : vector<8x2xf32> to vector<1x2xf32>
    %261 = arith.addf %260, %259 : vector<1x2xf32>
    %c0_15 = arith.constant 0 : index
    %c0_16 = arith.constant 0 : index
    %c0_17 = arith.constant 0 : index
    %262 = vector.load %arg4[%c0_15, %c0_16, %c0_17] : memref<3x8x2xf32, #tpu.memory_space<vmem>>, vector<1x1x2xf32>
    %263 = vector.shape_cast %262 : vector<1x1x2xf32> to vector<1x2xf32>
    %264 = vector.shape_cast %261 : vector<1x2xf32> to vector<1x1x2xf32>
    tpu.vector_store %arg4[%c0_15, %c0_16, %c0_17], %264 {strides = array<i32>} : memref<3x8x2xf32, #tpu.memory_space<vmem>>, vector<1x1x2xf32>,
    %265 = vector.broadcast %28 : f32 to vector<1x2xf32>
    %266 = arith.mulf %241, %265 : vector<1x2xf32>
    %267 = vector.broadcast %31 : f32 to vector<1x2xf32>
    %268 = arith.mulf %245, %267 : vector<1x2xf32>
    %269 = arith.addf %266, %268 : vector<1x2xf32>
    %270 = vector.broadcast %34 : f32 to vector<1x2xf32>
    %271 = arith.mulf %249, %270 : vector<1x2xf32>
    %272 = arith.addf %269, %271 : vector<1x2xf32>
    %273 = vector.broadcast %37 : f32 to vector<1x2xf32>
    %274 = arith.addf %272, %273 : vector<1x2xf32>
    %275 = vector.extract_strided_slice %141 {offsets = [0, 0], sizes = [1, 2], strides = [1, 1]} : vector<8x2xf32> to vector<1x2xf32>
    %276 = arith.addf %275, %274 : vector<1x2xf32>
    %c1_18 = arith.constant 1 : index
    %c0_19 = arith.constant 0 : index
    %c0_20 = arith.constant 0 : index
    %277 = vector.load %arg4[%c1_18, %c0_19, %c0_20] : memref<3x8x2xf32, #tpu.memory_space<vmem>>, vector<1x1x2xf32>
    %278 = vector.shape_cast %277 : vector<1x1x2xf32> to vector<1x2xf32>
    %279 = vector.shape_cast %276 : vector<1x2xf32> to vector<1x1x2xf32>
    tpu.vector_store %arg4[%c1_18, %c0_19, %c0_20], %279 {strides = array<i32>} : memref<3x8x2xf32, #tpu.memory_space<vmem>>, vector<1x1x2xf32>,
    %280 = vector.broadcast %29 : f32 to vector<1x2xf32>
    %281 = arith.mulf %241, %280 : vector<1x2xf32>
    %282 = vector.broadcast %32 : f32 to vector<1x2xf32>
    %283 = arith.mulf %245, %282 : vector<1x2xf32>
    %284 = arith.addf %281, %283 : vector<1x2xf32>
    %285 = vector.broadcast %35 : f32 to vector<1x2xf32>
    %286 = arith.mulf %249, %285 : vector<1x2xf32>
    %287 = arith.addf %284, %286 : vector<1x2xf32>
    %288 = vector.broadcast %38 : f32 to vector<1x2xf32>
    %289 = arith.addf %287, %288 : vector<1x2xf32>
    %290 = vector.extract_strided_slice %143 {offsets = [0, 0], sizes = [1, 2], strides = [1, 1]} : vector<8x2xf32> to vector<1x2xf32>
    %291 = arith.addf %290, %289 : vector<1x2xf32>
    %c2_21 = arith.constant 2 : index
    %c0_22 = arith.constant 0 : index
    %c0_23 = arith.constant 0 : index
    %292 = vector.load %arg4[%c2_21, %c0_22, %c0_23] : memref<3x8x2xf32, #tpu.memory_space<vmem>>, vector<1x1x2xf32>
    %293 = vector.shape_cast %292 : vector<1x1x2xf32> to vector<1x2xf32>
    %294 = vector.shape_cast %291 : vector<1x2xf32> to vector<1x1x2xf32>
    tpu.vector_store %arg4[%c2_21, %c0_22, %c0_23], %294 {strides = array<i32>} : memref<3x8x2xf32, #tpu.memory_space<vmem>>, vector<1x1x2xf32>,
    %295 = vector.extract_strided_slice %175 {offsets = [1, 0], sizes = [1, 2], strides = [1, 1]} : vector<8x2xf32> to vector<1x2xf32>
    %296 = vector.extract_strided_slice %151 {offsets = [0, 0], sizes = [2, 2], strides = [1, 1]} : vector<8x2xf32> to vector<2x2xf32>
    %297 = vector.broadcast %295 : vector<1x2xf32> to vector<2x2xf32>
    %298 = arith.mulf %297, %296 : vector<2x2xf32>
    %299 = vector.extract_strided_slice %183 {offsets = [1, 0], sizes = [1, 2], strides = [1, 1]} : vector<8x2xf32> to vector<1x2xf32>
    %300 = vector.extract_strided_slice %159 {offsets = [0, 0], sizes = [2, 2], strides = [1, 1]} : vector<8x2xf32> to vector<2x2xf32>
    %301 = vector.broadcast %299 : vector<1x2xf32> to vector<2x2xf32>
    %302 = arith.mulf %301, %300 : vector<2x2xf32>
    %303 = arith.addf %298, %302 : vector<2x2xf32>
    %304 = vector.extract_strided_slice %191 {offsets = [1, 0], sizes = [1, 2], strides = [1, 1]} : vector<8x2xf32> to vector<1x2xf32>
    %305 = vector.extract_strided_slice %167 {offsets = [0, 0], sizes = [2, 2], strides = [1, 1]} : vector<8x2xf32> to vector<2x2xf32>
    %306 = vector.broadcast %304 : vector<1x2xf32> to vector<2x2xf32>
    %307 = arith.mulf %306, %305 : vector<2x2xf32>
    %308 = arith.addf %303, %307 : vector<2x2xf32>
    %cst_24 = arith.constant 0.577350259 : f32
    %309 = vector.broadcast %cst_24 : f32 to vector<2x2xf32>
    %310 = arith.mulf %308, %309 : vector<2x2xf32>
    %cst_25 = arith.constant dense<0xFF800000> : vector<2xf32>
    %311 = vector.multi_reduction <maximumf>, %310, %cst_25 [0] : vector<2x2xf32> to vector<2xf32>
    %312 = vector.shape_cast %311 : vector<2xf32> to vector<1x2xf32>
    %313 = vector.broadcast %312 : vector<1x2xf32> to vector<2x2xf32>
    %314 = arith.subf %310, %313 : vector<2x2xf32>
    %315 = math.exp %314 : vector<2x2xf32>
    %cst_26 = arith.constant dense<0.000000e+00> : vector<2xf32>
    %316 = vector.multi_reduction <add>, %315, %cst_26 [0] : vector<2x2xf32> to vector<2xf32>
    %317 = vector.shape_cast %316 : vector<2xf32> to vector<1x2xf32>
    %cst_27 = arith.constant 1.000000e+00 : f32
    %318 = vector.broadcast %cst_27 : f32 to vector<1x2xf32>
    %319 = arith.divf %318, %317 : vector<1x2xf32>
    %320 = vector.broadcast %319 : vector<1x2xf32> to vector<2x2xf32>
    %321 = arith.mulf %315, %320 : vector<2x2xf32>
    %322 = vector.extract_strided_slice %199 {offsets = [0, 0], sizes = [2, 2], strides = [1, 1]} : vector<8x2xf32> to vector<2x2xf32>
    %323 = arith.mulf %321, %322 : vector<2x2xf32>
    %cst_28 = arith.constant dense<0.000000e+00> : vector<2xf32>
    %324 = vector.multi_reduction <add>, %323, %cst_28 [0] : vector<2x2xf32> to vector<2xf32>
    %325 = vector.shape_cast %324 : vector<2xf32> to vector<1x2xf32>
    %326 = vector.extract_strided_slice %207 {offsets = [0, 0], sizes = [2, 2], strides = [1, 1]} : vector<8x2xf32> to vector<2x2xf32>
    %327 = arith.mulf %321, %326 : vector<2x2xf32>
    %cst_29 = arith.constant dense<0.000000e+00> : vector<2xf32>
    %328 = vector.multi_reduction <add>, %327, %cst_29 [0] : vector<2x2xf32> to vector<2xf32>
    %329 = vector.shape_cast %328 : vector<2xf32> to vector<1x2xf32>
    %330 = vector.extract_strided_slice %215 {offsets = [0, 0], sizes = [2, 2], strides = [1, 1]} : vector<8x2xf32> to vector<2x2xf32>
    %331 = arith.mulf %321, %330 : vector<2x2xf32>
    %cst_30 = arith.constant dense<0.000000e+00> : vector<2xf32>
    %332 = vector.multi_reduction <add>, %331, %cst_30 [0] : vector<2x2xf32> to vector<2xf32>
    %333 = vector.shape_cast %332 : vector<2xf32> to vector<1x2xf32>
    %334 = vector.broadcast %27 : f32 to vector<1x2xf32>
    %335 = arith.mulf %325, %334 : vector<1x2xf32>
    %336 = vector.broadcast %30 : f32 to vector<1x2xf32>
    %337 = arith.mulf %329, %336 : vector<1x2xf32>
    %338 = arith.addf %335, %337 : vector<1x2xf32>
    %339 = vector.broadcast %33 : f32 to vector<1x2xf32>
    %340 = arith.mulf %333, %339 : vector<1x2xf32>
    %341 = arith.addf %338, %340 : vector<1x2xf32>
    %342 = vector.broadcast %36 : f32 to vector<1x2xf32>
    %343 = arith.addf %341, %342 : vector<1x2xf32>
    %344 = vector.extract_strided_slice %139 {offsets = [1, 0], sizes = [1, 2], strides = [1, 1]} : vector<8x2xf32> to vector<1x2xf32>
    %345 = arith.addf %344, %343 : vector<1x2xf32>
    %c0_31 = arith.constant 0 : index
    %c1_32 = arith.constant 1 : index
    %c0_33 = arith.constant 0 : index
    %346 = vector.load %arg4[%c0_31, %c1_32, %c0_33] : memref<3x8x2xf32, #tpu.memory_space<vmem>>, vector<1x1x2xf32>
    %347 = vector.shape_cast %346 : vector<1x1x2xf32> to vector<1x2xf32>
    %348 = vector.shape_cast %345 : vector<1x2xf32> to vector<1x1x2xf32>
    tpu.vector_store %arg4[%c0_31, %c1_32, %c0_33], %348 {strides = array<i32>} : memref<3x8x2xf32, #tpu.memory_space<vmem>>, vector<1x1x2xf32>,
    %349 = vector.broadcast %28 : f32 to vector<1x2xf32>
    %350 = arith.mulf %325, %349 : vector<1x2xf32>
    %351 = vector.broadcast %31 : f32 to vector<1x2xf32>
    %352 = arith.mulf %329, %351 : vector<1x2xf32>
    %353 = arith.addf %350, %352 : vector<1x2xf32>
    %354 = vector.broadcast %34 : f32 to vector<1x2xf32>
    %355 = arith.mulf %333, %354 : vector<1x2xf32>
    %356 = arith.addf %353, %355 : vector<1x2xf32>
    %357 = vector.broadcast %37 : f32 to vector<1x2xf32>
    %358 = arith.addf %356, %357 : vector<1x2xf32>
    %359 = vector.extract_strided_slice %141 {offsets = [1, 0], sizes = [1, 2], strides = [1, 1]} : vector<8x2xf32> to vector<1x2xf32>
    %360 = arith.addf %359, %358 : vector<1x2xf32>
    %c1_34 = arith.constant 1 : index
    %c1_35 = arith.constant 1 : index
    %c0_36 = arith.constant 0 : index
    %361 = vector.load %arg4[%c1_34, %c1_35, %c0_36] : memref<3x8x2xf32, #tpu.memory_space<vmem>>, vector<1x1x2xf32>
    %362 = vector.shape_cast %361 : vector<1x1x2xf32> to vector<1x2xf32>
    %363 = vector.shape_cast %360 : vector<1x2xf32> to vector<1x1x2xf32>
    tpu.vector_store %arg4[%c1_34, %c1_35, %c0_36], %363 {strides = array<i32>} : memref<3x8x2xf32, #tpu.memory_space<vmem>>, vector<1x1x2xf32>,
    %364 = vector.broadcast %29 : f32 to vector<1x2xf32>
    %365 = arith.mulf %325, %364 : vector<1x2xf32>
    %366 = vector.broadcast %32 : f32 to vector<1x2xf32>
    %367 = arith.mulf %329, %366 : vector<1x2xf32>
    %368 = arith.addf %365, %367 : vector<1x2xf32>
    %369 = vector.broadcast %35 : f32 to vector<1x2xf32>
    %370 = arith.mulf %333, %369 : vector<1x2xf32>
    %371 = arith.addf %368, %370 : vector<1x2xf32>
    %372 = vector.broadcast %38 : f32 to vector<1x2xf32>
    %373 = arith.addf %371, %372 : vector<1x2xf32>
    %374 = vector.extract_strided_slice %143 {offsets = [1, 0], sizes = [1, 2], strides = [1, 1]} : vector<8x2xf32> to vector<1x2xf32>
    %375 = arith.addf %374, %373 : vector<1x2xf32>
    %c2_37 = arith.constant 2 : index
    %c1_38 = arith.constant 1 : index
    %c0_39 = arith.constant 0 : index
    %376 = vector.load %arg4[%c2_37, %c1_38, %c0_39] : memref<3x8x2xf32, #tpu.memory_space<vmem>>, vector<1x1x2xf32>
    %377 = vector.shape_cast %376 : vector<1x1x2xf32> to vector<1x2xf32>
    %378 = vector.shape_cast %375 : vector<1x2xf32> to vector<1x1x2xf32>
    tpu.vector_store %arg4[%c2_37, %c1_38, %c0_39], %378 {strides = array<i32>} : memref<3x8x2xf32, #tpu.memory_space<vmem>>, vector<1x1x2xf32>,
    %379 = vector.extract_strided_slice %175 {offsets = [2, 0], sizes = [1, 2], strides = [1, 1]} : vector<8x2xf32> to vector<1x2xf32>
    %380 = vector.extract_strided_slice %151 {offsets = [0, 0], sizes = [3, 2], strides = [1, 1]} : vector<8x2xf32> to vector<3x2xf32>
    %381 = vector.broadcast %379 : vector<1x2xf32> to vector<3x2xf32>
    %382 = arith.mulf %381, %380 : vector<3x2xf32>
    %383 = vector.extract_strided_slice %183 {offsets = [2, 0], sizes = [1, 2], strides = [1, 1]} : vector<8x2xf32> to vector<1x2xf32>
    %384 = vector.extract_strided_slice %159 {offsets = [0, 0], sizes = [3, 2], strides = [1, 1]} : vector<8x2xf32> to vector<3x2xf32>
    %385 = vector.broadcast %383 : vector<1x2xf32> to vector<3x2xf32>
    %386 = arith.mulf %385, %384 : vector<3x2xf32>
    %387 = arith.addf %382, %386 : vector<3x2xf32>
    %388 = vector.extract_strided_slice %191 {offsets = [2, 0], sizes = [1, 2], strides = [1, 1]} : vector<8x2xf32> to vector<1x2xf32>
    %389 = vector.extract_strided_slice %167 {offsets = [0, 0], sizes = [3, 2], strides = [1, 1]} : vector<8x2xf32> to vector<3x2xf32>
    %390 = vector.broadcast %388 : vector<1x2xf32> to vector<3x2xf32>
    %391 = arith.mulf %390, %389 : vector<3x2xf32>
    %392 = arith.addf %387, %391 : vector<3x2xf32>
    %cst_40 = arith.constant 0.577350259 : f32
    %393 = vector.broadcast %cst_40 : f32 to vector<3x2xf32>
    %394 = arith.mulf %392, %393 : vector<3x2xf32>
    %cst_41 = arith.constant dense<0xFF800000> : vector<2xf32>
    %395 = vector.multi_reduction <maximumf>, %394, %cst_41 [0] : vector<3x2xf32> to vector<2xf32>
    %396 = vector.shape_cast %395 : vector<2xf32> to vector<1x2xf32>
    %397 = vector.broadcast %396 : vector<1x2xf32> to vector<3x2xf32>
    %398 = arith.subf %394, %397 : vector<3x2xf32>
    %399 = math.exp %398 : vector<3x2xf32>
    %cst_42 = arith.constant dense<0.000000e+00> : vector<2xf32>
    %400 = vector.multi_reduction <add>, %399, %cst_42 [0] : vector<3x2xf32> to vector<2xf32>
    %401 = vector.shape_cast %400 : vector<2xf32> to vector<1x2xf32>
    %cst_43 = arith.constant 1.000000e+00 : f32
    %402 = vector.broadcast %cst_43 : f32 to vector<1x2xf32>
    %403 = arith.divf %402, %401 : vector<1x2xf32>
    %404 = vector.broadcast %403 : vector<1x2xf32> to vector<3x2xf32>
    %405 = arith.mulf %399, %404 : vector<3x2xf32>
    %406 = vector.extract_strided_slice %199 {offsets = [0, 0], sizes = [3, 2], strides = [1, 1]} : vector<8x2xf32> to vector<3x2xf32>
    %407 = arith.mulf %405, %406 : vector<3x2xf32>
    %cst_44 = arith.constant dense<0.000000e+00> : vector<2xf32>
    %408 = vector.multi_reduction <add>, %407, %cst_44 [0] : vector<3x2xf32> to vector<2xf32>
    %409 = vector.shape_cast %408 : vector<2xf32> to vector<1x2xf32>
    %410 = vector.extract_strided_slice %207 {offsets = [0, 0], sizes = [3, 2], strides = [1, 1]} : vector<8x2xf32> to vector<3x2xf32>
    %411 = arith.mulf %405, %410 : vector<3x2xf32>
    %cst_45 = arith.constant dense<0.000000e+00> : vector<2xf32>
    %412 = vector.multi_reduction <add>, %411, %cst_45 [0] : vector<3x2xf32> to vector<2xf32>
    %413 = vector.shape_cast %412 : vector<2xf32> to vector<1x2xf32>
    %414 = vector.extract_strided_slice %215 {offsets = [0, 0], sizes = [3, 2], strides = [1, 1]} : vector<8x2xf32> to vector<3x2xf32>
    %415 = arith.mulf %405, %414 : vector<3x2xf32>
    %cst_46 = arith.constant dense<0.000000e+00> : vector<2xf32>
    %416 = vector.multi_reduction <add>, %415, %cst_46 [0] : vector<3x2xf32> to vector<2xf32>
    %417 = vector.shape_cast %416 : vector<2xf32> to vector<1x2xf32>
    %418 = vector.broadcast %27 : f32 to vector<1x2xf32>
    %419 = arith.mulf %409, %418 : vector<1x2xf32>
    %420 = vector.broadcast %30 : f32 to vector<1x2xf32>
    %421 = arith.mulf %413, %420 : vector<1x2xf32>
    %422 = arith.addf %419, %421 : vector<1x2xf32>
    %423 = vector.broadcast %33 : f32 to vector<1x2xf32>
    %424 = arith.mulf %417, %423 : vector<1x2xf32>
    %425 = arith.addf %422, %424 : vector<1x2xf32>
    %426 = vector.broadcast %36 : f32 to vector<1x2xf32>
    %427 = arith.addf %425, %426 : vector<1x2xf32>
    %428 = vector.extract_strided_slice %139 {offsets = [2, 0], sizes = [1, 2], strides = [1, 1]} : vector<8x2xf32> to vector<1x2xf32>
    %429 = arith.addf %428, %427 : vector<1x2xf32>
    %c0_47 = arith.constant 0 : index
    %c2_48 = arith.constant 2 : index
    %c0_49 = arith.constant 0 : index
    %430 = vector.load %arg4[%c0_47, %c2_48, %c0_49] : memref<3x8x2xf32, #tpu.memory_space<vmem>>, vector<1x1x2xf32>
    %431 = vector.shape_cast %430 : vector<1x1x2xf32> to vector<1x2xf32>
    %432 = vector.shape_cast %429 : vector<1x2xf32> to vector<1x1x2xf32>
    tpu.vector_store %arg4[%c0_47, %c2_48, %c0_49], %432 {strides = array<i32>} : memref<3x8x2xf32, #tpu.memory_space<vmem>>, vector<1x1x2xf32>,
    %433 = vector.broadcast %28 : f32 to vector<1x2xf32>
    %434 = arith.mulf %409, %433 : vector<1x2xf32>
    %435 = vector.broadcast %31 : f32 to vector<1x2xf32>
    %436 = arith.mulf %413, %435 : vector<1x2xf32>
    %437 = arith.addf %434, %436 : vector<1x2xf32>
    %438 = vector.broadcast %34 : f32 to vector<1x2xf32>
    %439 = arith.mulf %417, %438 : vector<1x2xf32>
    %440 = arith.addf %437, %439 : vector<1x2xf32>
    %441 = vector.broadcast %37 : f32 to vector<1x2xf32>
    %442 = arith.addf %440, %441 : vector<1x2xf32>
    %443 = vector.extract_strided_slice %141 {offsets = [2, 0], sizes = [1, 2], strides = [1, 1]} : vector<8x2xf32> to vector<1x2xf32>
    %444 = arith.addf %443, %442 : vector<1x2xf32>
    %c1_50 = arith.constant 1 : index
    %c2_51 = arith.constant 2 : index
    %c0_52 = arith.constant 0 : index
    %445 = vector.load %arg4[%c1_50, %c2_51, %c0_52] : memref<3x8x2xf32, #tpu.memory_space<vmem>>, vector<1x1x2xf32>
    %446 = vector.shape_cast %445 : vector<1x1x2xf32> to vector<1x2xf32>
    %447 = vector.shape_cast %444 : vector<1x2xf32> to vector<1x1x2xf32>
    tpu.vector_store %arg4[%c1_50, %c2_51, %c0_52], %447 {strides = array<i32>} : memref<3x8x2xf32, #tpu.memory_space<vmem>>, vector<1x1x2xf32>,
    %448 = vector.broadcast %29 : f32 to vector<1x2xf32>
    %449 = arith.mulf %409, %448 : vector<1x2xf32>
    %450 = vector.broadcast %32 : f32 to vector<1x2xf32>
    %451 = arith.mulf %413, %450 : vector<1x2xf32>
    %452 = arith.addf %449, %451 : vector<1x2xf32>
    %453 = vector.broadcast %35 : f32 to vector<1x2xf32>
    %454 = arith.mulf %417, %453 : vector<1x2xf32>
    %455 = arith.addf %452, %454 : vector<1x2xf32>
    %456 = vector.broadcast %38 : f32 to vector<1x2xf32>
    %457 = arith.addf %455, %456 : vector<1x2xf32>
    %458 = vector.extract_strided_slice %143 {offsets = [2, 0], sizes = [1, 2], strides = [1, 1]} : vector<8x2xf32> to vector<1x2xf32>
    %459 = arith.addf %458, %457 : vector<1x2xf32>
    %c2_53 = arith.constant 2 : index
    %c2_54 = arith.constant 2 : index
    %c0_55 = arith.constant 0 : index
    %460 = vector.load %arg4[%c2_53, %c2_54, %c0_55] : memref<3x8x2xf32, #tpu.memory_space<vmem>>, vector<1x1x2xf32>
    %461 = vector.shape_cast %460 : vector<1x1x2xf32> to vector<1x2xf32>
    %462 = vector.shape_cast %459 : vector<1x2xf32> to vector<1x1x2xf32>
    tpu.vector_store %arg4[%c2_53, %c2_54, %c0_55], %462 {strides = array<i32>} : memref<3x8x2xf32, #tpu.memory_space<vmem>>, vector<1x1x2xf32>,
    %463 = vector.extract_strided_slice %175 {offsets = [3, 0], sizes = [1, 2], strides = [1, 1]} : vector<8x2xf32> to vector<1x2xf32>
    %464 = vector.extract_strided_slice %151 {offsets = [0, 0], sizes = [4, 2], strides = [1, 1]} : vector<8x2xf32> to vector<4x2xf32>
    %465 = vector.broadcast %463 : vector<1x2xf32> to vector<4x2xf32>
    %466 = arith.mulf %465, %464 : vector<4x2xf32>
    %467 = vector.extract_strided_slice %183 {offsets = [3, 0], sizes = [1, 2], strides = [1, 1]} : vector<8x2xf32> to vector<1x2xf32>
    %468 = vector.extract_strided_slice %159 {offsets = [0, 0], sizes = [4, 2], strides = [1, 1]} : vector<8x2xf32> to vector<4x2xf32>
    %469 = vector.broadcast %467 : vector<1x2xf32> to vector<4x2xf32>
    %470 = arith.mulf %469, %468 : vector<4x2xf32>
    %471 = arith.addf %466, %470 : vector<4x2xf32>
    %472 = vector.extract_strided_slice %191 {offsets = [3, 0], sizes = [1, 2], strides = [1, 1]} : vector<8x2xf32> to vector<1x2xf32>
    %473 = vector.extract_strided_slice %167 {offsets = [0, 0], sizes = [4, 2], strides = [1, 1]} : vector<8x2xf32> to vector<4x2xf32>
    %474 = vector.broadcast %472 : vector<1x2xf32> to vector<4x2xf32>
    %475 = arith.mulf %474, %473 : vector<4x2xf32>
    %476 = arith.addf %471, %475 : vector<4x2xf32>
    %cst_56 = arith.constant 0.577350259 : f32
    %477 = vector.broadcast %cst_56 : f32 to vector<4x2xf32>
    %478 = arith.mulf %476, %477 : vector<4x2xf32>
    %cst_57 = arith.constant dense<0xFF800000> : vector<2xf32>
    %479 = vector.multi_reduction <maximumf>, %478, %cst_57 [0] : vector<4x2xf32> to vector<2xf32>
    %480 = vector.shape_cast %479 : vector<2xf32> to vector<1x2xf32>
    %481 = vector.broadcast %480 : vector<1x2xf32> to vector<4x2xf32>
    %482 = arith.subf %478, %481 : vector<4x2xf32>
    %483 = math.exp %482 : vector<4x2xf32>
    %cst_58 = arith.constant dense<0.000000e+00> : vector<2xf32>
    %484 = vector.multi_reduction <add>, %483, %cst_58 [0] : vector<4x2xf32> to vector<2xf32>
    %485 = vector.shape_cast %484 : vector<2xf32> to vector<1x2xf32>
    %cst_59 = arith.constant 1.000000e+00 : f32
    %486 = vector.broadcast %cst_59 : f32 to vector<1x2xf32>
    %487 = arith.divf %486, %485 : vector<1x2xf32>
    %488 = vector.broadcast %487 : vector<1x2xf32> to vector<4x2xf32>
    %489 = arith.mulf %483, %488 : vector<4x2xf32>
    %490 = vector.extract_strided_slice %199 {offsets = [0, 0], sizes = [4, 2], strides = [1, 1]} : vector<8x2xf32> to vector<4x2xf32>
    %491 = arith.mulf %489, %490 : vector<4x2xf32>
    %cst_60 = arith.constant dense<0.000000e+00> : vector<2xf32>
    %492 = vector.multi_reduction <add>, %491, %cst_60 [0] : vector<4x2xf32> to vector<2xf32>
    %493 = vector.shape_cast %492 : vector<2xf32> to vector<1x2xf32>
    %494 = vector.extract_strided_slice %207 {offsets = [0, 0], sizes = [4, 2], strides = [1, 1]} : vector<8x2xf32> to vector<4x2xf32>
    %495 = arith.mulf %489, %494 : vector<4x2xf32>
    %cst_61 = arith.constant dense<0.000000e+00> : vector<2xf32>
    %496 = vector.multi_reduction <add>, %495, %cst_61 [0] : vector<4x2xf32> to vector<2xf32>
    %497 = vector.shape_cast %496 : vector<2xf32> to vector<1x2xf32>
    %498 = vector.extract_strided_slice %215 {offsets = [0, 0], sizes = [4, 2], strides = [1, 1]} : vector<8x2xf32> to vector<4x2xf32>
    %499 = arith.mulf %489, %498 : vector<4x2xf32>
    %cst_62 = arith.constant dense<0.000000e+00> : vector<2xf32>
    %500 = vector.multi_reduction <add>, %499, %cst_62 [0] : vector<4x2xf32> to vector<2xf32>
    %501 = vector.shape_cast %500 : vector<2xf32> to vector<1x2xf32>
    %502 = vector.broadcast %27 : f32 to vector<1x2xf32>
    %503 = arith.mulf %493, %502 : vector<1x2xf32>
    %504 = vector.broadcast %30 : f32 to vector<1x2xf32>
    %505 = arith.mulf %497, %504 : vector<1x2xf32>
    %506 = arith.addf %503, %505 : vector<1x2xf32>
    %507 = vector.broadcast %33 : f32 to vector<1x2xf32>
    %508 = arith.mulf %501, %507 : vector<1x2xf32>
    %509 = arith.addf %506, %508 : vector<1x2xf32>
    %510 = vector.broadcast %36 : f32 to vector<1x2xf32>
    %511 = arith.addf %509, %510 : vector<1x2xf32>
    %512 = vector.extract_strided_slice %139 {offsets = [3, 0], sizes = [1, 2], strides = [1, 1]} : vector<8x2xf32> to vector<1x2xf32>
    %513 = arith.addf %512, %511 : vector<1x2xf32>
    %c0_63 = arith.constant 0 : index
    %c3_64 = arith.constant 3 : index
    %c0_65 = arith.constant 0 : index
    %514 = vector.load %arg4[%c0_63, %c3_64, %c0_65] : memref<3x8x2xf32, #tpu.memory_space<vmem>>, vector<1x1x2xf32>
    %515 = vector.shape_cast %514 : vector<1x1x2xf32> to vector<1x2xf32>
    %516 = vector.shape_cast %513 : vector<1x2xf32> to vector<1x1x2xf32>
    tpu.vector_store %arg4[%c0_63, %c3_64, %c0_65], %516 {strides = array<i32>} : memref<3x8x2xf32, #tpu.memory_space<vmem>>, vector<1x1x2xf32>,
    %517 = vector.broadcast %28 : f32 to vector<1x2xf32>
    %518 = arith.mulf %493, %517 : vector<1x2xf32>
    %519 = vector.broadcast %31 : f32 to vector<1x2xf32>
    %520 = arith.mulf %497, %519 : vector<1x2xf32>
    %521 = arith.addf %518, %520 : vector<1x2xf32>
    %522 = vector.broadcast %34 : f32 to vector<1x2xf32>
    %523 = arith.mulf %501, %522 : vector<1x2xf32>
    %524 = arith.addf %521, %523 : vector<1x2xf32>
    %525 = vector.broadcast %37 : f32 to vector<1x2xf32>
    %526 = arith.addf %524, %525 : vector<1x2xf32>
    %527 = vector.extract_strided_slice %141 {offsets = [3, 0], sizes = [1, 2], strides = [1, 1]} : vector<8x2xf32> to vector<1x2xf32>
    %528 = arith.addf %527, %526 : vector<1x2xf32>
    %c1_66 = arith.constant 1 : index
    %c3_67 = arith.constant 3 : index
    %c0_68 = arith.constant 0 : index
    %529 = vector.load %arg4[%c1_66, %c3_67, %c0_68] : memref<3x8x2xf32, #tpu.memory_space<vmem>>, vector<1x1x2xf32>
    %530 = vector.shape_cast %529 : vector<1x1x2xf32> to vector<1x2xf32>
    %531 = vector.shape_cast %528 : vector<1x2xf32> to vector<1x1x2xf32>
    tpu.vector_store %arg4[%c1_66, %c3_67, %c0_68], %531 {strides = array<i32>} : memref<3x8x2xf32, #tpu.memory_space<vmem>>, vector<1x1x2xf32>,
    %532 = vector.broadcast %29 : f32 to vector<1x2xf32>
    %533 = arith.mulf %493, %532 : vector<1x2xf32>
    %534 = vector.broadcast %32 : f32 to vector<1x2xf32>
    %535 = arith.mulf %497, %534 : vector<1x2xf32>
    %536 = arith.addf %533, %535 : vector<1x2xf32>
    %537 = vector.broadcast %35 : f32 to vector<1x2xf32>
    %538 = arith.mulf %501, %537 : vector<1x2xf32>
    %539 = arith.addf %536, %538 : vector<1x2xf32>
    %540 = vector.broadcast %38 : f32 to vector<1x2xf32>
    %541 = arith.addf %539, %540 : vector<1x2xf32>
    %542 = vector.extract_strided_slice %143 {offsets = [3, 0], sizes = [1, 2], strides = [1, 1]} : vector<8x2xf32> to vector<1x2xf32>
    %543 = arith.addf %542, %541 : vector<1x2xf32>
    %c2_69 = arith.constant 2 : index
    %c3_70 = arith.constant 3 : index
    %c0_71 = arith.constant 0 : index
    %544 = vector.load %arg4[%c2_69, %c3_70, %c0_71] : memref<3x8x2xf32, #tpu.memory_space<vmem>>, vector<1x1x2xf32>
    %545 = vector.shape_cast %544 : vector<1x1x2xf32> to vector<1x2xf32>
    %546 = vector.shape_cast %543 : vector<1x2xf32> to vector<1x1x2xf32>
    tpu.vector_store %arg4[%c2_69, %c3_70, %c0_71], %546 {strides = array<i32>} : memref<3x8x2xf32, #tpu.memory_space<vmem>>, vector<1x1x2xf32>,
    %547 = vector.extract_strided_slice %175 {offsets = [4, 0], sizes = [1, 2], strides = [1, 1]} : vector<8x2xf32> to vector<1x2xf32>
    %548 = vector.extract_strided_slice %151 {offsets = [0, 0], sizes = [5, 2], strides = [1, 1]} : vector<8x2xf32> to vector<5x2xf32>
    %549 = vector.broadcast %547 : vector<1x2xf32> to vector<5x2xf32>
    %550 = arith.mulf %549, %548 : vector<5x2xf32>
    %551 = vector.extract_strided_slice %183 {offsets = [4, 0], sizes = [1, 2], strides = [1, 1]} : vector<8x2xf32> to vector<1x2xf32>
    %552 = vector.extract_strided_slice %159 {offsets = [0, 0], sizes = [5, 2], strides = [1, 1]} : vector<8x2xf32> to vector<5x2xf32>
    %553 = vector.broadcast %551 : vector<1x2xf32> to vector<5x2xf32>
    %554 = arith.mulf %553, %552 : vector<5x2xf32>
    %555 = arith.addf %550, %554 : vector<5x2xf32>
    %556 = vector.extract_strided_slice %191 {offsets = [4, 0], sizes = [1, 2], strides = [1, 1]} : vector<8x2xf32> to vector<1x2xf32>
    %557 = vector.extract_strided_slice %167 {offsets = [0, 0], sizes = [5, 2], strides = [1, 1]} : vector<8x2xf32> to vector<5x2xf32>
    %558 = vector.broadcast %556 : vector<1x2xf32> to vector<5x2xf32>
    %559 = arith.mulf %558, %557 : vector<5x2xf32>
    %560 = arith.addf %555, %559 : vector<5x2xf32>
    %cst_72 = arith.constant 0.577350259 : f32
    %561 = vector.broadcast %cst_72 : f32 to vector<5x2xf32>
    %562 = arith.mulf %560, %561 : vector<5x2xf32>
    %cst_73 = arith.constant dense<0xFF800000> : vector<2xf32>
    %563 = vector.multi_reduction <maximumf>, %562, %cst_73 [0] : vector<5x2xf32> to vector<2xf32>
    %564 = vector.shape_cast %563 : vector<2xf32> to vector<1x2xf32>
    %565 = vector.broadcast %564 : vector<1x2xf32> to vector<5x2xf32>
    %566 = arith.subf %562, %565 : vector<5x2xf32>
    %567 = math.exp %566 : vector<5x2xf32>
    %cst_74 = arith.constant dense<0.000000e+00> : vector<2xf32>
    %568 = vector.multi_reduction <add>, %567, %cst_74 [0] : vector<5x2xf32> to vector<2xf32>
    %569 = vector.shape_cast %568 : vector<2xf32> to vector<1x2xf32>
    %cst_75 = arith.constant 1.000000e+00 : f32
    %570 = vector.broadcast %cst_75 : f32 to vector<1x2xf32>
    %571 = arith.divf %570, %569 : vector<1x2xf32>
    %572 = vector.broadcast %571 : vector<1x2xf32> to vector<5x2xf32>
    %573 = arith.mulf %567, %572 : vector<5x2xf32>
    %574 = vector.extract_strided_slice %199 {offsets = [0, 0], sizes = [5, 2], strides = [1, 1]} : vector<8x2xf32> to vector<5x2xf32>
    %575 = arith.mulf %573, %574 : vector<5x2xf32>
    %cst_76 = arith.constant dense<0.000000e+00> : vector<2xf32>
    %576 = vector.multi_reduction <add>, %575, %cst_76 [0] : vector<5x2xf32> to vector<2xf32>
    %577 = vector.shape_cast %576 : vector<2xf32> to vector<1x2xf32>
    %578 = vector.extract_strided_slice %207 {offsets = [0, 0], sizes = [5, 2], strides = [1, 1]} : vector<8x2xf32> to vector<5x2xf32>
    %579 = arith.mulf %573, %578 : vector<5x2xf32>
    %cst_77 = arith.constant dense<0.000000e+00> : vector<2xf32>
    %580 = vector.multi_reduction <add>, %579, %cst_77 [0] : vector<5x2xf32> to vector<2xf32>
    %581 = vector.shape_cast %580 : vector<2xf32> to vector<1x2xf32>
    %582 = vector.extract_strided_slice %215 {offsets = [0, 0], sizes = [5, 2], strides = [1, 1]} : vector<8x2xf32> to vector<5x2xf32>
    %583 = arith.mulf %573, %582 : vector<5x2xf32>
    %cst_78 = arith.constant dense<0.000000e+00> : vector<2xf32>
    %584 = vector.multi_reduction <add>, %583, %cst_78 [0] : vector<5x2xf32> to vector<2xf32>
    %585 = vector.shape_cast %584 : vector<2xf32> to vector<1x2xf32>
    %586 = vector.broadcast %27 : f32 to vector<1x2xf32>
    %587 = arith.mulf %577, %586 : vector<1x2xf32>
    %588 = vector.broadcast %30 : f32 to vector<1x2xf32>
    %589 = arith.mulf %581, %588 : vector<1x2xf32>
    %590 = arith.addf %587, %589 : vector<1x2xf32>
    %591 = vector.broadcast %33 : f32 to vector<1x2xf32>
    %592 = arith.mulf %585, %591 : vector<1x2xf32>
    %593 = arith.addf %590, %592 : vector<1x2xf32>
    %594 = vector.broadcast %36 : f32 to vector<1x2xf32>
    %595 = arith.addf %593, %594 : vector<1x2xf32>
    %596 = vector.extract_strided_slice %139 {offsets = [4, 0], sizes = [1, 2], strides = [1, 1]} : vector<8x2xf32> to vector<1x2xf32>
    %597 = arith.addf %596, %595 : vector<1x2xf32>
    %c0_79 = arith.constant 0 : index
    %c4_80 = arith.constant 4 : index
    %c0_81 = arith.constant 0 : index
    %598 = vector.load %arg4[%c0_79, %c4_80, %c0_81] : memref<3x8x2xf32, #tpu.memory_space<vmem>>, vector<1x1x2xf32>
    %599 = vector.shape_cast %598 : vector<1x1x2xf32> to vector<1x2xf32>
    %600 = vector.shape_cast %597 : vector<1x2xf32> to vector<1x1x2xf32>
    tpu.vector_store %arg4[%c0_79, %c4_80, %c0_81], %600 {strides = array<i32>} : memref<3x8x2xf32, #tpu.memory_space<vmem>>, vector<1x1x2xf32>,
    %601 = vector.broadcast %28 : f32 to vector<1x2xf32>
    %602 = arith.mulf %577, %601 : vector<1x2xf32>
    %603 = vector.broadcast %31 : f32 to vector<1x2xf32>
    %604 = arith.mulf %581, %603 : vector<1x2xf32>
    %605 = arith.addf %602, %604 : vector<1x2xf32>
    %606 = vector.broadcast %34 : f32 to vector<1x2xf32>
    %607 = arith.mulf %585, %606 : vector<1x2xf32>
    %608 = arith.addf %605, %607 : vector<1x2xf32>
    %609 = vector.broadcast %37 : f32 to vector<1x2xf32>
    %610 = arith.addf %608, %609 : vector<1x2xf32>
    %611 = vector.extract_strided_slice %141 {offsets = [4, 0], sizes = [1, 2], strides = [1, 1]} : vector<8x2xf32> to vector<1x2xf32>
    %612 = arith.addf %611, %610 : vector<1x2xf32>
    %c1_82 = arith.constant 1 : index
    %c4_83 = arith.constant 4 : index
    %c0_84 = arith.constant 0 : index
    %613 = vector.load %arg4[%c1_82, %c4_83, %c0_84] : memref<3x8x2xf32, #tpu.memory_space<vmem>>, vector<1x1x2xf32>
    %614 = vector.shape_cast %613 : vector<1x1x2xf32> to vector<1x2xf32>
    %615 = vector.shape_cast %612 : vector<1x2xf32> to vector<1x1x2xf32>
    tpu.vector_store %arg4[%c1_82, %c4_83, %c0_84], %615 {strides = array<i32>} : memref<3x8x2xf32, #tpu.memory_space<vmem>>, vector<1x1x2xf32>,
    %616 = vector.broadcast %29 : f32 to vector<1x2xf32>
    %617 = arith.mulf %577, %616 : vector<1x2xf32>
    %618 = vector.broadcast %32 : f32 to vector<1x2xf32>
    %619 = arith.mulf %581, %618 : vector<1x2xf32>
    %620 = arith.addf %617, %619 : vector<1x2xf32>
    %621 = vector.broadcast %35 : f32 to vector<1x2xf32>
    %622 = arith.mulf %585, %621 : vector<1x2xf32>
    %623 = arith.addf %620, %622 : vector<1x2xf32>
    %624 = vector.broadcast %38 : f32 to vector<1x2xf32>
    %625 = arith.addf %623, %624 : vector<1x2xf32>
    %626 = vector.extract_strided_slice %143 {offsets = [4, 0], sizes = [1, 2], strides = [1, 1]} : vector<8x2xf32> to vector<1x2xf32>
    %627 = arith.addf %626, %625 : vector<1x2xf32>
    %c2_85 = arith.constant 2 : index
    %c4_86 = arith.constant 4 : index
    %c0_87 = arith.constant 0 : index
    %628 = vector.load %arg4[%c2_85, %c4_86, %c0_87] : memref<3x8x2xf32, #tpu.memory_space<vmem>>, vector<1x1x2xf32>
    %629 = vector.shape_cast %628 : vector<1x1x2xf32> to vector<1x2xf32>
    %630 = vector.shape_cast %627 : vector<1x2xf32> to vector<1x1x2xf32>
    tpu.vector_store %arg4[%c2_85, %c4_86, %c0_87], %630 {strides = array<i32>} : memref<3x8x2xf32, #tpu.memory_space<vmem>>, vector<1x1x2xf32>,
    %631 = vector.extract_strided_slice %175 {offsets = [5, 0], sizes = [1, 2], strides = [1, 1]} : vector<8x2xf32> to vector<1x2xf32>
    %632 = vector.extract_strided_slice %151 {offsets = [0, 0], sizes = [6, 2], strides = [1, 1]} : vector<8x2xf32> to vector<6x2xf32>
    %633 = vector.broadcast %631 : vector<1x2xf32> to vector<6x2xf32>
    %634 = arith.mulf %633, %632 : vector<6x2xf32>
    %635 = vector.extract_strided_slice %183 {offsets = [5, 0], sizes = [1, 2], strides = [1, 1]} : vector<8x2xf32> to vector<1x2xf32>
    %636 = vector.extract_strided_slice %159 {offsets = [0, 0], sizes = [6, 2], strides = [1, 1]} : vector<8x2xf32> to vector<6x2xf32>
    %637 = vector.broadcast %635 : vector<1x2xf32> to vector<6x2xf32>
    %638 = arith.mulf %637, %636 : vector<6x2xf32>
    %639 = arith.addf %634, %638 : vector<6x2xf32>
    %640 = vector.extract_strided_slice %191 {offsets = [5, 0], sizes = [1, 2], strides = [1, 1]} : vector<8x2xf32> to vector<1x2xf32>
    %641 = vector.extract_strided_slice %167 {offsets = [0, 0], sizes = [6, 2], strides = [1, 1]} : vector<8x2xf32> to vector<6x2xf32>
    %642 = vector.broadcast %640 : vector<1x2xf32> to vector<6x2xf32>
    %643 = arith.mulf %642, %641 : vector<6x2xf32>
    %644 = arith.addf %639, %643 : vector<6x2xf32>
    %cst_88 = arith.constant 0.577350259 : f32
    %645 = vector.broadcast %cst_88 : f32 to vector<6x2xf32>
    %646 = arith.mulf %644, %645 : vector<6x2xf32>
    %cst_89 = arith.constant dense<0xFF800000> : vector<2xf32>
    %647 = vector.multi_reduction <maximumf>, %646, %cst_89 [0] : vector<6x2xf32> to vector<2xf32>
    %648 = vector.shape_cast %647 : vector<2xf32> to vector<1x2xf32>
    %649 = vector.broadcast %648 : vector<1x2xf32> to vector<6x2xf32>
    %650 = arith.subf %646, %649 : vector<6x2xf32>
    %651 = math.exp %650 : vector<6x2xf32>
    %cst_90 = arith.constant dense<0.000000e+00> : vector<2xf32>
    %652 = vector.multi_reduction <add>, %651, %cst_90 [0] : vector<6x2xf32> to vector<2xf32>
    %653 = vector.shape_cast %652 : vector<2xf32> to vector<1x2xf32>
    %cst_91 = arith.constant 1.000000e+00 : f32
    %654 = vector.broadcast %cst_91 : f32 to vector<1x2xf32>
    %655 = arith.divf %654, %653 : vector<1x2xf32>
    %656 = vector.broadcast %655 : vector<1x2xf32> to vector<6x2xf32>
    %657 = arith.mulf %651, %656 : vector<6x2xf32>
    %658 = vector.extract_strided_slice %199 {offsets = [0, 0], sizes = [6, 2], strides = [1, 1]} : vector<8x2xf32> to vector<6x2xf32>
    %659 = arith.mulf %657, %658 : vector<6x2xf32>
    %cst_92 = arith.constant dense<0.000000e+00> : vector<2xf32>
    %660 = vector.multi_reduction <add>, %659, %cst_92 [0] : vector<6x2xf32> to vector<2xf32>
    %661 = vector.shape_cast %660 : vector<2xf32> to vector<1x2xf32>
    %662 = vector.extract_strided_slice %207 {offsets = [0, 0], sizes = [6, 2], strides = [1, 1]} : vector<8x2xf32> to vector<6x2xf32>
    %663 = arith.mulf %657, %662 : vector<6x2xf32>
    %cst_93 = arith.constant dense<0.000000e+00> : vector<2xf32>
    %664 = vector.multi_reduction <add>, %663, %cst_93 [0] : vector<6x2xf32> to vector<2xf32>
    %665 = vector.shape_cast %664 : vector<2xf32> to vector<1x2xf32>
    %666 = vector.extract_strided_slice %215 {offsets = [0, 0], sizes = [6, 2], strides = [1, 1]} : vector<8x2xf32> to vector<6x2xf32>
    %667 = arith.mulf %657, %666 : vector<6x2xf32>
    %cst_94 = arith.constant dense<0.000000e+00> : vector<2xf32>
    %668 = vector.multi_reduction <add>, %667, %cst_94 [0] : vector<6x2xf32> to vector<2xf32>
    %669 = vector.shape_cast %668 : vector<2xf32> to vector<1x2xf32>
    %670 = vector.broadcast %27 : f32 to vector<1x2xf32>
    %671 = arith.mulf %661, %670 : vector<1x2xf32>
    %672 = vector.broadcast %30 : f32 to vector<1x2xf32>
    %673 = arith.mulf %665, %672 : vector<1x2xf32>
    %674 = arith.addf %671, %673 : vector<1x2xf32>
    %675 = vector.broadcast %33 : f32 to vector<1x2xf32>
    %676 = arith.mulf %669, %675 : vector<1x2xf32>
    %677 = arith.addf %674, %676 : vector<1x2xf32>
    %678 = vector.broadcast %36 : f32 to vector<1x2xf32>
    %679 = arith.addf %677, %678 : vector<1x2xf32>
    %680 = vector.extract_strided_slice %139 {offsets = [5, 0], sizes = [1, 2], strides = [1, 1]} : vector<8x2xf32> to vector<1x2xf32>
    %681 = arith.addf %680, %679 : vector<1x2xf32>
    %c0_95 = arith.constant 0 : index
    %c5_96 = arith.constant 5 : index
    %c0_97 = arith.constant 0 : index
    %682 = vector.load %arg4[%c0_95, %c5_96, %c0_97] : memref<3x8x2xf32, #tpu.memory_space<vmem>>, vector<1x1x2xf32>
    %683 = vector.shape_cast %682 : vector<1x1x2xf32> to vector<1x2xf32>
    %684 = vector.shape_cast %681 : vector<1x2xf32> to vector<1x1x2xf32>
    tpu.vector_store %arg4[%c0_95, %c5_96, %c0_97], %684 {strides = array<i32>} : memref<3x8x2xf32, #tpu.memory_space<vmem>>, vector<1x1x2xf32>,
    %685 = vector.broadcast %28 : f32 to vector<1x2xf32>
    %686 = arith.mulf %661, %685 : vector<1x2xf32>
    %687 = vector.broadcast %31 : f32 to vector<1x2xf32>
    %688 = arith.mulf %665, %687 : vector<1x2xf32>
    %689 = arith.addf %686, %688 : vector<1x2xf32>
    %690 = vector.broadcast %34 : f32 to vector<1x2xf32>
    %691 = arith.mulf %669, %690 : vector<1x2xf32>
    %692 = arith.addf %689, %691 : vector<1x2xf32>
    %693 = vector.broadcast %37 : f32 to vector<1x2xf32>
    %694 = arith.addf %692, %693 : vector<1x2xf32>
    %695 = vector.extract_strided_slice %141 {offsets = [5, 0], sizes = [1, 2], strides = [1, 1]} : vector<8x2xf32> to vector<1x2xf32>
    %696 = arith.addf %695, %694 : vector<1x2xf32>
    %c1_98 = arith.constant 1 : index
    %c5_99 = arith.constant 5 : index
    %c0_100 = arith.constant 0 : index
    %697 = vector.load %arg4[%c1_98, %c5_99, %c0_100] : memref<3x8x2xf32, #tpu.memory_space<vmem>>, vector<1x1x2xf32>
    %698 = vector.shape_cast %697 : vector<1x1x2xf32> to vector<1x2xf32>
    %699 = vector.shape_cast %696 : vector<1x2xf32> to vector<1x1x2xf32>
    tpu.vector_store %arg4[%c1_98, %c5_99, %c0_100], %699 {strides = array<i32>} : memref<3x8x2xf32, #tpu.memory_space<vmem>>, vector<1x1x2xf32>,
    %700 = vector.broadcast %29 : f32 to vector<1x2xf32>
    %701 = arith.mulf %661, %700 : vector<1x2xf32>
    %702 = vector.broadcast %32 : f32 to vector<1x2xf32>
    %703 = arith.mulf %665, %702 : vector<1x2xf32>
    %704 = arith.addf %701, %703 : vector<1x2xf32>
    %705 = vector.broadcast %35 : f32 to vector<1x2xf32>
    %706 = arith.mulf %669, %705 : vector<1x2xf32>
    %707 = arith.addf %704, %706 : vector<1x2xf32>
    %708 = vector.broadcast %38 : f32 to vector<1x2xf32>
    %709 = arith.addf %707, %708 : vector<1x2xf32>
    %710 = vector.extract_strided_slice %143 {offsets = [5, 0], sizes = [1, 2], strides = [1, 1]} : vector<8x2xf32> to vector<1x2xf32>
    %711 = arith.addf %710, %709 : vector<1x2xf32>
    %c2_101 = arith.constant 2 : index
    %c5_102 = arith.constant 5 : index
    %c0_103 = arith.constant 0 : index
    %712 = vector.load %arg4[%c2_101, %c5_102, %c0_103] : memref<3x8x2xf32, #tpu.memory_space<vmem>>, vector<1x1x2xf32>
    %713 = vector.shape_cast %712 : vector<1x1x2xf32> to vector<1x2xf32>
    %714 = vector.shape_cast %711 : vector<1x2xf32> to vector<1x1x2xf32>
    tpu.vector_store %arg4[%c2_101, %c5_102, %c0_103], %714 {strides = array<i32>} : memref<3x8x2xf32, #tpu.memory_space<vmem>>, vector<1x1x2xf32>,
    %715 = vector.extract_strided_slice %175 {offsets = [6, 0], sizes = [1, 2], strides = [1, 1]} : vector<8x2xf32> to vector<1x2xf32>
    %716 = vector.extract_strided_slice %151 {offsets = [0, 0], sizes = [7, 2], strides = [1, 1]} : vector<8x2xf32> to vector<7x2xf32>
    %717 = vector.broadcast %715 : vector<1x2xf32> to vector<7x2xf32>
    %718 = arith.mulf %717, %716 : vector<7x2xf32>
    %719 = vector.extract_strided_slice %183 {offsets = [6, 0], sizes = [1, 2], strides = [1, 1]} : vector<8x2xf32> to vector<1x2xf32>
    %720 = vector.extract_strided_slice %159 {offsets = [0, 0], sizes = [7, 2], strides = [1, 1]} : vector<8x2xf32> to vector<7x2xf32>
    %721 = vector.broadcast %719 : vector<1x2xf32> to vector<7x2xf32>
    %722 = arith.mulf %721, %720 : vector<7x2xf32>
    %723 = arith.addf %718, %722 : vector<7x2xf32>
    %724 = vector.extract_strided_slice %191 {offsets = [6, 0], sizes = [1, 2], strides = [1, 1]} : vector<8x2xf32> to vector<1x2xf32>
    %725 = vector.extract_strided_slice %167 {offsets = [0, 0], sizes = [7, 2], strides = [1, 1]} : vector<8x2xf32> to vector<7x2xf32>
    %726 = vector.broadcast %724 : vector<1x2xf32> to vector<7x2xf32>
    %727 = arith.mulf %726, %725 : vector<7x2xf32>
    %728 = arith.addf %723, %727 : vector<7x2xf32>
    %cst_104 = arith.constant 0.577350259 : f32
    %729 = vector.broadcast %cst_104 : f32 to vector<7x2xf32>
    %730 = arith.mulf %728, %729 : vector<7x2xf32>
    %cst_105 = arith.constant dense<0xFF800000> : vector<2xf32>
    %731 = vector.multi_reduction <maximumf>, %730, %cst_105 [0] : vector<7x2xf32> to vector<2xf32>
    %732 = vector.shape_cast %731 : vector<2xf32> to vector<1x2xf32>
    %733 = vector.broadcast %732 : vector<1x2xf32> to vector<7x2xf32>
    %734 = arith.subf %730, %733 : vector<7x2xf32>
    %735 = math.exp %734 : vector<7x2xf32>
    %cst_106 = arith.constant dense<0.000000e+00> : vector<2xf32>
    %736 = vector.multi_reduction <add>, %735, %cst_106 [0] : vector<7x2xf32> to vector<2xf32>
    %737 = vector.shape_cast %736 : vector<2xf32> to vector<1x2xf32>
    %cst_107 = arith.constant 1.000000e+00 : f32
    %738 = vector.broadcast %cst_107 : f32 to vector<1x2xf32>
    %739 = arith.divf %738, %737 : vector<1x2xf32>
    %740 = vector.broadcast %739 : vector<1x2xf32> to vector<7x2xf32>
    %741 = arith.mulf %735, %740 : vector<7x2xf32>
    %742 = vector.extract_strided_slice %199 {offsets = [0, 0], sizes = [7, 2], strides = [1, 1]} : vector<8x2xf32> to vector<7x2xf32>
    %743 = arith.mulf %741, %742 : vector<7x2xf32>
    %cst_108 = arith.constant dense<0.000000e+00> : vector<2xf32>
    %744 = vector.multi_reduction <add>, %743, %cst_108 [0] : vector<7x2xf32> to vector<2xf32>
    %745 = vector.shape_cast %744 : vector<2xf32> to vector<1x2xf32>
    %746 = vector.extract_strided_slice %207 {offsets = [0, 0], sizes = [7, 2], strides = [1, 1]} : vector<8x2xf32> to vector<7x2xf32>
    %747 = arith.mulf %741, %746 : vector<7x2xf32>
    %cst_109 = arith.constant dense<0.000000e+00> : vector<2xf32>
    %748 = vector.multi_reduction <add>, %747, %cst_109 [0] : vector<7x2xf32> to vector<2xf32>
    %749 = vector.shape_cast %748 : vector<2xf32> to vector<1x2xf32>
    %750 = vector.extract_strided_slice %215 {offsets = [0, 0], sizes = [7, 2], strides = [1, 1]} : vector<8x2xf32> to vector<7x2xf32>
    %751 = arith.mulf %741, %750 : vector<7x2xf32>
    %cst_110 = arith.constant dense<0.000000e+00> : vector<2xf32>
    %752 = vector.multi_reduction <add>, %751, %cst_110 [0] : vector<7x2xf32> to vector<2xf32>
    %753 = vector.shape_cast %752 : vector<2xf32> to vector<1x2xf32>
    %754 = vector.broadcast %27 : f32 to vector<1x2xf32>
    %755 = arith.mulf %745, %754 : vector<1x2xf32>
    %756 = vector.broadcast %30 : f32 to vector<1x2xf32>
    %757 = arith.mulf %749, %756 : vector<1x2xf32>
    %758 = arith.addf %755, %757 : vector<1x2xf32>
    %759 = vector.broadcast %33 : f32 to vector<1x2xf32>
    %760 = arith.mulf %753, %759 : vector<1x2xf32>
    %761 = arith.addf %758, %760 : vector<1x2xf32>
    %762 = vector.broadcast %36 : f32 to vector<1x2xf32>
    %763 = arith.addf %761, %762 : vector<1x2xf32>
    %764 = vector.extract_strided_slice %139 {offsets = [6, 0], sizes = [1, 2], strides = [1, 1]} : vector<8x2xf32> to vector<1x2xf32>
    %765 = arith.addf %764, %763 : vector<1x2xf32>
    %c0_111 = arith.constant 0 : index
    %c6_112 = arith.constant 6 : index
    %c0_113 = arith.constant 0 : index
    %766 = vector.load %arg4[%c0_111, %c6_112, %c0_113] : memref<3x8x2xf32, #tpu.memory_space<vmem>>, vector<1x1x2xf32>
    %767 = vector.shape_cast %766 : vector<1x1x2xf32> to vector<1x2xf32>
    %768 = vector.shape_cast %765 : vector<1x2xf32> to vector<1x1x2xf32>
    tpu.vector_store %arg4[%c0_111, %c6_112, %c0_113], %768 {strides = array<i32>} : memref<3x8x2xf32, #tpu.memory_space<vmem>>, vector<1x1x2xf32>,
    %769 = vector.broadcast %28 : f32 to vector<1x2xf32>
    %770 = arith.mulf %745, %769 : vector<1x2xf32>
    %771 = vector.broadcast %31 : f32 to vector<1x2xf32>
    %772 = arith.mulf %749, %771 : vector<1x2xf32>
    %773 = arith.addf %770, %772 : vector<1x2xf32>
    %774 = vector.broadcast %34 : f32 to vector<1x2xf32>
    %775 = arith.mulf %753, %774 : vector<1x2xf32>
    %776 = arith.addf %773, %775 : vector<1x2xf32>
    %777 = vector.broadcast %37 : f32 to vector<1x2xf32>
    %778 = arith.addf %776, %777 : vector<1x2xf32>
    %779 = vector.extract_strided_slice %141 {offsets = [6, 0], sizes = [1, 2], strides = [1, 1]} : vector<8x2xf32> to vector<1x2xf32>
    %780 = arith.addf %779, %778 : vector<1x2xf32>
    %c1_114 = arith.constant 1 : index
    %c6_115 = arith.constant 6 : index
    %c0_116 = arith.constant 0 : index
    %781 = vector.load %arg4[%c1_114, %c6_115, %c0_116] : memref<3x8x2xf32, #tpu.memory_space<vmem>>, vector<1x1x2xf32>
    %782 = vector.shape_cast %781 : vector<1x1x2xf32> to vector<1x2xf32>
    %783 = vector.shape_cast %780 : vector<1x2xf32> to vector<1x1x2xf32>
    tpu.vector_store %arg4[%c1_114, %c6_115, %c0_116], %783 {strides = array<i32>} : memref<3x8x2xf32, #tpu.memory_space<vmem>>, vector<1x1x2xf32>,
    %784 = vector.broadcast %29 : f32 to vector<1x2xf32>
    %785 = arith.mulf %745, %784 : vector<1x2xf32>
    %786 = vector.broadcast %32 : f32 to vector<1x2xf32>
    %787 = arith.mulf %749, %786 : vector<1x2xf32>
    %788 = arith.addf %785, %787 : vector<1x2xf32>
    %789 = vector.broadcast %35 : f32 to vector<1x2xf32>
    %790 = arith.mulf %753, %789 : vector<1x2xf32>
    %791 = arith.addf %788, %790 : vector<1x2xf32>
    %792 = vector.broadcast %38 : f32 to vector<1x2xf32>
    %793 = arith.addf %791, %792 : vector<1x2xf32>
    %794 = vector.extract_strided_slice %143 {offsets = [6, 0], sizes = [1, 2], strides = [1, 1]} : vector<8x2xf32> to vector<1x2xf32>
    %795 = arith.addf %794, %793 : vector<1x2xf32>
    %c2_117 = arith.constant 2 : index
    %c6_118 = arith.constant 6 : index
    %c0_119 = arith.constant 0 : index
    %796 = vector.load %arg4[%c2_117, %c6_118, %c0_119] : memref<3x8x2xf32, #tpu.memory_space<vmem>>, vector<1x1x2xf32>
    %797 = vector.shape_cast %796 : vector<1x1x2xf32> to vector<1x2xf32>
    %798 = vector.shape_cast %795 : vector<1x2xf32> to vector<1x1x2xf32>
    tpu.vector_store %arg4[%c2_117, %c6_118, %c0_119], %798 {strides = array<i32>} : memref<3x8x2xf32, #tpu.memory_space<vmem>>, vector<1x1x2xf32>,
    %799 = vector.extract_strided_slice %175 {offsets = [7, 0], sizes = [1, 2], strides = [1, 1]} : vector<8x2xf32> to vector<1x2xf32>
    %800 = vector.broadcast %799 : vector<1x2xf32> to vector<8x2xf32>
    %801 = arith.mulf %800, %151 : vector<8x2xf32>
    %802 = vector.extract_strided_slice %183 {offsets = [7, 0], sizes = [1, 2], strides = [1, 1]} : vector<8x2xf32> to vector<1x2xf32>
    %803 = vector.broadcast %802 : vector<1x2xf32> to vector<8x2xf32>
    %804 = arith.mulf %803, %159 : vector<8x2xf32>
    %805 = arith.addf %801, %804 : vector<8x2xf32>
    %806 = vector.extract_strided_slice %191 {offsets = [7, 0], sizes = [1, 2], strides = [1, 1]} : vector<8x2xf32> to vector<1x2xf32>
    %807 = vector.broadcast %806 : vector<1x2xf32> to vector<8x2xf32>
    %808 = arith.mulf %807, %167 : vector<8x2xf32>
    %809 = arith.addf %805, %808 : vector<8x2xf32>
    %cst_120 = arith.constant 0.577350259 : f32
    %810 = vector.broadcast %cst_120 : f32 to vector<8x2xf32>
    %811 = arith.mulf %809, %810 : vector<8x2xf32>
    %cst_121 = arith.constant dense<0xFF800000> : vector<2xf32>
    %812 = vector.multi_reduction <maximumf>, %811, %cst_121 [0] : vector<8x2xf32> to vector<2xf32>
    %813 = vector.shape_cast %812 : vector<2xf32> to vector<1x2xf32>
    %814 = vector.broadcast %813 : vector<1x2xf32> to vector<8x2xf32>
    %815 = arith.subf %811, %814 : vector<8x2xf32>
    %816 = math.exp %815 : vector<8x2xf32>
    %cst_122 = arith.constant dense<0.000000e+00> : vector<2xf32>
    %817 = vector.multi_reduction <add>, %816, %cst_122 [0] : vector<8x2xf32> to vector<2xf32>
    %818 = vector.shape_cast %817 : vector<2xf32> to vector<1x2xf32>
    %cst_123 = arith.constant 1.000000e+00 : f32
    %819 = vector.broadcast %cst_123 : f32 to vector<1x2xf32>
    %820 = arith.divf %819, %818 : vector<1x2xf32>
    %821 = vector.broadcast %820 : vector<1x2xf32> to vector<8x2xf32>
    %822 = arith.mulf %816, %821 : vector<8x2xf32>
    %823 = arith.mulf %822, %199 : vector<8x2xf32>
    %cst_124 = arith.constant dense<0.000000e+00> : vector<2xf32>
    %824 = vector.multi_reduction <add>, %823, %cst_124 [0] : vector<8x2xf32> to vector<2xf32>
    %825 = vector.shape_cast %824 : vector<2xf32> to vector<1x2xf32>
    %826 = arith.mulf %822, %207 : vector<8x2xf32>
    %cst_125 = arith.constant dense<0.000000e+00> : vector<2xf32>
    %827 = vector.multi_reduction <add>, %826, %cst_125 [0] : vector<8x2xf32> to vector<2xf32>
    %828 = vector.shape_cast %827 : vector<2xf32> to vector<1x2xf32>
    %829 = arith.mulf %822, %215 : vector<8x2xf32>
    %cst_126 = arith.constant dense<0.000000e+00> : vector<2xf32>
    %830 = vector.multi_reduction <add>, %829, %cst_126 [0] : vector<8x2xf32> to vector<2xf32>
    %831 = vector.shape_cast %830 : vector<2xf32> to vector<1x2xf32>
    %832 = vector.broadcast %27 : f32 to vector<1x2xf32>
    %833 = arith.mulf %825, %832 : vector<1x2xf32>
    %834 = vector.broadcast %30 : f32 to vector<1x2xf32>
    %835 = arith.mulf %828, %834 : vector<1x2xf32>
    %836 = arith.addf %833, %835 : vector<1x2xf32>
    %837 = vector.broadcast %33 : f32 to vector<1x2xf32>
    %838 = arith.mulf %831, %837 : vector<1x2xf32>
    %839 = arith.addf %836, %838 : vector<1x2xf32>
    %840 = vector.broadcast %36 : f32 to vector<1x2xf32>
    %841 = arith.addf %839, %840 : vector<1x2xf32>
    %842 = vector.extract_strided_slice %139 {offsets = [7, 0], sizes = [1, 2], strides = [1, 1]} : vector<8x2xf32> to vector<1x2xf32>
    %843 = arith.addf %842, %841 : vector<1x2xf32>
    %c0_127 = arith.constant 0 : index
    %c7_128 = arith.constant 7 : index
    %c0_129 = arith.constant 0 : index
    %844 = vector.load %arg4[%c0_127, %c7_128, %c0_129] : memref<3x8x2xf32, #tpu.memory_space<vmem>>, vector<1x1x2xf32>
    %845 = vector.shape_cast %844 : vector<1x1x2xf32> to vector<1x2xf32>
    %846 = vector.shape_cast %843 : vector<1x2xf32> to vector<1x1x2xf32>
    tpu.vector_store %arg4[%c0_127, %c7_128, %c0_129], %846 {strides = array<i32>} : memref<3x8x2xf32, #tpu.memory_space<vmem>>, vector<1x1x2xf32>,
    %847 = vector.broadcast %28 : f32 to vector<1x2xf32>
    %848 = arith.mulf %825, %847 : vector<1x2xf32>
    %849 = vector.broadcast %31 : f32 to vector<1x2xf32>
    %850 = arith.mulf %828, %849 : vector<1x2xf32>
    %851 = arith.addf %848, %850 : vector<1x2xf32>
    %852 = vector.broadcast %34 : f32 to vector<1x2xf32>
    %853 = arith.mulf %831, %852 : vector<1x2xf32>
    %854 = arith.addf %851, %853 : vector<1x2xf32>
    %855 = vector.broadcast %37 : f32 to vector<1x2xf32>
    %856 = arith.addf %854, %855 : vector<1x2xf32>
    %857 = vector.extract_strided_slice %141 {offsets = [7, 0], sizes = [1, 2], strides = [1, 1]} : vector<8x2xf32> to vector<1x2xf32>
    %858 = arith.addf %857, %856 : vector<1x2xf32>
    %c1_130 = arith.constant 1 : index
    %c7_131 = arith.constant 7 : index
    %c0_132 = arith.constant 0 : index
    %859 = vector.load %arg4[%c1_130, %c7_131, %c0_132] : memref<3x8x2xf32, #tpu.memory_space<vmem>>, vector<1x1x2xf32>
    %860 = vector.shape_cast %859 : vector<1x1x2xf32> to vector<1x2xf32>
    %861 = vector.shape_cast %858 : vector<1x2xf32> to vector<1x1x2xf32>
    tpu.vector_store %arg4[%c1_130, %c7_131, %c0_132], %861 {strides = array<i32>} : memref<3x8x2xf32, #tpu.memory_space<vmem>>, vector<1x1x2xf32>,
    %862 = vector.broadcast %29 : f32 to vector<1x2xf32>
    %863 = arith.mulf %825, %862 : vector<1x2xf32>
    %864 = vector.broadcast %32 : f32 to vector<1x2xf32>
    %865 = arith.mulf %828, %864 : vector<1x2xf32>
    %866 = arith.addf %863, %865 : vector<1x2xf32>
    %867 = vector.broadcast %35 : f32 to vector<1x2xf32>
    %868 = arith.mulf %831, %867 : vector<1x2xf32>
    %869 = arith.addf %866, %868 : vector<1x2xf32>
    %870 = vector.broadcast %38 : f32 to vector<1x2xf32>
    %871 = arith.addf %869, %870 : vector<1x2xf32>
    %872 = vector.extract_strided_slice %143 {offsets = [7, 0], sizes = [1, 2], strides = [1, 1]} : vector<8x2xf32> to vector<1x2xf32>
    %873 = arith.addf %872, %871 : vector<1x2xf32>
    %c2_133 = arith.constant 2 : index
    %c7_134 = arith.constant 7 : index
    %c0_135 = arith.constant 0 : index
    %874 = vector.load %arg4[%c2_133, %c7_134, %c0_135] : memref<3x8x2xf32, #tpu.memory_space<vmem>>, vector<1x1x2xf32>
    %875 = vector.shape_cast %874 : vector<1x1x2xf32> to vector<1x2xf32>
    %876 = vector.shape_cast %873 : vector<1x2xf32> to vector<1x1x2xf32>
    tpu.vector_store %arg4[%c2_133, %c7_134, %c0_135], %876 {strides = array<i32>} : memref<3x8x2xf32, #tpu.memory_space<vmem>>, vector<1x1x2xf32>,
    %c0_136 = arith.constant 0 : index
    %c0_137 = arith.constant 0 : index
    %c0_138 = arith.constant 0 : index
    %877 = vector.load %arg4[%c0_136, %c0_137, %c0_138] : memref<3x8x2xf32, #tpu.memory_space<vmem>>, vector<1x8x2xf32>
    %878 = vector.shape_cast %877 : vector<1x8x2xf32> to vector<8x2xf32>
    %c1_139 = arith.constant 1 : index
    %c0_140 = arith.constant 0 : index
    %c0_141 = arith.constant 0 : index
    %879 = vector.load %arg4[%c1_139, %c0_140, %c0_141] : memref<3x8x2xf32, #tpu.memory_space<vmem>>, vector<1x8x2xf32>
    %880 = vector.shape_cast %879 : vector<1x8x2xf32> to vector<8x2xf32>
    %c2_142 = arith.constant 2 : index
    %c0_143 = arith.constant 0 : index
    %c0_144 = arith.constant 0 : index
    %881 = vector.load %arg4[%c2_142, %c0_143, %c0_144] : memref<3x8x2xf32, #tpu.memory_space<vmem>>, vector<1x8x2xf32>
    %882 = vector.shape_cast %881 : vector<1x8x2xf32> to vector<8x2xf32>
    %883 = vector.broadcast %39 : f32 to vector<8x2xf32>
    %884 = arith.mulf %878, %883 : vector<8x2xf32>
    %885 = vector.broadcast %51 : f32 to vector<8x2xf32>
    %886 = arith.mulf %880, %885 : vector<8x2xf32>
    %887 = arith.addf %884, %886 : vector<8x2xf32>
    %888 = vector.broadcast %63 : f32 to vector<8x2xf32>
    %889 = arith.mulf %882, %888 : vector<8x2xf32>
    %890 = arith.addf %887, %889 : vector<8x2xf32>
    %891 = vector.broadcast %75 : f32 to vector<8x2xf32>
    %892 = arith.addf %890, %891 : vector<8x2xf32>
    %893 = vector.broadcast %40 : f32 to vector<8x2xf32>
    %894 = arith.mulf %878, %893 : vector<8x2xf32>
    %895 = vector.broadcast %52 : f32 to vector<8x2xf32>
    %896 = arith.mulf %880, %895 : vector<8x2xf32>
    %897 = arith.addf %894, %896 : vector<8x2xf32>
    %898 = vector.broadcast %64 : f32 to vector<8x2xf32>
    %899 = arith.mulf %882, %898 : vector<8x2xf32>
    %900 = arith.addf %897, %899 : vector<8x2xf32>
    %901 = vector.broadcast %76 : f32 to vector<8x2xf32>
    %902 = arith.addf %900, %901 : vector<8x2xf32>
    %903 = vector.broadcast %41 : f32 to vector<8x2xf32>
    %904 = arith.mulf %878, %903 : vector<8x2xf32>
    %905 = vector.broadcast %53 : f32 to vector<8x2xf32>
    %906 = arith.mulf %880, %905 : vector<8x2xf32>
    %907 = arith.addf %904, %906 : vector<8x2xf32>
    %908 = vector.broadcast %65 : f32 to vector<8x2xf32>
    %909 = arith.mulf %882, %908 : vector<8x2xf32>
    %910 = arith.addf %907, %909 : vector<8x2xf32>
    %911 = vector.broadcast %77 : f32 to vector<8x2xf32>
    %912 = arith.addf %910, %911 : vector<8x2xf32>
    %913 = vector.broadcast %42 : f32 to vector<8x2xf32>
    %914 = arith.mulf %878, %913 : vector<8x2xf32>
    %915 = vector.broadcast %54 : f32 to vector<8x2xf32>
    %916 = arith.mulf %880, %915 : vector<8x2xf32>
    %917 = arith.addf %914, %916 : vector<8x2xf32>
    %918 = vector.broadcast %66 : f32 to vector<8x2xf32>
    %919 = arith.mulf %882, %918 : vector<8x2xf32>
    %920 = arith.addf %917, %919 : vector<8x2xf32>
    %921 = vector.broadcast %78 : f32 to vector<8x2xf32>
    %922 = arith.addf %920, %921 : vector<8x2xf32>
    %923 = vector.broadcast %43 : f32 to vector<8x2xf32>
    %924 = arith.mulf %878, %923 : vector<8x2xf32>
    %925 = vector.broadcast %55 : f32 to vector<8x2xf32>
    %926 = arith.mulf %880, %925 : vector<8x2xf32>
    %927 = arith.addf %924, %926 : vector<8x2xf32>
    %928 = vector.broadcast %67 : f32 to vector<8x2xf32>
    %929 = arith.mulf %882, %928 : vector<8x2xf32>
    %930 = arith.addf %927, %929 : vector<8x2xf32>
    %931 = vector.broadcast %79 : f32 to vector<8x2xf32>
    %932 = arith.addf %930, %931 : vector<8x2xf32>
    %933 = vector.broadcast %44 : f32 to vector<8x2xf32>
    %934 = arith.mulf %878, %933 : vector<8x2xf32>
    %935 = vector.broadcast %56 : f32 to vector<8x2xf32>
    %936 = arith.mulf %880, %935 : vector<8x2xf32>
    %937 = arith.addf %934, %936 : vector<8x2xf32>
    %938 = vector.broadcast %68 : f32 to vector<8x2xf32>
    %939 = arith.mulf %882, %938 : vector<8x2xf32>
    %940 = arith.addf %937, %939 : vector<8x2xf32>
    %941 = vector.broadcast %80 : f32 to vector<8x2xf32>
    %942 = arith.addf %940, %941 : vector<8x2xf32>
    %943 = vector.broadcast %45 : f32 to vector<8x2xf32>
    %944 = arith.mulf %878, %943 : vector<8x2xf32>
    %945 = vector.broadcast %57 : f32 to vector<8x2xf32>
    %946 = arith.mulf %880, %945 : vector<8x2xf32>
    %947 = arith.addf %944, %946 : vector<8x2xf32>
    %948 = vector.broadcast %69 : f32 to vector<8x2xf32>
    %949 = arith.mulf %882, %948 : vector<8x2xf32>
    %950 = arith.addf %947, %949 : vector<8x2xf32>
    %951 = vector.broadcast %81 : f32 to vector<8x2xf32>
    %952 = arith.addf %950, %951 : vector<8x2xf32>
    %953 = vector.broadcast %46 : f32 to vector<8x2xf32>
    %954 = arith.mulf %878, %953 : vector<8x2xf32>
    %955 = vector.broadcast %58 : f32 to vector<8x2xf32>
    %956 = arith.mulf %880, %955 : vector<8x2xf32>
    %957 = arith.addf %954, %956 : vector<8x2xf32>
    %958 = vector.broadcast %70 : f32 to vector<8x2xf32>
    %959 = arith.mulf %882, %958 : vector<8x2xf32>
    %960 = arith.addf %957, %959 : vector<8x2xf32>
    %961 = vector.broadcast %82 : f32 to vector<8x2xf32>
    %962 = arith.addf %960, %961 : vector<8x2xf32>
    %963 = vector.broadcast %47 : f32 to vector<8x2xf32>
    %964 = arith.mulf %878, %963 : vector<8x2xf32>
    %965 = vector.broadcast %59 : f32 to vector<8x2xf32>
    %966 = arith.mulf %880, %965 : vector<8x2xf32>
    %967 = arith.addf %964, %966 : vector<8x2xf32>
    %968 = vector.broadcast %71 : f32 to vector<8x2xf32>
    %969 = arith.mulf %882, %968 : vector<8x2xf32>
    %970 = arith.addf %967, %969 : vector<8x2xf32>
    %971 = vector.broadcast %83 : f32 to vector<8x2xf32>
    %972 = arith.addf %970, %971 : vector<8x2xf32>
    %973 = vector.broadcast %48 : f32 to vector<8x2xf32>
    %974 = arith.mulf %878, %973 : vector<8x2xf32>
    %975 = vector.broadcast %60 : f32 to vector<8x2xf32>
    %976 = arith.mulf %880, %975 : vector<8x2xf32>
    %977 = arith.addf %974, %976 : vector<8x2xf32>
    %978 = vector.broadcast %72 : f32 to vector<8x2xf32>
    %979 = arith.mulf %882, %978 : vector<8x2xf32>
    %980 = arith.addf %977, %979 : vector<8x2xf32>
    %981 = vector.broadcast %84 : f32 to vector<8x2xf32>
    %982 = arith.addf %980, %981 : vector<8x2xf32>
    %983 = vector.broadcast %49 : f32 to vector<8x2xf32>
    %984 = arith.mulf %878, %983 : vector<8x2xf32>
    %985 = vector.broadcast %61 : f32 to vector<8x2xf32>
    %986 = arith.mulf %880, %985 : vector<8x2xf32>
    %987 = arith.addf %984, %986 : vector<8x2xf32>
    %988 = vector.broadcast %73 : f32 to vector<8x2xf32>
    %989 = arith.mulf %882, %988 : vector<8x2xf32>
    %990 = arith.addf %987, %989 : vector<8x2xf32>
    %991 = vector.broadcast %85 : f32 to vector<8x2xf32>
    %992 = arith.addf %990, %991 : vector<8x2xf32>
    %993 = vector.broadcast %50 : f32 to vector<8x2xf32>
    %994 = arith.mulf %878, %993 : vector<8x2xf32>
    %995 = vector.broadcast %62 : f32 to vector<8x2xf32>
    %996 = arith.mulf %880, %995 : vector<8x2xf32>
    %997 = arith.addf %994, %996 : vector<8x2xf32>
    %998 = vector.broadcast %74 : f32 to vector<8x2xf32>
    %999 = arith.mulf %882, %998 : vector<8x2xf32>
    %1000 = arith.addf %997, %999 : vector<8x2xf32>
    %1001 = vector.broadcast %86 : f32 to vector<8x2xf32>
    %1002 = arith.addf %1000, %1001 : vector<8x2xf32>
    %cst_145 = arith.constant 0.000000e+00 : f32
    %1003 = vector.broadcast %cst_145 : f32 to vector<8x2xf32>
    %1004 = arith.maximumf %892, %1003 : vector<8x2xf32>
    %cst_146 = arith.constant 0.000000e+00 : f32
    %1005 = vector.broadcast %cst_146 : f32 to vector<8x2xf32>
    %1006 = arith.maximumf %902, %1005 : vector<8x2xf32>
    %cst_147 = arith.constant 0.000000e+00 : f32
    %1007 = vector.broadcast %cst_147 : f32 to vector<8x2xf32>
    %1008 = arith.maximumf %912, %1007 : vector<8x2xf32>
    %cst_148 = arith.constant 0.000000e+00 : f32
    %1009 = vector.broadcast %cst_148 : f32 to vector<8x2xf32>
    %1010 = arith.maximumf %922, %1009 : vector<8x2xf32>
    %cst_149 = arith.constant 0.000000e+00 : f32
    %1011 = vector.broadcast %cst_149 : f32 to vector<8x2xf32>
    %1012 = arith.maximumf %932, %1011 : vector<8x2xf32>
    %cst_150 = arith.constant 0.000000e+00 : f32
    %1013 = vector.broadcast %cst_150 : f32 to vector<8x2xf32>
    %1014 = arith.maximumf %942, %1013 : vector<8x2xf32>
    %cst_151 = arith.constant 0.000000e+00 : f32
    %1015 = vector.broadcast %cst_151 : f32 to vector<8x2xf32>
    %1016 = arith.maximumf %952, %1015 : vector<8x2xf32>
    %cst_152 = arith.constant 0.000000e+00 : f32
    %1017 = vector.broadcast %cst_152 : f32 to vector<8x2xf32>
    %1018 = arith.maximumf %962, %1017 : vector<8x2xf32>
    %cst_153 = arith.constant 0.000000e+00 : f32
    %1019 = vector.broadcast %cst_153 : f32 to vector<8x2xf32>
    %1020 = arith.maximumf %972, %1019 : vector<8x2xf32>
    %cst_154 = arith.constant 0.000000e+00 : f32
    %1021 = vector.broadcast %cst_154 : f32 to vector<8x2xf32>
    %1022 = arith.maximumf %982, %1021 : vector<8x2xf32>
    %cst_155 = arith.constant 0.000000e+00 : f32
    %1023 = vector.broadcast %cst_155 : f32 to vector<8x2xf32>
    %1024 = arith.maximumf %992, %1023 : vector<8x2xf32>
    %cst_156 = arith.constant 0.000000e+00 : f32
    %1025 = vector.broadcast %cst_156 : f32 to vector<8x2xf32>
    %1026 = arith.maximumf %1002, %1025 : vector<8x2xf32>
    %1027 = vector.broadcast %87 : f32 to vector<8x2xf32>
    %1028 = arith.mulf %1004, %1027 : vector<8x2xf32>
    %1029 = vector.broadcast %90 : f32 to vector<8x2xf32>
    %1030 = arith.mulf %1006, %1029 : vector<8x2xf32>
    %1031 = arith.addf %1028, %1030 : vector<8x2xf32>
    %1032 = vector.broadcast %93 : f32 to vector<8x2xf32>
    %1033 = arith.mulf %1008, %1032 : vector<8x2xf32>
    %1034 = arith.addf %1031, %1033 : vector<8x2xf32>
    %1035 = vector.broadcast %96 : f32 to vector<8x2xf32>
    %1036 = arith.mulf %1010, %1035 : vector<8x2xf32>
    %1037 = arith.addf %1034, %1036 : vector<8x2xf32>
    %1038 = vector.broadcast %99 : f32 to vector<8x2xf32>
    %1039 = arith.mulf %1012, %1038 : vector<8x2xf32>
    %1040 = arith.addf %1037, %1039 : vector<8x2xf32>
    %1041 = vector.broadcast %102 : f32 to vector<8x2xf32>
    %1042 = arith.mulf %1014, %1041 : vector<8x2xf32>
    %1043 = arith.addf %1040, %1042 : vector<8x2xf32>
    %1044 = vector.broadcast %105 : f32 to vector<8x2xf32>
    %1045 = arith.mulf %1016, %1044 : vector<8x2xf32>
    %1046 = arith.addf %1043, %1045 : vector<8x2xf32>
    %1047 = vector.broadcast %108 : f32 to vector<8x2xf32>
    %1048 = arith.mulf %1018, %1047 : vector<8x2xf32>
    %1049 = arith.addf %1046, %1048 : vector<8x2xf32>
    %1050 = vector.broadcast %111 : f32 to vector<8x2xf32>
    %1051 = arith.mulf %1020, %1050 : vector<8x2xf32>
    %1052 = arith.addf %1049, %1051 : vector<8x2xf32>
    %1053 = vector.broadcast %114 : f32 to vector<8x2xf32>
    %1054 = arith.mulf %1022, %1053 : vector<8x2xf32>
    %1055 = arith.addf %1052, %1054 : vector<8x2xf32>
    %1056 = vector.broadcast %117 : f32 to vector<8x2xf32>
    %1057 = arith.mulf %1024, %1056 : vector<8x2xf32>
    %1058 = arith.addf %1055, %1057 : vector<8x2xf32>
    %1059 = vector.broadcast %120 : f32 to vector<8x2xf32>
    %1060 = arith.mulf %1026, %1059 : vector<8x2xf32>
    %1061 = arith.addf %1058, %1060 : vector<8x2xf32>
    %1062 = vector.broadcast %123 : f32 to vector<8x2xf32>
    %1063 = arith.addf %1061, %1062 : vector<8x2xf32>
    %1064 = vector.broadcast %88 : f32 to vector<8x2xf32>
    %1065 = arith.mulf %1004, %1064 : vector<8x2xf32>
    %1066 = vector.broadcast %91 : f32 to vector<8x2xf32>
    %1067 = arith.mulf %1006, %1066 : vector<8x2xf32>
    %1068 = arith.addf %1065, %1067 : vector<8x2xf32>
    %1069 = vector.broadcast %94 : f32 to vector<8x2xf32>
    %1070 = arith.mulf %1008, %1069 : vector<8x2xf32>
    %1071 = arith.addf %1068, %1070 : vector<8x2xf32>
    %1072 = vector.broadcast %97 : f32 to vector<8x2xf32>
    %1073 = arith.mulf %1010, %1072 : vector<8x2xf32>
    %1074 = arith.addf %1071, %1073 : vector<8x2xf32>
    %1075 = vector.broadcast %100 : f32 to vector<8x2xf32>
    %1076 = arith.mulf %1012, %1075 : vector<8x2xf32>
    %1077 = arith.addf %1074, %1076 : vector<8x2xf32>
    %1078 = vector.broadcast %103 : f32 to vector<8x2xf32>
    %1079 = arith.mulf %1014, %1078 : vector<8x2xf32>
    %1080 = arith.addf %1077, %1079 : vector<8x2xf32>
    %1081 = vector.broadcast %106 : f32 to vector<8x2xf32>
    %1082 = arith.mulf %1016, %1081 : vector<8x2xf32>
    %1083 = arith.addf %1080, %1082 : vector<8x2xf32>
    %1084 = vector.broadcast %109 : f32 to vector<8x2xf32>
    %1085 = arith.mulf %1018, %1084 : vector<8x2xf32>
    %1086 = arith.addf %1083, %1085 : vector<8x2xf32>
    %1087 = vector.broadcast %112 : f32 to vector<8x2xf32>
    %1088 = arith.mulf %1020, %1087 : vector<8x2xf32>
    %1089 = arith.addf %1086, %1088 : vector<8x2xf32>
    %1090 = vector.broadcast %115 : f32 to vector<8x2xf32>
    %1091 = arith.mulf %1022, %1090 : vector<8x2xf32>
    %1092 = arith.addf %1089, %1091 : vector<8x2xf32>
    %1093 = vector.broadcast %118 : f32 to vector<8x2xf32>
    %1094 = arith.mulf %1024, %1093 : vector<8x2xf32>
    %1095 = arith.addf %1092, %1094 : vector<8x2xf32>
    %1096 = vector.broadcast %121 : f32 to vector<8x2xf32>
    %1097 = arith.mulf %1026, %1096 : vector<8x2xf32>
    %1098 = arith.addf %1095, %1097 : vector<8x2xf32>
    %1099 = vector.broadcast %124 : f32 to vector<8x2xf32>
    %1100 = arith.addf %1098, %1099 : vector<8x2xf32>
    %1101 = vector.broadcast %89 : f32 to vector<8x2xf32>
    %1102 = arith.mulf %1004, %1101 : vector<8x2xf32>
    %1103 = vector.broadcast %92 : f32 to vector<8x2xf32>
    %1104 = arith.mulf %1006, %1103 : vector<8x2xf32>
    %1105 = arith.addf %1102, %1104 : vector<8x2xf32>
    %1106 = vector.broadcast %95 : f32 to vector<8x2xf32>
    %1107 = arith.mulf %1008, %1106 : vector<8x2xf32>
    %1108 = arith.addf %1105, %1107 : vector<8x2xf32>
    %1109 = vector.broadcast %98 : f32 to vector<8x2xf32>
    %1110 = arith.mulf %1010, %1109 : vector<8x2xf32>
    %1111 = arith.addf %1108, %1110 : vector<8x2xf32>
    %1112 = vector.broadcast %101 : f32 to vector<8x2xf32>
    %1113 = arith.mulf %1012, %1112 : vector<8x2xf32>
    %1114 = arith.addf %1111, %1113 : vector<8x2xf32>
    %1115 = vector.broadcast %104 : f32 to vector<8x2xf32>
    %1116 = arith.mulf %1014, %1115 : vector<8x2xf32>
    %1117 = arith.addf %1114, %1116 : vector<8x2xf32>
    %1118 = vector.broadcast %107 : f32 to vector<8x2xf32>
    %1119 = arith.mulf %1016, %1118 : vector<8x2xf32>
    %1120 = arith.addf %1117, %1119 : vector<8x2xf32>
    %1121 = vector.broadcast %110 : f32 to vector<8x2xf32>
    %1122 = arith.mulf %1018, %1121 : vector<8x2xf32>
    %1123 = arith.addf %1120, %1122 : vector<8x2xf32>
    %1124 = vector.broadcast %113 : f32 to vector<8x2xf32>
    %1125 = arith.mulf %1020, %1124 : vector<8x2xf32>
    %1126 = arith.addf %1123, %1125 : vector<8x2xf32>
    %1127 = vector.broadcast %116 : f32 to vector<8x2xf32>
    %1128 = arith.mulf %1022, %1127 : vector<8x2xf32>
    %1129 = arith.addf %1126, %1128 : vector<8x2xf32>
    %1130 = vector.broadcast %119 : f32 to vector<8x2xf32>
    %1131 = arith.mulf %1024, %1130 : vector<8x2xf32>
    %1132 = arith.addf %1129, %1131 : vector<8x2xf32>
    %1133 = vector.broadcast %122 : f32 to vector<8x2xf32>
    %1134 = arith.mulf %1026, %1133 : vector<8x2xf32>
    %1135 = arith.addf %1132, %1134 : vector<8x2xf32>
    %1136 = vector.broadcast %125 : f32 to vector<8x2xf32>
    %1137 = arith.addf %1135, %1136 : vector<8x2xf32>
    %1138 = arith.addf %878, %1063 : vector<8x2xf32>
    %1139 = arith.addf %880, %1100 : vector<8x2xf32>
    %1140 = arith.addf %882, %1137 : vector<8x2xf32>
    %1141 = arith.addf %1138, %1139 : vector<8x2xf32>
    %1142 = arith.addf %1141, %1140 : vector<8x2xf32>
    %cst_157 = arith.constant 0.333333343 : f32
    %1143 = vector.broadcast %cst_157 : f32 to vector<8x2xf32>
    %1144 = arith.mulf %1142, %1143 : vector<8x2xf32>
    %1145 = arith.subf %1138, %1144 : vector<8x2xf32>
    %1146 = arith.subf %1139, %1144 : vector<8x2xf32>
    %1147 = arith.subf %1140, %1144 : vector<8x2xf32>
    %1148 = arith.mulf %1145, %1145 : vector<8x2xf32>
    %1149 = arith.mulf %1146, %1146 : vector<8x2xf32>
    %1150 = arith.addf %1148, %1149 : vector<8x2xf32>
    %1151 = arith.mulf %1147, %1147 : vector<8x2xf32>
    %1152 = arith.addf %1150, %1151 : vector<8x2xf32>
    %cst_158 = arith.constant 0.333333343 : f32
    %1153 = vector.broadcast %cst_158 : f32 to vector<8x2xf32>
    %1154 = arith.mulf %1152, %1153 : vector<8x2xf32>
    %cst_159 = arith.constant 9.99999974E-6 : f32
    %1155 = vector.broadcast %cst_159 : f32 to vector<8x2xf32>
    %1156 = arith.addf %1154, %1155 : vector<8x2xf32>
    %1157 = math.rsqrt %1156 : vector<8x2xf32>
    %1158 = arith.mulf %1145, %1157 : vector<8x2xf32>
    %1159 = vector.broadcast %126 : f32 to vector<8x2xf32>
    %1160 = arith.mulf %1158, %1159 : vector<8x2xf32>
    %1161 = vector.broadcast %129 : f32 to vector<8x2xf32>
    %1162 = arith.addf %1160, %1161 : vector<8x2xf32>
    %1163 = arith.mulf %1146, %1157 : vector<8x2xf32>
    %1164 = vector.broadcast %127 : f32 to vector<8x2xf32>
    %1165 = arith.mulf %1163, %1164 : vector<8x2xf32>
    %1166 = vector.broadcast %130 : f32 to vector<8x2xf32>
    %1167 = arith.addf %1165, %1166 : vector<8x2xf32>
    %1168 = arith.mulf %1147, %1157 : vector<8x2xf32>
    %1169 = vector.broadcast %128 : f32 to vector<8x2xf32>
    %1170 = arith.mulf %1168, %1169 : vector<8x2xf32>
    %1171 = vector.broadcast %131 : f32 to vector<8x2xf32>
    %1172 = arith.addf %1170, %1171 : vector<8x2xf32>
    %1173 = vector.broadcast %0 : f32 to vector<8x2xf32>
    %1174 = arith.mulf %1162, %1173 : vector<8x2xf32>
    %1175 = vector.broadcast %3 : f32 to vector<8x2xf32>
    %1176 = arith.mulf %1167, %1175 : vector<8x2xf32>
    %1177 = arith.addf %1174, %1176 : vector<8x2xf32>
    %1178 = vector.broadcast %6 : f32 to vector<8x2xf32>
    %1179 = arith.mulf %1172, %1178 : vector<8x2xf32>
    %1180 = arith.addf %1177, %1179 : vector<8x2xf32>
    %1181 = vector.broadcast %1 : f32 to vector<8x2xf32>
    %1182 = arith.mulf %1162, %1181 : vector<8x2xf32>
    %1183 = vector.broadcast %4 : f32 to vector<8x2xf32>
    %1184 = arith.mulf %1167, %1183 : vector<8x2xf32>
    %1185 = arith.addf %1182, %1184 : vector<8x2xf32>
    %1186 = vector.broadcast %7 : f32 to vector<8x2xf32>
    %1187 = arith.mulf %1172, %1186 : vector<8x2xf32>
    %1188 = arith.addf %1185, %1187 : vector<8x2xf32>
    %1189 = vector.broadcast %2 : f32 to vector<8x2xf32>
    %1190 = arith.mulf %1162, %1189 : vector<8x2xf32>
    %1191 = vector.broadcast %5 : f32 to vector<8x2xf32>
    %1192 = arith.mulf %1167, %1191 : vector<8x2xf32>
    %1193 = arith.addf %1190, %1192 : vector<8x2xf32>
    %1194 = vector.broadcast %8 : f32 to vector<8x2xf32>
    %1195 = arith.mulf %1172, %1194 : vector<8x2xf32>
    %1196 = arith.addf %1193, %1195 : vector<8x2xf32>
    %1197 = vector.broadcast %9 : f32 to vector<8x2xf32>
    %1198 = arith.mulf %1162, %1197 : vector<8x2xf32>
    %1199 = vector.broadcast %12 : f32 to vector<8x2xf32>
    %1200 = arith.mulf %1167, %1199 : vector<8x2xf32>
    %1201 = arith.addf %1198, %1200 : vector<8x2xf32>
    %1202 = vector.broadcast %15 : f32 to vector<8x2xf32>
    %1203 = arith.mulf %1172, %1202 : vector<8x2xf32>
    %1204 = arith.addf %1201, %1203 : vector<8x2xf32>
    %1205 = vector.broadcast %10 : f32 to vector<8x2xf32>
    %1206 = arith.mulf %1162, %1205 : vector<8x2xf32>
    %1207 = vector.broadcast %13 : f32 to vector<8x2xf32>
    %1208 = arith.mulf %1167, %1207 : vector<8x2xf32>
    %1209 = arith.addf %1206, %1208 : vector<8x2xf32>
    %1210 = vector.broadcast %16 : f32 to vector<8x2xf32>
    %1211 = arith.mulf %1172, %1210 : vector<8x2xf32>
    %1212 = arith.addf %1209, %1211 : vector<8x2xf32>
    %1213 = vector.broadcast %11 : f32 to vector<8x2xf32>
    %1214 = arith.mulf %1162, %1213 : vector<8x2xf32>
    %1215 = vector.broadcast %14 : f32 to vector<8x2xf32>
    %1216 = arith.mulf %1167, %1215 : vector<8x2xf32>
    %1217 = arith.addf %1214, %1216 : vector<8x2xf32>
    %1218 = vector.broadcast %17 : f32 to vector<8x2xf32>
    %1219 = arith.mulf %1172, %1218 : vector<8x2xf32>
    %1220 = arith.addf %1217, %1219 : vector<8x2xf32>
    %1221 = vector.broadcast %18 : f32 to vector<8x2xf32>
    %1222 = arith.mulf %1162, %1221 : vector<8x2xf32>
    %1223 = vector.broadcast %21 : f32 to vector<8x2xf32>
    %1224 = arith.mulf %1167, %1223 : vector<8x2xf32>
    %1225 = arith.addf %1222, %1224 : vector<8x2xf32>
    %1226 = vector.broadcast %24 : f32 to vector<8x2xf32>
    %1227 = arith.mulf %1172, %1226 : vector<8x2xf32>
    %1228 = arith.addf %1225, %1227 : vector<8x2xf32>
    %1229 = vector.broadcast %19 : f32 to vector<8x2xf32>
    %1230 = arith.mulf %1162, %1229 : vector<8x2xf32>
    %1231 = vector.broadcast %22 : f32 to vector<8x2xf32>
    %1232 = arith.mulf %1167, %1231 : vector<8x2xf32>
    %1233 = arith.addf %1230, %1232 : vector<8x2xf32>
    %1234 = vector.broadcast %25 : f32 to vector<8x2xf32>
    %1235 = arith.mulf %1172, %1234 : vector<8x2xf32>
    %1236 = arith.addf %1233, %1235 : vector<8x2xf32>
    %1237 = vector.broadcast %20 : f32 to vector<8x2xf32>
    %1238 = arith.mulf %1162, %1237 : vector<8x2xf32>
    %1239 = vector.broadcast %23 : f32 to vector<8x2xf32>
    %1240 = arith.mulf %1167, %1239 : vector<8x2xf32>
    %1241 = arith.addf %1238, %1240 : vector<8x2xf32>
    %1242 = vector.broadcast %26 : f32 to vector<8x2xf32>
    %1243 = arith.mulf %1172, %1242 : vector<8x2xf32>
    %1244 = arith.addf %1241, %1243 : vector<8x2xf32>
    %1245 = vector.extract_strided_slice %1204 {offsets = [0, 0], sizes = [1, 2], strides = [1, 1]} : vector<8x2xf32> to vector<1x2xf32>
    %1246 = vector.extract_strided_slice %1180 {offsets = [0, 0], sizes = [1, 2], strides = [1, 1]} : vector<8x2xf32> to vector<1x2xf32>
    %1247 = arith.mulf %1245, %1246 : vector<1x2xf32>
    %1248 = vector.extract_strided_slice %1212 {offsets = [0, 0], sizes = [1, 2], strides = [1, 1]} : vector<8x2xf32> to vector<1x2xf32>
    %1249 = vector.extract_strided_slice %1188 {offsets = [0, 0], sizes = [1, 2], strides = [1, 1]} : vector<8x2xf32> to vector<1x2xf32>
    %1250 = arith.mulf %1248, %1249 : vector<1x2xf32>
    %1251 = arith.addf %1247, %1250 : vector<1x2xf32>
    %1252 = vector.extract_strided_slice %1220 {offsets = [0, 0], sizes = [1, 2], strides = [1, 1]} : vector<8x2xf32> to vector<1x2xf32>
    %1253 = vector.extract_strided_slice %1196 {offsets = [0, 0], sizes = [1, 2], strides = [1, 1]} : vector<8x2xf32> to vector<1x2xf32>
    %1254 = arith.mulf %1252, %1253 : vector<1x2xf32>
    %1255 = arith.addf %1251, %1254 : vector<1x2xf32>
    %cst_160 = arith.constant 0.577350259 : f32
    %1256 = vector.broadcast %cst_160 : f32 to vector<1x2xf32>
    %1257 = arith.mulf %1255, %1256 : vector<1x2xf32>
    %cst_161 = arith.constant dense<0xFF800000> : vector<2xf32>
    %1258 = vector.multi_reduction <maximumf>, %1257, %cst_161 [0] : vector<1x2xf32> to vector<2xf32>
    %1259 = vector.shape_cast %1258 : vector<2xf32> to vector<1x2xf32>
    %1260 = arith.subf %1257, %1259 : vector<1x2xf32>
    %1261 = math.exp %1260 : vector<1x2xf32>
    %cst_162 = arith.constant dense<0.000000e+00> : vector<2xf32>
    %1262 = vector.multi_reduction <add>, %1261, %cst_162 [0] : vector<1x2xf32> to vector<2xf32>
    %1263 = vector.shape_cast %1262 : vector<2xf32> to vector<1x2xf32>
    %cst_163 = arith.constant 1.000000e+00 : f32
    %1264 = vector.broadcast %cst_163 : f32 to vector<1x2xf32>
    %1265 = arith.divf %1264, %1263 : vector<1x2xf32>
    %1266 = arith.mulf %1261, %1265 : vector<1x2xf32>
    %1267 = vector.extract_strided_slice %1228 {offsets = [0, 0], sizes = [1, 2], strides = [1, 1]} : vector<8x2xf32> to vector<1x2xf32>
    %1268 = arith.mulf %1266, %1267 : vector<1x2xf32>
    %cst_164 = arith.constant dense<0.000000e+00> : vector<2xf32>
    %1269 = vector.multi_reduction <add>, %1268, %cst_164 [0] : vector<1x2xf32> to vector<2xf32>
    %1270 = vector.shape_cast %1269 : vector<2xf32> to vector<1x2xf32>
    %1271 = vector.extract_strided_slice %1236 {offsets = [0, 0], sizes = [1, 2], strides = [1, 1]} : vector<8x2xf32> to vector<1x2xf32>
    %1272 = arith.mulf %1266, %1271 : vector<1x2xf32>
    %cst_165 = arith.constant dense<0.000000e+00> : vector<2xf32>
    %1273 = vector.multi_reduction <add>, %1272, %cst_165 [0] : vector<1x2xf32> to vector<2xf32>
    %1274 = vector.shape_cast %1273 : vector<2xf32> to vector<1x2xf32>
    %1275 = vector.extract_strided_slice %1244 {offsets = [0, 0], sizes = [1, 2], strides = [1, 1]} : vector<8x2xf32> to vector<1x2xf32>
    %1276 = arith.mulf %1266, %1275 : vector<1x2xf32>
    %cst_166 = arith.constant dense<0.000000e+00> : vector<2xf32>
    %1277 = vector.multi_reduction <add>, %1276, %cst_166 [0] : vector<1x2xf32> to vector<2xf32>
    %1278 = vector.shape_cast %1277 : vector<2xf32> to vector<1x2xf32>
    %1279 = vector.broadcast %27 : f32 to vector<1x2xf32>
    %1280 = arith.mulf %1270, %1279 : vector<1x2xf32>
    %1281 = vector.broadcast %30 : f32 to vector<1x2xf32>
    %1282 = arith.mulf %1274, %1281 : vector<1x2xf32>
    %1283 = arith.addf %1280, %1282 : vector<1x2xf32>
    %1284 = vector.broadcast %33 : f32 to vector<1x2xf32>
    %1285 = arith.mulf %1278, %1284 : vector<1x2xf32>
    %1286 = arith.addf %1283, %1285 : vector<1x2xf32>
    %1287 = vector.broadcast %36 : f32 to vector<1x2xf32>
    %1288 = arith.addf %1286, %1287 : vector<1x2xf32>
    %1289 = vector.extract_strided_slice %1138 {offsets = [0, 0], sizes = [1, 2], strides = [1, 1]} : vector<8x2xf32> to vector<1x2xf32>
    %1290 = arith.addf %1289, %1288 : vector<1x2xf32>
    %c0_167 = arith.constant 0 : index
    %c0_168 = arith.constant 0 : index
    %c0_169 = arith.constant 0 : index
    %1291 = vector.load %arg4[%c0_167, %c0_168, %c0_169] : memref<3x8x2xf32, #tpu.memory_space<vmem>>, vector<1x1x2xf32>
    %1292 = vector.shape_cast %1291 : vector<1x1x2xf32> to vector<1x2xf32>
    %1293 = vector.shape_cast %1290 : vector<1x2xf32> to vector<1x1x2xf32>
    tpu.vector_store %arg4[%c0_167, %c0_168, %c0_169], %1293 {strides = array<i32>} : memref<3x8x2xf32, #tpu.memory_space<vmem>>, vector<1x1x2xf32>,
    %1294 = vector.broadcast %28 : f32 to vector<1x2xf32>
    %1295 = arith.mulf %1270, %1294 : vector<1x2xf32>
    %1296 = vector.broadcast %31 : f32 to vector<1x2xf32>
    %1297 = arith.mulf %1274, %1296 : vector<1x2xf32>
    %1298 = arith.addf %1295, %1297 : vector<1x2xf32>
    %1299 = vector.broadcast %34 : f32 to vector<1x2xf32>
    %1300 = arith.mulf %1278, %1299 : vector<1x2xf32>
    %1301 = arith.addf %1298, %1300 : vector<1x2xf32>
    %1302 = vector.broadcast %37 : f32 to vector<1x2xf32>
    %1303 = arith.addf %1301, %1302 : vector<1x2xf32>
    %1304 = vector.extract_strided_slice %1139 {offsets = [0, 0], sizes = [1, 2], strides = [1, 1]} : vector<8x2xf32> to vector<1x2xf32>
    %1305 = arith.addf %1304, %1303 : vector<1x2xf32>
    %c1_170 = arith.constant 1 : index
    %c0_171 = arith.constant 0 : index
    %c0_172 = arith.constant 0 : index
    %1306 = vector.load %arg4[%c1_170, %c0_171, %c0_172] : memref<3x8x2xf32, #tpu.memory_space<vmem>>, vector<1x1x2xf32>
    %1307 = vector.shape_cast %1306 : vector<1x1x2xf32> to vector<1x2xf32>
    %1308 = vector.shape_cast %1305 : vector<1x2xf32> to vector<1x1x2xf32>
    tpu.vector_store %arg4[%c1_170, %c0_171, %c0_172], %1308 {strides = array<i32>} : memref<3x8x2xf32, #tpu.memory_space<vmem>>, vector<1x1x2xf32>,
    %1309 = vector.broadcast %29 : f32 to vector<1x2xf32>
    %1310 = arith.mulf %1270, %1309 : vector<1x2xf32>
    %1311 = vector.broadcast %32 : f32 to vector<1x2xf32>
    %1312 = arith.mulf %1274, %1311 : vector<1x2xf32>
    %1313 = arith.addf %1310, %1312 : vector<1x2xf32>
    %1314 = vector.broadcast %35 : f32 to vector<1x2xf32>
    %1315 = arith.mulf %1278, %1314 : vector<1x2xf32>
    %1316 = arith.addf %1313, %1315 : vector<1x2xf32>
    %1317 = vector.broadcast %38 : f32 to vector<1x2xf32>
    %1318 = arith.addf %1316, %1317 : vector<1x2xf32>
    %1319 = vector.extract_strided_slice %1140 {offsets = [0, 0], sizes = [1, 2], strides = [1, 1]} : vector<8x2xf32> to vector<1x2xf32>
    %1320 = arith.addf %1319, %1318 : vector<1x2xf32>
    %c2_173 = arith.constant 2 : index
    %c0_174 = arith.constant 0 : index
    %c0_175 = arith.constant 0 : index
    %1321 = vector.load %arg4[%c2_173, %c0_174, %c0_175] : memref<3x8x2xf32, #tpu.memory_space<vmem>>, vector<1x1x2xf32>
    %1322 = vector.shape_cast %1321 : vector<1x1x2xf32> to vector<1x2xf32>
    %1323 = vector.shape_cast %1320 : vector<1x2xf32> to vector<1x1x2xf32>
    tpu.vector_store %arg4[%c2_173, %c0_174, %c0_175], %1323 {strides = array<i32>} : memref<3x8x2xf32, #tpu.memory_space<vmem>>, vector<1x1x2xf32>,
    %1324 = vector.extract_strided_slice %1204 {offsets = [1, 0], sizes = [1, 2], strides = [1, 1]} : vector<8x2xf32> to vector<1x2xf32>
    %1325 = vector.extract_strided_slice %1180 {offsets = [0, 0], sizes = [2, 2], strides = [1, 1]} : vector<8x2xf32> to vector<2x2xf32>
    %1326 = vector.broadcast %1324 : vector<1x2xf32> to vector<2x2xf32>
    %1327 = arith.mulf %1326, %1325 : vector<2x2xf32>
    %1328 = vector.extract_strided_slice %1212 {offsets = [1, 0], sizes = [1, 2], strides = [1, 1]} : vector<8x2xf32> to vector<1x2xf32>
    %1329 = vector.extract_strided_slice %1188 {offsets = [0, 0], sizes = [2, 2], strides = [1, 1]} : vector<8x2xf32> to vector<2x2xf32>
    %1330 = vector.broadcast %1328 : vector<1x2xf32> to vector<2x2xf32>
    %1331 = arith.mulf %1330, %1329 : vector<2x2xf32>
    %1332 = arith.addf %1327, %1331 : vector<2x2xf32>
    %1333 = vector.extract_strided_slice %1220 {offsets = [1, 0], sizes = [1, 2], strides = [1, 1]} : vector<8x2xf32> to vector<1x2xf32>
    %1334 = vector.extract_strided_slice %1196 {offsets = [0, 0], sizes = [2, 2], strides = [1, 1]} : vector<8x2xf32> to vector<2x2xf32>
    %1335 = vector.broadcast %1333 : vector<1x2xf32> to vector<2x2xf32>
    %1336 = arith.mulf %1335, %1334 : vector<2x2xf32>
    %1337 = arith.addf %1332, %1336 : vector<2x2xf32>
    %cst_176 = arith.constant 0.577350259 : f32
    %1338 = vector.broadcast %cst_176 : f32 to vector<2x2xf32>
    %1339 = arith.mulf %1337, %1338 : vector<2x2xf32>
    %cst_177 = arith.constant dense<0xFF800000> : vector<2xf32>
    %1340 = vector.multi_reduction <maximumf>, %1339, %cst_177 [0] : vector<2x2xf32> to vector<2xf32>
    %1341 = vector.shape_cast %1340 : vector<2xf32> to vector<1x2xf32>
    %1342 = vector.broadcast %1341 : vector<1x2xf32> to vector<2x2xf32>
    %1343 = arith.subf %1339, %1342 : vector<2x2xf32>
    %1344 = math.exp %1343 : vector<2x2xf32>
    %cst_178 = arith.constant dense<0.000000e+00> : vector<2xf32>
    %1345 = vector.multi_reduction <add>, %1344, %cst_178 [0] : vector<2x2xf32> to vector<2xf32>
    %1346 = vector.shape_cast %1345 : vector<2xf32> to vector<1x2xf32>
    %cst_179 = arith.constant 1.000000e+00 : f32
    %1347 = vector.broadcast %cst_179 : f32 to vector<1x2xf32>
    %1348 = arith.divf %1347, %1346 : vector<1x2xf32>
    %1349 = vector.broadcast %1348 : vector<1x2xf32> to vector<2x2xf32>
    %1350 = arith.mulf %1344, %1349 : vector<2x2xf32>
    %1351 = vector.extract_strided_slice %1228 {offsets = [0, 0], sizes = [2, 2], strides = [1, 1]} : vector<8x2xf32> to vector<2x2xf32>
    %1352 = arith.mulf %1350, %1351 : vector<2x2xf32>
    %cst_180 = arith.constant dense<0.000000e+00> : vector<2xf32>
    %1353 = vector.multi_reduction <add>, %1352, %cst_180 [0] : vector<2x2xf32> to vector<2xf32>
    %1354 = vector.shape_cast %1353 : vector<2xf32> to vector<1x2xf32>
    %1355 = vector.extract_strided_slice %1236 {offsets = [0, 0], sizes = [2, 2], strides = [1, 1]} : vector<8x2xf32> to vector<2x2xf32>
    %1356 = arith.mulf %1350, %1355 : vector<2x2xf32>
    %cst_181 = arith.constant dense<0.000000e+00> : vector<2xf32>
    %1357 = vector.multi_reduction <add>, %1356, %cst_181 [0] : vector<2x2xf32> to vector<2xf32>
    %1358 = vector.shape_cast %1357 : vector<2xf32> to vector<1x2xf32>
    %1359 = vector.extract_strided_slice %1244 {offsets = [0, 0], sizes = [2, 2], strides = [1, 1]} : vector<8x2xf32> to vector<2x2xf32>
    %1360 = arith.mulf %1350, %1359 : vector<2x2xf32>
    %cst_182 = arith.constant dense<0.000000e+00> : vector<2xf32>
    %1361 = vector.multi_reduction <add>, %1360, %cst_182 [0] : vector<2x2xf32> to vector<2xf32>
    %1362 = vector.shape_cast %1361 : vector<2xf32> to vector<1x2xf32>
    %1363 = vector.broadcast %27 : f32 to vector<1x2xf32>
    %1364 = arith.mulf %1354, %1363 : vector<1x2xf32>
    %1365 = vector.broadcast %30 : f32 to vector<1x2xf32>
    %1366 = arith.mulf %1358, %1365 : vector<1x2xf32>
    %1367 = arith.addf %1364, %1366 : vector<1x2xf32>
    %1368 = vector.broadcast %33 : f32 to vector<1x2xf32>
    %1369 = arith.mulf %1362, %1368 : vector<1x2xf32>
    %1370 = arith.addf %1367, %1369 : vector<1x2xf32>
    %1371 = vector.broadcast %36 : f32 to vector<1x2xf32>
    %1372 = arith.addf %1370, %1371 : vector<1x2xf32>
    %1373 = vector.extract_strided_slice %1138 {offsets = [1, 0], sizes = [1, 2], strides = [1, 1]} : vector<8x2xf32> to vector<1x2xf32>
    %1374 = arith.addf %1373, %1372 : vector<1x2xf32>
    %c0_183 = arith.constant 0 : index
    %c1_184 = arith.constant 1 : index
    %c0_185 = arith.constant 0 : index
    %1375 = vector.load %arg4[%c0_183, %c1_184, %c0_185] : memref<3x8x2xf32, #tpu.memory_space<vmem>>, vector<1x1x2xf32>
    %1376 = vector.shape_cast %1375 : vector<1x1x2xf32> to vector<1x2xf32>
    %1377 = vector.shape_cast %1374 : vector<1x2xf32> to vector<1x1x2xf32>
    tpu.vector_store %arg4[%c0_183, %c1_184, %c0_185], %1377 {strides = array<i32>} : memref<3x8x2xf32, #tpu.memory_space<vmem>>, vector<1x1x2xf32>,
    %1378 = vector.broadcast %28 : f32 to vector<1x2xf32>
    %1379 = arith.mulf %1354, %1378 : vector<1x2xf32>
    %1380 = vector.broadcast %31 : f32 to vector<1x2xf32>
    %1381 = arith.mulf %1358, %1380 : vector<1x2xf32>
    %1382 = arith.addf %1379, %1381 : vector<1x2xf32>
    %1383 = vector.broadcast %34 : f32 to vector<1x2xf32>
    %1384 = arith.mulf %1362, %1383 : vector<1x2xf32>
    %1385 = arith.addf %1382, %1384 : vector<1x2xf32>
    %1386 = vector.broadcast %37 : f32 to vector<1x2xf32>
    %1387 = arith.addf %1385, %1386 : vector<1x2xf32>
    %1388 = vector.extract_strided_slice %1139 {offsets = [1, 0], sizes = [1, 2], strides = [1, 1]} : vector<8x2xf32> to vector<1x2xf32>
    %1389 = arith.addf %1388, %1387 : vector<1x2xf32>
    %c1_186 = arith.constant 1 : index
    %c1_187 = arith.constant 1 : index
    %c0_188 = arith.constant 0 : index
    %1390 = vector.load %arg4[%c1_186, %c1_187, %c0_188] : memref<3x8x2xf32, #tpu.memory_space<vmem>>, vector<1x1x2xf32>
    %1391 = vector.shape_cast %1390 : vector<1x1x2xf32> to vector<1x2xf32>
    %1392 = vector.shape_cast %1389 : vector<1x2xf32> to vector<1x1x2xf32>
    tpu.vector_store %arg4[%c1_186, %c1_187, %c0_188], %1392 {strides = array<i32>} : memref<3x8x2xf32, #tpu.memory_space<vmem>>, vector<1x1x2xf32>,
    %1393 = vector.broadcast %29 : f32 to vector<1x2xf32>
    %1394 = arith.mulf %1354, %1393 : vector<1x2xf32>
    %1395 = vector.broadcast %32 : f32 to vector<1x2xf32>
    %1396 = arith.mulf %1358, %1395 : vector<1x2xf32>
    %1397 = arith.addf %1394, %1396 : vector<1x2xf32>
    %1398 = vector.broadcast %35 : f32 to vector<1x2xf32>
    %1399 = arith.mulf %1362, %1398 : vector<1x2xf32>
    %1400 = arith.addf %1397, %1399 : vector<1x2xf32>
    %1401 = vector.broadcast %38 : f32 to vector<1x2xf32>
    %1402 = arith.addf %1400, %1401 : vector<1x2xf32>
    %1403 = vector.extract_strided_slice %1140 {offsets = [1, 0], sizes = [1, 2], strides = [1, 1]} : vector<8x2xf32> to vector<1x2xf32>
    %1404 = arith.addf %1403, %1402 : vector<1x2xf32>
    %c2_189 = arith.constant 2 : index
    %c1_190 = arith.constant 1 : index
    %c0_191 = arith.constant 0 : index
    %1405 = vector.load %arg4[%c2_189, %c1_190, %c0_191] : memref<3x8x2xf32, #tpu.memory_space<vmem>>, vector<1x1x2xf32>
    %1406 = vector.shape_cast %1405 : vector<1x1x2xf32> to vector<1x2xf32>
    %1407 = vector.shape_cast %1404 : vector<1x2xf32> to vector<1x1x2xf32>
    tpu.vector_store %arg4[%c2_189, %c1_190, %c0_191], %1407 {strides = array<i32>} : memref<3x8x2xf32, #tpu.memory_space<vmem>>, vector<1x1x2xf32>,
    %1408 = vector.extract_strided_slice %1204 {offsets = [2, 0], sizes = [1, 2], strides = [1, 1]} : vector<8x2xf32> to vector<1x2xf32>
    %1409 = vector.extract_strided_slice %1180 {offsets = [0, 0], sizes = [3, 2], strides = [1, 1]} : vector<8x2xf32> to vector<3x2xf32>
    %1410 = vector.broadcast %1408 : vector<1x2xf32> to vector<3x2xf32>
    %1411 = arith.mulf %1410, %1409 : vector<3x2xf32>
    %1412 = vector.extract_strided_slice %1212 {offsets = [2, 0], sizes = [1, 2], strides = [1, 1]} : vector<8x2xf32> to vector<1x2xf32>
    %1413 = vector.extract_strided_slice %1188 {offsets = [0, 0], sizes = [3, 2], strides = [1, 1]} : vector<8x2xf32> to vector<3x2xf32>
    %1414 = vector.broadcast %1412 : vector<1x2xf32> to vector<3x2xf32>
    %1415 = arith.mulf %1414, %1413 : vector<3x2xf32>
    %1416 = arith.addf %1411, %1415 : vector<3x2xf32>
    %1417 = vector.extract_strided_slice %1220 {offsets = [2, 0], sizes = [1, 2], strides = [1, 1]} : vector<8x2xf32> to vector<1x2xf32>
    %1418 = vector.extract_strided_slice %1196 {offsets = [0, 0], sizes = [3, 2], strides = [1, 1]} : vector<8x2xf32> to vector<3x2xf32>
    %1419 = vector.broadcast %1417 : vector<1x2xf32> to vector<3x2xf32>
    %1420 = arith.mulf %1419, %1418 : vector<3x2xf32>
    %1421 = arith.addf %1416, %1420 : vector<3x2xf32>
    %cst_192 = arith.constant 0.577350259 : f32
    %1422 = vector.broadcast %cst_192 : f32 to vector<3x2xf32>
    %1423 = arith.mulf %1421, %1422 : vector<3x2xf32>
    %cst_193 = arith.constant dense<0xFF800000> : vector<2xf32>
    %1424 = vector.multi_reduction <maximumf>, %1423, %cst_193 [0] : vector<3x2xf32> to vector<2xf32>
    %1425 = vector.shape_cast %1424 : vector<2xf32> to vector<1x2xf32>
    %1426 = vector.broadcast %1425 : vector<1x2xf32> to vector<3x2xf32>
    %1427 = arith.subf %1423, %1426 : vector<3x2xf32>
    %1428 = math.exp %1427 : vector<3x2xf32>
    %cst_194 = arith.constant dense<0.000000e+00> : vector<2xf32>
    %1429 = vector.multi_reduction <add>, %1428, %cst_194 [0] : vector<3x2xf32> to vector<2xf32>
    %1430 = vector.shape_cast %1429 : vector<2xf32> to vector<1x2xf32>
    %cst_195 = arith.constant 1.000000e+00 : f32
    %1431 = vector.broadcast %cst_195 : f32 to vector<1x2xf32>
    %1432 = arith.divf %1431, %1430 : vector<1x2xf32>
    %1433 = vector.broadcast %1432 : vector<1x2xf32> to vector<3x2xf32>
    %1434 = arith.mulf %1428, %1433 : vector<3x2xf32>
    %1435 = vector.extract_strided_slice %1228 {offsets = [0, 0], sizes = [3, 2], strides = [1, 1]} : vector<8x2xf32> to vector<3x2xf32>
    %1436 = arith.mulf %1434, %1435 : vector<3x2xf32>
    %cst_196 = arith.constant dense<0.000000e+00> : vector<2xf32>
    %1437 = vector.multi_reduction <add>, %1436, %cst_196 [0] : vector<3x2xf32> to vector<2xf32>
    %1438 = vector.shape_cast %1437 : vector<2xf32> to vector<1x2xf32>
    %1439 = vector.extract_strided_slice %1236 {offsets = [0, 0], sizes = [3, 2], strides = [1, 1]} : vector<8x2xf32> to vector<3x2xf32>
    %1440 = arith.mulf %1434, %1439 : vector<3x2xf32>
    %cst_197 = arith.constant dense<0.000000e+00> : vector<2xf32>
    %1441 = vector.multi_reduction <add>, %1440, %cst_197 [0] : vector<3x2xf32> to vector<2xf32>
    %1442 = vector.shape_cast %1441 : vector<2xf32> to vector<1x2xf32>
    %1443 = vector.extract_strided_slice %1244 {offsets = [0, 0], sizes = [3, 2], strides = [1, 1]} : vector<8x2xf32> to vector<3x2xf32>
    %1444 = arith.mulf %1434, %1443 : vector<3x2xf32>
    %cst_198 = arith.constant dense<0.000000e+00> : vector<2xf32>
    %1445 = vector.multi_reduction <add>, %1444, %cst_198 [0] : vector<3x2xf32> to vector<2xf32>
    %1446 = vector.shape_cast %1445 : vector<2xf32> to vector<1x2xf32>
    %1447 = vector.broadcast %27 : f32 to vector<1x2xf32>
    %1448 = arith.mulf %1438, %1447 : vector<1x2xf32>
    %1449 = vector.broadcast %30 : f32 to vector<1x2xf32>
    %1450 = arith.mulf %1442, %1449 : vector<1x2xf32>
    %1451 = arith.addf %1448, %1450 : vector<1x2xf32>
    %1452 = vector.broadcast %33 : f32 to vector<1x2xf32>
    %1453 = arith.mulf %1446, %1452 : vector<1x2xf32>
    %1454 = arith.addf %1451, %1453 : vector<1x2xf32>
    %1455 = vector.broadcast %36 : f32 to vector<1x2xf32>
    %1456 = arith.addf %1454, %1455 : vector<1x2xf32>
    %1457 = vector.extract_strided_slice %1138 {offsets = [2, 0], sizes = [1, 2], strides = [1, 1]} : vector<8x2xf32> to vector<1x2xf32>
    %1458 = arith.addf %1457, %1456 : vector<1x2xf32>
    %c0_199 = arith.constant 0 : index
    %c2_200 = arith.constant 2 : index
    %c0_201 = arith.constant 0 : index
    %1459 = vector.load %arg4[%c0_199, %c2_200, %c0_201] : memref<3x8x2xf32, #tpu.memory_space<vmem>>, vector<1x1x2xf32>
    %1460 = vector.shape_cast %1459 : vector<1x1x2xf32> to vector<1x2xf32>
    %1461 = vector.shape_cast %1458 : vector<1x2xf32> to vector<1x1x2xf32>
    tpu.vector_store %arg4[%c0_199, %c2_200, %c0_201], %1461 {strides = array<i32>} : memref<3x8x2xf32, #tpu.memory_space<vmem>>, vector<1x1x2xf32>,
    %1462 = vector.broadcast %28 : f32 to vector<1x2xf32>
    %1463 = arith.mulf %1438, %1462 : vector<1x2xf32>
    %1464 = vector.broadcast %31 : f32 to vector<1x2xf32>
    %1465 = arith.mulf %1442, %1464 : vector<1x2xf32>
    %1466 = arith.addf %1463, %1465 : vector<1x2xf32>
    %1467 = vector.broadcast %34 : f32 to vector<1x2xf32>
    %1468 = arith.mulf %1446, %1467 : vector<1x2xf32>
    %1469 = arith.addf %1466, %1468 : vector<1x2xf32>
    %1470 = vector.broadcast %37 : f32 to vector<1x2xf32>
    %1471 = arith.addf %1469, %1470 : vector<1x2xf32>
    %1472 = vector.extract_strided_slice %1139 {offsets = [2, 0], sizes = [1, 2], strides = [1, 1]} : vector<8x2xf32> to vector<1x2xf32>
    %1473 = arith.addf %1472, %1471 : vector<1x2xf32>
    %c1_202 = arith.constant 1 : index
    %c2_203 = arith.constant 2 : index
    %c0_204 = arith.constant 0 : index
    %1474 = vector.load %arg4[%c1_202, %c2_203, %c0_204] : memref<3x8x2xf32, #tpu.memory_space<vmem>>, vector<1x1x2xf32>
    %1475 = vector.shape_cast %1474 : vector<1x1x2xf32> to vector<1x2xf32>
    %1476 = vector.shape_cast %1473 : vector<1x2xf32> to vector<1x1x2xf32>
    tpu.vector_store %arg4[%c1_202, %c2_203, %c0_204], %1476 {strides = array<i32>} : memref<3x8x2xf32, #tpu.memory_space<vmem>>, vector<1x1x2xf32>,
    %1477 = vector.broadcast %29 : f32 to vector<1x2xf32>
    %1478 = arith.mulf %1438, %1477 : vector<1x2xf32>
    %1479 = vector.broadcast %32 : f32 to vector<1x2xf32>
    %1480 = arith.mulf %1442, %1479 : vector<1x2xf32>
    %1481 = arith.addf %1478, %1480 : vector<1x2xf32>
    %1482 = vector.broadcast %35 : f32 to vector<1x2xf32>
    %1483 = arith.mulf %1446, %1482 : vector<1x2xf32>
    %1484 = arith.addf %1481, %1483 : vector<1x2xf32>
    %1485 = vector.broadcast %38 : f32 to vector<1x2xf32>
    %1486 = arith.addf %1484, %1485 : vector<1x2xf32>
    %1487 = vector.extract_strided_slice %1140 {offsets = [2, 0], sizes = [1, 2], strides = [1, 1]} : vector<8x2xf32> to vector<1x2xf32>
    %1488 = arith.addf %1487, %1486 : vector<1x2xf32>
    %c2_205 = arith.constant 2 : index
    %c2_206 = arith.constant 2 : index
    %c0_207 = arith.constant 0 : index
    %1489 = vector.load %arg4[%c2_205, %c2_206, %c0_207] : memref<3x8x2xf32, #tpu.memory_space<vmem>>, vector<1x1x2xf32>
    %1490 = vector.shape_cast %1489 : vector<1x1x2xf32> to vector<1x2xf32>
    %1491 = vector.shape_cast %1488 : vector<1x2xf32> to vector<1x1x2xf32>
    tpu.vector_store %arg4[%c2_205, %c2_206, %c0_207], %1491 {strides = array<i32>} : memref<3x8x2xf32, #tpu.memory_space<vmem>>, vector<1x1x2xf32>,
    %1492 = vector.extract_strided_slice %1204 {offsets = [3, 0], sizes = [1, 2], strides = [1, 1]} : vector<8x2xf32> to vector<1x2xf32>
    %1493 = vector.extract_strided_slice %1180 {offsets = [0, 0], sizes = [4, 2], strides = [1, 1]} : vector<8x2xf32> to vector<4x2xf32>
    %1494 = vector.broadcast %1492 : vector<1x2xf32> to vector<4x2xf32>
    %1495 = arith.mulf %1494, %1493 : vector<4x2xf32>
    %1496 = vector.extract_strided_slice %1212 {offsets = [3, 0], sizes = [1, 2], strides = [1, 1]} : vector<8x2xf32> to vector<1x2xf32>
    %1497 = vector.extract_strided_slice %1188 {offsets = [0, 0], sizes = [4, 2], strides = [1, 1]} : vector<8x2xf32> to vector<4x2xf32>
    %1498 = vector.broadcast %1496 : vector<1x2xf32> to vector<4x2xf32>
    %1499 = arith.mulf %1498, %1497 : vector<4x2xf32>
    %1500 = arith.addf %1495, %1499 : vector<4x2xf32>
    %1501 = vector.extract_strided_slice %1220 {offsets = [3, 0], sizes = [1, 2], strides = [1, 1]} : vector<8x2xf32> to vector<1x2xf32>
    %1502 = vector.extract_strided_slice %1196 {offsets = [0, 0], sizes = [4, 2], strides = [1, 1]} : vector<8x2xf32> to vector<4x2xf32>
    %1503 = vector.broadcast %1501 : vector<1x2xf32> to vector<4x2xf32>
    %1504 = arith.mulf %1503, %1502 : vector<4x2xf32>
    %1505 = arith.addf %1500, %1504 : vector<4x2xf32>
    %cst_208 = arith.constant 0.577350259 : f32
    %1506 = vector.broadcast %cst_208 : f32 to vector<4x2xf32>
    %1507 = arith.mulf %1505, %1506 : vector<4x2xf32>
    %cst_209 = arith.constant dense<0xFF800000> : vector<2xf32>
    %1508 = vector.multi_reduction <maximumf>, %1507, %cst_209 [0] : vector<4x2xf32> to vector<2xf32>
    %1509 = vector.shape_cast %1508 : vector<2xf32> to vector<1x2xf32>
    %1510 = vector.broadcast %1509 : vector<1x2xf32> to vector<4x2xf32>
    %1511 = arith.subf %1507, %1510 : vector<4x2xf32>
    %1512 = math.exp %1511 : vector<4x2xf32>
    %cst_210 = arith.constant dense<0.000000e+00> : vector<2xf32>
    %1513 = vector.multi_reduction <add>, %1512, %cst_210 [0] : vector<4x2xf32> to vector<2xf32>
    %1514 = vector.shape_cast %1513 : vector<2xf32> to vector<1x2xf32>
    %cst_211 = arith.constant 1.000000e+00 : f32
    %1515 = vector.broadcast %cst_211 : f32 to vector<1x2xf32>
    %1516 = arith.divf %1515, %1514 : vector<1x2xf32>
    %1517 = vector.broadcast %1516 : vector<1x2xf32> to vector<4x2xf32>
    %1518 = arith.mulf %1512, %1517 : vector<4x2xf32>
    %1519 = vector.extract_strided_slice %1228 {offsets = [0, 0], sizes = [4, 2], strides = [1, 1]} : vector<8x2xf32> to vector<4x2xf32>
    %1520 = arith.mulf %1518, %1519 : vector<4x2xf32>
    %cst_212 = arith.constant dense<0.000000e+00> : vector<2xf32>
    %1521 = vector.multi_reduction <add>, %1520, %cst_212 [0] : vector<4x2xf32> to vector<2xf32>
    %1522 = vector.shape_cast %1521 : vector<2xf32> to vector<1x2xf32>
    %1523 = vector.extract_strided_slice %1236 {offsets = [0, 0], sizes = [4, 2], strides = [1, 1]} : vector<8x2xf32> to vector<4x2xf32>
    %1524 = arith.mulf %1518, %1523 : vector<4x2xf32>
    %cst_213 = arith.constant dense<0.000000e+00> : vector<2xf32>
    %1525 = vector.multi_reduction <add>, %1524, %cst_213 [0] : vector<4x2xf32> to vector<2xf32>
    %1526 = vector.shape_cast %1525 : vector<2xf32> to vector<1x2xf32>
    %1527 = vector.extract_strided_slice %1244 {offsets = [0, 0], sizes = [4, 2], strides = [1, 1]} : vector<8x2xf32> to vector<4x2xf32>
    %1528 = arith.mulf %1518, %1527 : vector<4x2xf32>
    %cst_214 = arith.constant dense<0.000000e+00> : vector<2xf32>
    %1529 = vector.multi_reduction <add>, %1528, %cst_214 [0] : vector<4x2xf32> to vector<2xf32>
    %1530 = vector.shape_cast %1529 : vector<2xf32> to vector<1x2xf32>
    %1531 = vector.broadcast %27 : f32 to vector<1x2xf32>
    %1532 = arith.mulf %1522, %1531 : vector<1x2xf32>
    %1533 = vector.broadcast %30 : f32 to vector<1x2xf32>
    %1534 = arith.mulf %1526, %1533 : vector<1x2xf32>
    %1535 = arith.addf %1532, %1534 : vector<1x2xf32>
    %1536 = vector.broadcast %33 : f32 to vector<1x2xf32>
    %1537 = arith.mulf %1530, %1536 : vector<1x2xf32>
    %1538 = arith.addf %1535, %1537 : vector<1x2xf32>
    %1539 = vector.broadcast %36 : f32 to vector<1x2xf32>
    %1540 = arith.addf %1538, %1539 : vector<1x2xf32>
    %1541 = vector.extract_strided_slice %1138 {offsets = [3, 0], sizes = [1, 2], strides = [1, 1]} : vector<8x2xf32> to vector<1x2xf32>
    %1542 = arith.addf %1541, %1540 : vector<1x2xf32>
    %c0_215 = arith.constant 0 : index
    %c3_216 = arith.constant 3 : index
    %c0_217 = arith.constant 0 : index
    %1543 = vector.load %arg4[%c0_215, %c3_216, %c0_217] : memref<3x8x2xf32, #tpu.memory_space<vmem>>, vector<1x1x2xf32>
    %1544 = vector.shape_cast %1543 : vector<1x1x2xf32> to vector<1x2xf32>
    %1545 = vector.shape_cast %1542 : vector<1x2xf32> to vector<1x1x2xf32>
    tpu.vector_store %arg4[%c0_215, %c3_216, %c0_217], %1545 {strides = array<i32>} : memref<3x8x2xf32, #tpu.memory_space<vmem>>, vector<1x1x2xf32>,
    %1546 = vector.broadcast %28 : f32 to vector<1x2xf32>
    %1547 = arith.mulf %1522, %1546 : vector<1x2xf32>
    %1548 = vector.broadcast %31 : f32 to vector<1x2xf32>
    %1549 = arith.mulf %1526, %1548 : vector<1x2xf32>
    %1550 = arith.addf %1547, %1549 : vector<1x2xf32>
    %1551 = vector.broadcast %34 : f32 to vector<1x2xf32>
    %1552 = arith.mulf %1530, %1551 : vector<1x2xf32>
    %1553 = arith.addf %1550, %1552 : vector<1x2xf32>
    %1554 = vector.broadcast %37 : f32 to vector<1x2xf32>
    %1555 = arith.addf %1553, %1554 : vector<1x2xf32>
    %1556 = vector.extract_strided_slice %1139 {offsets = [3, 0], sizes = [1, 2], strides = [1, 1]} : vector<8x2xf32> to vector<1x2xf32>
    %1557 = arith.addf %1556, %1555 : vector<1x2xf32>
    %c1_218 = arith.constant 1 : index
    %c3_219 = arith.constant 3 : index
    %c0_220 = arith.constant 0 : index
    %1558 = vector.load %arg4[%c1_218, %c3_219, %c0_220] : memref<3x8x2xf32, #tpu.memory_space<vmem>>, vector<1x1x2xf32>
    %1559 = vector.shape_cast %1558 : vector<1x1x2xf32> to vector<1x2xf32>
    %1560 = vector.shape_cast %1557 : vector<1x2xf32> to vector<1x1x2xf32>
    tpu.vector_store %arg4[%c1_218, %c3_219, %c0_220], %1560 {strides = array<i32>} : memref<3x8x2xf32, #tpu.memory_space<vmem>>, vector<1x1x2xf32>,
    %1561 = vector.broadcast %29 : f32 to vector<1x2xf32>
    %1562 = arith.mulf %1522, %1561 : vector<1x2xf32>
    %1563 = vector.broadcast %32 : f32 to vector<1x2xf32>
    %1564 = arith.mulf %1526, %1563 : vector<1x2xf32>
    %1565 = arith.addf %1562, %1564 : vector<1x2xf32>
    %1566 = vector.broadcast %35 : f32 to vector<1x2xf32>
    %1567 = arith.mulf %1530, %1566 : vector<1x2xf32>
    %1568 = arith.addf %1565, %1567 : vector<1x2xf32>
    %1569 = vector.broadcast %38 : f32 to vector<1x2xf32>
    %1570 = arith.addf %1568, %1569 : vector<1x2xf32>
    %1571 = vector.extract_strided_slice %1140 {offsets = [3, 0], sizes = [1, 2], strides = [1, 1]} : vector<8x2xf32> to vector<1x2xf32>
    %1572 = arith.addf %1571, %1570 : vector<1x2xf32>
    %c2_221 = arith.constant 2 : index
    %c3_222 = arith.constant 3 : index
    %c0_223 = arith.constant 0 : index
    %1573 = vector.load %arg4[%c2_221, %c3_222, %c0_223] : memref<3x8x2xf32, #tpu.memory_space<vmem>>, vector<1x1x2xf32>
    %1574 = vector.shape_cast %1573 : vector<1x1x2xf32> to vector<1x2xf32>
    %1575 = vector.shape_cast %1572 : vector<1x2xf32> to vector<1x1x2xf32>
    tpu.vector_store %arg4[%c2_221, %c3_222, %c0_223], %1575 {strides = array<i32>} : memref<3x8x2xf32, #tpu.memory_space<vmem>>, vector<1x1x2xf32>,
    %1576 = vector.extract_strided_slice %1204 {offsets = [4, 0], sizes = [1, 2], strides = [1, 1]} : vector<8x2xf32> to vector<1x2xf32>
    %1577 = vector.extract_strided_slice %1180 {offsets = [0, 0], sizes = [5, 2], strides = [1, 1]} : vector<8x2xf32> to vector<5x2xf32>
    %1578 = vector.broadcast %1576 : vector<1x2xf32> to vector<5x2xf32>
    %1579 = arith.mulf %1578, %1577 : vector<5x2xf32>
    %1580 = vector.extract_strided_slice %1212 {offsets = [4, 0], sizes = [1, 2], strides = [1, 1]} : vector<8x2xf32> to vector<1x2xf32>
    %1581 = vector.extract_strided_slice %1188 {offsets = [0, 0], sizes = [5, 2], strides = [1, 1]} : vector<8x2xf32> to vector<5x2xf32>
    %1582 = vector.broadcast %1580 : vector<1x2xf32> to vector<5x2xf32>
    %1583 = arith.mulf %1582, %1581 : vector<5x2xf32>
    %1584 = arith.addf %1579, %1583 : vector<5x2xf32>
    %1585 = vector.extract_strided_slice %1220 {offsets = [4, 0], sizes = [1, 2], strides = [1, 1]} : vector<8x2xf32> to vector<1x2xf32>
    %1586 = vector.extract_strided_slice %1196 {offsets = [0, 0], sizes = [5, 2], strides = [1, 1]} : vector<8x2xf32> to vector<5x2xf32>
    %1587 = vector.broadcast %1585 : vector<1x2xf32> to vector<5x2xf32>
    %1588 = arith.mulf %1587, %1586 : vector<5x2xf32>
    %1589 = arith.addf %1584, %1588 : vector<5x2xf32>
    %cst_224 = arith.constant 0.577350259 : f32
    %1590 = vector.broadcast %cst_224 : f32 to vector<5x2xf32>
    %1591 = arith.mulf %1589, %1590 : vector<5x2xf32>
    %cst_225 = arith.constant dense<0xFF800000> : vector<2xf32>
    %1592 = vector.multi_reduction <maximumf>, %1591, %cst_225 [0] : vector<5x2xf32> to vector<2xf32>
    %1593 = vector.shape_cast %1592 : vector<2xf32> to vector<1x2xf32>
    %1594 = vector.broadcast %1593 : vector<1x2xf32> to vector<5x2xf32>
    %1595 = arith.subf %1591, %1594 : vector<5x2xf32>
    %1596 = math.exp %1595 : vector<5x2xf32>
    %cst_226 = arith.constant dense<0.000000e+00> : vector<2xf32>
    %1597 = vector.multi_reduction <add>, %1596, %cst_226 [0] : vector<5x2xf32> to vector<2xf32>
    %1598 = vector.shape_cast %1597 : vector<2xf32> to vector<1x2xf32>
    %cst_227 = arith.constant 1.000000e+00 : f32
    %1599 = vector.broadcast %cst_227 : f32 to vector<1x2xf32>
    %1600 = arith.divf %1599, %1598 : vector<1x2xf32>
    %1601 = vector.broadcast %1600 : vector<1x2xf32> to vector<5x2xf32>
    %1602 = arith.mulf %1596, %1601 : vector<5x2xf32>
    %1603 = vector.extract_strided_slice %1228 {offsets = [0, 0], sizes = [5, 2], strides = [1, 1]} : vector<8x2xf32> to vector<5x2xf32>
    %1604 = arith.mulf %1602, %1603 : vector<5x2xf32>
    %cst_228 = arith.constant dense<0.000000e+00> : vector<2xf32>
    %1605 = vector.multi_reduction <add>, %1604, %cst_228 [0] : vector<5x2xf32> to vector<2xf32>
    %1606 = vector.shape_cast %1605 : vector<2xf32> to vector<1x2xf32>
    %1607 = vector.extract_strided_slice %1236 {offsets = [0, 0], sizes = [5, 2], strides = [1, 1]} : vector<8x2xf32> to vector<5x2xf32>
    %1608 = arith.mulf %1602, %1607 : vector<5x2xf32>
    %cst_229 = arith.constant dense<0.000000e+00> : vector<2xf32>
    %1609 = vector.multi_reduction <add>, %1608, %cst_229 [0] : vector<5x2xf32> to vector<2xf32>
    %1610 = vector.shape_cast %1609 : vector<2xf32> to vector<1x2xf32>
    %1611 = vector.extract_strided_slice %1244 {offsets = [0, 0], sizes = [5, 2], strides = [1, 1]} : vector<8x2xf32> to vector<5x2xf32>
    %1612 = arith.mulf %1602, %1611 : vector<5x2xf32>
    %cst_230 = arith.constant dense<0.000000e+00> : vector<2xf32>
    %1613 = vector.multi_reduction <add>, %1612, %cst_230 [0] : vector<5x2xf32> to vector<2xf32>
    %1614 = vector.shape_cast %1613 : vector<2xf32> to vector<1x2xf32>
    %1615 = vector.broadcast %27 : f32 to vector<1x2xf32>
    %1616 = arith.mulf %1606, %1615 : vector<1x2xf32>
    %1617 = vector.broadcast %30 : f32 to vector<1x2xf32>
    %1618 = arith.mulf %1610, %1617 : vector<1x2xf32>
    %1619 = arith.addf %1616, %1618 : vector<1x2xf32>
    %1620 = vector.broadcast %33 : f32 to vector<1x2xf32>
    %1621 = arith.mulf %1614, %1620 : vector<1x2xf32>
    %1622 = arith.addf %1619, %1621 : vector<1x2xf32>
    %1623 = vector.broadcast %36 : f32 to vector<1x2xf32>
    %1624 = arith.addf %1622, %1623 : vector<1x2xf32>
    %1625 = vector.extract_strided_slice %1138 {offsets = [4, 0], sizes = [1, 2], strides = [1, 1]} : vector<8x2xf32> to vector<1x2xf32>
    %1626 = arith.addf %1625, %1624 : vector<1x2xf32>
    %c0_231 = arith.constant 0 : index
    %c4_232 = arith.constant 4 : index
    %c0_233 = arith.constant 0 : index
    %1627 = vector.load %arg4[%c0_231, %c4_232, %c0_233] : memref<3x8x2xf32, #tpu.memory_space<vmem>>, vector<1x1x2xf32>
    %1628 = vector.shape_cast %1627 : vector<1x1x2xf32> to vector<1x2xf32>
    %1629 = vector.shape_cast %1626 : vector<1x2xf32> to vector<1x1x2xf32>
    tpu.vector_store %arg4[%c0_231, %c4_232, %c0_233], %1629 {strides = array<i32>} : memref<3x8x2xf32, #tpu.memory_space<vmem>>, vector<1x1x2xf32>,
    %1630 = vector.broadcast %28 : f32 to vector<1x2xf32>
    %1631 = arith.mulf %1606, %1630 : vector<1x2xf32>
    %1632 = vector.broadcast %31 : f32 to vector<1x2xf32>
    %1633 = arith.mulf %1610, %1632 : vector<1x2xf32>
    %1634 = arith.addf %1631, %1633 : vector<1x2xf32>
    %1635 = vector.broadcast %34 : f32 to vector<1x2xf32>
    %1636 = arith.mulf %1614, %1635 : vector<1x2xf32>
    %1637 = arith.addf %1634, %1636 : vector<1x2xf32>
    %1638 = vector.broadcast %37 : f32 to vector<1x2xf32>
    %1639 = arith.addf %1637, %1638 : vector<1x2xf32>
    %1640 = vector.extract_strided_slice %1139 {offsets = [4, 0], sizes = [1, 2], strides = [1, 1]} : vector<8x2xf32> to vector<1x2xf32>
    %1641 = arith.addf %1640, %1639 : vector<1x2xf32>
    %c1_234 = arith.constant 1 : index
    %c4_235 = arith.constant 4 : index
    %c0_236 = arith.constant 0 : index
    %1642 = vector.load %arg4[%c1_234, %c4_235, %c0_236] : memref<3x8x2xf32, #tpu.memory_space<vmem>>, vector<1x1x2xf32>
    %1643 = vector.shape_cast %1642 : vector<1x1x2xf32> to vector<1x2xf32>
    %1644 = vector.shape_cast %1641 : vector<1x2xf32> to vector<1x1x2xf32>
    tpu.vector_store %arg4[%c1_234, %c4_235, %c0_236], %1644 {strides = array<i32>} : memref<3x8x2xf32, #tpu.memory_space<vmem>>, vector<1x1x2xf32>,
    %1645 = vector.broadcast %29 : f32 to vector<1x2xf32>
    %1646 = arith.mulf %1606, %1645 : vector<1x2xf32>
    %1647 = vector.broadcast %32 : f32 to vector<1x2xf32>
    %1648 = arith.mulf %1610, %1647 : vector<1x2xf32>
    %1649 = arith.addf %1646, %1648 : vector<1x2xf32>
    %1650 = vector.broadcast %35 : f32 to vector<1x2xf32>
    %1651 = arith.mulf %1614, %1650 : vector<1x2xf32>
    %1652 = arith.addf %1649, %1651 : vector<1x2xf32>
    %1653 = vector.broadcast %38 : f32 to vector<1x2xf32>
    %1654 = arith.addf %1652, %1653 : vector<1x2xf32>
    %1655 = vector.extract_strided_slice %1140 {offsets = [4, 0], sizes = [1, 2], strides = [1, 1]} : vector<8x2xf32> to vector<1x2xf32>
    %1656 = arith.addf %1655, %1654 : vector<1x2xf32>
    %c2_237 = arith.constant 2 : index
    %c4_238 = arith.constant 4 : index
    %c0_239 = arith.constant 0 : index
    %1657 = vector.load %arg4[%c2_237, %c4_238, %c0_239] : memref<3x8x2xf32, #tpu.memory_space<vmem>>, vector<1x1x2xf32>
    %1658 = vector.shape_cast %1657 : vector<1x1x2xf32> to vector<1x2xf32>
    %1659 = vector.shape_cast %1656 : vector<1x2xf32> to vector<1x1x2xf32>
    tpu.vector_store %arg4[%c2_237, %c4_238, %c0_239], %1659 {strides = array<i32>} : memref<3x8x2xf32, #tpu.memory_space<vmem>>, vector<1x1x2xf32>,
    %1660 = vector.extract_strided_slice %1204 {offsets = [5, 0], sizes = [1, 2], strides = [1, 1]} : vector<8x2xf32> to vector<1x2xf32>
    %1661 = vector.extract_strided_slice %1180 {offsets = [0, 0], sizes = [6, 2], strides = [1, 1]} : vector<8x2xf32> to vector<6x2xf32>
    %1662 = vector.broadcast %1660 : vector<1x2xf32> to vector<6x2xf32>
    %1663 = arith.mulf %1662, %1661 : vector<6x2xf32>
    %1664 = vector.extract_strided_slice %1212 {offsets = [5, 0], sizes = [1, 2], strides = [1, 1]} : vector<8x2xf32> to vector<1x2xf32>
    %1665 = vector.extract_strided_slice %1188 {offsets = [0, 0], sizes = [6, 2], strides = [1, 1]} : vector<8x2xf32> to vector<6x2xf32>
    %1666 = vector.broadcast %1664 : vector<1x2xf32> to vector<6x2xf32>
    %1667 = arith.mulf %1666, %1665 : vector<6x2xf32>
    %1668 = arith.addf %1663, %1667 : vector<6x2xf32>
    %1669 = vector.extract_strided_slice %1220 {offsets = [5, 0], sizes = [1, 2], strides = [1, 1]} : vector<8x2xf32> to vector<1x2xf32>
    %1670 = vector.extract_strided_slice %1196 {offsets = [0, 0], sizes = [6, 2], strides = [1, 1]} : vector<8x2xf32> to vector<6x2xf32>
    %1671 = vector.broadcast %1669 : vector<1x2xf32> to vector<6x2xf32>
    %1672 = arith.mulf %1671, %1670 : vector<6x2xf32>
    %1673 = arith.addf %1668, %1672 : vector<6x2xf32>
    %cst_240 = arith.constant 0.577350259 : f32
    %1674 = vector.broadcast %cst_240 : f32 to vector<6x2xf32>
    %1675 = arith.mulf %1673, %1674 : vector<6x2xf32>
    %cst_241 = arith.constant dense<0xFF800000> : vector<2xf32>
    %1676 = vector.multi_reduction <maximumf>, %1675, %cst_241 [0] : vector<6x2xf32> to vector<2xf32>
    %1677 = vector.shape_cast %1676 : vector<2xf32> to vector<1x2xf32>
    %1678 = vector.broadcast %1677 : vector<1x2xf32> to vector<6x2xf32>
    %1679 = arith.subf %1675, %1678 : vector<6x2xf32>
    %1680 = math.exp %1679 : vector<6x2xf32>
    %cst_242 = arith.constant dense<0.000000e+00> : vector<2xf32>
    %1681 = vector.multi_reduction <add>, %1680, %cst_242 [0] : vector<6x2xf32> to vector<2xf32>
    %1682 = vector.shape_cast %1681 : vector<2xf32> to vector<1x2xf32>
    %cst_243 = arith.constant 1.000000e+00 : f32
    %1683 = vector.broadcast %cst_243 : f32 to vector<1x2xf32>
    %1684 = arith.divf %1683, %1682 : vector<1x2xf32>
    %1685 = vector.broadcast %1684 : vector<1x2xf32> to vector<6x2xf32>
    %1686 = arith.mulf %1680, %1685 : vector<6x2xf32>
    %1687 = vector.extract_strided_slice %1228 {offsets = [0, 0], sizes = [6, 2], strides = [1, 1]} : vector<8x2xf32> to vector<6x2xf32>
    %1688 = arith.mulf %1686, %1687 : vector<6x2xf32>
    %cst_244 = arith.constant dense<0.000000e+00> : vector<2xf32>
    %1689 = vector.multi_reduction <add>, %1688, %cst_244 [0] : vector<6x2xf32> to vector<2xf32>
    %1690 = vector.shape_cast %1689 : vector<2xf32> to vector<1x2xf32>
    %1691 = vector.extract_strided_slice %1236 {offsets = [0, 0], sizes = [6, 2], strides = [1, 1]} : vector<8x2xf32> to vector<6x2xf32>
    %1692 = arith.mulf %1686, %1691 : vector<6x2xf32>
    %cst_245 = arith.constant dense<0.000000e+00> : vector<2xf32>
    %1693 = vector.multi_reduction <add>, %1692, %cst_245 [0] : vector<6x2xf32> to vector<2xf32>
    %1694 = vector.shape_cast %1693 : vector<2xf32> to vector<1x2xf32>
    %1695 = vector.extract_strided_slice %1244 {offsets = [0, 0], sizes = [6, 2], strides = [1, 1]} : vector<8x2xf32> to vector<6x2xf32>
    %1696 = arith.mulf %1686, %1695 : vector<6x2xf32>
    %cst_246 = arith.constant dense<0.000000e+00> : vector<2xf32>
    %1697 = vector.multi_reduction <add>, %1696, %cst_246 [0] : vector<6x2xf32> to vector<2xf32>
    %1698 = vector.shape_cast %1697 : vector<2xf32> to vector<1x2xf32>
    %1699 = vector.broadcast %27 : f32 to vector<1x2xf32>
    %1700 = arith.mulf %1690, %1699 : vector<1x2xf32>
    %1701 = vector.broadcast %30 : f32 to vector<1x2xf32>
    %1702 = arith.mulf %1694, %1701 : vector<1x2xf32>
    %1703 = arith.addf %1700, %1702 : vector<1x2xf32>
    %1704 = vector.broadcast %33 : f32 to vector<1x2xf32>
    %1705 = arith.mulf %1698, %1704 : vector<1x2xf32>
    %1706 = arith.addf %1703, %1705 : vector<1x2xf32>
    %1707 = vector.broadcast %36 : f32 to vector<1x2xf32>
    %1708 = arith.addf %1706, %1707 : vector<1x2xf32>
    %1709 = vector.extract_strided_slice %1138 {offsets = [5, 0], sizes = [1, 2], strides = [1, 1]} : vector<8x2xf32> to vector<1x2xf32>
    %1710 = arith.addf %1709, %1708 : vector<1x2xf32>
    %c0_247 = arith.constant 0 : index
    %c5_248 = arith.constant 5 : index
    %c0_249 = arith.constant 0 : index
    %1711 = vector.load %arg4[%c0_247, %c5_248, %c0_249] : memref<3x8x2xf32, #tpu.memory_space<vmem>>, vector<1x1x2xf32>
    %1712 = vector.shape_cast %1711 : vector<1x1x2xf32> to vector<1x2xf32>
    %1713 = vector.shape_cast %1710 : vector<1x2xf32> to vector<1x1x2xf32>
    tpu.vector_store %arg4[%c0_247, %c5_248, %c0_249], %1713 {strides = array<i32>} : memref<3x8x2xf32, #tpu.memory_space<vmem>>, vector<1x1x2xf32>,
    %1714 = vector.broadcast %28 : f32 to vector<1x2xf32>
    %1715 = arith.mulf %1690, %1714 : vector<1x2xf32>
    %1716 = vector.broadcast %31 : f32 to vector<1x2xf32>
    %1717 = arith.mulf %1694, %1716 : vector<1x2xf32>
    %1718 = arith.addf %1715, %1717 : vector<1x2xf32>
    %1719 = vector.broadcast %34 : f32 to vector<1x2xf32>
    %1720 = arith.mulf %1698, %1719 : vector<1x2xf32>
    %1721 = arith.addf %1718, %1720 : vector<1x2xf32>
    %1722 = vector.broadcast %37 : f32 to vector<1x2xf32>
    %1723 = arith.addf %1721, %1722 : vector<1x2xf32>
    %1724 = vector.extract_strided_slice %1139 {offsets = [5, 0], sizes = [1, 2], strides = [1, 1]} : vector<8x2xf32> to vector<1x2xf32>
    %1725 = arith.addf %1724, %1723 : vector<1x2xf32>
    %c1_250 = arith.constant 1 : index
    %c5_251 = arith.constant 5 : index
    %c0_252 = arith.constant 0 : index
    %1726 = vector.load %arg4[%c1_250, %c5_251, %c0_252] : memref<3x8x2xf32, #tpu.memory_space<vmem>>, vector<1x1x2xf32>
    %1727 = vector.shape_cast %1726 : vector<1x1x2xf32> to vector<1x2xf32>
    %1728 = vector.shape_cast %1725 : vector<1x2xf32> to vector<1x1x2xf32>
    tpu.vector_store %arg4[%c1_250, %c5_251, %c0_252], %1728 {strides = array<i32>} : memref<3x8x2xf32, #tpu.memory_space<vmem>>, vector<1x1x2xf32>,
    %1729 = vector.broadcast %29 : f32 to vector<1x2xf32>
    %1730 = arith.mulf %1690, %1729 : vector<1x2xf32>
    %1731 = vector.broadcast %32 : f32 to vector<1x2xf32>
    %1732 = arith.mulf %1694, %1731 : vector<1x2xf32>
    %1733 = arith.addf %1730, %1732 : vector<1x2xf32>
    %1734 = vector.broadcast %35 : f32 to vector<1x2xf32>
    %1735 = arith.mulf %1698, %1734 : vector<1x2xf32>
    %1736 = arith.addf %1733, %1735 : vector<1x2xf32>
    %1737 = vector.broadcast %38 : f32 to vector<1x2xf32>
    %1738 = arith.addf %1736, %1737 : vector<1x2xf32>
    %1739 = vector.extract_strided_slice %1140 {offsets = [5, 0], sizes = [1, 2], strides = [1, 1]} : vector<8x2xf32> to vector<1x2xf32>
    %1740 = arith.addf %1739, %1738 : vector<1x2xf32>
    %c2_253 = arith.constant 2 : index
    %c5_254 = arith.constant 5 : index
    %c0_255 = arith.constant 0 : index
    %1741 = vector.load %arg4[%c2_253, %c5_254, %c0_255] : memref<3x8x2xf32, #tpu.memory_space<vmem>>, vector<1x1x2xf32>
    %1742 = vector.shape_cast %1741 : vector<1x1x2xf32> to vector<1x2xf32>
    %1743 = vector.shape_cast %1740 : vector<1x2xf32> to vector<1x1x2xf32>
    tpu.vector_store %arg4[%c2_253, %c5_254, %c0_255], %1743 {strides = array<i32>} : memref<3x8x2xf32, #tpu.memory_space<vmem>>, vector<1x1x2xf32>,
    %1744 = vector.extract_strided_slice %1204 {offsets = [6, 0], sizes = [1, 2], strides = [1, 1]} : vector<8x2xf32> to vector<1x2xf32>
    %1745 = vector.extract_strided_slice %1180 {offsets = [0, 0], sizes = [7, 2], strides = [1, 1]} : vector<8x2xf32> to vector<7x2xf32>
    %1746 = vector.broadcast %1744 : vector<1x2xf32> to vector<7x2xf32>
    %1747 = arith.mulf %1746, %1745 : vector<7x2xf32>
    %1748 = vector.extract_strided_slice %1212 {offsets = [6, 0], sizes = [1, 2], strides = [1, 1]} : vector<8x2xf32> to vector<1x2xf32>
    %1749 = vector.extract_strided_slice %1188 {offsets = [0, 0], sizes = [7, 2], strides = [1, 1]} : vector<8x2xf32> to vector<7x2xf32>
    %1750 = vector.broadcast %1748 : vector<1x2xf32> to vector<7x2xf32>
    %1751 = arith.mulf %1750, %1749 : vector<7x2xf32>
    %1752 = arith.addf %1747, %1751 : vector<7x2xf32>
    %1753 = vector.extract_strided_slice %1220 {offsets = [6, 0], sizes = [1, 2], strides = [1, 1]} : vector<8x2xf32> to vector<1x2xf32>
    %1754 = vector.extract_strided_slice %1196 {offsets = [0, 0], sizes = [7, 2], strides = [1, 1]} : vector<8x2xf32> to vector<7x2xf32>
    %1755 = vector.broadcast %1753 : vector<1x2xf32> to vector<7x2xf32>
    %1756 = arith.mulf %1755, %1754 : vector<7x2xf32>
    %1757 = arith.addf %1752, %1756 : vector<7x2xf32>
    %cst_256 = arith.constant 0.577350259 : f32
    %1758 = vector.broadcast %cst_256 : f32 to vector<7x2xf32>
    %1759 = arith.mulf %1757, %1758 : vector<7x2xf32>
    %cst_257 = arith.constant dense<0xFF800000> : vector<2xf32>
    %1760 = vector.multi_reduction <maximumf>, %1759, %cst_257 [0] : vector<7x2xf32> to vector<2xf32>
    %1761 = vector.shape_cast %1760 : vector<2xf32> to vector<1x2xf32>
    %1762 = vector.broadcast %1761 : vector<1x2xf32> to vector<7x2xf32>
    %1763 = arith.subf %1759, %1762 : vector<7x2xf32>
    %1764 = math.exp %1763 : vector<7x2xf32>
    %cst_258 = arith.constant dense<0.000000e+00> : vector<2xf32>
    %1765 = vector.multi_reduction <add>, %1764, %cst_258 [0] : vector<7x2xf32> to vector<2xf32>
    %1766 = vector.shape_cast %1765 : vector<2xf32> to vector<1x2xf32>
    %cst_259 = arith.constant 1.000000e+00 : f32
    %1767 = vector.broadcast %cst_259 : f32 to vector<1x2xf32>
    %1768 = arith.divf %1767, %1766 : vector<1x2xf32>
    %1769 = vector.broadcast %1768 : vector<1x2xf32> to vector<7x2xf32>
    %1770 = arith.mulf %1764, %1769 : vector<7x2xf32>
    %1771 = vector.extract_strided_slice %1228 {offsets = [0, 0], sizes = [7, 2], strides = [1, 1]} : vector<8x2xf32> to vector<7x2xf32>
    %1772 = arith.mulf %1770, %1771 : vector<7x2xf32>
    %cst_260 = arith.constant dense<0.000000e+00> : vector<2xf32>
    %1773 = vector.multi_reduction <add>, %1772, %cst_260 [0] : vector<7x2xf32> to vector<2xf32>
    %1774 = vector.shape_cast %1773 : vector<2xf32> to vector<1x2xf32>
    %1775 = vector.extract_strided_slice %1236 {offsets = [0, 0], sizes = [7, 2], strides = [1, 1]} : vector<8x2xf32> to vector<7x2xf32>
    %1776 = arith.mulf %1770, %1775 : vector<7x2xf32>
    %cst_261 = arith.constant dense<0.000000e+00> : vector<2xf32>
    %1777 = vector.multi_reduction <add>, %1776, %cst_261 [0] : vector<7x2xf32> to vector<2xf32>
    %1778 = vector.shape_cast %1777 : vector<2xf32> to vector<1x2xf32>
    %1779 = vector.extract_strided_slice %1244 {offsets = [0, 0], sizes = [7, 2], strides = [1, 1]} : vector<8x2xf32> to vector<7x2xf32>
    %1780 = arith.mulf %1770, %1779 : vector<7x2xf32>
    %cst_262 = arith.constant dense<0.000000e+00> : vector<2xf32>
    %1781 = vector.multi_reduction <add>, %1780, %cst_262 [0] : vector<7x2xf32> to vector<2xf32>
    %1782 = vector.shape_cast %1781 : vector<2xf32> to vector<1x2xf32>
    %1783 = vector.broadcast %27 : f32 to vector<1x2xf32>
    %1784 = arith.mulf %1774, %1783 : vector<1x2xf32>
    %1785 = vector.broadcast %30 : f32 to vector<1x2xf32>
    %1786 = arith.mulf %1778, %1785 : vector<1x2xf32>
    %1787 = arith.addf %1784, %1786 : vector<1x2xf32>
    %1788 = vector.broadcast %33 : f32 to vector<1x2xf32>
    %1789 = arith.mulf %1782, %1788 : vector<1x2xf32>
    %1790 = arith.addf %1787, %1789 : vector<1x2xf32>
    %1791 = vector.broadcast %36 : f32 to vector<1x2xf32>
    %1792 = arith.addf %1790, %1791 : vector<1x2xf32>
    %1793 = vector.extract_strided_slice %1138 {offsets = [6, 0], sizes = [1, 2], strides = [1, 1]} : vector<8x2xf32> to vector<1x2xf32>
    %1794 = arith.addf %1793, %1792 : vector<1x2xf32>
    %c0_263 = arith.constant 0 : index
    %c6_264 = arith.constant 6 : index
    %c0_265 = arith.constant 0 : index
    %1795 = vector.load %arg4[%c0_263, %c6_264, %c0_265] : memref<3x8x2xf32, #tpu.memory_space<vmem>>, vector<1x1x2xf32>
    %1796 = vector.shape_cast %1795 : vector<1x1x2xf32> to vector<1x2xf32>
    %1797 = vector.shape_cast %1794 : vector<1x2xf32> to vector<1x1x2xf32>
    tpu.vector_store %arg4[%c0_263, %c6_264, %c0_265], %1797 {strides = array<i32>} : memref<3x8x2xf32, #tpu.memory_space<vmem>>, vector<1x1x2xf32>,
    %1798 = vector.broadcast %28 : f32 to vector<1x2xf32>
    %1799 = arith.mulf %1774, %1798 : vector<1x2xf32>
    %1800 = vector.broadcast %31 : f32 to vector<1x2xf32>
    %1801 = arith.mulf %1778, %1800 : vector<1x2xf32>
    %1802 = arith.addf %1799, %1801 : vector<1x2xf32>
    %1803 = vector.broadcast %34 : f32 to vector<1x2xf32>
    %1804 = arith.mulf %1782, %1803 : vector<1x2xf32>
    %1805 = arith.addf %1802, %1804 : vector<1x2xf32>
    %1806 = vector.broadcast %37 : f32 to vector<1x2xf32>
    %1807 = arith.addf %1805, %1806 : vector<1x2xf32>
    %1808 = vector.extract_strided_slice %1139 {offsets = [6, 0], sizes = [1, 2], strides = [1, 1]} : vector<8x2xf32> to vector<1x2xf32>
    %1809 = arith.addf %1808, %1807 : vector<1x2xf32>
    %c1_266 = arith.constant 1 : index
    %c6_267 = arith.constant 6 : index
    %c0_268 = arith.constant 0 : index
    %1810 = vector.load %arg4[%c1_266, %c6_267, %c0_268] : memref<3x8x2xf32, #tpu.memory_space<vmem>>, vector<1x1x2xf32>
    %1811 = vector.shape_cast %1810 : vector<1x1x2xf32> to vector<1x2xf32>
    %1812 = vector.shape_cast %1809 : vector<1x2xf32> to vector<1x1x2xf32>
    tpu.vector_store %arg4[%c1_266, %c6_267, %c0_268], %1812 {strides = array<i32>} : memref<3x8x2xf32, #tpu.memory_space<vmem>>, vector<1x1x2xf32>,
    %1813 = vector.broadcast %29 : f32 to vector<1x2xf32>
    %1814 = arith.mulf %1774, %1813 : vector<1x2xf32>
    %1815 = vector.broadcast %32 : f32 to vector<1x2xf32>
    %1816 = arith.mulf %1778, %1815 : vector<1x2xf32>
    %1817 = arith.addf %1814, %1816 : vector<1x2xf32>
    %1818 = vector.broadcast %35 : f32 to vector<1x2xf32>
    %1819 = arith.mulf %1782, %1818 : vector<1x2xf32>
    %1820 = arith.addf %1817, %1819 : vector<1x2xf32>
    %1821 = vector.broadcast %38 : f32 to vector<1x2xf32>
    %1822 = arith.addf %1820, %1821 : vector<1x2xf32>
    %1823 = vector.extract_strided_slice %1140 {offsets = [6, 0], sizes = [1, 2], strides = [1, 1]} : vector<8x2xf32> to vector<1x2xf32>
    %1824 = arith.addf %1823, %1822 : vector<1x2xf32>
    %c2_269 = arith.constant 2 : index
    %c6_270 = arith.constant 6 : index
    %c0_271 = arith.constant 0 : index
    %1825 = vector.load %arg4[%c2_269, %c6_270, %c0_271] : memref<3x8x2xf32, #tpu.memory_space<vmem>>, vector<1x1x2xf32>
    %1826 = vector.shape_cast %1825 : vector<1x1x2xf32> to vector<1x2xf32>
    %1827 = vector.shape_cast %1824 : vector<1x2xf32> to vector<1x1x2xf32>
    tpu.vector_store %arg4[%c2_269, %c6_270, %c0_271], %1827 {strides = array<i32>} : memref<3x8x2xf32, #tpu.memory_space<vmem>>, vector<1x1x2xf32>,
    %1828 = vector.extract_strided_slice %1204 {offsets = [7, 0], sizes = [1, 2], strides = [1, 1]} : vector<8x2xf32> to vector<1x2xf32>
    %1829 = vector.broadcast %1828 : vector<1x2xf32> to vector<8x2xf32>
    %1830 = arith.mulf %1829, %1180 : vector<8x2xf32>
    %1831 = vector.extract_strided_slice %1212 {offsets = [7, 0], sizes = [1, 2], strides = [1, 1]} : vector<8x2xf32> to vector<1x2xf32>
    %1832 = vector.broadcast %1831 : vector<1x2xf32> to vector<8x2xf32>
    %1833 = arith.mulf %1832, %1188 : vector<8x2xf32>
    %1834 = arith.addf %1830, %1833 : vector<8x2xf32>
    %1835 = vector.extract_strided_slice %1220 {offsets = [7, 0], sizes = [1, 2], strides = [1, 1]} : vector<8x2xf32> to vector<1x2xf32>
    %1836 = vector.broadcast %1835 : vector<1x2xf32> to vector<8x2xf32>
    %1837 = arith.mulf %1836, %1196 : vector<8x2xf32>
    %1838 = arith.addf %1834, %1837 : vector<8x2xf32>
    %cst_272 = arith.constant 0.577350259 : f32
    %1839 = vector.broadcast %cst_272 : f32 to vector<8x2xf32>
    %1840 = arith.mulf %1838, %1839 : vector<8x2xf32>
    %cst_273 = arith.constant dense<0xFF800000> : vector<2xf32>
    %1841 = vector.multi_reduction <maximumf>, %1840, %cst_273 [0] : vector<8x2xf32> to vector<2xf32>
    %1842 = vector.shape_cast %1841 : vector<2xf32> to vector<1x2xf32>
    %1843 = vector.broadcast %1842 : vector<1x2xf32> to vector<8x2xf32>
    %1844 = arith.subf %1840, %1843 : vector<8x2xf32>
    %1845 = math.exp %1844 : vector<8x2xf32>
    %cst_274 = arith.constant dense<0.000000e+00> : vector<2xf32>
    %1846 = vector.multi_reduction <add>, %1845, %cst_274 [0] : vector<8x2xf32> to vector<2xf32>
    %1847 = vector.shape_cast %1846 : vector<2xf32> to vector<1x2xf32>
    %cst_275 = arith.constant 1.000000e+00 : f32
    %1848 = vector.broadcast %cst_275 : f32 to vector<1x2xf32>
    %1849 = arith.divf %1848, %1847 : vector<1x2xf32>
    %1850 = vector.broadcast %1849 : vector<1x2xf32> to vector<8x2xf32>
    %1851 = arith.mulf %1845, %1850 : vector<8x2xf32>
    %1852 = arith.mulf %1851, %1228 : vector<8x2xf32>
    %cst_276 = arith.constant dense<0.000000e+00> : vector<2xf32>
    %1853 = vector.multi_reduction <add>, %1852, %cst_276 [0] : vector<8x2xf32> to vector<2xf32>
    %1854 = vector.shape_cast %1853 : vector<2xf32> to vector<1x2xf32>
    %1855 = arith.mulf %1851, %1236 : vector<8x2xf32>
    %cst_277 = arith.constant dense<0.000000e+00> : vector<2xf32>
    %1856 = vector.multi_reduction <add>, %1855, %cst_277 [0] : vector<8x2xf32> to vector<2xf32>
    %1857 = vector.shape_cast %1856 : vector<2xf32> to vector<1x2xf32>
    %1858 = arith.mulf %1851, %1244 : vector<8x2xf32>
    %cst_278 = arith.constant dense<0.000000e+00> : vector<2xf32>
    %1859 = vector.multi_reduction <add>, %1858, %cst_278 [0] : vector<8x2xf32> to vector<2xf32>
    %1860 = vector.shape_cast %1859 : vector<2xf32> to vector<1x2xf32>
    %1861 = vector.broadcast %27 : f32 to vector<1x2xf32>
    %1862 = arith.mulf %1854, %1861 : vector<1x2xf32>
    %1863 = vector.broadcast %30 : f32 to vector<1x2xf32>
    %1864 = arith.mulf %1857, %1863 : vector<1x2xf32>
    %1865 = arith.addf %1862, %1864 : vector<1x2xf32>
    %1866 = vector.broadcast %33 : f32 to vector<1x2xf32>
    %1867 = arith.mulf %1860, %1866 : vector<1x2xf32>
    %1868 = arith.addf %1865, %1867 : vector<1x2xf32>
    %1869 = vector.broadcast %36 : f32 to vector<1x2xf32>
    %1870 = arith.addf %1868, %1869 : vector<1x2xf32>
    %1871 = vector.extract_strided_slice %1138 {offsets = [7, 0], sizes = [1, 2], strides = [1, 1]} : vector<8x2xf32> to vector<1x2xf32>
    %1872 = arith.addf %1871, %1870 : vector<1x2xf32>
    %c0_279 = arith.constant 0 : index
    %c7_280 = arith.constant 7 : index
    %c0_281 = arith.constant 0 : index
    %1873 = vector.load %arg4[%c0_279, %c7_280, %c0_281] : memref<3x8x2xf32, #tpu.memory_space<vmem>>, vector<1x1x2xf32>
    %1874 = vector.shape_cast %1873 : vector<1x1x2xf32> to vector<1x2xf32>
    %1875 = vector.shape_cast %1872 : vector<1x2xf32> to vector<1x1x2xf32>
    tpu.vector_store %arg4[%c0_279, %c7_280, %c0_281], %1875 {strides = array<i32>} : memref<3x8x2xf32, #tpu.memory_space<vmem>>, vector<1x1x2xf32>,
    %1876 = vector.broadcast %28 : f32 to vector<1x2xf32>
    %1877 = arith.mulf %1854, %1876 : vector<1x2xf32>
    %1878 = vector.broadcast %31 : f32 to vector<1x2xf32>
    %1879 = arith.mulf %1857, %1878 : vector<1x2xf32>
    %1880 = arith.addf %1877, %1879 : vector<1x2xf32>
    %1881 = vector.broadcast %34 : f32 to vector<1x2xf32>
    %1882 = arith.mulf %1860, %1881 : vector<1x2xf32>
    %1883 = arith.addf %1880, %1882 : vector<1x2xf32>
    %1884 = vector.broadcast %37 : f32 to vector<1x2xf32>
    %1885 = arith.addf %1883, %1884 : vector<1x2xf32>
    %1886 = vector.extract_strided_slice %1139 {offsets = [7, 0], sizes = [1, 2], strides = [1, 1]} : vector<8x2xf32> to vector<1x2xf32>
    %1887 = arith.addf %1886, %1885 : vector<1x2xf32>
    %c1_282 = arith.constant 1 : index
    %c7_283 = arith.constant 7 : index
    %c0_284 = arith.constant 0 : index
    %1888 = vector.load %arg4[%c1_282, %c7_283, %c0_284] : memref<3x8x2xf32, #tpu.memory_space<vmem>>, vector<1x1x2xf32>
    %1889 = vector.shape_cast %1888 : vector<1x1x2xf32> to vector<1x2xf32>
    %1890 = vector.shape_cast %1887 : vector<1x2xf32> to vector<1x1x2xf32>
    tpu.vector_store %arg4[%c1_282, %c7_283, %c0_284], %1890 {strides = array<i32>} : memref<3x8x2xf32, #tpu.memory_space<vmem>>, vector<1x1x2xf32>,
    %1891 = vector.broadcast %29 : f32 to vector<1x2xf32>
    %1892 = arith.mulf %1854, %1891 : vector<1x2xf32>
    %1893 = vector.broadcast %32 : f32 to vector<1x2xf32>
    %1894 = arith.mulf %1857, %1893 : vector<1x2xf32>
    %1895 = arith.addf %1892, %1894 : vector<1x2xf32>
    %1896 = vector.broadcast %35 : f32 to vector<1x2xf32>
    %1897 = arith.mulf %1860, %1896 : vector<1x2xf32>
    %1898 = arith.addf %1895, %1897 : vector<1x2xf32>
    %1899 = vector.broadcast %38 : f32 to vector<1x2xf32>
    %1900 = arith.addf %1898, %1899 : vector<1x2xf32>
    %1901 = vector.extract_strided_slice %1140 {offsets = [7, 0], sizes = [1, 2], strides = [1, 1]} : vector<8x2xf32> to vector<1x2xf32>
    %1902 = arith.addf %1901, %1900 : vector<1x2xf32>
    %c2_285 = arith.constant 2 : index
    %c7_286 = arith.constant 7 : index
    %c0_287 = arith.constant 0 : index
    %1903 = vector.load %arg4[%c2_285, %c7_286, %c0_287] : memref<3x8x2xf32, #tpu.memory_space<vmem>>, vector<1x1x2xf32>
    %1904 = vector.shape_cast %1903 : vector<1x1x2xf32> to vector<1x2xf32>
    %1905 = vector.shape_cast %1902 : vector<1x2xf32> to vector<1x1x2xf32>
    tpu.vector_store %arg4[%c2_285, %c7_286, %c0_287], %1905 {strides = array<i32>} : memref<3x8x2xf32, #tpu.memory_space<vmem>>, vector<1x1x2xf32>,
    %c0_288 = arith.constant 0 : index
    %c0_289 = arith.constant 0 : index
    %c0_290 = arith.constant 0 : index
    %1906 = vector.load %arg4[%c0_288, %c0_289, %c0_290] : memref<3x8x2xf32, #tpu.memory_space<vmem>>, vector<1x8x2xf32>
    %1907 = vector.shape_cast %1906 : vector<1x8x2xf32> to vector<8x2xf32>
    %c1_291 = arith.constant 1 : index
    %c0_292 = arith.constant 0 : index
    %c0_293 = arith.constant 0 : index
    %1908 = vector.load %arg4[%c1_291, %c0_292, %c0_293] : memref<3x8x2xf32, #tpu.memory_space<vmem>>, vector<1x8x2xf32>
    %1909 = vector.shape_cast %1908 : vector<1x8x2xf32> to vector<8x2xf32>
    %c2_294 = arith.constant 2 : index
    %c0_295 = arith.constant 0 : index
    %c0_296 = arith.constant 0 : index
    %1910 = vector.load %arg4[%c2_294, %c0_295, %c0_296] : memref<3x8x2xf32, #tpu.memory_space<vmem>>, vector<1x8x2xf32>
    %1911 = vector.shape_cast %1910 : vector<1x8x2xf32> to vector<8x2xf32>
    %1912 = arith.addf %1907, %1909 : vector<8x2xf32>
    %1913 = arith.addf %1912, %1911 : vector<8x2xf32>
    %cst_297 = arith.constant 0.333333343 : f32
    %1914 = vector.broadcast %cst_297 : f32 to vector<8x2xf32>
    %1915 = arith.mulf %1913, %1914 : vector<8x2xf32>
    %1916 = arith.subf %1907, %1915 : vector<8x2xf32>
    %1917 = arith.subf %1909, %1915 : vector<8x2xf32>
    %1918 = arith.subf %1911, %1915 : vector<8x2xf32>
    %1919 = arith.mulf %1916, %1916 : vector<8x2xf32>
    %1920 = arith.mulf %1917, %1917 : vector<8x2xf32>
    %1921 = arith.addf %1919, %1920 : vector<8x2xf32>
    %1922 = arith.mulf %1918, %1918 : vector<8x2xf32>
    %1923 = arith.addf %1921, %1922 : vector<8x2xf32>
    %cst_298 = arith.constant 0.333333343 : f32
    %1924 = vector.broadcast %cst_298 : f32 to vector<8x2xf32>
    %1925 = arith.mulf %1923, %1924 : vector<8x2xf32>
    %cst_299 = arith.constant 9.99999974E-6 : f32
    %1926 = vector.broadcast %cst_299 : f32 to vector<8x2xf32>
    %1927 = arith.addf %1925, %1926 : vector<8x2xf32>
    %1928 = math.rsqrt %1927 : vector<8x2xf32>
    %1929 = arith.mulf %1916, %1928 : vector<8x2xf32>
    %1930 = vector.broadcast %132 : f32 to vector<8x2xf32>
    %1931 = arith.mulf %1929, %1930 : vector<8x2xf32>
    %1932 = vector.broadcast %135 : f32 to vector<8x2xf32>
    %1933 = arith.addf %1931, %1932 : vector<8x2xf32>
    %1934 = arith.mulf %1917, %1928 : vector<8x2xf32>
    %1935 = vector.broadcast %133 : f32 to vector<8x2xf32>
    %1936 = arith.mulf %1934, %1935 : vector<8x2xf32>
    %1937 = vector.broadcast %136 : f32 to vector<8x2xf32>
    %1938 = arith.addf %1936, %1937 : vector<8x2xf32>
    %1939 = arith.mulf %1918, %1928 : vector<8x2xf32>
    %1940 = vector.broadcast %134 : f32 to vector<8x2xf32>
    %1941 = arith.mulf %1939, %1940 : vector<8x2xf32>
    %1942 = vector.broadcast %137 : f32 to vector<8x2xf32>
    %1943 = arith.addf %1941, %1942 : vector<8x2xf32>
    %1944 = vector.broadcast %39 : f32 to vector<8x2xf32>
    %1945 = arith.mulf %1933, %1944 : vector<8x2xf32>
    %1946 = vector.broadcast %51 : f32 to vector<8x2xf32>
    %1947 = arith.mulf %1938, %1946 : vector<8x2xf32>
    %1948 = arith.addf %1945, %1947 : vector<8x2xf32>
    %1949 = vector.broadcast %63 : f32 to vector<8x2xf32>
    %1950 = arith.mulf %1943, %1949 : vector<8x2xf32>
    %1951 = arith.addf %1948, %1950 : vector<8x2xf32>
    %1952 = vector.broadcast %75 : f32 to vector<8x2xf32>
    %1953 = arith.addf %1951, %1952 : vector<8x2xf32>
    %1954 = vector.broadcast %40 : f32 to vector<8x2xf32>
    %1955 = arith.mulf %1933, %1954 : vector<8x2xf32>
    %1956 = vector.broadcast %52 : f32 to vector<8x2xf32>
    %1957 = arith.mulf %1938, %1956 : vector<8x2xf32>
    %1958 = arith.addf %1955, %1957 : vector<8x2xf32>
    %1959 = vector.broadcast %64 : f32 to vector<8x2xf32>
    %1960 = arith.mulf %1943, %1959 : vector<8x2xf32>
    %1961 = arith.addf %1958, %1960 : vector<8x2xf32>
    %1962 = vector.broadcast %76 : f32 to vector<8x2xf32>
    %1963 = arith.addf %1961, %1962 : vector<8x2xf32>
    %1964 = vector.broadcast %41 : f32 to vector<8x2xf32>
    %1965 = arith.mulf %1933, %1964 : vector<8x2xf32>
    %1966 = vector.broadcast %53 : f32 to vector<8x2xf32>
    %1967 = arith.mulf %1938, %1966 : vector<8x2xf32>
    %1968 = arith.addf %1965, %1967 : vector<8x2xf32>
    %1969 = vector.broadcast %65 : f32 to vector<8x2xf32>
    %1970 = arith.mulf %1943, %1969 : vector<8x2xf32>
    %1971 = arith.addf %1968, %1970 : vector<8x2xf32>
    %1972 = vector.broadcast %77 : f32 to vector<8x2xf32>
    %1973 = arith.addf %1971, %1972 : vector<8x2xf32>
    %1974 = vector.broadcast %42 : f32 to vector<8x2xf32>
    %1975 = arith.mulf %1933, %1974 : vector<8x2xf32>
    %1976 = vector.broadcast %54 : f32 to vector<8x2xf32>
    %1977 = arith.mulf %1938, %1976 : vector<8x2xf32>
    %1978 = arith.addf %1975, %1977 : vector<8x2xf32>
    %1979 = vector.broadcast %66 : f32 to vector<8x2xf32>
    %1980 = arith.mulf %1943, %1979 : vector<8x2xf32>
    %1981 = arith.addf %1978, %1980 : vector<8x2xf32>
    %1982 = vector.broadcast %78 : f32 to vector<8x2xf32>
    %1983 = arith.addf %1981, %1982 : vector<8x2xf32>
    %1984 = vector.broadcast %43 : f32 to vector<8x2xf32>
    %1985 = arith.mulf %1933, %1984 : vector<8x2xf32>
    %1986 = vector.broadcast %55 : f32 to vector<8x2xf32>
    %1987 = arith.mulf %1938, %1986 : vector<8x2xf32>
    %1988 = arith.addf %1985, %1987 : vector<8x2xf32>
    %1989 = vector.broadcast %67 : f32 to vector<8x2xf32>
    %1990 = arith.mulf %1943, %1989 : vector<8x2xf32>
    %1991 = arith.addf %1988, %1990 : vector<8x2xf32>
    %1992 = vector.broadcast %79 : f32 to vector<8x2xf32>
    %1993 = arith.addf %1991, %1992 : vector<8x2xf32>
    %1994 = vector.broadcast %44 : f32 to vector<8x2xf32>
    %1995 = arith.mulf %1933, %1994 : vector<8x2xf32>
    %1996 = vector.broadcast %56 : f32 to vector<8x2xf32>
    %1997 = arith.mulf %1938, %1996 : vector<8x2xf32>
    %1998 = arith.addf %1995, %1997 : vector<8x2xf32>
    %1999 = vector.broadcast %68 : f32 to vector<8x2xf32>
    %2000 = arith.mulf %1943, %1999 : vector<8x2xf32>
    %2001 = arith.addf %1998, %2000 : vector<8x2xf32>
    %2002 = vector.broadcast %80 : f32 to vector<8x2xf32>
    %2003 = arith.addf %2001, %2002 : vector<8x2xf32>
    %2004 = vector.broadcast %45 : f32 to vector<8x2xf32>
    %2005 = arith.mulf %1933, %2004 : vector<8x2xf32>
    %2006 = vector.broadcast %57 : f32 to vector<8x2xf32>
    %2007 = arith.mulf %1938, %2006 : vector<8x2xf32>
    %2008 = arith.addf %2005, %2007 : vector<8x2xf32>
    %2009 = vector.broadcast %69 : f32 to vector<8x2xf32>
    %2010 = arith.mulf %1943, %2009 : vector<8x2xf32>
    %2011 = arith.addf %2008, %2010 : vector<8x2xf32>
    %2012 = vector.broadcast %81 : f32 to vector<8x2xf32>
    %2013 = arith.addf %2011, %2012 : vector<8x2xf32>
    %2014 = vector.broadcast %46 : f32 to vector<8x2xf32>
    %2015 = arith.mulf %1933, %2014 : vector<8x2xf32>
    %2016 = vector.broadcast %58 : f32 to vector<8x2xf32>
    %2017 = arith.mulf %1938, %2016 : vector<8x2xf32>
    %2018 = arith.addf %2015, %2017 : vector<8x2xf32>
    %2019 = vector.broadcast %70 : f32 to vector<8x2xf32>
    %2020 = arith.mulf %1943, %2019 : vector<8x2xf32>
    %2021 = arith.addf %2018, %2020 : vector<8x2xf32>
    %2022 = vector.broadcast %82 : f32 to vector<8x2xf32>
    %2023 = arith.addf %2021, %2022 : vector<8x2xf32>
    %2024 = vector.broadcast %47 : f32 to vector<8x2xf32>
    %2025 = arith.mulf %1933, %2024 : vector<8x2xf32>
    %2026 = vector.broadcast %59 : f32 to vector<8x2xf32>
    %2027 = arith.mulf %1938, %2026 : vector<8x2xf32>
    %2028 = arith.addf %2025, %2027 : vector<8x2xf32>
    %2029 = vector.broadcast %71 : f32 to vector<8x2xf32>
    %2030 = arith.mulf %1943, %2029 : vector<8x2xf32>
    %2031 = arith.addf %2028, %2030 : vector<8x2xf32>
    %2032 = vector.broadcast %83 : f32 to vector<8x2xf32>
    %2033 = arith.addf %2031, %2032 : vector<8x2xf32>
    %2034 = vector.broadcast %48 : f32 to vector<8x2xf32>
    %2035 = arith.mulf %1933, %2034 : vector<8x2xf32>
    %2036 = vector.broadcast %60 : f32 to vector<8x2xf32>
    %2037 = arith.mulf %1938, %2036 : vector<8x2xf32>
    %2038 = arith.addf %2035, %2037 : vector<8x2xf32>
    %2039 = vector.broadcast %72 : f32 to vector<8x2xf32>
    %2040 = arith.mulf %1943, %2039 : vector<8x2xf32>
    %2041 = arith.addf %2038, %2040 : vector<8x2xf32>
    %2042 = vector.broadcast %84 : f32 to vector<8x2xf32>
    %2043 = arith.addf %2041, %2042 : vector<8x2xf32>
    %2044 = vector.broadcast %49 : f32 to vector<8x2xf32>
    %2045 = arith.mulf %1933, %2044 : vector<8x2xf32>
    %2046 = vector.broadcast %61 : f32 to vector<8x2xf32>
    %2047 = arith.mulf %1938, %2046 : vector<8x2xf32>
    %2048 = arith.addf %2045, %2047 : vector<8x2xf32>
    %2049 = vector.broadcast %73 : f32 to vector<8x2xf32>
    %2050 = arith.mulf %1943, %2049 : vector<8x2xf32>
    %2051 = arith.addf %2048, %2050 : vector<8x2xf32>
    %2052 = vector.broadcast %85 : f32 to vector<8x2xf32>
    %2053 = arith.addf %2051, %2052 : vector<8x2xf32>
    %2054 = vector.broadcast %50 : f32 to vector<8x2xf32>
    %2055 = arith.mulf %1933, %2054 : vector<8x2xf32>
    %2056 = vector.broadcast %62 : f32 to vector<8x2xf32>
    %2057 = arith.mulf %1938, %2056 : vector<8x2xf32>
    %2058 = arith.addf %2055, %2057 : vector<8x2xf32>
    %2059 = vector.broadcast %74 : f32 to vector<8x2xf32>
    %2060 = arith.mulf %1943, %2059 : vector<8x2xf32>
    %2061 = arith.addf %2058, %2060 : vector<8x2xf32>
    %2062 = vector.broadcast %86 : f32 to vector<8x2xf32>
    %2063 = arith.addf %2061, %2062 : vector<8x2xf32>
    %cst_300 = arith.constant 0.000000e+00 : f32
    %2064 = vector.broadcast %cst_300 : f32 to vector<8x2xf32>
    %2065 = arith.maximumf %1953, %2064 : vector<8x2xf32>
    %cst_301 = arith.constant 0.000000e+00 : f32
    %2066 = vector.broadcast %cst_301 : f32 to vector<8x2xf32>
    %2067 = arith.maximumf %1963, %2066 : vector<8x2xf32>
    %cst_302 = arith.constant 0.000000e+00 : f32
    %2068 = vector.broadcast %cst_302 : f32 to vector<8x2xf32>
    %2069 = arith.maximumf %1973, %2068 : vector<8x2xf32>
    %cst_303 = arith.constant 0.000000e+00 : f32
    %2070 = vector.broadcast %cst_303 : f32 to vector<8x2xf32>
    %2071 = arith.maximumf %1983, %2070 : vector<8x2xf32>
    %cst_304 = arith.constant 0.000000e+00 : f32
    %2072 = vector.broadcast %cst_304 : f32 to vector<8x2xf32>
    %2073 = arith.maximumf %1993, %2072 : vector<8x2xf32>
    %cst_305 = arith.constant 0.000000e+00 : f32
    %2074 = vector.broadcast %cst_305 : f32 to vector<8x2xf32>
    %2075 = arith.maximumf %2003, %2074 : vector<8x2xf32>
    %cst_306 = arith.constant 0.000000e+00 : f32
    %2076 = vector.broadcast %cst_306 : f32 to vector<8x2xf32>
    %2077 = arith.maximumf %2013, %2076 : vector<8x2xf32>
    %cst_307 = arith.constant 0.000000e+00 : f32
    %2078 = vector.broadcast %cst_307 : f32 to vector<8x2xf32>
    %2079 = arith.maximumf %2023, %2078 : vector<8x2xf32>
    %cst_308 = arith.constant 0.000000e+00 : f32
    %2080 = vector.broadcast %cst_308 : f32 to vector<8x2xf32>
    %2081 = arith.maximumf %2033, %2080 : vector<8x2xf32>
    %cst_309 = arith.constant 0.000000e+00 : f32
    %2082 = vector.broadcast %cst_309 : f32 to vector<8x2xf32>
    %2083 = arith.maximumf %2043, %2082 : vector<8x2xf32>
    %cst_310 = arith.constant 0.000000e+00 : f32
    %2084 = vector.broadcast %cst_310 : f32 to vector<8x2xf32>
    %2085 = arith.maximumf %2053, %2084 : vector<8x2xf32>
    %cst_311 = arith.constant 0.000000e+00 : f32
    %2086 = vector.broadcast %cst_311 : f32 to vector<8x2xf32>
    %2087 = arith.maximumf %2063, %2086 : vector<8x2xf32>
    %2088 = vector.broadcast %87 : f32 to vector<8x2xf32>
    %2089 = arith.mulf %2065, %2088 : vector<8x2xf32>
    %2090 = vector.broadcast %90 : f32 to vector<8x2xf32>
    %2091 = arith.mulf %2067, %2090 : vector<8x2xf32>
    %2092 = arith.addf %2089, %2091 : vector<8x2xf32>
    %2093 = vector.broadcast %93 : f32 to vector<8x2xf32>
    %2094 = arith.mulf %2069, %2093 : vector<8x2xf32>
    %2095 = arith.addf %2092, %2094 : vector<8x2xf32>
    %2096 = vector.broadcast %96 : f32 to vector<8x2xf32>
    %2097 = arith.mulf %2071, %2096 : vector<8x2xf32>
    %2098 = arith.addf %2095, %2097 : vector<8x2xf32>
    %2099 = vector.broadcast %99 : f32 to vector<8x2xf32>
    %2100 = arith.mulf %2073, %2099 : vector<8x2xf32>
    %2101 = arith.addf %2098, %2100 : vector<8x2xf32>
    %2102 = vector.broadcast %102 : f32 to vector<8x2xf32>
    %2103 = arith.mulf %2075, %2102 : vector<8x2xf32>
    %2104 = arith.addf %2101, %2103 : vector<8x2xf32>
    %2105 = vector.broadcast %105 : f32 to vector<8x2xf32>
    %2106 = arith.mulf %2077, %2105 : vector<8x2xf32>
    %2107 = arith.addf %2104, %2106 : vector<8x2xf32>
    %2108 = vector.broadcast %108 : f32 to vector<8x2xf32>
    %2109 = arith.mulf %2079, %2108 : vector<8x2xf32>
    %2110 = arith.addf %2107, %2109 : vector<8x2xf32>
    %2111 = vector.broadcast %111 : f32 to vector<8x2xf32>
    %2112 = arith.mulf %2081, %2111 : vector<8x2xf32>
    %2113 = arith.addf %2110, %2112 : vector<8x2xf32>
    %2114 = vector.broadcast %114 : f32 to vector<8x2xf32>
    %2115 = arith.mulf %2083, %2114 : vector<8x2xf32>
    %2116 = arith.addf %2113, %2115 : vector<8x2xf32>
    %2117 = vector.broadcast %117 : f32 to vector<8x2xf32>
    %2118 = arith.mulf %2085, %2117 : vector<8x2xf32>
    %2119 = arith.addf %2116, %2118 : vector<8x2xf32>
    %2120 = vector.broadcast %120 : f32 to vector<8x2xf32>
    %2121 = arith.mulf %2087, %2120 : vector<8x2xf32>
    %2122 = arith.addf %2119, %2121 : vector<8x2xf32>
    %2123 = vector.broadcast %123 : f32 to vector<8x2xf32>
    %2124 = arith.addf %2122, %2123 : vector<8x2xf32>
    %2125 = vector.broadcast %88 : f32 to vector<8x2xf32>
    %2126 = arith.mulf %2065, %2125 : vector<8x2xf32>
    %2127 = vector.broadcast %91 : f32 to vector<8x2xf32>
    %2128 = arith.mulf %2067, %2127 : vector<8x2xf32>
    %2129 = arith.addf %2126, %2128 : vector<8x2xf32>
    %2130 = vector.broadcast %94 : f32 to vector<8x2xf32>
    %2131 = arith.mulf %2069, %2130 : vector<8x2xf32>
    %2132 = arith.addf %2129, %2131 : vector<8x2xf32>
    %2133 = vector.broadcast %97 : f32 to vector<8x2xf32>
    %2134 = arith.mulf %2071, %2133 : vector<8x2xf32>
    %2135 = arith.addf %2132, %2134 : vector<8x2xf32>
    %2136 = vector.broadcast %100 : f32 to vector<8x2xf32>
    %2137 = arith.mulf %2073, %2136 : vector<8x2xf32>
    %2138 = arith.addf %2135, %2137 : vector<8x2xf32>
    %2139 = vector.broadcast %103 : f32 to vector<8x2xf32>
    %2140 = arith.mulf %2075, %2139 : vector<8x2xf32>
    %2141 = arith.addf %2138, %2140 : vector<8x2xf32>
    %2142 = vector.broadcast %106 : f32 to vector<8x2xf32>
    %2143 = arith.mulf %2077, %2142 : vector<8x2xf32>
    %2144 = arith.addf %2141, %2143 : vector<8x2xf32>
    %2145 = vector.broadcast %109 : f32 to vector<8x2xf32>
    %2146 = arith.mulf %2079, %2145 : vector<8x2xf32>
    %2147 = arith.addf %2144, %2146 : vector<8x2xf32>
    %2148 = vector.broadcast %112 : f32 to vector<8x2xf32>
    %2149 = arith.mulf %2081, %2148 : vector<8x2xf32>
    %2150 = arith.addf %2147, %2149 : vector<8x2xf32>
    %2151 = vector.broadcast %115 : f32 to vector<8x2xf32>
    %2152 = arith.mulf %2083, %2151 : vector<8x2xf32>
    %2153 = arith.addf %2150, %2152 : vector<8x2xf32>
    %2154 = vector.broadcast %118 : f32 to vector<8x2xf32>
    %2155 = arith.mulf %2085, %2154 : vector<8x2xf32>
    %2156 = arith.addf %2153, %2155 : vector<8x2xf32>
    %2157 = vector.broadcast %121 : f32 to vector<8x2xf32>
    %2158 = arith.mulf %2087, %2157 : vector<8x2xf32>
    %2159 = arith.addf %2156, %2158 : vector<8x2xf32>
    %2160 = vector.broadcast %124 : f32 to vector<8x2xf32>
    %2161 = arith.addf %2159, %2160 : vector<8x2xf32>
    %2162 = vector.broadcast %89 : f32 to vector<8x2xf32>
    %2163 = arith.mulf %2065, %2162 : vector<8x2xf32>
    %2164 = vector.broadcast %92 : f32 to vector<8x2xf32>
    %2165 = arith.mulf %2067, %2164 : vector<8x2xf32>
    %2166 = arith.addf %2163, %2165 : vector<8x2xf32>
    %2167 = vector.broadcast %95 : f32 to vector<8x2xf32>
    %2168 = arith.mulf %2069, %2167 : vector<8x2xf32>
    %2169 = arith.addf %2166, %2168 : vector<8x2xf32>
    %2170 = vector.broadcast %98 : f32 to vector<8x2xf32>
    %2171 = arith.mulf %2071, %2170 : vector<8x2xf32>
    %2172 = arith.addf %2169, %2171 : vector<8x2xf32>
    %2173 = vector.broadcast %101 : f32 to vector<8x2xf32>
    %2174 = arith.mulf %2073, %2173 : vector<8x2xf32>
    %2175 = arith.addf %2172, %2174 : vector<8x2xf32>
    %2176 = vector.broadcast %104 : f32 to vector<8x2xf32>
    %2177 = arith.mulf %2075, %2176 : vector<8x2xf32>
    %2178 = arith.addf %2175, %2177 : vector<8x2xf32>
    %2179 = vector.broadcast %107 : f32 to vector<8x2xf32>
    %2180 = arith.mulf %2077, %2179 : vector<8x2xf32>
    %2181 = arith.addf %2178, %2180 : vector<8x2xf32>
    %2182 = vector.broadcast %110 : f32 to vector<8x2xf32>
    %2183 = arith.mulf %2079, %2182 : vector<8x2xf32>
    %2184 = arith.addf %2181, %2183 : vector<8x2xf32>
    %2185 = vector.broadcast %113 : f32 to vector<8x2xf32>
    %2186 = arith.mulf %2081, %2185 : vector<8x2xf32>
    %2187 = arith.addf %2184, %2186 : vector<8x2xf32>
    %2188 = vector.broadcast %116 : f32 to vector<8x2xf32>
    %2189 = arith.mulf %2083, %2188 : vector<8x2xf32>
    %2190 = arith.addf %2187, %2189 : vector<8x2xf32>
    %2191 = vector.broadcast %119 : f32 to vector<8x2xf32>
    %2192 = arith.mulf %2085, %2191 : vector<8x2xf32>
    %2193 = arith.addf %2190, %2192 : vector<8x2xf32>
    %2194 = vector.broadcast %122 : f32 to vector<8x2xf32>
    %2195 = arith.mulf %2087, %2194 : vector<8x2xf32>
    %2196 = arith.addf %2193, %2195 : vector<8x2xf32>
    %2197 = vector.broadcast %125 : f32 to vector<8x2xf32>
    %2198 = arith.addf %2196, %2197 : vector<8x2xf32>
    %2199 = arith.addf %1907, %2124 : vector<8x2xf32>
    %c0_312 = arith.constant 0 : index
    %c0_313 = arith.constant 0 : index
    %c0_314 = arith.constant 0 : index
    %2200 = vector.load %arg4[%c0_312, %c0_313, %c0_314] : memref<3x8x2xf32, #tpu.memory_space<vmem>>, vector<1x8x2xf32>
    %2201 = vector.shape_cast %2200 : vector<1x8x2xf32> to vector<8x2xf32>
    %2202 = vector.shape_cast %2199 : vector<8x2xf32> to vector<1x8x2xf32>
    tpu.vector_store %arg4[%c0_312, %c0_313, %c0_314], %2202 {strides = array<i32>} : memref<3x8x2xf32, #tpu.memory_space<vmem>>, vector<1x8x2xf32>,
    %2203 = arith.addf %1909, %2161 : vector<8x2xf32>
    %c1_315 = arith.constant 1 : index
    %c0_316 = arith.constant 0 : index
    %c0_317 = arith.constant 0 : index
    %2204 = vector.load %arg4[%c1_315, %c0_316, %c0_317] : memref<3x8x2xf32, #tpu.memory_space<vmem>>, vector<1x8x2xf32>
    %2205 = vector.shape_cast %2204 : vector<1x8x2xf32> to vector<8x2xf32>
    %2206 = vector.shape_cast %2203 : vector<8x2xf32> to vector<1x8x2xf32>
    tpu.vector_store %arg4[%c1_315, %c0_316, %c0_317], %2206 {strides = array<i32>} : memref<3x8x2xf32, #tpu.memory_space<vmem>>, vector<1x8x2xf32>,
    %2207 = arith.addf %1911, %2198 : vector<8x2xf32>
    %c2_318 = arith.constant 2 : index
    %c0_319 = arith.constant 0 : index
    %c0_320 = arith.constant 0 : index
    %2208 = vector.load %arg4[%c2_318, %c0_319, %c0_320] : memref<3x8x2xf32, #tpu.memory_space<vmem>>, vector<1x8x2xf32>
    %2209 = vector.shape_cast %2208 : vector<1x8x2xf32> to vector<8x2xf32>
    %2210 = vector.shape_cast %2207 : vector<8x2xf32> to vector<1x8x2xf32>
    tpu.vector_store %arg4[%c2_318, %c0_319, %c0_320], %2210 {strides = array<i32>} : memref<3x8x2xf32, #tpu.memory_space<vmem>>, vector<1x8x2xf32>,
    return
  }
  func.func @transform_0(%arg0: i32) -> (i32, i32, i32) {
    %c0_i32 = arith.constant 0 : i32
    %c0_i32_0 = arith.constant 0 : i32
    %c0_i32_1 = arith.constant 0 : i32
    return %c0_i32, %c0_i32_0, %arg0 : i32, i32, i32
  }
  func.func @transform_1(%arg0: i32) -> i32 {
    %c0_i32 = arith.constant 0 : i32
    %c0_i32_0 = arith.constant 0 : i32
    return %c0_i32 : i32
  }
  func.func @transform_2(%arg0: i32) -> i32 {
    %c0_i32 = arith.constant 0 : i32
    %c0_i32_0 = arith.constant 0 : i32
    return %c0_i32 : i32
  }
  func.func @transform_3(%arg0: i32) -> (i32, i32, i32) {
    %c0_i32 = arith.constant 0 : i32
    %c0_i32_0 = arith.constant 0 : i32
    %c0_i32_1 = arith.constant 0 : i32
    return %c0_i32, %c0_i32_0, %arg0 : i32, i32, i32
  }
}

</mosaic_0001>

<bundles_post_ra>
// kernel: block_forward_channel_major.1
= control target key start
LH: loop header
LB: loop body
LE: loop exit
PB: predicated region body
PF: predicated region fallthrough
CT: control target
= control target key end

     0   :  { %s4427_s0 = inlined_call_operand.vmem [shape: f32[3,8,2], index: 0, kind: input, shape index: {}]   ;;  %s4428_s1 = inlined_call_operand.vmem [shape: f32[138], index: 1, kind: input, shape index: {}]   ;;  %s4429_s2 = inlined_call_operand.<no memory space> [shape: s32[1], index: 2, kind: input, shape index: {}]   ;;  %s4430_s3 = inlined_call_operand.vmem [shape: f32[3,8,2], index: 3, kind: output, shape index: {}]  }
   0x1   :  { %4672 = sst [smem:[#allocation106_spill]] %s4430_s3 }
   0x2   :  { %9 = vsyncpa [#allocation4], 0  ;;  %s18_s14 = sshll.u32 %s4428_s1, 4  ;;  %s19_s14 = int_to_ptr.vmem [resolvable:$true] %s18_s14 }
   0x3   :  { %s2333_s15 = scalar_lea.vmem %s19_s14, 32  ;;  %p2338_p1 = scmp.lt.s32.totalorder %s19_s14, %s19_s14 }
   0x4   :  { %p2334_p0 = scmp.ne.s32.totalorder %s19_s14, %s2333_s15  ;;  %p2339_p2 = scmp.lt.s32.totalorder %s2333_s15, %s2333_s15 }
   0x6   :  { %p2340_p3 = por %p2339_p2, %p2338_p1 }
   0x8   :  { %p2341_p4 = pnand %p2340_p3, %p2334_p0 }
   0xa   :  { %2344 = shalt.err (!%p2341_p4)
}
   0xb   :  { %s2347_s16 = smov [#allocation3]  }
   0xc   :  { %21 = dma.vmem_to_smem %s19_s14, 32, %s2347_s16, [#allocation4]  }
   0xd   :  { %2345 = dma.done.wait [#allocation4], 32  }
   0xe   :  { %2346 = vsyncadd [#allocation4], 4294967264 }
   0xf   :  { %27 = sfence }
  0x10   :  { %s2371_s2 = sld [smem:[#allocation3]]  ;;  %s2373_s17 = sld [smem:[#allocation3 + $0x1]]  ;;  %v301_v0 = vlaneseq  ;;  %v2402_v1 = vld [vmem:[%s4427_s0] sm:$0xff]  ;;  %v2415_v5 = vld [vmem:[%s4427_s0 + $0x8] sm:$0xff]  ;;  %v2442_v14 = vld [vmem:[%s4427_s0 + $0x10] sm:$0xff]  ;;  %vm319_vm0 = vcmask 9216  }
  0x11   :  { %s2375_s1 = sld [smem:[#allocation3 + $0x2]]  ;;  %s2377_s18 = sld [smem:[#allocation3 + $0x3]]  ;;  %vm407_vm1 = vcmask 10240   ;;  %vm495_vm2 = vcmask 11264   ;;  %vm583_vm3 = vcmask 12288   ;;  %vm671_vm4 = vcmask 13312  }
  0x12   :  { %s2379_s19 = sld [smem:[#allocation3 + $0x4]]  ;;  %s2381_s20 = sld [smem:[#allocation3 + $0x5]]  ;;  %v2406_v4 = vshrl.u32 %v301_v0, 7  ;;  %vm759_vm5 = vcmask 14336   ;;  %vm847_vm6 = vcmask 15360   ;;  %vm273_vm7 = vcmask 8192  }
  0x13   :  { %s2383_s21 = sld [smem:[#allocation3 + $0x6]]  ;;  %s2385_s22 = sld [smem:[#allocation3 + $0x7]]  ;;  %vm371_vm8 = vcmask 9217   ;;  %vm459_vm9 = vcmask 10242   ;;  %vm547_vm10 = vcmask 11267   ;;  %vm635_vm11 = vcmask 12292  }
  0x14   :  { %s2387_s23 = sld [smem:[#allocation3 + $0x8]]  ;;  %s2389_s24 = sld [smem:[#allocation3 + $0x9]]  ;;  %vm723_vm12 = vcmask 13317   ;;  %vm811_vm13 = vcmask 14342   ;;  %vm899_vm14 = vcmask 15367  }
  0x15   :  { %s2391_s25 = sld [smem:[#allocation3 + $0xa]]  ;;  %s2393_s26 = sld [smem:[#allocation3 + $0xb]] }
  0x16   :  { %4673 = sst [smem:[#allocation6_spill]] %s2371_s2  ;;  %s2395_s27 = sld [smem:[#allocation3 + $0xc]]  ;;  %v4462_v2 = vstv %s2371_s2  ;;  %v4460_v3 = vstv %s2373_s17 }
  0x17   :  { %4674 = sst [smem:[#allocation7_spill]] %s2373_s17  ;;  %s2397_s28 = sld [smem:[#allocation3 + $0xd]]  ;;  %v172_v6 = vmul.f32 %v4462_v2, %v2402_v1  ;;  %v4461_v7 = vstv %s2377_s18  ;;  %v180_v8 = vmul.f32 %v4460_v3, %v2402_v1  ;;  %v4458_v9 = vstv %s2375_s1 }
  0x18   :  { %4675 = sst [smem:[#allocation8_spill]] %s2375_s1  ;;  %s2408_s4 = sld [smem:[#allocation3 + $0xe]]  ;;  %v174_v10 = vmul.f32 %v2415_v5, %v4461_v7  ;;  %v4459_v11 = vstv %s2379_s19  ;;  %v188_v12 = vmul.f32 %v4458_v9, %v2402_v1  ;;  %v4457_v13 = vstv %s2381_s20 }
  0x19   :  { %4676 = sst [smem:[#allocation9_spill]] %s2377_s18  ;;  %s2410_s5 = sld [smem:[#allocation3 + $0xf]]  ;;  %v4454_v15 = vstv %s2383_s21  ;;  %v182_v16 = vmul.f32 %v2415_v5, %v4459_v11  ;;  %v4453_v17 = vstv %s2385_s22  ;;  %v190_v18 = vmul.f32 %v2415_v5, %v4457_v13 }
  0x1a   :  { %4677 = sst [smem:[#allocation10_spill]] %s2379_s19  ;;  %s2425_s8 = sld [smem:[#allocation3 + $0x10]]  ;;  %v175_v19 = vadd.f32 %v174_v10, %v172_v6  ;;  %v177_v20 = vmul.f32 %v2442_v14, %v4454_v15  ;;  %v185_v21 = vmul.f32 %v2442_v14, %v4453_v17  ;;  %v4449_v22 = vstv %s2387_s23 }
  0x1b   :  { %4678 = sst [smem:[#allocation11_spill]] %s2381_s20  ;;  %s2427_s9 = sld [smem:[#allocation3 + $0x11]]  ;;  %v183_v23 = vadd.f32 %v182_v16, %v180_v8  ;;  %v191_v24 = vadd.f32 %v190_v18, %v188_v12  ;;  %v193_v25 = vmul.f32 %v2442_v14, %v4449_v22  ;;  %v4456_v26 = vstv %s2389_s24 }
  0x1c   :  { %4679 = sst [smem:[#allocation12_spill]] %s2383_s21  ;;  %s2437_s10 = sld [smem:[#allocation3 + $0x12]]  ;;  %v2475_v27 = vadd.f32 %v177_v20, %v175_v19  ;;  %v196_v28 = vmul.f32 %v4456_v26, %v2402_v1  ;;  %v4455_v29 = vstv %s2395_s27  ;;  %v4452_v30 = vstv %s2391_s25 }
  0x1d   :  { %4680 = sst [smem:[#allocation13_spill]] %s2385_s22  ;;  %s2452_s13 = sld [smem:[#allocation3 + $0x13]]  ;;  %v2482_v31 = vadd.f32 %v185_v21, %v183_v23  ;;  %v2484_v32 = vadd.f32 %v193_v25, %v191_v24  ;;  %v198_v33 = vmul.f32 %v2415_v5, %v4455_v29  ;;  %v204_v36 = vmul.f32 %v4452_v30, %v2402_v1 }
  0x1e   :  { %4681 = sst [smem:[#allocation14_spill]] %s2387_s23  ;;  %s2454_s14 = sld [smem:[#allocation3 + $0x15]]  ;;  %v4450_v37 = vstv %s2397_s28  ;;  %v4448_v42 = vstv %s2393_s26  ;;  %v4447_v44 = vstv %s2408_s4  ;;  %v2572_v21 = vsub.s32 1, %v2406_v4 }
  0x1f   :  { %4682 = sst [smem:[#allocation15_spill]] %s2389_s24  ;;  %s2463_s15 = sld [smem:[#allocation3 + $0x14]]  ;;  %v4451_v34 = vstv %s2410_s5  ;;  %v199_v39 = vadd.f32 %v198_v33, %v196_v28  ;;  %v206_v40 = vmul.f32 %v2415_v5, %v4450_v37  ;;  %v212_v43 = vmul.f32 %v4448_v42, %v2402_v1 }
  0x20   :  { %4683 = sst [smem:[#allocation16_spill]] %s2391_s25  ;;  %s2465_s16 = sld [smem:[#allocation3 + $0x16]]  ;;  %v201_v35 = vmul.f32 %v2442_v14, %v4451_v34  ;;  %v4446_v38 = vstv %s2425_s8  ;;  %v214_v49 = vmul.f32 %v2415_v5, %v4447_v44  ;;  %v2579_v25 = vsub.s32 2, %v2406_v4 }
  0x21   :  { %4684 = sst [smem:[#allocation17_spill]] %s2393_s26  ;;  %s2471_s29 = sld [smem:[#allocation3 + $0x18]]  ;;  %v209_v41 = vmul.f32 %v2442_v14, %v4446_v38  ;;  %v4445_v45 = vstv %s2427_s9  ;;  %v207_v48 = vadd.f32 %v206_v40, %v204_v36  ;;  %v2582_v28 = vsub.s32 3, %v2406_v4 }
  0x22   :  { %4685 = sst [smem:[#allocation18_spill]] %s2395_s27  ;;  %s2473_s30 = sld [smem:[#allocation3 + $0x19]]  ;;  %v4444_v46 = vstv %s2437_s10  ;;  %v2519_v47 = vadd.f32 %v201_v35, %v199_v39  ;;  %v217_v50 = vmul.f32 %v2442_v14, %v4445_v45  ;;  %v215_v56 = vadd.f32 %v214_v49, %v212_v43 }
  0x23   :  { %4686 = sst [smem:[#allocation19_spill]] %s2397_s28  ;;  %s2490_s6 = sld [smem:[#allocation3 + $0x17]]  ;;  %v220_v51 = vmul.f32 %v4444_v46, %v2402_v1  ;;  %v4441_v54 = vstv %s2452_s13  ;;  %v2537_v55 = vadd.f32 %v209_v41, %v207_v48 }
  0x24   :  { %4687 = sst [smem:[#allocation20_spill]] %s2408_s4  ;;  %s2492_s7 = sld [smem:[#allocation3 + $0x1a]]  ;;  %v4443_v52 = vstv %s2454_s14  ;;  %v228_v59 = vmul.f32 %v4441_v54, %v2402_v1  ;;  %v2553_v63 = vadd.f32 %v217_v50, %v215_v56  ;;  %v243_v18 = vmul.f32 %v2519_v47, %v2475_v27 }
  0x25   :  { %4688 = sst [smem:[#allocation21_spill]] %s2410_s5  ;;  %s2515_s11 = sld [smem:[#allocation3 + $0x1b]]  ;;  %v222_v57 = vmul.f32 %v2415_v5, %v4443_v52  ;;  %v4439_v62 = vstv %s2463_s15  ;;  %v244_v23 = vmul.f32 %v2537_v55, %v2482_v31  ;;  %v309_v56 = vrot.slane %v2537_v55, %v2572_v21 }
  0x26   :  { %4689 = sst [smem:[#allocation22_spill]] %s2425_s8  ;;  %s2517_s12 = sld [smem:[#allocation3 + $0x1e]]  ;;  %v4440_v60 = vstv %s2465_s16  ;;  %v236_v10 = vmul.f32 %v4439_v62, %v2402_v1  ;;  %v246_v24 = vmul.f32 %v2553_v63, %v2484_v32 }
  0x27   :  { %4690 = sst [smem:[#allocation23_spill]] %s2427_s9  ;;  %v4442_v53 = vstv %s2471_s29  ;;  %s2535_s4 = sld [smem:[#allocation3 + $0x24]]  ;;  %v223_v0 = vadd.f32 %v222_v57, %v220_v51  ;;  %v230_v6 = vmul.f32 %v2415_v5, %v4440_v60  ;;  %v245_v43 = vadd.f32 %v244_v23, %v243_v18 }
  0x28   :  { %4691 = sst [smem:[#allocation24_spill]] %s2437_s10  ;;  %s2527_s8 = sld [smem:[#allocation3 + $0x21]]  ;;  %v225_v58 = vmul.f32 %v2442_v14, %v4442_v53  ;;  %v4437_v61 = vstv %s2473_s30  ;;  %v304_v51 = vrot.slane %v2519_v47, %v2572_v21  ;;  %v480_v18 = vrot.slane %v2519_v47, %v2582_v28 }
  0x29   :  { %4692 = sst [smem:[#allocation25_spill]] %s2452_s13  ;;  %s2545_s10 = sld [smem:[#allocation3 + $0x1c]]  ;;  %v233_v8 = vmul.f32 %v2442_v14, %v4437_v61  ;;  %v4438_v12 = vstv %s2490_s6  ;;  %v231_v19 = vadd.f32 %v230_v6, %v228_v59  ;;  %v247_v57 = vadd.f32 %v246_v24, %v245_v43 }
  0x2a   :  { %4693 = sst [smem:[#allocation26_spill]] %s2454_s14  ;;  %v4436_v16 = vstv %s2492_s7  ;;  %v238_v20 = vmul.f32 %v2415_v5, %v4438_v12  ;;  %v2584_v33 = vadd.f32 %v225_v58, %v223_v0  ;;  %v315_v58 = vrot.slane %v2553_v63, %v2572_v21  ;;  %s3116_s13 = sld [smem:[#allocation3 + $0x30]] }
  0x2b   :  { %4694 = sst [smem:[#allocation27_spill]] %s2463_s15  ;;  %v2589_v35 = vmul.f32 %v2442_v14, %v4436_v16  ;;  %v2592_v36 = vstv %s2515_s11  ;;  %v2601_v40 = vadd.f32 %v233_v8, %v231_v19  ;;  %v392_v59 = vrot.slane %v2519_v47, %v2579_v25  ;;  %s3097_s11 = sld [smem:[#allocation3 + $0x2c]] }
  0x2c   :  { %4695 = sst [smem:[#allocation28_spill]] %s2465_s16  ;;  %v2595_v39 = vstv %s2517_s12  ;;  %v239_v41 = vadd.f32 %v238_v20, %v236_v10  ;;  %v397_v0 = vrot.slane %v2537_v55, %v2579_v25  ;;  %v305_v6 = vmul.f32 %v304_v51, %v2475_v27  ;;  %s3081_s12 = sld [smem:[#allocation3 + $0x27]] }
  0x2d   :  { %4696 = sst [smem:[#allocation29_spill]] %s2471_s29  ;;  %v2607_v49 = vstv %s2535_s4  ;;  %v310_v8 = vmul.f32 %v309_v56, %v2482_v31  ;;  %v403_v10 = vrot.slane %v2553_v63, %v2579_v25  ;;  %v248_v19 = vmul.f32 0.57735026, %v247_v57  ;;  %s2650_s4 = sld [smem:[#allocation3 + $0x25]] }
  0x2e   :  { %4697 = sst [smem:[#allocation30_spill]] %s2473_s30  ;;  %s2597_s30 = sld [smem:[#allocation3 + $0x1f]]  ;;  %v2604_v48 = vstv %s2527_s8  ;;  %v316_v20 = vmul.f32 %v315_v58, %v2484_v32  ;;  %v393_v23 = vmul.f32 %v392_v59, %v2475_v27  ;;  %v398_v24 = vmul.f32 %v397_v0, %v2482_v31 }
  0x2f   :  { %4698 = sst [smem:[#allocation31_spill]] %s2490_s6  ;;  %s2599_s6 = sld [smem:[#allocation3 + $0x22]]  ;;  %v2610_v50 = vstv %s2545_s10  ;;  %v311_v43 = vadd.f32 %v310_v8, %v305_v6  ;;  %v404_v51 = vmul.f32 %v403_v10, %v2484_v32  ;;  %v481_v56 = vmul.f32 %v480_v18, %v2475_v27 }
  0x30   :  { %4699 = sst [smem:[#allocation32_spill]] %s2492_s7  ;;  %v485_v16 = vrot.slane %v2537_v55, %v2582_v28  ;;  %v249_v61 = vsub.f32 %v248_v19, %v248_v19  ;;  %v399_v12 = vadd.f32 %v398_v24, %v393_v23  ;;  %v491_v57 = vrot.slane %v2553_v63, %v2582_v28  ;;  %s2708_s8 = sld [smem:[#allocation3 + $0x1d]] }
  0x31   :  { %v2638_v58 = vsub.s32 4, %v2406_v4  ;;  %v317_v6 = vadd.f32 %v316_v20, %v311_v43  ;;  %s2716_s10 = sld [smem:[#allocation3 + $0x20]]  ;;  %s3106_s7 = sld [smem:[#allocation3 + $0x2d]] }
  0x32   :  { %v486_v8 = vmul.f32 %v485_v16, %v2482_v31  ;;  %v250_v10 = vmul.f32 1.442695, %v249_v61  ;;  %v405_v18 = vadd.f32 %v404_v51, %v399_v12  ;;  %v492_v62 = vmul.f32 %v491_v57, %v2484_v32  ;;  %4701 = sst [smem:[#allocation34_spill]] %s3081_s12  ;;  %s3108_s15 = sld [smem:[#allocation3 + $0x2e]] }
  0x33   :  { %v568_v19 = vrot.slane %v2519_v47, %v2638_v58  ;;  %v2652_v23 = vmul.f32 0.57735026, %v317_v6  ;;  %v573_v60 = vrot.slane %v2537_v55, %v2638_v58  ;;  %v579_v20 = vrot.slane %v2553_v63, %v2638_v58  ;;  %4706 = sst [smem:[#allocation39_spill]] %s3097_s11  ;;  %s3114_s16 = sld [smem:[#allocation3 + $0x2f]] }
  0x34   :  { %v2641_v59 = vstv %s2597_s30  ;;  %v487_v24 = vadd.f32 %v486_v8, %v481_v56  ;;  %2262 = vpow2.f32 %v250_v10  ;;  %v2658_v16 = vmul.f32 0.57735026, %v405_v18  ;;  %s2718_s30 = sld [smem:[#allocation3 + $0x23]]  ;;  %4710 = sst [smem:[#allocation43_spill]] %s3116_s13 }
  0x35   :  { %v2644_v0 = vstv %s2599_s6  ;;  %v569_v61 = vmul.f32 %v568_v19, %v2475_v27  ;;  %v2662_v12 = vsub.s32 5, %v2406_v4  ;;  %v320_v43 = vsel %vm319_vm0, %v2652_v23, -inf  ;;  %s2724_s6 = sld [smem:[#allocation3 + $0x26]]  ;;  %s3127_s29 = sld [smem:[#allocation3 + $0x33]] }
  0x36   :  { %v493_v51 = vadd.f32 %v492_v62, %v487_v24  ;;  %v574_v56 = vmul.f32 %v573_v60, %v2482_v31  ;;  %v580_v57 = vmul.f32 %v579_v20, %v2484_v32  ;;  %v321_v6 = vrot.slane %v320_v43, 4  ;;  %s3131_s14 = sld [smem:[#allocation3 + $0x34]]  ;;  %s3133_s9 = sld [smem:[#allocation3 + $0x35]] }
  0x37   :  { %v408_v8 = vsel %vm407_vm1, %v2658_v16, -inf  ;;  %v656_v10 = vrot.slane %v2519_v47, %v2662_v12  ;;  %v661_v18 = vrot.slane %v2537_v55, %v2662_v12  ;;  %v667_v60 = vrot.slane %v2553_v63, %v2662_v12  ;;  %4707 = sst [smem:[#allocation40_spill]] %s3106_s7  ;;  %s3136_s26 = sld [smem:[#allocation3 + $0x36]] }
  0x38   :  { %v409_v19 = vrot.slane %v408_v8, 4  ;;  %v2674_v54 = vmul.f32 0.57735026, %v493_v51  ;;  %v575_v53 = vadd.f32 %v574_v56, %v569_v61  ;;  %v2679_v62 = vadd.f32 %v2589_v35, %v239_v41  ;;  %4708 = sst [smem:[#allocation41_spill]] %s3108_s15  ;;  %s3138_s23 = sld [smem:[#allocation3 + $0x3f]] }
  0x39   :  { %v322_v24 = vmax.f32 %v320_v43, %v321_v6  ;;  %v657_v20 = vmul.f32 %v656_v10, %v2475_v27  ;;  %v662_v52 = vmul.f32 %v661_v18, %v2482_v31  ;;  %v668_v51 = vmul.f32 %v667_v60, %v2484_v32  ;;  %4709 = sst [smem:[#allocation42_spill]] %s3114_s16  ;;  %s3140_s28 = sld [smem:[#allocation3 + $0x37]] }
  0x3a   :  { %v410_v46 = vmax.f32 %v408_v8, %v409_v19  ;;  %v496_v45 = vsel %vm495_vm2, %v2674_v54, -inf  ;;  %v581_v38 = vadd.f32 %v580_v57, %v575_v53  ;;  %v2687_v42 = vstv %s2650_s4  ;;  %s3083_s4 = sld [smem:[#allocation3 + $0x28]]  ;;  %s3147_s22 = sld [smem:[#allocation3 + $0x39]] }
  0x3b   :  { %v323_v44 = vrot.slane %v322_v24, 2  ;;  %v497_v61 = vrot.slane %v496_v45, 4  ;;  %v663_v56 = vadd.f32 %v662_v52, %v657_v20  ;;  %v2692_v43 = vsub.s32 6, %v2406_v4  ;;  %4713 = sst [smem:[#allocation46_spill]] %s3127_s29  ;;  %s3142_s5 = sld [smem:[#allocation3 + $0x40]] }
  0x3c   :  { %v411_v35 = vrot.slane %v410_v46, 2  ;;  %v2689_v41 = vmul.f32 0.57735026, %v581_v38  ;;  %4714 = sst [smem:[#allocation47_spill]] %s3131_s14  ;;  %s3150_s21 = sld [smem:[#allocation3 + $0x3a]] }
  0x3d   :  { %v324_v6 = vmax.f32 %v322_v24, %v323_v44  ;;  %v498_v8 = vmax.f32 %v496_v45, %v497_v61  ;;  %v669_v10 = vadd.f32 %v668_v51, %v663_v56  ;;  %v744_v57 = vrot.slane %v2519_v47, %v2692_v43  ;;  %4715 = sst [smem:[#allocation48_spill]] %s3133_s9  ;;  %s3145_s25 = sld [smem:[#allocation3 + $0x38]] }
  0x3e   :  { %v412_v18 = vmax.f32 %v410_v46, %v411_v35  ;;  %v584_v53 = vsel %vm583_vm3, %v2689_v41, -inf  ;;  %v749_v52 = vrot.slane %v2537_v55, %v2692_v43  ;;  %v2263_v19 = vpop.eup %2262  ;;  %v755_v30 = vrot.slane %v2553_v63, %v2692_v43  ;;  %4716 = sst [smem:[#allocation49_spill]] %s3136_s26  ;;  %s3152_s27 = sld [smem:[#allocation3 + $0x3b]] }
  0x3f   :  { %v325_v38 = vrot.slane %v324_v6, 1  ;;  %v499_v60 = vrot.slane %v498_v8, 2  ;;  %v585_v20 = vrot.slane %v584_v53, 4  ;;  %v2700_v22 = vmul.f32 0.57735026, %v669_v10  ;;  %4717 = sst [smem:[#allocation50_spill]] %s3138_s23 }
  0x40   :  { %2264 = vrcp.f32 %v2263_v19  ;;  %v413_v44 = vrot.slane %v412_v18, 1  ;;  %v745_v45 = vmul.f32 %v744_v57, %v2475_v27  ;;  %v750_v46 = vmul.f32 %v749_v52, %v2482_v31  ;;  %4702 = sst [smem:[#allocation35_spill]] %s3083_s4  ;;  %s3157_s20 = sld [smem:[#allocation3 + $0x3d]] }
  0x41   :  { %v326_v24 = vmax.f32 %v324_v6, %v325_v38  ;;  %v500_v51 = vmax.f32 %v498_v8, %v499_v60  ;;  %v586_v61 = vmax.f32 %v584_v53, %v585_v20  ;;  %v672_v56 = vsel %vm671_vm4, %v2700_v22, -inf  ;;  %4718 = sst [smem:[#allocation51_spill]] %s3140_s28  ;;  %s3161_s1 = sld [smem:[#allocation3 + $0x3e]] }
  0x42   :  { %v414_v35 = vmax.f32 %v412_v18, %v413_v44  ;;  %v673_v37 = vrot.slane %v672_v56, 4  ;;  %v751_v34 = vadd.f32 %v750_v46, %v745_v45  ;;  %v2712_v52 = vsub.s32 7, %v2406_v4  ;;  %4719 = sst [smem:[#allocation52_spill]] %s3142_s5  ;;  %s3155_s24 = sld [smem:[#allocation3 + $0x3c]] }
  0x43   :  { %v327_v10 = vsub.f32 %v2652_v23, %v326_v24  ;;  %v501_v17 = vrot.slane %v500_v51, 1  ;;  %v587_v57 = vrot.slane %v586_v61, 2  ;;  %v756_v53 = vmul.f32 %v755_v30, %v2484_v32  ;;  %4720 = sst [smem:[#allocation53_spill]] %s3145_s25  ;;  %s3163_s19 = sld [smem:[#allocation3 + $0x41]] }
  0x44   :  { %4700 = vst [vmem:[#allocation33_spill] sm:$0xff] %v2712_v52  ;;  %v415_v6 = vsub.f32 %v2658_v16, %v414_v35  ;;  %v674_v8 = vmax.f32 %v672_v56, %v673_v37  ;;  %v832_v23 = vrot.slane %v2519_v47, %v2712_v52  ;;  %v837_v16 = vrot.slane %v2537_v55, %v2712_v52  ;;  %4721 = sst [smem:[#allocation54_spill]] %s3147_s22  ;;  %s3169_s2 = sld [smem:[#allocation3 + $0x42]] }
  0x45   :  { %v328_v18 = vmul.f32 1.442695, %v327_v10  ;;  %v502_v38 = vmax.f32 %v500_v51, %v501_v17  ;;  %v588_v60 = vmax.f32 %v586_v61, %v587_v57  ;;  %v757_v4 = vadd.f32 %v756_v53, %v751_v34  ;;  %4722 = sst [smem:[#allocation55_spill]] %s3150_s21  ;;  %s3178_s17 = sld [smem:[#allocation3 + $0x44]] }
  0x46   :  { %v416_v20 = vmul.f32 1.442695, %v415_v6  ;;  %v675_v44 = vrot.slane %v674_v8, 2  ;;  %v833_v45 = vmul.f32 %v832_v23, %v2475_v27  ;;  %v838_v47 = vmul.f32 %v837_v16, %v2482_v31  ;;  %4723 = sst [smem:[#allocation56_spill]] %s3152_s27  ;;  %s3180_s18 = sld [smem:[#allocation3 + $0x4b]] }
  0x47   :  { %2266 = vpow2.f32 %v328_v18  ;;  %v503_v30 = vsub.f32 %v2674_v54, %v502_v38  ;;  %v589_v37 = vrot.slane %v588_v60, 1  ;;  %v2728_v46 = vmul.f32 0.57735026, %v757_v4  ;;  %4725 = sst [smem:[#allocation58_spill]] %s3157_s20  ;;  %s3193_s13 = sld [smem:[#allocation3 + $0x4e]] }
  0x48   :  { %2268 = vpow2.f32 %v416_v20  ;;  %v676_v17 = vmax.f32 %v674_v8, %v675_v44  ;;  %v843_v55 = vrot.slane %v2553_v63, %v2712_v52  ;;  %v839_v27 = vadd.f32 %v838_v47, %v833_v45  ;;  %4724 = sst [smem:[#allocation57_spill]] %s3155_s24  ;;  %s3185_s24 = sld [smem:[#allocation3 + $0x4d]] }
  0x49   :  { %v504_v34 = vmul.f32 1.442695, %v503_v30  ;;  %v590_v24 = vmax.f32 %v588_v60, %v589_v37  ;;  %v760_v54 = vsel %vm759_vm5, %v2728_v46, -inf  ;;  %v2736_v56 = vstv %s2708_s8  ;;  %s3122_s8 = sld [smem:[#allocation3 + $0x31]]  ;;  %4726 = sst [smem:[#allocation59_spill]] %s3161_s1 }
  0x4a   :  { %v2265_v51 = vpop.eup %2264  ;;  %v677_v61 = vrot.slane %v676_v17, 1  ;;  %v761_v10 = vrot.slane %v760_v54, 4  ;;  %v844_v6 = vmul.f32 %v843_v55, %v2484_v32  ;;  %v2741_v8 = vstv %s2716_s10  ;;  %s3124_s10 = sld [smem:[#allocation3 + $0x32]]  ;;  %4727 = sst [smem:[#allocation60_spill]] %s3163_s19 }
  0x4b   :  { %v255_v35 = vmul.f32 %v2265_v51, %v2263_v19  ;;  %2270 = vpow2.f32 %v504_v34  ;;  %v591_v31 = vsub.f32 %v2689_v41, %v590_v24  ;;  %v2744_v63 = vstv %s2718_s30  ;;  %s3091_s30 = sld [smem:[#allocation3 + $0x29]]  ;;  %4728 = sst [smem:[#allocation61_spill]] %s3169_s2 }
  0x4c   :  { %v678_v57 = vmax.f32 %v676_v17, %v677_v61  ;;  %v762_v23 = vmax.f32 %v760_v54, %v761_v10  ;;  %v845_v41 = vadd.f32 %v844_v6, %v839_v27  ;;  %v2751_v20 = vstv %s2724_s6  ;;  %s3093_s6 = sld [smem:[#allocation3 + $0x2a]]  ;;  %4730 = sst [smem:[#allocation63_spill]] %s3178_s17 }
  0x4d   :  { %v256_v53 = vmul.f32 %v255_v35, %v2584_v33  ;;  %v258_v18 = vmul.f32 %v255_v35, %v2601_v40  ;;  %v260_v38 = vmul.f32 %v255_v35, %v2679_v62  ;;  %v592_v60 = vmul.f32 1.442695, %v591_v31  ;;  %4731 = sst [smem:[#allocation64_spill]] %s3180_s18  ;;  %s3183_s1 = sld [smem:[#allocation3 + $0x4c]] }
  0x4e   :  { %v679_v19 = vsub.f32 %v2700_v22, %v678_v57  ;;  %v763_v47 = vrot.slane %v762_v23, 2  ;;  %v2761_v34 = vmul.f32 0.57735026, %v845_v41  ;;  %4733 = sst [smem:[#allocation66_spill]] %s3185_s24  ;;  %s3195_s27 = sld [smem:[#allocation3 + $0x4f]] }
  0x4f   :  { %v263_v32 = vmul.f32 %v2592_v36, %v256_v53  ;;  %v265_v44 = vmul.f32 %v2595_v39, %v258_v18  ;;  %v268_v4 = vmul.f32 %v2604_v48, %v260_v38  ;;  %v276_v16 = vmul.f32 %v2610_v50, %v256_v53  ;;  %4711 = sst [smem:[#allocation44_spill]] %s3122_s8  ;;  %s3206_s20 = sld [smem:[#allocation3 + $0x46]] }
  0x50   :  { %v278_v30 = vmul.f32 %v2641_v59, %v258_v18  ;;  %v281_v37 = vmul.f32 %v2644_v0, %v260_v38  ;;  %2272 = vpow2.f32 %v592_v60  ;;  %v680_v45 = vmul.f32 1.442695, %v679_v19  ;;  %4712 = sst [smem:[#allocation45_spill]] %s3124_s10  ;;  %s3171_s10 = sld [smem:[#allocation3 + $0x43]] }
  0x51   :  { %v2759_v17 = vpop.eup %2266  ;;  %v266_v22 = vadd.f32 %v265_v44, %v263_v32  ;;  %v289_v24 = vmul.f32 %v2736_v56, %v256_v53  ;;  %v291_v54 = vmul.f32 %v2741_v8, %v258_v18  ;;  %v764_v10 = vmax.f32 %v762_v23, %v763_v47  ;;  %4703 = sst [smem:[#allocation36_spill]] %s3091_s30  ;;  %s3212_s8 = sld [smem:[#allocation3 + $0x47]] }
  0x52   :  { %v2764_v55 = vpop.eup %2268  ;;  %v279_v51 = vadd.f32 %v278_v30, %v276_v16  ;;  %v330_v61 = vsel %vm319_vm0, %v2759_v17, 0.0  ;;  %2274 = vpow2.f32 %v680_v45  ;;  %v848_v53 = vsel %vm847_vm6, %v2761_v34, -inf  ;;  %4704 = sst [smem:[#allocation37_spill]] %s3093_s6 }
  0x53   :  { %v269_v27 = vadd.f32 %v268_v4, %v266_v22  ;;  %v331_v35 = vrot.slane %v330_v61, 4  ;;  %v418_v31 = vsel %vm407_vm1, %v2764_v55, 0.0  ;;  %v292_v60 = vadd.f32 %v291_v54, %v289_v24  ;;  %4732 = sst [smem:[#allocation65_spill]] %s3183_s1 }
  0x54   :  { %v282_v57 = vadd.f32 %v281_v37, %v279_v51  ;;  %v419_v6 = vrot.slane %v418_v31, 4  ;;  %v765_v44 = vrot.slane %v764_v10, 1  ;;  %v849_v16 = vrot.slane %v848_v53, 4  ;;  %4734 = sst [smem:[#allocation67_spill]] %s3193_s13 }
  0x55   :  { %v2773_v19 = vpop.eup %2270  ;;  %v271_v41 = vadd.f32 %v2607_v49, %v269_v27  ;;  %v332_v32 = vadd.f32 %v331_v35, %v330_v61  ;;  %v294_v23 = vmul.f32 %v2744_v63, %v260_v38  ;;  %4735 = sst [smem:[#allocation68_spill]] %s3195_s27  ;;  %s3269_s27 = sld [smem:[#allocation3 + $0x69]] }
  0x56   :  { %v284_v18 = vadd.f32 %v2687_v42, %v282_v57  ;;  %v420_v4 = vadd.f32 %v419_v6, %v418_v31  ;;  %v506_v30 = vsel %vm495_vm2, %v2773_v19, 0.0  ;;  %v766_v47 = vmax.f32 %v764_v10, %v765_v44  ;;  %4729 = sst [smem:[#allocation62_spill]] %s3171_s10 }
  0x57   :  { %v272_v37 = vadd.f32 %v271_v41, %v2402_v1  ;;  %v333_v45 = vrot.slane %v332_v32, 2  ;;  %v507_v22 = vrot.slane %v506_v30, 4  ;;  %v850_v54 = vmax.f32 %v848_v53, %v849_v16  ;;  %4737 = sst [smem:[#allocation70_spill]] %s3206_s20 }
  0x58   :  { %v285_v24 = vadd.f32 %v2415_v5, %v284_v18  ;;  %v421_v51 = vrot.slane %v420_v4, 2  ;;  %v295_v61 = vadd.f32 %v294_v23, %v292_v60  ;;  %v767_v31 = vsub.f32 %v2728_v46, %v766_v47  ;;  %4738 = sst [smem:[#allocation71_spill]] %s3212_s8  ;;  %s3229_s8 = sld [smem:[#allocation3 + $0x4a]] }
  0x59   :  { %274 = vst.msk [vmem:[%s4430_s3] sm:$0x1] %vm273_vm7, %v272_v37  ;;  %v334_v27 = vadd.f32 %v333_v45, %v332_v32  ;;  %v508_v35 = vadd.f32 %v507_v22, %v506_v30  ;;  %v851_v57 = vrot.slane %v850_v54, 2 }
  0x5a   :  { %v2787_v38 = vpop.eup %2272  ;;  %2223 = vst.msk [vmem:[%s4430_s3 + $0x8] sm:$0x1] %vm273_vm7, %v285_v24  ;;  %v422_v10 = vadd.f32 %v421_v51, %v420_v4  ;;  %v297_v6 = vadd.f32 %v2751_v20, %v295_v61  ;;  %v768_v32 = vmul.f32 1.442695, %v767_v31 }
  0x5b   :  { %v335_v53 = vrot.slane %v334_v27, 1  ;;  %v509_v60 = vrot.slane %v508_v35, 2  ;;  %v594_v41 = vsel %vm583_vm3, %v2787_v38, 0.0  ;;  %v852_v18 = vmax.f32 %v850_v54, %v851_v57  ;;  %4754 = sst [smem:[#allocation87_spill]] %s3269_s27  ;;  %s3292_s27 = sld [smem:[#allocation3 + $0x6c]] }
  0x5c   :  { %v2796_v44 = vpop.eup %2274  ;;  %v423_v46 = vrot.slane %v422_v10, 1  ;;  %v595_v16 = vrot.slane %v594_v41, 4  ;;  %v298_v30 = vadd.f32 %v2442_v14, %v297_v6  ;;  %2276 = vpow2.f32 %v768_v32 }
  0x5d   :  { %v336_v23 = vadd.f32 %v335_v53, %v334_v27  ;;  %v510_v37 = vadd.f32 %v509_v60, %v508_v35  ;;  %v682_v4 = vsel %vm671_vm4, %v2796_v44, 0.0  ;;  %v853_v24 = vrot.slane %v852_v18, 1 }
  0x5e   :  { %v424_v45 = vadd.f32 %v423_v46, %v422_v10  ;;  %v596_v22 = vadd.f32 %v595_v16, %v594_v41  ;;  %v683_v47 = vrot.slane %v682_v4, 4  ;;  %2224 = vst.msk [vmem:[%s4430_s3 + $0x10] sm:$0x1] %vm273_vm7, %v298_v30  ;;  %4744 = sst [smem:[#allocation77_spill]] %s3229_s8 }
  0x5f   :  { %2278 = vrcp.f32 %v336_v23  ;;  %v511_v51 = vrot.slane %v510_v37, 1  ;;  %v854_v61 = vmax.f32 %v852_v18, %v853_v24 }
  0x60   :  { %2280 = vrcp.f32 %v424_v45  ;;  %v597_v54 = vrot.slane %v596_v22, 2  ;;  %v684_v14 = vadd.f32 %v683_v47, %v682_v4 }
  0x61   :  { %v512_v27 = vadd.f32 %v511_v51, %v510_v37  ;;  %v855_v57 = vsub.f32 %v2761_v34, %v854_v61 }
  0x62   :  { %v598_v35 = vadd.f32 %v597_v54, %v596_v22  ;;  %v685_v31 = vrot.slane %v684_v14, 2 }
  0x63   :  { %2282 = vrcp.f32 %v512_v27  ;;  %v856_v60 = vmul.f32 1.442695, %v855_v57 }
  0x64   :  { %v599_v10 = vrot.slane %v598_v35, 1  ;;  %v686_v6 = vadd.f32 %v685_v31, %v684_v14 }
  0x65   :  { %2284 = vpow2.f32 %v856_v60 }
  0x66   :  { %v687_v53 = vrot.slane %v686_v6, 1  ;;  %v2806_v41 = vpop.eup %2276  ;;  %v600_v32 = vadd.f32 %v599_v10, %v598_v35 }
  0x67   :  { %v770_v16 = vsel %vm759_vm5, %v2806_v41, 0.0 }
  0x68   :  { %v688_v46 = vadd.f32 %v687_v53, %v686_v6  ;;  %v771_v23 = vrot.slane %v770_v16, 4  ;;  %2286 = vrcp.f32 %v600_v32 }
  0x69   :  { %v2279_v30 = vpop.eup %2278 }
  0x6a   :  { %v2281_v18 = vpop.eup %2280  ;;  %v339_v37 = vmul.f32 %v2279_v30, %v2759_v17  ;;  %v2812_v4 = vadd.f32 %v771_v23, %v770_v16  ;;  %2288 = vrcp.f32 %v688_v46 }
  0x6b   :  { %v427_v34 = vmul.f32 %v2281_v18, %v2764_v55 }
  0x6c   :  { %v340_v45 = vmul.f32 %v339_v37, %v2584_v33  ;;  %v348_v22 = vmul.f32 %v339_v37, %v2601_v40  ;;  %v356_v47 = vmul.f32 %v339_v37, %v2679_v62  ;;  %v773_v14 = vrot.slane %v2812_v4, 2 }
  0x6d   :  { %v2283_v24 = vpop.eup %2282  ;;  %v428_v51 = vmul.f32 %v427_v34, %v2584_v33  ;;  %v436_v54 = vmul.f32 %v427_v34, %v2601_v40  ;;  %v444_v17 = vmul.f32 %v427_v34, %v2679_v62 }
  0x6e   :  { %v341_v55 = vsel %vm319_vm0, %v340_v45, 0.0  ;;  %v349_v61 = vsel %vm319_vm0, %v348_v22, 0.0  ;;  %v357_v27 = vsel %vm319_vm0, %v356_v47, 0.0  ;;  %v2825_v35 = vmul.f32 %v2283_v24, %v2773_v19 }
  0x6f   :  { %v342_v31 = vrot.slane %v341_v55, 4  ;;  %v350_v57 = vrot.slane %v349_v61, 4  ;;  %v358_v10 = vrot.slane %v357_v27, 4  ;;  %v429_v6 = vsel %vm407_vm1, %v428_v51, 0.0 }
  0x70   :  { %v430_v53 = vrot.slane %v429_v6, 4  ;;  %v437_v60 = vsel %vm407_vm1, %v436_v54, 0.0  ;;  %v445_v32 = vsel %vm407_vm1, %v444_v17, 0.0  ;;  %v516_v46 = vmul.f32 %v2825_v35, %v2584_v33  ;;  %v2835_v54 = vpop.eup %2284 }
  0x71   :  { %v343_v16 = vadd.f32 %v342_v31, %v341_v55  ;;  %v351_v30 = vadd.f32 %v350_v57, %v349_v61  ;;  %v359_v23 = vadd.f32 %v358_v10, %v357_v27  ;;  %v438_v18 = vrot.slane %v437_v60, 4 }
  0x72   :  { %v431_v37 = vadd.f32 %v430_v53, %v429_v6  ;;  %v446_v19 = vrot.slane %v445_v32, 4  ;;  %v517_v34 = vsel %vm495_vm2, %v516_v46, 0.0  ;;  %v524_v45 = vmul.f32 %v2825_v35, %v2601_v40  ;;  %v2838_v61 = vpop.eup %2286 }
  0x73   :  { %v344_v22 = vrot.slane %v343_v16, 2  ;;  %v352_v47 = vrot.slane %v351_v30, 2  ;;  %v360_v24 = vrot.slane %v359_v23, 2  ;;  %v439_v51 = vadd.f32 %v438_v18, %v437_v60 }
  0x74   :  { %v432_v17 = vrot.slane %v431_v37, 2  ;;  %v447_v15 = vadd.f32 %v446_v19, %v445_v32  ;;  %v518_v29 = vrot.slane %v517_v34, 4  ;;  %v525_v55 = vsel %vm495_vm2, %v524_v45, 0.0  ;;  %v2289_v6 = vpop.eup %2288 }
  0x75   :  { %v345_v27 = vadd.f32 %v344_v22, %v343_v16  ;;  %v353_v31 = vadd.f32 %v352_v47, %v351_v30  ;;  %v361_v57 = vadd.f32 %v360_v24, %v359_v23  ;;  %v440_v10 = vrot.slane %v439_v51, 2 }
  0x76   :  { %v433_v53 = vadd.f32 %v432_v17, %v431_v37  ;;  %v448_v46 = vrot.slane %v447_v15, 2  ;;  %v519_v26 = vadd.f32 %v518_v29, %v517_v34  ;;  %v526_v13 = vrot.slane %v525_v55, 4 }
  0x77   :  { %v346_v9 = vrot.slane %v345_v27, 1  ;;  %v354_v60 = vrot.slane %v353_v31, 1  ;;  %v362_v18 = vrot.slane %v361_v57, 1  ;;  %v441_v11 = vadd.f32 %v440_v10, %v439_v51 }
  0x78   :  { %v434_v3 = vrot.slane %v433_v53, 1  ;;  %v449_v32 = vadd.f32 %v448_v46, %v447_v15  ;;  %v520_v19 = vrot.slane %v519_v26, 2  ;;  %v527_v7 = vadd.f32 %v526_v13, %v525_v55 }
  0x79   :  { %v2840_v45 = vadd.f32 %v346_v9, %v345_v27  ;;  %v2842_v2 = vadd.f32 %v354_v60, %v353_v31  ;;  %v2844_v16 = vadd.f32 %v362_v18, %v361_v57  ;;  %v442_v30 = vrot.slane %v441_v11, 1 }
  0x7a   :  { %v2846_v23 = vadd.f32 %v434_v3, %v433_v53  ;;  %v450_v29 = vrot.slane %v449_v32, 1  ;;  %v521_v37 = vadd.f32 %v520_v19, %v519_v26  ;;  %v528_v34 = vrot.slane %v527_v7, 2 }
  0x7b   :  { %v364_v22 = vmul.f32 %v2840_v45, %v2592_v36  ;;  %v365_v15 = vmul.f32 %v2842_v2, %v2595_v39  ;;  %v367_v9 = vmul.f32 %v2844_v16, %v2604_v48  ;;  %v373_v13 = vmul.f32 %v2840_v45, %v2610_v50 }
  0x7c   :  { %v374_v47 = vmul.f32 %v2842_v2, %v2641_v59  ;;  %v376_v3 = vmul.f32 %v2844_v16, %v2644_v0  ;;  %v2860_v26 = vadd.f32 %v442_v30, %v441_v11  ;;  %v2862_v24 = vadd.f32 %v450_v29, %v449_v32 }
  0x7d   :  { %v366_v51 = vadd.f32 %v365_v15, %v364_v22  ;;  %v452_v17 = vmul.f32 %v2846_v23, %v2592_v36  ;;  %v461_v55 = vmul.f32 %v2846_v23, %v2610_v50  ;;  %v522_v27 = vrot.slane %v521_v37, 1 }
  0x7e   :  { %v375_v31 = vadd.f32 %v374_v47, %v373_v13  ;;  %v453_v57 = vmul.f32 %v2860_v26, %v2595_v39  ;;  %v455_v10 = vmul.f32 %v2862_v24, %v2604_v48  ;;  %v462_v11 = vmul.f32 %v2860_v26, %v2641_v59 }
  0x7f   :  { %v368_v53 = vadd.f32 %v367_v9, %v366_v51  ;;  %v464_v46 = vmul.f32 %v2862_v24, %v2644_v0  ;;  %v2876_v60 = vadd.f32 %v522_v27, %v521_v37  ;;  %v529_v18 = vadd.f32 %v528_v34, %v527_v7 }
  0x80   :  { %v377_v32 = vadd.f32 %v376_v3, %v375_v31  ;;  %v454_v19 = vadd.f32 %v453_v57, %v452_v17  ;;  %v463_v30 = vadd.f32 %v462_v11, %v461_v55  ;;  %v532_v29 = vmul.f32 %v2825_v35, %v2679_v62 }
  0x81   :  { %v369_v22 = vadd.f32 %v368_v53, %v2607_v49  ;;  %v530_v15 = vrot.slane %v529_v18, 1  ;;  %v540_v13 = vmul.f32 %v2876_v60, %v2592_v36  ;;  %v549_v9 = vmul.f32 %v2876_v60, %v2610_v50 }
  0x82   :  { %v378_v47 = vadd.f32 %v377_v32, %v2687_v42  ;;  %v456_v37 = vadd.f32 %v455_v10, %v454_v19  ;;  %v465_v51 = vadd.f32 %v464_v46, %v463_v30  ;;  %v533_v7 = vsel %vm495_vm2, %v532_v29, 0.0 }
  0x83   :  { %v370_v34 = vadd.f32 %v369_v22, %v2402_v1  ;;  %v2888_v3 = vadd.f32 %v530_v15, %v529_v18  ;;  %v534_v35 = vrot.slane %v533_v7, 4  ;;  %v603_v17 = vmul.f32 %v2838_v61, %v2787_v38 }
  0x84   :  { %v379_v55 = vadd.f32 %v2415_v5, %v378_v47  ;;  %v457_v27 = vadd.f32 %v456_v37, %v2607_v49  ;;  %v466_v31 = vadd.f32 %v465_v51, %v2687_v42  ;;  %v691_v57 = vmul.f32 %v2289_v6, %v2796_v44 }
  0x85   :  { %372 = vst.msk [vmem:[%s4430_s3] sm:$0x2] %vm371_vm8, %v370_v34  ;;  %v535_v10 = vadd.f32 %v534_v35, %v533_v7  ;;  %v541_v11 = vmul.f32 %v2888_v3, %v2595_v39  ;;  %v550_v38 = vmul.f32 %v2888_v3, %v2641_v59  ;;  %v604_v61 = vmul.f32 %v603_v17, %v2584_v33 }
  0x86   :  { %2225 = vst.msk [vmem:[%s4430_s3 + $0x8] sm:$0x2] %vm371_vm8, %v379_v55  ;;  %v458_v44 = vadd.f32 %v457_v27, %v2402_v1  ;;  %v467_v6 = vadd.f32 %v2415_v5, %v466_v31  ;;  %v612_v53 = vmul.f32 %v603_v17, %v2601_v40  ;;  %v620_v46 = vmul.f32 %v603_v17, %v2679_v62 }
  0x87   :  { %v536_v18 = vrot.slane %v535_v10, 2  ;;  %v542_v32 = vadd.f32 %v541_v11, %v540_v13  ;;  %v551_v19 = vadd.f32 %v550_v38, %v549_v9  ;;  %v605_v30 = vsel %vm583_vm3, %v604_v61, 0.0 }
  0x88   :  { %460 = vst.msk [vmem:[%s4430_s3] sm:$0x4] %vm459_vm9, %v458_v44  ;;  %2227 = vst.msk [vmem:[%s4430_s3 + $0x8] sm:$0x4] %vm459_vm9, %v467_v6  ;;  %v606_v1 = vrot.slane %v605_v30, 4  ;;  %v613_v5 = vsel %vm583_vm3, %v612_v53, 0.0  ;;  %v692_v22 = vmul.f32 %v691_v57, %v2584_v33  ;;  %v700_v47 = vmul.f32 %v691_v57, %v2601_v40 }
  0x89   :  { %v621_v29 = vsel %vm583_vm3, %v620_v46, 0.0  ;;  %v537_v15 = vadd.f32 %v536_v18, %v535_v10  ;;  %v614_v13 = vrot.slane %v613_v5, 4  ;;  %v708_v7 = vmul.f32 %v691_v57, %v2679_v62 }
  0x8a   :  { %v622_v9 = vrot.slane %v621_v29, 4  ;;  %v607_v37 = vadd.f32 %v606_v1, %v605_v30  ;;  %v693_v51 = vsel %vm671_vm4, %v692_v22, 0.0  ;;  %v774_v34 = vadd.f32 %v773_v14, %v2812_v4 }
  0x8b   :  { %v538_v35 = vrot.slane %v537_v15, 1  ;;  %v615_v17 = vadd.f32 %v614_v13, %v613_v5  ;;  %v694_v27 = vrot.slane %v693_v51, 4  ;;  %v701_v10 = vsel %vm671_vm4, %v700_v47, 0.0 }
  0x8c   :  { %v623_v55 = vadd.f32 %v622_v9, %v621_v29  ;;  %v608_v31 = vrot.slane %v607_v37, 2  ;;  %v709_v11 = vsel %vm671_vm4, %v708_v7, 0.0  ;;  %v775_v38 = vrot.slane %v774_v34, 1 }
  0x8d   :  { %v2933_v61 = vadd.f32 %v538_v35, %v537_v15  ;;  %v616_v44 = vrot.slane %v615_v17, 2  ;;  %v695_v57 = vadd.f32 %v694_v27, %v693_v51  ;;  %v702_v46 = vrot.slane %v701_v10, 4 }
  0x8e   :  { %v624_v6 = vrot.slane %v623_v55, 2  ;;  %v609_v53 = vadd.f32 %v608_v31, %v607_v37  ;;  %v710_v18 = vrot.slane %v709_v11, 4  ;;  %v776_v4 = vadd.f32 %v775_v38, %v774_v34 }
  0x8f   :  { %v543_v14 = vmul.f32 %v2933_v61, %v2604_v48  ;;  %v552_v30 = vmul.f32 %v2933_v61, %v2644_v0  ;;  %v617_v1 = vadd.f32 %v616_v44, %v615_v17  ;;  %v696_v22 = vrot.slane %v695_v57, 2 }
  0x90   :  { %v625_v5 = vadd.f32 %v624_v6, %v623_v55  ;;  %v610_v29 = vrot.slane %v609_v53, 1  ;;  %v703_v13 = vadd.f32 %v702_v46, %v701_v10  ;;  %v711_v15 = vadd.f32 %v710_v18, %v709_v11  ;;  %v2954_v11 = vld [vmem:[%s4427_s0] sm:$0xff]  ;;  %v2960_v6 = vld [vmem:[%s4427_s0 + $0x8] sm:$0xff] }
  0x91   :  { %v544_v9 = vadd.f32 %v543_v14, %v542_v32  ;;  %v553_v47 = vadd.f32 %v552_v30, %v551_v19  ;;  %v618_v7 = vrot.slane %v617_v1, 1  ;;  %v697_v35 = vadd.f32 %v696_v22, %v695_v57 }
  0x92   :  { %v626_v51 = vrot.slane %v625_v5, 1  ;;  %v2939_v37 = vadd.f32 %v610_v29, %v609_v53  ;;  %v704_v34 = vrot.slane %v703_v13, 2  ;;  %v712_v27 = vrot.slane %v711_v15, 2 }
  0x93   :  { %v545_v31 = vadd.f32 %v544_v9, %v2607_v49  ;;  %v554_v38 = vadd.f32 %v553_v47, %v2687_v42  ;;  %v2943_v52 = vadd.f32 %v618_v7, %v617_v1  ;;  %v698_v19 = vrot.slane %v697_v35, 1 }
  0x94   :  { %v2945_v17 = vadd.f32 %v626_v51, %v625_v5  ;;  %v628_v55 = vmul.f32 %v2939_v37, %v2592_v36  ;;  %v637_v32 = vmul.f32 %v2939_v37, %v2610_v50  ;;  %v705_v10 = vadd.f32 %v704_v34, %v703_v13 }
  0x95   :  { %v546_v44 = vadd.f32 %v2954_v11, %v545_v31  ;;  %v555_v57 = vadd.f32 %v2960_v6, %v554_v38  ;;  %v629_v53 = vmul.f32 %v2943_v52, %v2595_v39  ;;  %v638_v18 = vmul.f32 %v2943_v52, %v2641_v59 }
  0x96   :  { %v631_v46 = vmul.f32 %v2945_v17, %v2604_v48  ;;  %v640_v14 = vmul.f32 %v2945_v17, %v2644_v0  ;;  %v2971_v30 = vadd.f32 %v698_v19, %v697_v35  ;;  %v706_v1 = vrot.slane %v705_v10, 1 }
  0x97   :  { %548 = vst.msk [vmem:[%s4430_s3] sm:$0x8] %vm547_vm10, %v546_v44  ;;  %2229 = vst.msk [vmem:[%s4430_s3 + $0x8] sm:$0x8] %vm547_vm10, %v555_v57  ;;  %v630_v5 = vadd.f32 %v629_v53, %v628_v55  ;;  %v713_v29 = vadd.f32 %v712_v27, %v711_v15  ;;  %2290 = vrcp.f32 %v776_v4  ;;  %v858_v22 = vsel %vm847_vm6, %v2835_v54, 0.0 }
  0x98   :  { %v639_v13 = vadd.f32 %v638_v18, %v637_v32  ;;  %v2983_v9 = vadd.f32 %v706_v1, %v705_v10  ;;  %v716_v47 = vmul.f32 %v2971_v30, %v2592_v36  ;;  %v725_v7 = vmul.f32 %v2971_v30, %v2610_v50 }
  0x99   :  { %v632_v51 = vadd.f32 %v631_v46, %v630_v5  ;;  %v714_v35 = vrot.slane %v713_v29, 1  ;;  %v859_v34 = vrot.slane %v858_v22, 4  ;;  %v381_v31 = vmul.f32 %v2840_v45, %v2736_v56 }
  0x9a   :  { %v641_v15 = vadd.f32 %v640_v14, %v639_v13  ;;  %v717_v4 = vmul.f32 %v2983_v9, %v2595_v39  ;;  %v726_v27 = vmul.f32 %v2983_v9, %v2641_v59  ;;  %v382_v38 = vmul.f32 %v2842_v2, %v2741_v8 }
  0x9b   :  { %v633_v55 = vadd.f32 %v632_v51, %v2607_v49  ;;  %v715_v32 = vadd.f32 %v714_v35, %v713_v29  ;;  %v860_v19 = vadd.f32 %v859_v34, %v858_v22  ;;  %v384_v10 = vmul.f32 %v2844_v16, %v2744_v63 }
  0x9c   :  { %v642_v45 = vadd.f32 %v641_v15, %v2687_v42  ;;  %v718_v44 = vadd.f32 %v717_v4, %v716_v47  ;;  %v727_v57 = vadd.f32 %v726_v27, %v725_v7  ;;  %v383_v53 = vadd.f32 %v382_v38, %v381_v31  ;;  %v3032_v38 = vld [vmem:[%s4427_s0 + $0x10] sm:$0xff]  ;;  %s3095_s0 = sld [smem:[#allocation3 + $0x2b]] }
  0x9d   :  { %v634_v46 = vadd.f32 %v2954_v11, %v633_v55  ;;  %v719_v18 = vmul.f32 %v715_v32, %v2604_v48  ;;  %v728_v14 = vmul.f32 %v715_v32, %v2644_v0  ;;  %v861_v1 = vrot.slane %v860_v19, 2 }
  0x9e   :  { %v643_v2 = vadd.f32 %v2960_v6, %v642_v45  ;;  %v385_v5 = vadd.f32 %v384_v10, %v383_v53  ;;  %v469_v29 = vmul.f32 %v2846_v23, %v2736_v56  ;;  %v470_v16 = vmul.f32 %v2860_v26, %v2741_v8 }
  0x9f   :  { %636 = vst.msk [vmem:[%s4430_s3] sm:$0x10] %vm635_vm11, %v634_v46  ;;  %v720_v22 = vadd.f32 %v719_v18, %v718_v44  ;;  %v729_v13 = vadd.f32 %v728_v14, %v727_v57  ;;  %v862_v47 = vadd.f32 %v861_v1, %v860_v19  ;;  %v472_v7 = vmul.f32 %v2862_v24, %v2744_v63 }
  0xa0   :  { %2231 = vst.msk [vmem:[%s4430_s3 + $0x8] sm:$0x10] %vm635_vm11, %v643_v2  ;;  %v386_v23 = vadd.f32 %v385_v5, %v2751_v20  ;;  %v471_v51 = vadd.f32 %v470_v16, %v469_v29  ;;  %v557_v26 = vmul.f32 %v2876_v60, %v2736_v56  ;;  %v558_v35 = vmul.f32 %v2888_v3, %v2741_v8 }
  0xa1   :  { %v2291_v34 = vpop.eup %2290  ;;  %v721_v31 = vadd.f32 %v720_v22, %v2607_v49  ;;  %v730_v15 = vadd.f32 %v729_v13, %v2687_v42  ;;  %v863_v24 = vrot.slane %v862_v47, 1  ;;  %v560_v4 = vmul.f32 %v2933_v61, %v2744_v63 }
  0xa2   :  { %v779_v27 = vmul.f32 %v2291_v34, %v2806_v41  ;;  %v387_v60 = vadd.f32 %v3032_v38, %v386_v23  ;;  %v473_v55 = vadd.f32 %v472_v7, %v471_v51  ;;  %v559_v3 = vadd.f32 %v558_v35, %v557_v26  ;;  %4705 = sst [smem:[#allocation38_spill]] %s3095_s0 }
  0xa3   :  { %v722_v19 = vadd.f32 %v2954_v11, %v721_v31  ;;  %v731_v10 = vadd.f32 %v2960_v6, %v730_v15  ;;  %v864_v45 = vadd.f32 %v863_v24, %v862_v47  ;;  %v645_v44 = vmul.f32 %v2939_v37, %v2736_v56 }
  0xa4   :  { %v780_v61 = vmul.f32 %v779_v27, %v2584_v33  ;;  %v788_v41 = vmul.f32 %v779_v27, %v2601_v40  ;;  %v796_v57 = vmul.f32 %v779_v27, %v2679_v62  ;;  %2226 = vst.msk [vmem:[%s4430_s3 + $0x10] sm:$0x2] %vm371_vm8, %v387_v60  ;;  %v474_v53 = vadd.f32 %v473_v55, %v2751_v20 }
  0xa5   :  { %724 = vst.msk [vmem:[%s4430_s3] sm:$0x20] %vm723_vm12, %v722_v19  ;;  %2233 = vst.msk [vmem:[%s4430_s3 + $0x8] sm:$0x20] %vm723_vm12, %v731_v10  ;;  %2292 = vrcp.f32 %v864_v45  ;;  %v561_v37 = vadd.f32 %v560_v4, %v559_v3  ;;  %v646_v46 = vmul.f32 %v2943_v52, %v2741_v8  ;;  %v648_v18 = vmul.f32 %v2945_v17, %v2744_v63 }
  0xa6   :  { %v781_v14 = vsel %vm759_vm5, %v780_v61, 0.0  ;;  %v789_v1 = vsel %vm759_vm5, %v788_v41, 0.0  ;;  %v797_v2 = vsel %vm759_vm5, %v796_v57, 0.0  ;;  %v475_v5 = vadd.f32 %v3032_v38, %v474_v53 }
  0xa7   :  { %v782_v29 = vrot.slane %v781_v14, 4  ;;  %v790_v16 = vrot.slane %v789_v1, 4  ;;  %v798_v22 = vrot.slane %v797_v2, 4  ;;  %v562_v13 = vadd.f32 %v561_v37, %v2751_v20 }
  0xa8   :  { %2228 = vst.msk [vmem:[%s4430_s3 + $0x10] sm:$0x4] %vm459_vm9, %v475_v5  ;;  %v647_v52 = vadd.f32 %v646_v46, %v645_v44  ;;  %v733_v17 = vmul.f32 %v2971_v30, %v2736_v56  ;;  %v734_v47 = vmul.f32 %v2983_v9, %v2741_v8  ;;  %v736_v7 = vmul.f32 %v715_v32, %v2744_v63 }
  0xa9   :  { %v783_v23 = vadd.f32 %v782_v29, %v781_v14  ;;  %v791_v51 = vadd.f32 %v790_v16, %v789_v1  ;;  %v799_v26 = vadd.f32 %v798_v22, %v797_v2  ;;  %v563_v35 = vadd.f32 %v3032_v38, %v562_v13 }
  0xaa   :  { %v649_v34 = vadd.f32 %v648_v18, %v647_v52  ;;  %v735_v31 = vadd.f32 %v734_v47, %v733_v17 }
  0xab   :  { %v784_v15 = vrot.slane %v783_v23, 2  ;;  %v792_v24 = vrot.slane %v791_v51, 2  ;;  %v800_v4 = vrot.slane %v799_v26, 2  ;;  %2230 = vst.msk [vmem:[%s4430_s3 + $0x10] sm:$0x8] %vm547_vm10, %v563_v35 }
  0xac   :  { %v650_v30 = vadd.f32 %v649_v34, %v2751_v20  ;;  %v737_v9 = vadd.f32 %v736_v7, %v735_v31 }
  0xad   :  { %v785_v27 = vadd.f32 %v784_v15, %v783_v23  ;;  %v793_v32 = vadd.f32 %v792_v24, %v791_v51  ;;  %v801_v60 = vadd.f32 %v800_v4, %v799_v26 }
  0xae   :  { %v651_v55 = vadd.f32 %v3032_v38, %v650_v30  ;;  %v738_v3 = vadd.f32 %v737_v9, %v2751_v20 }
  0xaf   :  { %v2293_v19 = vpop.eup %2292  ;;  %v786_v10 = vrot.slane %v785_v27, 1  ;;  %v794_v45 = vrot.slane %v793_v32, 1  ;;  %v802_v44 = vrot.slane %v801_v60, 1 }
  0xb0   :  { %v867_v61 = vmul.f32 %v2293_v19, %v2835_v54  ;;  %2232 = vst.msk [vmem:[%s4430_s3 + $0x10] sm:$0x10] %vm635_vm11, %v651_v55  ;;  %v739_v41 = vadd.f32 %v3032_v38, %v738_v3 }
  0xb1   :  { %v787_v57 = vadd.f32 %v786_v10, %v785_v27  ;;  %v795_v53 = vadd.f32 %v794_v45, %v793_v32  ;;  %v803_v37 = vadd.f32 %v802_v44, %v801_v60 }
  0xb2   :  { %v868_v54 = vmul.f32 %v867_v61, %v2584_v33  ;;  %v876_v46 = vmul.f32 %v867_v61, %v2601_v40  ;;  %v884_v18 = vmul.f32 %v867_v61, %v2679_v62  ;;  %2234 = vst.msk [vmem:[%s4430_s3 + $0x10] sm:$0x20] %vm723_vm12, %v739_v41 }
  0xb3   :  { %v804_v14 = vmul.f32 %v787_v57, %v2592_v36  ;;  %v805_v1 = vmul.f32 %v795_v53, %v2595_v39  ;;  %v807_v2 = vmul.f32 %v803_v37, %v2604_v48  ;;  %v813_v33 = vmul.f32 %v787_v57, %v2610_v50 }
  0xb4   :  { %v814_v40 = vmul.f32 %v795_v53, %v2641_v59  ;;  %v816_v62 = vmul.f32 %v803_v37, %v2644_v0  ;;  %v869_v5 = vsel %vm847_vm6, %v868_v54, 0.0  ;;  %v877_v29 = vsel %vm847_vm6, %v876_v46, 0.0 }
  0xb5   :  { %v806_v16 = vadd.f32 %v805_v1, %v804_v14  ;;  %v870_v22 = vrot.slane %v869_v5, 4  ;;  %v878_v13 = vrot.slane %v877_v29, 4  ;;  %v885_v52 = vsel %vm847_vm6, %v884_v18, 0.0 }
  0xb6   :  { %v815_v17 = vadd.f32 %v814_v40, %v813_v33  ;;  %v886_v47 = vrot.slane %v885_v52, 4  ;;  %v821_v7 = vmul.f32 %v787_v57, %v2736_v56  ;;  %v822_v23 = vmul.f32 %v795_v53, %v2741_v8 }
  0xb7   :  { %v808_v51 = vadd.f32 %v807_v2, %v806_v16  ;;  %v871_v26 = vadd.f32 %v870_v22, %v869_v5  ;;  %v879_v35 = vadd.f32 %v878_v13, %v877_v29  ;;  %v824_v34 = vmul.f32 %v803_v37, %v2744_v63 }
  0xb8   :  { %v817_v31 = vadd.f32 %v816_v62, %v815_v17  ;;  %v887_v15 = vadd.f32 %v886_v47, %v885_v52  ;;  %v823_v24 = vadd.f32 %v822_v23, %v821_v7  ;;  %v4580_v37 = vstv %s3081_s12  ;;  %s3224_s12 = sld [smem:[#allocation3 + $0x52]] }
  0xb9   :  { %v809_v4 = vadd.f32 %v808_v51, %v2607_v49  ;;  %v872_v30 = vrot.slane %v871_v26, 2  ;;  %v880_v9 = vrot.slane %v879_v35, 2  ;;  %v4581_v18 = vstv %s3127_s29  ;;  %s3222_s29 = sld [smem:[#allocation3 + $0x49]] }
  0xba   :  { %v818_v27 = vadd.f32 %v817_v31, %v2687_v42  ;;  %v888_v32 = vrot.slane %v887_v15, 2  ;;  %v825_v60 = vadd.f32 %v824_v34, %v823_v24  ;;  %v4584_v14 = vstv %s3138_s23  ;;  %s3204_s23 = sld [smem:[#allocation3 + $0x45]] }
  0xbb   :  { %v810_v55 = vadd.f32 %v2954_v11, %v809_v4  ;;  %v873_v3 = vadd.f32 %v872_v30, %v871_v26  ;;  %v881_v19 = vadd.f32 %v880_v9, %v879_v35  ;;  %v4582_v2 = vstv %s3083_s4  ;;  %s3219_s4 = sld [smem:[#allocation3 + $0x51]] }
  0xbc   :  { %v819_v10 = vadd.f32 %v2960_v6, %v818_v27  ;;  %v889_v45 = vadd.f32 %v888_v32, %v887_v15  ;;  %v826_v44 = vadd.f32 %v825_v60, %v2751_v20  ;;  %v4583_v33 = vstv %s3131_s14  ;;  %s3217_s14 = sld [smem:[#allocation3 + $0x48]] }
  0xbd   :  { %812 = vst.msk [vmem:[%s4430_s3] sm:$0x40] %vm811_vm13, %v810_v55  ;;  %v874_v61 = vrot.slane %v873_v3, 1  ;;  %v882_v41 = vrot.slane %v881_v19, 1  ;;  %v4587_v40 = vstv %s3142_s5  ;;  %s3214_s5 = sld [smem:[#allocation3 + $0x50]]  ;;  %v4585_v51 = vstv %s3091_s30  ;;  %s3235_s30 = sld [smem:[#allocation3 + $0x54]] }
  0xbe   :  { %2235 = vst.msk [vmem:[%s4430_s3 + $0x8] sm:$0x40] %vm811_vm13, %v819_v10  ;;  %v890_v57 = vrot.slane %v889_v45, 1  ;;  %v827_v53 = vadd.f32 %v3032_v38, %v826_v44  ;;  %4743 = sst [smem:[#allocation76_spill]] %s3224_s12  ;;  %v4586_v35 = vstv %s3133_s9  ;;  %v4593_v34 = vstv %s3163_s19  ;;  %s3244_s19 = sld [smem:[#allocation3 + $0x56]] }
  0xbf   :  { %v875_v54 = vadd.f32 %v874_v61, %v873_v3  ;;  %v883_v46 = vadd.f32 %v882_v41, %v881_v19  ;;  %4742 = sst [smem:[#allocation75_spill]] %s3222_s29  ;;  %v4589_v31 = vstv %s3093_s6  ;;  %v4588_v4 = vstv %s3136_s26  ;;  %s3237_s29 = sld [smem:[#allocation3 + $0x55]] }
  0xc0   :  { %v891_v1 = vadd.f32 %v890_v57, %v889_v45  ;;  %2236 = vst.msk [vmem:[%s4430_s3 + $0x10] sm:$0x40] %vm811_vm13, %v827_v53  ;;  %4736 = sst [smem:[#allocation69_spill]] %s3204_s23  ;;  %v4592_v30 = vstv %s3169_s2  ;;  %v4622_v27 = vstv %s3180_s18  ;;  %v4594_v32 = vstv %s3095_s0  ;;  %s3246_s2 = sld [smem:[#allocation3 + $0x57]] }
  0xc1   :  { %v892_v62 = vmul.f32 %v875_v54, %v2592_v36  ;;  %v893_v5 = vmul.f32 %v883_v46, %v2595_v39  ;;  %v901_v29 = vmul.f32 %v875_v54, %v2610_v50  ;;  %v902_v16 = vmul.f32 %v883_v46, %v2641_v59  ;;  %4741 = sst [smem:[#allocation74_spill]] %s3219_s4  ;;  %s3251_s26 = sld [smem:[#allocation3 + $0x5a]] }
  0xc2   :  { %v895_v22 = vmul.f32 %v891_v1, %v2604_v48  ;;  %v904_v13 = vmul.f32 %v891_v1, %v2644_v0  ;;  %v909_v52 = vmul.f32 %v875_v54, %v2736_v56  ;;  %v910_v17 = vmul.f32 %v883_v46, %v2741_v8  ;;  %4740 = sst [smem:[#allocation73_spill]] %s3217_s14  ;;  %s3231_s14 = sld [smem:[#allocation3 + $0x53]] }
  0xc3   :  { %4739 = sst [smem:[#allocation72_spill]] %s3214_s5  ;;  %v894_v47 = vadd.f32 %v893_v5, %v892_v62  ;;  %v903_v7 = vadd.f32 %v902_v16, %v901_v29  ;;  %v912_v23 = vmul.f32 %v891_v1, %v2744_v63  ;;  %v4609_v60 = vstv %s3140_s28  ;;  %s3253_s18 = sld [smem:[#allocation3 + $0x5d]] }
  0xc4   :  { %v911_v26 = vadd.f32 %v910_v17, %v909_v52  ;;  %4746 = sst [smem:[#allocation79_spill]] %s3235_s30  ;;  %v4621_v19 = vstv %s3183_s1  ;;  %v4607_v10 = vstv %s3171_s10  ;;  %v4617_v44 = vstv %s3185_s24  ;;  %s3262_s10 = sld [smem:[#allocation3 + $0x63]] }
  0xc5   :  { %v896_v15 = vadd.f32 %v895_v22, %v894_v47  ;;  %v905_v24 = vadd.f32 %v904_v13, %v903_v7  ;;  %4747 = sst [smem:[#allocation80_spill]] %s3237_s29  ;;  %v4620_v61 = vstv %s3193_s13  ;;  %s3260_s1 = sld [smem:[#allocation3 + $0x60]]  ;;  %v4608_v54 = vstv %s3097_s11 }
  0xc6   :  { %v913_v9 = vadd.f32 %v912_v23, %v911_v26  ;;  %4748 = sst [smem:[#allocation81_spill]] %s3244_s19  ;;  %v4599_v46 = vstv %s3145_s25  ;;  %s3267_s13 = sld [smem:[#allocation3 + $0x66]]  ;;  %v4611_v5 = vstv %s3204_s23  ;;  %v4626_v16 = vstv %s3108_s15 }
  0xc7   :  { %v897_v55 = vadd.f32 %v896_v15, %v2607_v49  ;;  %v906_v3 = vadd.f32 %v905_v24, %v2687_v42  ;;  %4749 = sst [smem:[#allocation82_spill]] %s3246_s2  ;;  %s4755_s0 = sld [smem:[#allocation56_spill]]  ;;  %v4623_v22 = vstv %s3150_s21  ;;  %v4618_v13 = vstv %s3206_s20 }
  0xc8   :  { %4745 = sst [smem:[#allocation78_spill]] %s3231_s14  ;;  %v914_v45 = vadd.f32 %v913_v9, %v2751_v20  ;;  %s4756_s6 = sld [smem:[#allocation71_spill]]  ;;  %v4615_v17 = vstv %s3114_s16 }
  0xc9   :  { %4750 = sst [smem:[#allocation83_spill]] %s3251_s26  ;;  %v898_v57 = vadd.f32 %v2954_v11, %v897_v55  ;;  %v907_v53 = vadd.f32 %v2960_v6, %v906_v3  ;;  %v4616_v11 = vstv %s3178_s17  ;;  %v4604_v6 = vstv %s3106_s7  ;;  %s4758_s7 = sld [smem:[#allocation57_spill]] }
  0xca   :  { %4751 = sst [smem:[#allocation84_spill]] %s3253_s18  ;;  %v915_v1 = vadd.f32 %v3032_v38, %v914_v45  ;;  %v4603_v38 = vstv %s3147_s22  ;;  %s4757_s9 = sld [smem:[#allocation43_spill]] }
  0xcb   :  { %4752 = sst [smem:[#allocation85_spill]] %s3260_s1  ;;  %900 = vst.msk [vmem:[%s4430_s3] sm:$0x80] %vm899_vm14, %v898_v57  ;;  %2237 = vst.msk [vmem:[%s4430_s3 + $0x8] sm:$0x80] %vm899_vm14, %v907_v53  ;;  %s3290_s28 = sld [smem:[#allocation3 + $0x58]] }
  0xcc   :  { %4753 = sst [smem:[#allocation86_spill]] %s3262_s10  ;;  %2238 = vst.msk [vmem:[%s4430_s3 + $0x10] sm:$0x80] %vm899_vm14, %v915_v1  ;;  %s3298_s23 = sld [smem:[#allocation3 + $0x5b]] }
  0xcd   :  { %s3300_s15 = sld [smem:[#allocation3 + $0x6f]]  ;;  %s4765_s5 = sld [smem:[#allocation45_spill]]  ;;  %v4613_v47 = vstv %s4755_s0 }
  0xce   :  { %s4766_s17 = sld [smem:[#allocation59_spill]]  ;;  %v4619_v7 = vstv %s4756_s6  ;;  %s3306_s21 = sld [smem:[#allocation3 + $0x72]] }
  0xcf   :  { %s3308_s12 = sld [smem:[#allocation3 + $0x75]]  ;;  %v4614_v15 = vstv %s4758_s7  ;;  %s3314_s20 = sld [smem:[#allocation3 + $0x5e]] }
  0xd0   :  { %v4612_v26 = vstv %s4757_s9  ;;  %s3316_s6 = sld [smem:[#allocation3 + $0x78]]  ;;  %s3340_s2 = sld [smem:[#allocation3 + $0x61]] }
  0xd1   :  { %s4771_s14 = sld [smem:[#allocation87_spill]]  ;;  %s3342_s26 = sld [smem:[#allocation3 + $0x64]] }
  0xd2   :  { %4763 = sst [smem:[#allocation88_spill]] %s3298_s23  ;;  %v3333_v45 = vld [vmem:[%s4430_s3] sm:$0xff]  ;;  %v3338_v57 = vld [vmem:[%s4430_s3 + $0x8] sm:$0xff]  ;;  %s3351_s18 = sld [smem:[#allocation3 + $0x67]] }
  0xd3   :  { %4764 = sst [smem:[#allocation89_spill]] %s3300_s15  ;;  %v3349_v41 = vld [vmem:[%s4430_s3 + $0x10] sm:$0xff]  ;;  %v921_v23 = vmul.f32 %v4580_v37, %v3333_v45  ;;  %v923_v55 = vmul.f32 %v3338_v57, %v4581_v18  ;;  %v931_v52 = vmul.f32 %v4582_v2, %v3333_v45  ;;  %v933_v9 = vmul.f32 %v3338_v57, %v4583_v33  ;;  %s3367_s1 = sld [smem:[#allocation3 + $0x6d]] }
  0xd4   :  { %4767 = sst [smem:[#allocation90_spill]] %s3306_s21  ;;  %s3353_s4 = sld [smem:[#allocation3 + $0x6a]]  ;;  %v926_v37 = vmul.f32 %v3349_v41, %v4584_v14  ;;  %v941_v18 = vmul.f32 %v4585_v51, %v3333_v45  ;;  %v943_v2 = vmul.f32 %v3338_v57, %v4586_v35  ;;  %v936_v1 = vmul.f32 %v3349_v41, %v4587_v40 }
  0xd5   :  { %4768 = sst [smem:[#allocation91_spill]] %s3308_s12  ;;  %s3369_s10 = sld [smem:[#allocation3 + $0x70]]  ;;  %v924_v29 = vadd.f32 %v923_v55, %v921_v23  ;;  %v934_v33 = vadd.f32 %v933_v9, %v931_v52  ;;  %v951_v53 = vmul.f32 %v4589_v31, %v3333_v45  ;;  %v953_v14 = vmul.f32 %v3338_v57, %v4588_v4 }
  0xd6   :  { %4769 = sst [smem:[#allocation92_spill]] %s3314_s20  ;;  %v1089_v23 = vstv %s3290_s28  ;;  %v1091_v52 = vstv %s3298_s23  ;;  %v1094_v9 = vstv %s3314_s20  ;;  %s3397_s9 = sld [smem:[#allocation3 + $0x59]]  ;;  %v944_v55 = vadd.f32 %v943_v2, %v941_v18 }
  0xd7   :  { %4770 = sst [smem:[#allocation93_spill]] %s3316_s6  ;;  %s3399_s25 = sld [smem:[#allocation3 + $0x73]]  ;;  %v946_v40 = vmul.f32 %v3349_v41, %v4593_v34  ;;  %v956_v4 = vmul.f32 %v3349_v41, %v4592_v30  ;;  %v961_v31 = vmul.f32 %v4594_v32, %v3333_v45  ;;  %v927_v35 = vadd.f32 %v926_v37, %v924_v29 }
  0xd8   :  { %4779 = sst [smem:[#allocation94_spill]] %s3340_s2  ;;  %s3410_s3 = sld [smem:[#allocation3 + $0x5c]]  ;;  %v937_v24 = vadd.f32 %v936_v1, %v934_v33  ;;  %v954_v51 = vadd.f32 %v953_v14, %v951_v53  ;;  %v963_v18 = vmul.f32 %v3338_v57, %v4609_v60  ;;  %v971_v2 = vmul.f32 %v4608_v54, %v3333_v45 }
  0xd9   :  { %4780 = sst [smem:[#allocation95_spill]] %s3342_s26  ;;  %v973_v30 = vmul.f32 %v3338_v57, %v4599_v46  ;;  %v1097_v34 = vstv %s3340_s2  ;;  %v4668_v32 = vstv %s3342_s26  ;;  %v981_v3 = vmul.f32 %v4604_v6, %v3333_v45  ;;  %s3436_s21 = sld [smem:[#allocation3 + $0x5f]] }
  0xda   :  { %4783 = sst [smem:[#allocation96_spill]] %s3351_s18  ;;  %v983_v37 = vmul.f32 %v3338_v57, %v4603_v38  ;;  %v947_v29 = vadd.f32 %v946_v40, %v944_v55  ;;  %v966_v53 = vmul.f32 %v3349_v41, %v4607_v10  ;;  %s3438_s22 = sld [smem:[#allocation3 + $0x62]]  ;;  %v929_v38 = vadd.f32 %v4622_v27, %v927_v35 }
  0xdb   :  { %4785 = sst [smem:[#allocation97_spill]] %s3353_s4  ;;  %v939_v6 = vadd.f32 %v4621_v19, %v937_v24  ;;  %v957_v40 = vadd.f32 %v956_v4, %v954_v51  ;;  %v964_v55 = vadd.f32 %v963_v18, %v961_v31  ;;  %v974_v10 = vadd.f32 %v973_v30, %v971_v2  ;;  %s4815_s11 = sld [smem:[#allocation44_spill]] }
  0xdc   :  { %4786 = sst [smem:[#allocation98_spill]] %s3367_s1  ;;  %v976_v54 = vmul.f32 %v3349_v41, %v4616_v11  ;;  %v991_v60 = vmul.f32 %v4626_v16, %v3333_v45  ;;  %v993_v46 = vmul.f32 %v3338_v57, %v4623_v22  ;;  %v984_v1 = vadd.f32 %v983_v37, %v981_v3  ;;  %s4814_s7 = sld [smem:[#allocation73_spill]] }
  0xdd   :  { %4787 = sst [smem:[#allocation99_spill]] %s3369_s10  ;;  %v986_v35 = vmul.f32 %v3349_v41, %v4611_v5  ;;  %v1001_v51 = vmul.f32 %v4615_v17, %v3333_v45  ;;  %v1003_v31 = vmul.f32 %v3338_v57, %v4613_v47  ;;  %v1011_v4 = vmul.f32 %v4612_v26, %v3333_v45  ;;  %s3470_s12 = sld [smem:[#allocation3 + $0x65]] }
  0xde   :  { %4795 = sst [smem:[#allocation100_spill]] %s3397_s9  ;;  %v1013_v30 = vmul.f32 %v3338_v57, %v4614_v15  ;;  %v4670_v18 = vstv %s3397_s9  ;;  %s4817_s6 = sld [smem:[#allocation58_spill]]  ;;  %v949_v3 = vadd.f32 %v4617_v44, %v947_v29  ;;  %v959_v2 = vadd.f32 %v4620_v61, %v957_v40 }
  0xdf   :  { %4796 = sst [smem:[#allocation101_spill]] %s3399_s25  ;;  %s4818_s16 = sld [smem:[#allocation68_spill]]  ;;  %v967_v37 = vadd.f32 %v966_v53, %v964_v55  ;;  %v4669_v5 = vstv %s3410_s3  ;;  %v977_v26 = vadd.f32 %v976_v54, %v974_v10  ;;  %v994_v47 = vadd.f32 %v993_v46, %v991_v60 }
  0xe0   :  { %4798 = sst [smem:[#allocation102_spill]] %s3410_s3  ;;  %s4819_s0 = sld [smem:[#allocation72_spill]]  ;;  %v996_v15 = vmul.f32 %v3349_v41, %v4618_v13  ;;  %v1006_v17 = vmul.f32 %v3349_v41, %v4619_v7  ;;  %v987_v11 = vadd.f32 %v986_v35, %v984_v1  ;;  %v1004_v29 = vadd.f32 %v1003_v31, %v1001_v51 }
  0xe1   :  { %4808 = sst [smem:[#allocation103_spill]] %s3436_s21  ;;  %s4820_s4 = sld [smem:[#allocation75_spill]]  ;;  %v1040_v44 = vmax.f32 %v929_v38, 0.0  ;;  %v1041_v53 = vmax.f32 %v939_v6, 0.0  ;;  %v1014_v40 = vadd.f32 %v1013_v30, %v1011_v4  ;;  %v4825_v10 = vstv %s4815_s11 }
  0xe2   :  { %4809 = sst [smem:[#allocation104_spill]] %s3438_s22  ;;  %s4821_s29 = sld [smem:[#allocation82_spill]]  ;;  %v4823_v55 = vstv %s4814_s7  ;;  %v1021_v54 = vmul.f32 %v4825_v10, %v3333_v45  ;;  %v1042_v1 = vmax.f32 %v949_v3, 0.0  ;;  %v4667_v35 = vstv %s3436_s21 }
  0xe3   :  { %4816 = sst [smem:[#allocation44_spill]] %s3470_s12  ;;  %s4822_s19 = sld [smem:[#allocation83_spill]]  ;;  %v1016_v60 = vmul.f32 %v3349_v41, %v4823_v55  ;;  %v997_v31 = vadd.f32 %v996_v15, %v994_v47  ;;  %v4831_v4 = vstv %s4765_s5  ;;  %v4832_v55 = vstv %s4766_s17 }
  0xe4   :  { %s4824_s8 = sld [smem:[#allocation74_spill]]  ;;  %v4826_v46 = vstv %s4817_s6  ;;  %s4828_s24 = sld [smem:[#allocation84_spill]]  ;;  %v1031_v30 = vmul.f32 %v4831_v4, %v3333_v45  ;;  %v1033_v10 = vmul.f32 %v3338_v57, %v4832_v55  ;;  %v1007_v15 = vadd.f32 %v1006_v17, %v1004_v29 }
  0xe5   :  { %v1023_v13 = vmul.f32 %v3338_v57, %v4826_v46  ;;  %v4827_v7 = vstv %s4818_s16  ;;  %s4830_s30 = sld [smem:[#allocation76_spill]]  ;;  %s4833_s7 = sld [smem:[#allocation77_spill]] }
  0xe6   :  { %v969_v61 = vadd.f32 %v4827_v7, %v967_v37  ;;  %v4829_v51 = vstv %s4819_s0  ;;  %v1043_v7 = vmax.f32 %v959_v2, 0.0  ;;  %s4836_s16 = sld [smem:[#allocation85_spill]]  ;;  %s4839_s5 = sld [smem:[#allocation78_spill]] }
  0xe7   :  { %v979_v6 = vadd.f32 %v4829_v51, %v977_v26  ;;  %v4834_v19 = vstv %s4820_s4  ;;  %v1017_v51 = vadd.f32 %v1016_v60, %v1014_v40  ;;  %s4840_s17 = sld [smem:[#allocation79_spill]]  ;;  %v1024_v4 = vadd.f32 %v1023_v13, %v1021_v54  ;;  %s4842_s4 = sld [smem:[#allocation86_spill]] }
  0xe8   :  { %v1026_v46 = vmul.f32 %v3349_v41, %v4834_v19  ;;  %v4835_v3 = vstv %s4821_s29  ;;  %v1044_v16 = vmax.f32 %v969_v61, 0.0  ;;  %v4666_v19 = vstv %s3470_s12  ;;  %s3537_s23 = sld [smem:[#allocation3 + $0x6b]]  ;;  %s3549_s20 = sld [smem:[#allocation3 + $0x6e]] }
  0xe9   :  { %v1053_v37 = vmul.f32 %v4835_v3, %v1040_v44  ;;  %v4837_v27 = vstv %s4822_s19  ;;  %v1034_v3 = vadd.f32 %v1033_v10, %v1031_v30  ;;  %v1045_v62 = vmax.f32 %v979_v6, 0.0  ;;  %s4858_s3 = sld [smem:[#allocation97_spill]]  ;;  %s3561_s9 = sld [smem:[#allocation3 + $0x71]] }
  0xea   :  { %v1055_v22 = vmul.f32 %v4837_v27, %v1041_v53  ;;  %v4838_v26 = vstv %s4824_s8  ;;  %v4841_v24 = vstv %s4828_s24  ;;  %v1090_v61 = vmul.f32 %v1089_v23, %v1040_v44  ;;  %s3527_s24 = sld [smem:[#allocation3 + $0x68]]  ;;  %s3563_s2 = sld [smem:[#allocation3 + $0x79]] }
  0xeb   :  { %v989_v47 = vadd.f32 %v4838_v26, %v987_v11  ;;  %v1058_v33 = vmul.f32 %v4841_v24, %v1042_v1  ;;  %v4843_v2 = vstv %s4830_s30  ;;  %v4844_v14 = vstv %s4833_s7  ;;  %s4849_s7 = sld [smem:[#allocation80_spill]]  ;;  %s4864_s26 = sld [smem:[#allocation90_spill]] }
  0xec   :  { %v1056_v55 = vadd.f32 %v1055_v22, %v1053_v37  ;;  %v999_v38 = vadd.f32 %v4843_v2, %v997_v31  ;;  %v1036_v27 = vmul.f32 %v3349_v41, %v4844_v14  ;;  %v4845_v17 = vstv %s4836_s16  ;;  %s3574_s21 = sld [smem:[#allocation3 + $0x74]]  ;;  %s3595_s12 = sld [smem:[#allocation3 + $0x7a]] }
  0xed   :  { %v1061_v29 = vmul.f32 %v4845_v17, %v1043_v7  ;;  %v1092_v22 = vmul.f32 %v1091_v52, %v1041_v53  ;;  %v4847_v13 = vstv %s4839_s5  ;;  %v4848_v40 = vstv %s4840_s17  ;;  %s4853_s17 = sld [smem:[#allocation81_spill]]  ;;  %s5040_s28 = sld [smem:[#allocation96_spill]] }
  0xee   :  { %v1059_v11 = vadd.f32 %v1058_v33, %v1056_v55  ;;  %v1009_v24 = vadd.f32 %v4847_v13, %v1007_v15  ;;  %v1019_v60 = vadd.f32 %v4848_v40, %v1017_v51  ;;  %v1027_v54 = vadd.f32 %v1026_v46, %v1024_v4  ;;  %4851 = sst [smem:[#allocation72_spill]] %s3537_s23 }
  0xef   :  { %v1046_v14 = vmax.f32 %v989_v47, 0.0  ;;  %v4850_v6 = vstv %s4842_s4  ;;  %v1093_v30 = vadd.f32 %v1092_v22, %v1090_v61  ;;  %v1095_v10 = vmul.f32 %v1094_v9, %v1042_v1  ;;  %4854 = sst [smem:[#allocation82_spill]] %s3549_s20  ;;  %s3551_s4 = sld [smem:[#allocation3 + $0x76]] }
  0xf0   :  { %4846 = sst [smem:[#allocation58_spill]] %s3527_s24  ;;  %v1062_v33 = vadd.f32 %v1061_v29, %v1059_v11  ;;  %v1064_v31 = vmul.f32 %v4850_v6, %v1044_v16  ;;  %v1037_v37 = vadd.f32 %v1036_v27, %v1034_v3  ;;  %v3539_v26 = vmax.f32 %v999_v38, 0.0 }
  0xf1   :  { %v4852_v15 = vstv %s3267_s13  ;;  %v1098_v46 = vmul.f32 %v1097_v34, %v1043_v7  ;;  %v1096_v51 = vadd.f32 %v1095_v10, %v1093_v30  ;;  %v1127_v4 = vmul.f32 %v4670_v18, %v1040_v44  ;;  %4859 = sst [smem:[#allocation74_spill]] %s3561_s9 }
  0xf2   :  { %v1067_v55 = vmul.f32 %v4852_v15, %v1045_v62  ;;  %v1065_v47 = vadd.f32 %v1064_v31, %v1062_v33  ;;  %v1129_v2 = vmul.f32 %v4669_v5, %v1041_v53  ;;  %v4856_v38 = vstv %s4849_s7  ;;  %4860 = sst [smem:[#allocation76_spill]] %s3563_s2 }
  0xf3   :  { %v1029_v3 = vadd.f32 %v4856_v38, %v1027_v54  ;;  %v1048_v27 = vmax.f32 %v1009_v24, 0.0  ;;  %v4857_v11 = vstv %s4771_s14  ;;  %v1101_v29 = vmul.f32 %v4668_v32, %v1044_v16  ;;  %4866 = sst [smem:[#allocation85_spill]] %s3574_s21  ;;  %s3576_s14 = sld [smem:[#allocation3 + $0x7b]] }
  0xf4   :  { %v1070_v17 = vmul.f32 %v4857_v11, %v1046_v14  ;;  %v1068_v61 = vadd.f32 %v1067_v55, %v1065_v47  ;;  %v1099_v22 = vadd.f32 %v1098_v46, %v1096_v51  ;;  %v1130_v44 = vadd.f32 %v1129_v2, %v1127_v4  ;;  %4875 = sst [smem:[#allocation81_spill]] %s3595_s12 }
  0xf5   :  { %4855 = sst [smem:[#allocation83_spill]] %s3551_s4  ;;  %v1132_v53 = vmul.f32 %v4667_v35, %v1042_v1  ;;  %v4861_v13 = vstv %s4853_s17  ;;  %v1049_v24 = vmax.f32 %v1019_v60, 0.0  ;;  %v4862_v54 = vstv %s3292_s27 }
  0xf6   :  { %v1039_v40 = vadd.f32 %v4861_v13, %v1037_v37  ;;  %v1073_v33 = vmul.f32 %v4862_v54, %v3539_v26  ;;  %v4863_v6 = vstv %s3351_s18  ;;  %v1071_v30 = vadd.f32 %v1070_v17, %v1068_v61  ;;  %s4870_s18 = sld [smem:[#allocation91_spill]] }
  0xf7   :  { %v1104_v31 = vmul.f32 %v4863_v6, %v1045_v62  ;;  %v1102_v10 = vadd.f32 %v1101_v29, %v1099_v22  ;;  %v1133_v15 = vadd.f32 %v1132_v53, %v1130_v44  ;;  %v4865_v1 = vstv %s3438_s22  ;;  %s3585_s22 = sld [smem:[#allocation3 + $0x77]] }
  0xf8   :  { %v1135_v55 = vmul.f32 %v4865_v1, %v1043_v7  ;;  %v1050_v37 = vmax.f32 %v1029_v3, 0.0  ;;  %v4868_v60 = vstv %s3300_s15  ;;  %v4869_v47 = vstv %s4858_s3  ;;  %s4874_s3 = sld [smem:[#allocation93_spill]]  ;;  %s3597_s15 = sld [smem:[#allocation3 + $0x7c]] }
  0xf9   :  { %4867 = sst [smem:[#allocation78_spill]] %s3576_s14  ;;  %v1076_v46 = vmul.f32 %v4868_v60, %v1048_v27  ;;  %v1107_v51 = vmul.f32 %v4869_v47, %v1046_v14  ;;  %v4665_v4 = vstv %s3527_s24  ;;  %v1074_v2 = vadd.f32 %v1073_v33, %v1071_v30  ;;  %s4890_s24 = sld [smem:[#allocation12_spill]] }
  0xfa   :  { %v1105_v38 = vadd.f32 %v1104_v31, %v1102_v10  ;;  %v1136_v11 = vadd.f32 %v1135_v55, %v1133_v15  ;;  %v1138_v7 = vmul.f32 %v4666_v19, %v1044_v16  ;;  %v1051_v17 = vmax.f32 %v1039_v40, 0.0 }
  0xfb   :  { %v4872_v29 = vstv %s4864_s26  ;;  %v4873_v61 = vstv %s3367_s1  ;;  %v4664_v44 = vstv %s3537_s23  ;;  %v1077_v53 = vadd.f32 %v1076_v46, %v1074_v2  ;;  %s3616_s23 = sld [smem:[#allocation3 + $0x7d]]  ;;  %s4891_s1 = sld [smem:[#allocation13_spill]] }
  0xfc   :  { %v1079_v3 = vmul.f32 %v4872_v29, %v1049_v24  ;;  %v1110_v22 = vmul.f32 %v4873_v61, %v3539_v26  ;;  %v1108_v13 = vadd.f32 %v1107_v51, %v1105_v38  ;;  %v1139_v54 = vadd.f32 %v1138_v7, %v1136_v11 }
  0xfd   :  { %4871 = sst [smem:[#allocation80_spill]] %s3585_s22  ;;  %v1141_v33 = vmul.f32 %v4665_v4, %v1045_v62  ;;  %v4877_v16 = vstv %s4870_s18  ;;  %v4878_v6 = vstv %s3369_s10  ;;  %v4662_v30 = vstv %s3551_s4  ;;  %s4889_s18 = sld [smem:[#allocation18_spill]] }
  0xfe   :  { %4876 = sst [smem:[#allocation90_spill]] %s3597_s15  ;;  %v1082_v40 = vmul.f32 %v4877_v16, %v1050_v37  ;;  %v1113_v31 = vmul.f32 %v4878_v6, %v1048_v27  ;;  %v4663_v10 = vstv %s3549_s20  ;;  %v1080_v15 = vadd.f32 %v1079_v3, %v1077_v53  ;;  %s4884_s4 = sld [smem:[#allocation7_spill]] }
  0xff   :  { %v1111_v1 = vadd.f32 %v1110_v22, %v1108_v13  ;;  %v1142_v55 = vadd.f32 %v1141_v33, %v1139_v54  ;;  %v1144_v60 = vmul.f32 %v4664_v44, %v1046_v14  ;;  %v4879_v62 = vstv %s4874_s3  ;;  %s4885_s20 = sld [smem:[#allocation10_spill]]  ;;  %s4887_s3 = sld [smem:[#allocation11_spill]] }
 0x100   :  { %v1085_v46 = vmul.f32 %v4879_v62, %v1051_v17  ;;  %v4880_v47 = vstv %s3399_s25  ;;  %v4660_v2 = vstv %s3563_s2  ;;  %v4661_v38 = vstv %s3561_s9  ;;  %s4882_s2 = sld [smem:[#allocation6_spill]]  ;;  %s4883_s9 = sld [smem:[#allocation9_spill]] }
 0x101   :  { %v1116_v51 = vmul.f32 %v4880_v47, %v1049_v24  ;;  %v1083_v11 = vadd.f32 %v1082_v40, %v1080_v15  ;;  %v1114_v7 = vadd.f32 %v1113_v31, %v1111_v1  ;;  %v1145_v29 = vadd.f32 %v1144_v60, %v1142_v55  ;;  %4881 = sst [smem:[#allocation105_spill]] %s3616_s23  ;;  %s4888_s10 = sld [smem:[#allocation15_spill]] }
 0x102   :  { %v1147_v3 = vmul.f32 %v4663_v10, %v3539_v26  ;;  %v4659_v14 = vstv %s3576_s14  ;;  %v1119_v61 = vmul.f32 %v4662_v30, %v1050_v37  ;;  %v4658_v22 = vstv %s3574_s21  ;;  %s2213_s21 = sld [smem:[#allocation3 + $0x82]]  ;;  %s2214_s14 = sld [smem:[#allocation3 + $0x83]] }
 0x103   :  { %v1086_v53 = vadd.f32 %v1085_v46, %v1083_v11  ;;  %v1117_v13 = vadd.f32 %v1116_v51, %v1114_v7  ;;  %v1150_v33 = vmul.f32 %v4661_v38, %v1048_v27  ;;  %v1122_v16 = vmul.f32 %v4660_v2, %v1051_v17  ;;  %s4886_s25 = sld [smem:[#allocation8_spill]] }
 0x104   :  { %v1148_v54 = vadd.f32 %v1147_v3, %v1145_v29  ;;  %v4657_v40 = vstv %s3585_s22  ;;  %v1153_v15 = vmul.f32 %v4658_v22, %v1049_v24  ;;  %v4656_v1 = vstv %s3597_s15  ;;  %s2211_s15 = sld [smem:[#allocation3 + $0x80]]  ;;  %s2212_s22 = sld [smem:[#allocation3 + $0x81]] }
 0x105   :  { %v1088_v26 = vadd.f32 %v4659_v14, %v1086_v53  ;;  %v1120_v6 = vadd.f32 %v1119_v61, %v1117_v13  ;;  %v4655_v55 = vstv %s3595_s12  ;;  %v1156_v46 = vmul.f32 %v4657_v40, %v1050_v37  ;;  %s2210_s12 = sld [smem:[#allocation3 + $0x7f]] }
 0x106   :  { %v1151_v31 = vadd.f32 %v1150_v33, %v1148_v54  ;;  %v1159_v51 = vmul.f32 %v4655_v55, %v1051_v17  ;;  %v4654_v7 = vstv %s3616_s23  ;;  %s2209_s23 = sld [smem:[#allocation3 + $0x7e]] }
 0x107   :  { %v1123_v60 = vadd.f32 %v1122_v16, %v1120_v6  ;;  %v3640_v11 = vadd.f32 %v1088_v26, %v3333_v45 }
 0x108   :  { %v1154_v62 = vadd.f32 %v1153_v15, %v1151_v31 }
 0x109   :  { %v1125_v47 = vadd.f32 %v4656_v1, %v1123_v60 }
 0x10a   :  { %v1157_v27 = vadd.f32 %v1156_v46, %v1154_v62  ;;  %v1191_v46 = vstv %s2211_s15  ;;  %s4894_s15 = sld [smem:[#allocation21_spill]] }
 0x10b   :  { %v3644_v3 = vadd.f32 %v3338_v57, %v1125_v47  ;;  %v1186_v62 = vstv %s2210_s12  ;;  %s4896_s12 = sld [smem:[#allocation19_spill]] }
 0x10c   :  { %v1160_v29 = vadd.f32 %v1159_v51, %v1157_v27  ;;  %v1181_v60 = vstv %s2209_s23  ;;  %s4892_s23 = sld [smem:[#allocation16_spill]] }
 0x10d   :  { %v1166_v61 = vadd.f32 %v3644_v3, %v3640_v11 }
 0x10e   :  { %v1162_v24 = vadd.f32 %v4654_v7, %v1160_v29  ;;  %v1183_v29 = vstv %s2212_s22  ;;  %s4901_s22 = sld [smem:[#allocation17_spill]] }
 0x110   :  { %v3651_v37 = vadd.f32 %v3349_v41, %v1162_v24  ;;  %v1188_v24 = vstv %s2213_s21  ;;  %s4899_s21 = sld [smem:[#allocation14_spill]] }
 0x112   :  { %v1167_v53 = vadd.f32 %v1166_v61, %v3651_v37 }
 0x114   :  { %v1168_v13 = vmul.f32 0.33333334, %v1167_v53 }
 0x116   :  { %v1169_v17 = vsub.f32 %v3640_v11, %v1168_v13  ;;  %v1170_v45 = vsub.f32 %v3644_v3, %v1168_v13  ;;  %v1171_v54 = vsub.f32 %v3651_v37, %v1168_v13 }
 0x118   :  { %v1172_v33 = vmul.f32 %v1169_v17, %v1169_v17  ;;  %v1173_v57 = vmul.f32 %v1170_v45, %v1170_v45  ;;  %v1175_v26 = vmul.f32 %v1171_v54, %v1171_v54 }
 0x11a   :  { %v1174_v16 = vadd.f32 %v1173_v57, %v1172_v33  ;;  %v1193_v33 = vstv %s2214_s14  ;;  %s4903_s14 = sld [smem:[#allocation20_spill]] }
 0x11c   :  { %v1176_v6 = vadd.f32 %v1175_v26, %v1174_v16 }
 0x11e   :  { %v1177_v31 = vmul.f32 0.33333334, %v1176_v6  ;;  %v4895_v6 = vstv %s4883_s9  ;;  %s4909_s9 = sld [smem:[#allocation23_spill]] }
 0x120   :  { %v1178_v15 = vadd.f32 1e-05, %v1177_v31  ;;  %v4897_v31 = vstv %s4884_s4  ;;  %v4919_v1 = vstv %s4903_s14  ;;  %s4922_s4 = sld [smem:[#allocation27_spill]]  ;;  %s4941_s14 = sld [smem:[#allocation47_spill]] }
 0x122   :  { %2294 = vrsqrt.f32 %v1178_v15 }
 0x12c   :  { %v2295_v41 = vpop.eup %2294 }
 0x12d   :  { %v1180_v47 = vmul.f32 %v2295_v41, %v1169_v17  ;;  %v1185_v27 = vmul.f32 %v2295_v41, %v1170_v45  ;;  %v1190_v51 = vmul.f32 %v2295_v41, %v1171_v54  ;;  %v4893_v17 = vstv %s4882_s2  ;;  %s4907_s2 = sld [smem:[#allocation22_spill]] }
 0x12e   :  { %v4898_v41 = vstv %s4885_s20  ;;  %s4911_s20 = sld [smem:[#allocation24_spill]] }
 0x12f   :  { %v1182_v61 = vmul.f32 %v1181_v60, %v1180_v47  ;;  %v1187_v53 = vmul.f32 %v1186_v62, %v1185_v27  ;;  %v1192_v13 = vmul.f32 %v1191_v46, %v1190_v51  ;;  %v4900_v62 = vstv %s4886_s25  ;;  %s4920_s25 = sld [smem:[#allocation28_spill]] }
 0x130   :  { %v4902_v47 = vstv %s4887_s3  ;;  %s4912_s3 = sld [smem:[#allocation26_spill]] }
 0x131   :  { %v1184_v57 = vadd.f32 %v1183_v29, %v1182_v61  ;;  %v1189_v16 = vadd.f32 %v1188_v24, %v1187_v53  ;;  %v3657_v26 = vadd.f32 %v1193_v33, %v1192_v13  ;;  %v4904_v29 = vstv %s4888_s10  ;;  %s4933_s10 = sld [smem:[#allocation30_spill]] }
 0x132   :  { %v4905_v61 = vstv %s4889_s18  ;;  %v4906_v13 = vstv %s4890_s24  ;;  %s4915_s18 = sld [smem:[#allocation29_spill]]  ;;  %s4917_s24 = sld [smem:[#allocation25_spill]] }
 0x133   :  { %v1195_v45 = vmul.f32 %v1184_v57, %v4893_v17  ;;  %v1196_v54 = vmul.f32 %v1189_v16, %v4895_v6  ;;  %v1200_v15 = vmul.f32 %v1184_v57, %v4897_v31  ;;  %v1201_v60 = vmul.f32 %v1189_v16, %v4898_v41 }
 0x134   :  { %v1205_v46 = vmul.f32 %v1184_v57, %v4900_v62  ;;  %v1206_v27 = vmul.f32 %v1189_v16, %v4902_v47  ;;  %v1210_v24 = vmul.f32 %v1184_v57, %v4904_v29  ;;  %v1211_v53 = vmul.f32 %v1189_v16, %v4905_v61 }
 0x135   :  { %v1197_v51 = vadd.f32 %v1196_v54, %v1195_v45  ;;  %v1198_v33 = vmul.f32 %v3657_v26, %v4906_v13  ;;  %v1202_v17 = vadd.f32 %v1201_v60, %v1200_v15  ;;  %v4908_v6 = vstv %s4891_s1  ;;  %s4926_s1 = sld [smem:[#allocation31_spill]] }
 0x136   :  { %v1203_v31 = vmul.f32 %v3657_v26, %v4908_v6  ;;  %v4910_v41 = vstv %s4892_s23  ;;  %v1207_v7 = vadd.f32 %v1206_v27, %v1205_v46  ;;  %v1212_v47 = vadd.f32 %v1211_v53, %v1210_v24  ;;  %s4934_s23 = sld [smem:[#allocation32_spill]] }
 0x137   :  { %v1215_v62 = vmul.f32 %v1184_v57, %v4910_v41  ;;  %v4913_v45 = vstv %s4894_s15  ;;  %v4914_v29 = vstv %s4896_s12  ;;  %v3688_v55 = vadd.f32 %v1198_v33, %v1197_v51  ;;  %s4938_s15 = sld [smem:[#allocation34_spill]]  ;;  %s4939_s12 = sld [smem:[#allocation46_spill]] }
 0x138   :  { %v1213_v54 = vmul.f32 %v3657_v26, %v4913_v45  ;;  %v1216_v61 = vmul.f32 %v1189_v16, %v4914_v29  ;;  %v4916_v13 = vstv %s4899_s21  ;;  %v4918_v60 = vstv %s4901_s22  ;;  %s4937_s21 = sld [smem:[#allocation106_spill]]  ;;  %s4940_s22 = sld [smem:[#allocation35_spill]] }
 0x139   :  { %v1208_v15 = vmul.f32 %v3657_v26, %v4916_v13  ;;  %v1220_v6 = vmul.f32 %v1184_v57, %v4918_v60  ;;  %v1221_v40 = vmul.f32 %v1189_v16, %v4919_v1  ;;  %v3697_v41 = vadd.f32 %v1203_v31, %v1202_v17 }
 0x13a   :  { %v3699_v46 = vadd.f32 %v1213_v54, %v1212_v47  ;;  %v1217_v27 = vadd.f32 %v1216_v61, %v1215_v62  ;;  %v4921_v24 = vstv %s4907_s2  ;;  %v4923_v33 = vstv %s4909_s9  ;;  %s4942_s2 = sld [smem:[#allocation36_spill]]  ;;  %s4943_s9 = sld [smem:[#allocation48_spill]] }
 0x13b   :  { %v1218_v53 = vmul.f32 %v3657_v26, %v4921_v24  ;;  %v1222_v51 = vadd.f32 %v1221_v40, %v1220_v6  ;;  %v1223_v45 = vmul.f32 %v3657_v26, %v4923_v33  ;;  %v4924_v29 = vstv %s4911_s20  ;;  %s4944_s20 = sld [smem:[#allocation37_spill]] }
 0x13c   :  { %v1225_v13 = vmul.f32 %v1184_v57, %v4924_v29  ;;  %v4925_v22 = vstv %s4912_s3  ;;  %v3711_v14 = vadd.f32 %v1208_v15, %v1207_v7  ;;  %v4927_v31 = vstv %s4915_s18  ;;  %s4945_s3 = sld [smem:[#allocation49_spill]]  ;;  %s4946_s18 = sld [smem:[#allocation50_spill]] }
 0x13d   :  { %v1226_v60 = vmul.f32 %v1189_v16, %v4925_v22  ;;  %v3713_v1 = vadd.f32 %v1218_v53, %v1217_v27  ;;  %v3715_v17 = vadd.f32 %v1223_v45, %v1222_v51  ;;  %v3720_v62 = vmul.f32 %v3657_v26, %v4927_v31 }
 0x13e   :  { %v4928_v47 = vstv %s4917_s24  ;;  %v1240_v54 = vmul.f32 %v3699_v46, %v3688_v55  ;;  %v1286_v7 = vrot.slane %v3699_v46, %v2572_v21  ;;  %v4929_v15 = vstv %s4920_s25  ;;  %s2215_s24 = sld [smem:[#allocation3 + $0x84]]  ;;  %s2216_s25 = sld [smem:[#allocation3 + $0x85]] }
 0x13f   :  { %v3724_v40 = vmul.f32 %v1184_v57, %v4928_v47  ;;  %v1241_v22 = vmul.f32 %v3713_v1, %v3697_v41  ;;  %v3732_v61 = vadd.f32 %v1226_v60, %v1225_v13  ;;  %v3736_v6 = vmul.f32 %v1189_v16, %v4929_v15 }
 0x140   :  { %v4930_v27 = vstv %s4922_s4  ;;  %v1291_v53 = vrot.slane %v3713_v1, %v2572_v21  ;;  %v1243_v33 = vmul.f32 %v3715_v17, %v3711_v14  ;;  %v1287_v45 = vmul.f32 %v1286_v7, %v3688_v55  ;;  %s2217_s4 = sld [smem:[#allocation3 + $0x86]] }
 0x141   :  { %v3740_v24 = vmul.f32 %v1184_v57, %v4930_v27  ;;  %v1242_v51 = vadd.f32 %v1241_v22, %v1240_v54  ;;  %v1297_v29 = vrot.slane %v3715_v17, %v2572_v21  ;;  %v4931_v13 = vstv %s4926_s1  ;;  %s2218_s1 = sld [smem:[#allocation3 + $0x87]] }
 0x142   :  { %v3751_v60 = vmul.f32 %v1189_v16, %v4931_v13  ;;  %v1292_v31 = vmul.f32 %v1291_v53, %v3697_v41  ;;  %v1372_v57 = vrot.slane %v3699_v46, %v2579_v25  ;;  %v1377_v47 = vrot.slane %v3713_v1, %v2579_v25 }
 0x143   :  { %v1244_v54 = vadd.f32 %v1243_v33, %v1242_v51  ;;  %v1298_v22 = vmul.f32 %v1297_v29, %v3711_v14  ;;  %v1383_v7 = vrot.slane %v3715_v17, %v2579_v25  ;;  %v1458_v21 = vrot.slane %v3699_v46, %v2582_v28 }
 0x144   :  { %v1293_v15 = vadd.f32 %v1292_v31, %v1287_v45  ;;  %v1373_v16 = vmul.f32 %v1372_v57, %v3688_v55  ;;  %v1378_v27 = vmul.f32 %v1377_v47, %v3697_v41  ;;  %v1463_v53 = vrot.slane %v3713_v1, %v2582_v28 }
 0x145   :  { %v1245_v13 = vmul.f32 0.57735026, %v1244_v54  ;;  %v1384_v2 = vmul.f32 %v1383_v7, %v3711_v14  ;;  %v1459_v51 = vmul.f32 %v1458_v21, %v3688_v55  ;;  %v1469_v33 = vrot.slane %v3715_v17, %v2582_v28 }
 0x146   :  { %v1299_v25 = vadd.f32 %v1298_v22, %v1293_v15  ;;  %v1379_v29 = vadd.f32 %v1378_v27, %v1373_v16  ;;  %v1464_v38 = vmul.f32 %v1463_v53, %v3697_v41  ;;  %v1544_v45 = vrot.slane %v3699_v46, %v2638_v58 }
 0x147   :  { %v1246_v31 = vsub.f32 %v1245_v13, %v1245_v13  ;;  %v1470_v57 = vmul.f32 %v1469_v33, %v3711_v14  ;;  %v1549_v47 = vrot.slane %v3713_v1, %v2638_v58  ;;  %v1555_v54 = vrot.slane %v3715_v17, %v2638_v58 }
 0x148   :  { %v3779_v7 = vmul.f32 0.57735026, %v1299_v25  ;;  %v1385_v21 = vadd.f32 %v1384_v2, %v1379_v29  ;;  %v1465_v28 = vadd.f32 %v1464_v38, %v1459_v51  ;;  %v1545_v22 = vmul.f32 %v1544_v45, %v3688_v55 }
 0x149   :  { %v1247_v15 = vmul.f32 1.442695, %v1246_v31  ;;  %v1550_v16 = vmul.f32 %v1549_v47, %v3697_v41  ;;  %v1556_v27 = vmul.f32 %v1555_v54, %v3711_v14  ;;  %v1630_v53 = vrot.slane %v3699_v46, %v2662_v12 }
 0x14a   :  { %v1301_v13 = vsel %vm319_vm0, %v3779_v7, -inf  ;;  %v3788_v33 = vmul.f32 0.57735026, %v1385_v21  ;;  %v1471_v58 = vadd.f32 %v1470_v57, %v1465_v28  ;;  %v1635_v2 = vrot.slane %v3713_v1, %v2662_v12 }
 0x14b   :  { %2296 = vpow2.f32 %v1247_v15  ;;  %v1302_v38 = vrot.slane %v1301_v13, 4  ;;  %v1551_v51 = vadd.f32 %v1550_v16, %v1545_v22  ;;  %v1631_v25 = vmul.f32 %v1630_v53, %v3688_v55 }
 0x14c   :  { %v1387_v29 = vsel %vm407_vm1, %v3788_v33, -inf  ;;  %v3795_v45 = vmul.f32 0.57735026, %v1471_v58  ;;  %v1636_v31 = vmul.f32 %v1635_v2, %v3697_v41  ;;  %v1641_v47 = vrot.slane %v3715_v17, %v2662_v12 }
 0x14d   :  { %v1303_v54 = vmax.f32 %v1301_v13, %v1302_v38  ;;  %v1388_v57 = vrot.slane %v1387_v29, 4  ;;  %v1557_v21 = vadd.f32 %v1556_v27, %v1551_v51  ;;  %v1716_v28 = vrot.slane %v3699_v46, %v2692_v43 }
 0x14e   :  { %v1473_v22 = vsel %vm495_vm2, %v3795_v45, -inf  ;;  %v1637_v15 = vadd.f32 %v1636_v31, %v1631_v25  ;;  %v1642_v16 = vmul.f32 %v1641_v47, %v3711_v14  ;;  %v1721_v53 = vrot.slane %v3713_v1, %v2692_v43 }
 0x14f   :  { %v1304_v58 = vrot.slane %v1303_v54, 2  ;;  %v1389_v2 = vmax.f32 %v1387_v29, %v1388_v57  ;;  %v1474_v30 = vrot.slane %v1473_v22, 4  ;;  %v3807_v10 = vmul.f32 0.57735026, %v1557_v21 }
 0x150   :  { %v1643_v12 = vadd.f32 %v1642_v16, %v1637_v15  ;;  %v1717_v27 = vmul.f32 %v1716_v28, %v3688_v55  ;;  %v1722_v13 = vmul.f32 %v1721_v53, %v3697_v41  ;;  %v1727_v38 = vrot.slane %v3715_v17, %v2692_v43  ;;  %v4932_v16 = vld [vmem:[#allocation33_spill] sm:$0xff] }
 0x151   :  { %v1305_v51 = vmax.f32 %v1303_v54, %v1304_v58  ;;  %v1390_v25 = vrot.slane %v1389_v2, 2  ;;  %v1475_v31 = vmax.f32 %v1473_v22, %v1474_v30  ;;  %v1559_v47 = vsel %vm583_vm3, %v3807_v10, -inf }
 0x152   :  { %v1560_v44 = vrot.slane %v1559_v47, 4  ;;  %v3815_v4 = vmul.f32 0.57735026, %v1643_v12  ;;  %v1723_v29 = vadd.f32 %v1722_v13, %v1717_v27  ;;  %v1728_v57 = vmul.f32 %v1727_v38, %v3711_v14 }
 0x153   :  { %v1306_v21 = vrot.slane %v1305_v51, 1  ;;  %v1391_v15 = vmax.f32 %v1389_v2, %v1390_v25  ;;  %v1476_v28 = vrot.slane %v1475_v31, 2  ;;  %v1802_v53 = vrot.slane %v3699_v46, %v4932_v16 }
 0x154   :  { %v1561_v19 = vmax.f32 %v1559_v47, %v1560_v44  ;;  %v1645_v43 = vsel %vm671_vm4, %v3815_v4, -inf  ;;  %v1729_v30 = vadd.f32 %v1728_v57, %v1723_v29  ;;  %v1807_v54 = vrot.slane %v3713_v1, %v4932_v16 }
 0x155   :  { %v2297_v22 = vpop.eup %2296  ;;  %v1307_v58 = vmax.f32 %v1305_v51, %v1306_v21  ;;  %v1392_v12 = vrot.slane %v1391_v15, 1  ;;  %v1477_v27 = vmax.f32 %v1475_v31, %v1476_v28  ;;  %v1646_v13 = vrot.slane %v1645_v43, 4 }
 0x156   :  { %2298 = vrcp.f32 %v2297_v22  ;;  %v1562_v38 = vrot.slane %v1561_v19, 2  ;;  %v3824_v2 = vmul.f32 0.57735026, %v1729_v30  ;;  %v1803_v25 = vmul.f32 %v1802_v53, %v3688_v55 }
 0x157   :  { %v1308_v44 = vsub.f32 %v3779_v7, %v1307_v58  ;;  %v1393_v46 = vmax.f32 %v1391_v15, %v1392_v12  ;;  %v1478_v47 = vrot.slane %v1477_v27, 1  ;;  %v1647_v35 = vmax.f32 %v1645_v43, %v1646_v13 }
 0x158   :  { %v1563_v29 = vmax.f32 %v1561_v19, %v1562_v38  ;;  %v1731_v1 = vsel %vm759_vm5, %v3824_v2, -inf  ;;  %v1808_v51 = vmul.f32 %v1807_v54, %v3697_v41  ;;  %v1813_v31 = vrot.slane %v3715_v17, %v4932_v16 }
 0x159   :  { %v1309_v57 = vmul.f32 1.442695, %v1308_v44  ;;  %v1394_v21 = vsub.f32 %v3788_v33, %v1393_v46  ;;  %v1479_v28 = vmax.f32 %v1477_v27, %v1478_v47  ;;  %v1648_v30 = vrot.slane %v1647_v35, 2 }
 0x15a   :  { %v1564_v55 = vrot.slane %v1563_v29, 1  ;;  %v1732_v7 = vrot.slane %v1731_v1, 4  ;;  %v1809_v15 = vadd.f32 %v1808_v51, %v1803_v25  ;;  %v1814_v53 = vmul.f32 %v1813_v31, %v3711_v14 }
 0x15b   :  { %2300 = vpow2.f32 %v1309_v57  ;;  %v1395_v19 = vmul.f32 1.442695, %v1394_v21  ;;  %v1480_v43 = vsub.f32 %v3795_v45, %v1479_v28  ;;  %v1649_v41 = vmax.f32 %v1647_v35, %v1648_v30 }
 0x15c   :  { %v1232_v17 = vadd.f32 %v3736_v6, %v3724_v40  ;;  %v1565_v16 = vmax.f32 %v1563_v29, %v1564_v55  ;;  %v1733_v54 = vmax.f32 %v1731_v1, %v1732_v7  ;;  %v1815_v33 = vadd.f32 %v1814_v53, %v1809_v15 }
 0x15d   :  { %v1237_v58 = vadd.f32 %v3751_v60, %v3740_v24  ;;  %2302 = vpow2.f32 %v1395_v19  ;;  %v1481_v12 = vmul.f32 1.442695, %v1480_v43  ;;  %v1650_v27 = vrot.slane %v1649_v41, 1 }
 0x15e   :  { %v4935_v13 = vstv %s4933_s10  ;;  %v1566_v38 = vsub.f32 %v3807_v10, %v1565_v16  ;;  %v1734_v25 = vrot.slane %v1733_v54, 2  ;;  %v3844_v45 = vmul.f32 0.57735026, %v1815_v33  ;;  %s2219_s10 = sld [smem:[#allocation3 + $0x88]] }
 0x15f   :  { %v1233_v14 = vmul.f32 %v3657_v26, %v4935_v13  ;;  %v3848_v35 = vadd.f32 %v3720_v62, %v3732_v61  ;;  %v4936_v40 = vstv %s4934_s23  ;;  %2304 = vpow2.f32 %v1481_v12  ;;  %s2220_s23 = sld [smem:[#allocation3 + $0x89]] }
 0x160   :  { %v1238_v6 = vmul.f32 %v3657_v26, %v4936_v40  ;;  %v1651_v24 = vmax.f32 %v1649_v41, %v1650_v27  ;;  %v2299_v60 = vpop.eup %2298  ;;  %v1567_v46 = vmul.f32 1.442695, %v1566_v38  ;;  %v1735_v47 = vmax.f32 %v1733_v54, %v1734_v25 }
 0x161   :  { %v3853_v44 = vadd.f32 %v1233_v14, %v1232_v17  ;;  %v1817_v10 = vsel %vm847_vm6, %v3844_v45, -inf  ;;  %v1252_v1 = vmul.f32 %v2299_v60, %v2297_v22 }
 0x162   :  { %v3857_v29 = vadd.f32 %v1238_v6, %v1237_v58  ;;  %v1652_v51 = vsub.f32 %v3815_v4, %v1651_v24  ;;  %v1818_v62 = vrot.slane %v1817_v10, 4  ;;  %2306 = vpow2.f32 %v1567_v46 }
 0x163   :  { %v1736_v61 = vrot.slane %v1735_v47, 1  ;;  %v1253_v26 = vmul.f32 %v1252_v1, %v3848_v35  ;;  %v1255_v31 = vmul.f32 %v1252_v1, %v3853_v44 }
 0x164   :  { %v1257_v57 = vmul.f32 %v1252_v1, %v3857_v29  ;;  %v1653_v21 = vmul.f32 1.442695, %v1652_v51  ;;  %v1819_v30 = vmax.f32 %v1817_v10, %v1818_v62 }
 0x165   :  { %v1737_v28 = vmax.f32 %v1735_v47, %v1736_v61  ;;  %v3863_v55 = vpop.eup %2300  ;;  %v1259_v7 = vmul.f32 %v1253_v26, %v2592_v36  ;;  %v1260_v22 = vmul.f32 %v1255_v31, %v2595_v39  ;;  %v1267_v15 = vmul.f32 %v1253_v26, %v2610_v50 }
 0x166   :  { %v1262_v4 = vmul.f32 %v1257_v57, %v2604_v48  ;;  %v1268_v53 = vmul.f32 %v1255_v31, %v2641_v59  ;;  %v1270_v19 = vmul.f32 %v1257_v57, %v2644_v0  ;;  %v1275_v43 = vmul.f32 %v1253_v26, %v2736_v56 }
 0x167   :  { %v1276_v41 = vmul.f32 %v1255_v31, %v2741_v8  ;;  %v3873_v17 = vpop.eup %2302  ;;  %v1261_v16 = vadd.f32 %v1260_v22, %v1259_v7  ;;  %v1278_v54 = vmul.f32 %v1257_v57, %v2744_v63  ;;  %v1311_v33 = vsel %vm319_vm0, %v3863_v55, 0.0 }
 0x168   :  { %2308 = vpow2.f32 %v1653_v21  ;;  %v1269_v58 = vadd.f32 %v1268_v53, %v1267_v15  ;;  %v1312_v27 = vrot.slane %v1311_v33, 4  ;;  %v1397_v13 = vsel %vm407_vm1, %v3873_v17, 0.0 }
 0x169   :  { %v1277_v12 = vadd.f32 %v1276_v41, %v1275_v43  ;;  %v3880_v14 = vpop.eup %2304  ;;  %v1263_v38 = vadd.f32 %v1262_v4, %v1261_v16  ;;  %v1398_v25 = vrot.slane %v1397_v13, 4  ;;  %v1738_v40 = vsub.f32 %v3824_v2, %v1737_v28 }
 0x16a   :  { %v1820_v6 = vrot.slane %v1819_v30, 2  ;;  %v1271_v24 = vadd.f32 %v1270_v19, %v1269_v58  ;;  %v1313_v46 = vadd.f32 %v1312_v27, %v1311_v33  ;;  %v1483_v47 = vsel %vm495_vm2, %v3880_v14, 0.0 }
 0x16b   :  { %v1279_v60 = vadd.f32 %v1278_v54, %v1277_v12  ;;  %v1264_v10 = vadd.f32 %v1263_v38, %v2607_v49  ;;  %v1399_v1 = vadd.f32 %v1398_v25, %v1397_v13  ;;  %v1484_v51 = vrot.slane %v1483_v47, 4 }
 0x16c   :  { %v1739_v62 = vmul.f32 1.442695, %v1738_v40  ;;  %v3886_v61 = vpop.eup %2306  ;;  %v1272_v26 = vadd.f32 %v1271_v24, %v2687_v42  ;;  %v1314_v57 = vrot.slane %v1313_v46, 2  ;;  %v1821_v2 = vmax.f32 %v1819_v30, %v1820_v6 }
 0x16d   :  { %v1280_v31 = vadd.f32 %v1279_v60, %v2751_v20  ;;  %v1265_v21 = vadd.f32 %v1264_v10, %v3640_v11  ;;  %v1400_v28 = vrot.slane %v1399_v1, 2  ;;  %v1485_v7 = vadd.f32 %v1484_v51, %v1483_v47 }
 0x16e   :  { %v1569_v22 = vsel %vm583_vm3, %v3886_v61, 0.0  ;;  %v1273_v4 = vadd.f32 %v1272_v26, %v3644_v3  ;;  %v1315_v53 = vadd.f32 %v1314_v57, %v1313_v46  ;;  %2310 = vpow2.f32 %v1739_v62 }
 0x16f   :  { %v1281_v15 = vadd.f32 %v1280_v31, %v3651_v37  ;;  %v1570_v19 = vrot.slane %v1569_v22, 4  ;;  %1266 = vst.msk [vmem:[%s4937_s21] sm:$0x1] %vm273_vm7, %v1265_v21  ;;  %v1401_v43 = vadd.f32 %v1400_v28, %v1399_v1  ;;  %v1486_v30 = vrot.slane %v1485_v7, 2 }
 0x170   :  { %v1822_v41 = vrot.slane %v1821_v2, 1  ;;  %2241 = vst.msk [vmem:[%s4937_s21 + $0x8] sm:$0x1] %vm273_vm7, %v1273_v4  ;;  %v1316_v16 = vrot.slane %v1315_v53, 1 }
 0x171   :  { %2242 = vst.msk [vmem:[%s4937_s21 + $0x10] sm:$0x1] %vm273_vm7, %v1281_v15  ;;  %v1571_v54 = vadd.f32 %v1570_v19, %v1569_v22  ;;  %v1402_v58 = vrot.slane %v1401_v43, 1  ;;  %v1487_v12 = vadd.f32 %v1486_v30, %v1485_v7 }
 0x172   :  { %v3907_v33 = vpop.eup %2308  ;;  %v1317_v27 = vadd.f32 %v1316_v16, %v1315_v53  ;;  %v1823_v25 = vmax.f32 %v1821_v2, %v1822_v41 }
 0x173   :  { %v1572_v13 = vrot.slane %v1571_v54, 2  ;;  %v1655_v38 = vsel %vm671_vm4, %v3907_v33, 0.0  ;;  %v1403_v40 = vadd.f32 %v1402_v58, %v1401_v43  ;;  %v1488_v6 = vrot.slane %v1487_v12, 1 }
 0x174   :  { %v1656_v24 = vrot.slane %v1655_v38, 4  ;;  %2312 = vrcp.f32 %v1317_v27  ;;  %v1824_v10 = vsub.f32 %v3844_v45, %v1823_v25 }
 0x175   :  { %v1573_v60 = vadd.f32 %v1572_v13, %v1571_v54  ;;  %2314 = vrcp.f32 %v1403_v40  ;;  %v1489_v46 = vadd.f32 %v1488_v6, %v1487_v12 }
 0x176   :  { %v1657_v47 = vadd.f32 %v1656_v24, %v1655_v38  ;;  %v1825_v57 = vmul.f32 1.442695, %v1824_v10 }
 0x177   :  { %2316 = vrcp.f32 %v1489_v46  ;;  %v1574_v1 = vrot.slane %v1573_v60, 1 }
 0x178   :  { %v1658_v51 = vrot.slane %v1657_v47, 2  ;;  %v3912_v62 = vpop.eup %2310  ;;  %2318 = vpow2.f32 %v1825_v57 }
 0x179   :  { %v1741_v31 = vsel %vm759_vm5, %v3912_v62, 0.0  ;;  %v1575_v2 = vadd.f32 %v1574_v1, %v1573_v60 }
 0x17a   :  { %v1659_v26 = vadd.f32 %v1658_v51, %v1657_v47  ;;  %v1742_v28 = vrot.slane %v1741_v31, 4 }
 0x17b   :  { %2320 = vrcp.f32 %v1575_v2 }
 0x17c   :  { %v1660_v21 = vrot.slane %v1659_v26, 1  ;;  %v1743_v22 = vadd.f32 %v1742_v28, %v1741_v31 }
 0x17e   :  { %v1661_v7 = vadd.f32 %v1660_v21, %v1659_v26  ;;  %v2313_v4 = vpop.eup %2312  ;;  %v1744_v53 = vrot.slane %v1743_v22, 2 }
 0x17f   :  { %v2315_v15 = vpop.eup %2314  ;;  %v1320_v45 = vmul.f32 %v2313_v4, %v3863_v55 }
 0x180   :  { %v1406_v19 = vmul.f32 %v2315_v15, %v3873_v17  ;;  %2322 = vrcp.f32 %v1661_v7  ;;  %v3921_v54 = vadd.f32 %v1744_v53, %v1743_v22 }
 0x181   :  { %v2317_v43 = vpop.eup %2316  ;;  %v1321_v30 = vmul.f32 %v1320_v45, %v3848_v35  ;;  %v1329_v41 = vmul.f32 %v1320_v45, %v3853_v44  ;;  %v1337_v16 = vmul.f32 %v1320_v45, %v3857_v29 }
 0x182   :  { %v1407_v58 = vmul.f32 %v1406_v19, %v3848_v35  ;;  %v1415_v12 = vmul.f32 %v1406_v19, %v3853_v44  ;;  %v1423_v55 = vmul.f32 %v1406_v19, %v3857_v29  ;;  %v3927_v27 = vmul.f32 %v2317_v43, %v3880_v14  ;;  %v3941_v7 = vpop.eup %2318 }
 0x183   :  { %v1322_v17 = vsel %vm319_vm0, %v1321_v30, 0.0  ;;  %v1330_v13 = vsel %vm319_vm0, %v1329_v41, 0.0  ;;  %v1338_v38 = vsel %vm319_vm0, %v1337_v16, 0.0  ;;  %v1746_v25 = vrot.slane %v3921_v54, 1 }
 0x184   :  { %v1323_v40 = vrot.slane %v1322_v17, 4  ;;  %v1331_v6 = vrot.slane %v1330_v13, 4  ;;  %v1339_v24 = vrot.slane %v1338_v38, 4  ;;  %v1408_v60 = vsel %vm407_vm1, %v1407_v58, 0.0 }
 0x185   :  { %v1409_v46 = vrot.slane %v1408_v60, 4  ;;  %v1416_v47 = vsel %vm407_vm1, %v1415_v12, 0.0  ;;  %v1424_v10 = vsel %vm407_vm1, %v1423_v55, 0.0  ;;  %v1493_v14 = vmul.f32 %v3927_v27, %v3848_v35  ;;  %v3943_v53 = vpop.eup %2320 }
 0x186   :  { %v1324_v1 = vadd.f32 %v1323_v40, %v1322_v17  ;;  %v1332_v51 = vadd.f32 %v1331_v6, %v1330_v13  ;;  %v1340_v26 = vadd.f32 %v1339_v24, %v1338_v38  ;;  %v1417_v31 = vrot.slane %v1416_v47, 4 }
 0x187   :  { %v1410_v57 = vadd.f32 %v1409_v46, %v1408_v60  ;;  %v1425_v2 = vrot.slane %v1424_v10, 4  ;;  %v1494_v21 = vsel %vm495_vm2, %v1493_v14, 0.0  ;;  %v1501_v28 = vmul.f32 %v3927_v27, %v3853_v44 }
 0x188   :  { %v1325_v22 = vrot.slane %v1324_v1, 2  ;;  %v1333_v4 = vrot.slane %v1332_v51, 2  ;;  %v1341_v15 = vrot.slane %v1340_v26, 2  ;;  %v1418_v45 = vadd.f32 %v1417_v31, %v1416_v47 }
 0x189   :  { %v1411_v19 = vrot.slane %v1410_v57, 2  ;;  %v1426_v43 = vadd.f32 %v1425_v2, %v1424_v10  ;;  %v1495_v30 = vrot.slane %v1494_v21, 4  ;;  %v1502_v41 = vsel %vm495_vm2, %v1501_v28, 0.0 }
 0x18a   :  { %v3946_v16 = vpop.eup %2322  ;;  %v1326_v58 = vadd.f32 %v1325_v22, %v1324_v1  ;;  %v1334_v12 = vadd.f32 %v1333_v4, %v1332_v51  ;;  %v1342_v55 = vadd.f32 %v1341_v15, %v1340_v26  ;;  %v1419_v17 = vrot.slane %v1418_v45, 2 }
 0x18b   :  { %v1412_v13 = vadd.f32 %v1411_v19, %v1410_v57  ;;  %v1427_v38 = vrot.slane %v1426_v43, 2  ;;  %v1496_v40 = vadd.f32 %v1495_v30, %v1494_v21  ;;  %v1503_v6 = vrot.slane %v1502_v41, 4 }
 0x18c   :  { %v1327_v24 = vrot.slane %v1326_v58, 1  ;;  %v1335_v60 = vrot.slane %v1334_v12, 1  ;;  %v1343_v46 = vrot.slane %v1342_v55, 1  ;;  %v1420_v47 = vadd.f32 %v1419_v17, %v1418_v45 }
 0x18d   :  { %v1413_v14 = vrot.slane %v1412_v13, 1  ;;  %v1428_v31 = vadd.f32 %v1427_v38, %v1426_v43  ;;  %v1497_v10 = vrot.slane %v1496_v40, 2  ;;  %v1504_v2 = vadd.f32 %v1503_v6, %v1502_v41 }
 0x18e   :  { %v1328_v32 = vadd.f32 %v1327_v24, %v1326_v58  ;;  %v1336_v28 = vadd.f32 %v1335_v60, %v1334_v12  ;;  %v1344_v5 = vadd.f32 %v1343_v46, %v1342_v55  ;;  %v1421_v18 = vrot.slane %v1420_v47, 1 }
 0x18f   :  { %v1414_v1 = vadd.f32 %v1413_v14, %v1412_v13  ;;  %v1429_v51 = vrot.slane %v1428_v31, 1  ;;  %v1498_v26 = vadd.f32 %v1497_v10, %v1496_v40  ;;  %v1505_v22 = vrot.slane %v1504_v2, 2 }
 0x190   :  { %v1345_v57 = vmul.f32 %v1328_v32, %v2592_v36  ;;  %v1346_v21 = vmul.f32 %v1336_v28, %v2595_v39  ;;  %v1348_v4 = vmul.f32 %v1344_v5, %v2604_v48  ;;  %v1353_v15 = vmul.f32 %v1328_v32, %v2610_v50 }
 0x191   :  { %v1354_v45 = vmul.f32 %v1336_v28, %v2641_v59  ;;  %v1356_v19 = vmul.f32 %v1344_v5, %v2644_v0  ;;  %v1361_v43 = vmul.f32 %v1328_v32, %v2736_v56  ;;  %v1362_v30 = vmul.f32 %v1336_v28, %v2741_v8 }
 0x192   :  { %v1347_v41 = vadd.f32 %v1346_v21, %v1345_v57  ;;  %v1364_v58 = vmul.f32 %v1344_v5, %v2744_v63  ;;  %v1422_v12 = vadd.f32 %v1421_v18, %v1420_v47  ;;  %v1430_v55 = vadd.f32 %v1429_v51, %v1428_v31 }
 0x193   :  { %v1355_v17 = vadd.f32 %v1354_v45, %v1353_v15  ;;  %v1363_v13 = vadd.f32 %v1362_v30, %v1361_v43  ;;  %v1431_v38 = vmul.f32 %v1414_v1, %v2592_v36  ;;  %v1439_v40 = vmul.f32 %v1414_v1, %v2610_v50 }
 0x194   :  { %v1349_v6 = vadd.f32 %v1348_v4, %v1347_v41  ;;  %v1432_v24 = vmul.f32 %v1422_v12, %v2595_v39  ;;  %v1434_v60 = vmul.f32 %v1430_v55, %v2604_v48  ;;  %v1440_v32 = vmul.f32 %v1422_v12, %v2641_v59 }
 0x195   :  { %v1357_v46 = vadd.f32 %v1356_v19, %v1355_v17  ;;  %v1365_v14 = vadd.f32 %v1364_v58, %v1363_v13  ;;  %v1442_v10 = vmul.f32 %v1430_v55, %v2644_v0  ;;  %v1447_v5 = vmul.f32 %v1414_v1, %v2736_v56 }
 0x196   :  { %v1350_v18 = vadd.f32 %v1349_v6, %v2607_v49  ;;  %v1433_v47 = vadd.f32 %v1432_v24, %v1431_v38  ;;  %v1441_v31 = vadd.f32 %v1440_v32, %v1439_v40  ;;  %v1448_v28 = vmul.f32 %v1422_v12, %v2741_v8 }
 0x197   :  { %v1358_v51 = vadd.f32 %v1357_v46, %v2687_v42  ;;  %v1366_v57 = vadd.f32 %v1365_v14, %v2751_v20  ;;  %v1450_v21 = vmul.f32 %v1430_v55, %v2744_v63  ;;  %v1499_v4 = vrot.slane %v1498_v26, 1 }
 0x198   :  { %v1351_v15 = vadd.f32 %v1350_v18, %v3640_v11  ;;  %v1435_v45 = vadd.f32 %v1434_v60, %v1433_v47  ;;  %v1443_v19 = vadd.f32 %v1442_v10, %v1441_v31  ;;  %v1449_v43 = vadd.f32 %v1448_v28, %v1447_v5 }
 0x199   :  { %v1359_v1 = vadd.f32 %v1358_v51, %v3644_v3  ;;  %v1367_v30 = vadd.f32 %v1366_v57, %v3651_v37  ;;  %v1500_v41 = vadd.f32 %v1499_v4, %v1498_v26  ;;  %v1506_v58 = vadd.f32 %v1505_v22, %v1504_v2 }
 0x19a   :  { %1352 = vst.msk [vmem:[%s4937_s21] sm:$0x2] %vm371_vm8, %v1351_v15  ;;  %v1436_v12 = vadd.f32 %v1435_v45, %v2607_v49  ;;  %v1444_v55 = vadd.f32 %v1443_v19, %v2687_v42  ;;  %v1451_v17 = vadd.f32 %v1450_v21, %v1449_v43  ;;  %v1509_v13 = vmul.f32 %v3927_v27, %v3857_v29 }
 0x19b   :  { %2243 = vst.msk [vmem:[%s4937_s21 + $0x8] sm:$0x2] %vm371_vm8, %v1359_v1  ;;  %2244 = vst.msk [vmem:[%s4937_s21 + $0x10] sm:$0x2] %vm371_vm8, %v1367_v30  ;;  %v1507_v2 = vrot.slane %v1506_v58, 1  ;;  %v1517_v26 = vmul.f32 %v1500_v41, %v2592_v36  ;;  %v1525_v22 = vmul.f32 %v1500_v41, %v2610_v50  ;;  %v1578_v32 = vmul.f32 %v3943_v53, %v3886_v61 }
 0x19c   :  { %v1437_v38 = vadd.f32 %v1436_v12, %v3640_v11  ;;  %v1445_v40 = vadd.f32 %v1444_v55, %v3644_v3  ;;  %v1452_v27 = vadd.f32 %v1451_v17, %v2751_v20  ;;  %v1510_v6 = vsel %vm495_vm2, %v1509_v13, 0.0 }
 0x19d   :  { %v1508_v24 = vadd.f32 %v1507_v2, %v1506_v58  ;;  %v1511_v60 = vrot.slane %v1510_v6, 4  ;;  %v1664_v46 = vmul.f32 %v3946_v16, %v3907_v33  ;;  %v1533_v10 = vmul.f32 %v1500_v41, %v2736_v56 }
 0x19e   :  { %1438 = vst.msk [vmem:[%s4937_s21] sm:$0x4] %vm459_vm9, %v1437_v38  ;;  %2245 = vst.msk [vmem:[%s4937_s21 + $0x8] sm:$0x4] %vm459_vm9, %v1445_v40  ;;  %v1453_v14 = vadd.f32 %v1452_v27, %v3651_v37  ;;  %v1747_v61 = vadd.f32 %v1746_v25, %v3921_v54  ;;  %v1579_v18 = vmul.f32 %v1578_v32, %v3848_v35  ;;  %v1827_v57 = vsel %vm847_vm6, %v3941_v7, 0.0 }
 0x19f   :  { %v1512_v53 = vadd.f32 %v1511_v60, %v1510_v6  ;;  %v1518_v33 = vmul.f32 %v1508_v24, %v2595_v39  ;;  %v1526_v16 = vmul.f32 %v1508_v24, %v2641_v59  ;;  %v1534_v5 = vmul.f32 %v1508_v24, %v2741_v8 }
 0x1a0   :  { %2246 = vst.msk [vmem:[%s4937_s21 + $0x10] sm:$0x4] %vm459_vm9, %v1453_v14  ;;  %v1587_v47 = vmul.f32 %v1578_v32, %v3853_v44  ;;  %v1595_v31 = vmul.f32 %v1578_v32, %v3857_v29  ;;  %v1665_v54 = vmul.f32 %v1664_v46, %v3848_v35  ;;  %v1580_v21 = vsel %vm583_vm3, %v1579_v18, 0.0 }
 0x1a1   :  { %v1513_v25 = vrot.slane %v1512_v53, 2  ;;  %v1519_v28 = vadd.f32 %v1518_v33, %v1517_v26  ;;  %v1527_v51 = vadd.f32 %v1526_v16, %v1525_v22  ;;  %v1581_v43 = vrot.slane %v1580_v21, 4 }
 0x1a2   :  { %v1588_v4 = vsel %vm583_vm3, %v1587_v47, 0.0  ;;  %v1596_v15 = vsel %vm583_vm3, %v1595_v31, 0.0  ;;  %v1666_v45 = vsel %vm671_vm4, %v1665_v54, 0.0  ;;  %v1535_v41 = vadd.f32 %v1534_v5, %v1533_v10 }
 0x1a3   :  { %v1514_v19 = vadd.f32 %v1513_v25, %v1512_v53  ;;  %v1589_v1 = vrot.slane %v1588_v4, 4  ;;  %v1597_v30 = vrot.slane %v1596_v15, 4  ;;  %v1667_v58 = vrot.slane %v1666_v45, 4 }
 0x1a4   :  { %v1673_v12 = vmul.f32 %v1664_v46, %v3853_v44  ;;  %v1681_v55 = vmul.f32 %v1664_v46, %v3857_v29  ;;  %v1582_v13 = vadd.f32 %v1581_v43, %v1580_v21  ;;  %2324 = vrcp.f32 %v1747_v61 }
 0x1a5   :  { %v1515_v17 = vrot.slane %v1514_v19, 1  ;;  %v1590_v2 = vadd.f32 %v1589_v1, %v1588_v4  ;;  %v1598_v26 = vadd.f32 %v1597_v30, %v1596_v15  ;;  %v1668_v22 = vadd.f32 %v1667_v58, %v1666_v45 }
 0x1a6   :  { %v1674_v38 = vsel %vm671_vm4, %v1673_v12, 0.0  ;;  %v1682_v40 = vsel %vm671_vm4, %v1681_v55, 0.0  ;;  %v1583_v6 = vrot.slane %v1582_v13, 2  ;;  %v1828_v53 = vrot.slane %v1827_v57, 4 }
 0x1a7   :  { %v1516_v27 = vadd.f32 %v1515_v17, %v1514_v19  ;;  %v1591_v24 = vrot.slane %v1590_v2, 2  ;;  %v1599_v60 = vrot.slane %v1598_v26, 2  ;;  %v1669_v32 = vrot.slane %v1668_v22, 2 }
 0x1a8   :  { %v1675_v14 = vrot.slane %v1674_v38, 4  ;;  %v1683_v10 = vrot.slane %v1682_v40, 4  ;;  %v1584_v5 = vadd.f32 %v1583_v6, %v1582_v13 }
 0x1a9   :  { %v1520_v46 = vmul.f32 %v1516_v27, %v2604_v48  ;;  %v1528_v33 = vmul.f32 %v1516_v27, %v2644_v0  ;;  %v1536_v16 = vmul.f32 %v1516_v27, %v2744_v63  ;;  %v1592_v18 = vadd.f32 %v1591_v24, %v1590_v2 }
 0x1aa   :  { %v1600_v47 = vadd.f32 %v1599_v60, %v1598_v26  ;;  %v1670_v31 = vadd.f32 %v1669_v32, %v1668_v22  ;;  %v1676_v54 = vadd.f32 %v1675_v14, %v1674_v38  ;;  %v1585_v4 = vrot.slane %v1584_v5, 1 }
 0x1ab   :  { %v1521_v61 = vadd.f32 %v1520_v46, %v1519_v28  ;;  %v1529_v25 = vadd.f32 %v1528_v33, %v1527_v51  ;;  %v1537_v21 = vadd.f32 %v1536_v16, %v1535_v41  ;;  %v1593_v15 = vrot.slane %v1592_v18, 1 }
 0x1ac   :  { %v1601_v45 = vrot.slane %v1600_v47, 1  ;;  %v1671_v19 = vrot.slane %v1670_v31, 1  ;;  %v1677_v43 = vrot.slane %v1676_v54, 2  ;;  %v1586_v12 = vadd.f32 %v1585_v4, %v1584_v5 }
 0x1ad   :  { %v1522_v1 = vadd.f32 %v1521_v61, %v2607_v49  ;;  %v1530_v30 = vadd.f32 %v1529_v25, %v2687_v42  ;;  %v1538_v58 = vadd.f32 %v1537_v21, %v2751_v20  ;;  %v1594_v55 = vadd.f32 %v1593_v15, %v1592_v18 }
 0x1ae   :  { %v1602_v17 = vadd.f32 %v1601_v45, %v1600_v47  ;;  %v1672_v13 = vadd.f32 %v1671_v19, %v1670_v31  ;;  %v1678_v2 = vadd.f32 %v1677_v43, %v1676_v54  ;;  %v1603_v26 = vmul.f32 %v1586_v12, %v2592_v36  ;;  %v2325_v22 = vpop.eup %2324 }
 0x1af   :  { %v1523_v28 = vadd.f32 %v1522_v1, %v3640_v11  ;;  %v1531_v51 = vadd.f32 %v1530_v30, %v3644_v3  ;;  %v1539_v41 = vadd.f32 %v1538_v58, %v3651_v37  ;;  %v1604_v38 = vmul.f32 %v1594_v55, %v2595_v39 }
 0x1b0   :  { %v1611_v27 = vmul.f32 %v1586_v12, %v2610_v50  ;;  %v1612_v6 = vmul.f32 %v1594_v55, %v2641_v59  ;;  %v1829_v24 = vadd.f32 %v1828_v53, %v1827_v57  ;;  %v1606_v60 = vmul.f32 %v1602_v17, %v2604_v48 }
 0x1b1   :  { %1524 = vst.msk [vmem:[%s4937_s21] sm:$0x8] %vm547_vm10, %v1523_v28  ;;  %2247 = vst.msk [vmem:[%s4937_s21 + $0x8] sm:$0x8] %vm547_vm10, %v1531_v51  ;;  %v1614_v32 = vmul.f32 %v1602_v17, %v2644_v0  ;;  %v1619_v57 = vmul.f32 %v1586_v12, %v2736_v56  ;;  %v1620_v14 = vmul.f32 %v1594_v55, %v2741_v8  ;;  %v1679_v33 = vrot.slane %v1678_v2, 1 }
 0x1b2   :  { %2248 = vst.msk [vmem:[%s4937_s21 + $0x10] sm:$0x8] %vm547_vm10, %v1539_v41  ;;  %v1605_v53 = vadd.f32 %v1604_v38, %v1603_v26  ;;  %v1613_v46 = vadd.f32 %v1612_v6, %v1611_v27  ;;  %v1684_v16 = vadd.f32 %v1683_v10, %v1682_v40  ;;  %v1622_v18 = vmul.f32 %v1602_v17, %v2744_v63 }
 0x1b3   :  { %v1621_v5 = vadd.f32 %v1620_v14, %v1619_v57  ;;  %v1689_v47 = vmul.f32 %v1672_v13, %v2592_v36  ;;  %v1697_v31 = vmul.f32 %v1672_v13, %v2610_v50  ;;  %v1680_v25 = vadd.f32 %v1679_v33, %v1678_v2 }
 0x1b4   :  { %v1607_v54 = vadd.f32 %v1606_v60, %v1605_v53  ;;  %v1615_v61 = vadd.f32 %v1614_v32, %v1613_v46  ;;  %v1685_v21 = vrot.slane %v1684_v16, 2  ;;  %v1705_v15 = vmul.f32 %v1672_v13, %v2736_v56 }
 0x1b5   :  { %v1623_v4 = vadd.f32 %v1622_v18, %v1621_v5  ;;  %v1750_v45 = vmul.f32 %v2325_v22, %v3912_v62  ;;  %v1830_v19 = vrot.slane %v1829_v24, 2  ;;  %v1690_v1 = vmul.f32 %v1680_v25, %v2595_v39 }
 0x1b6   :  { %v1608_v43 = vadd.f32 %v1607_v54, %v2607_v49  ;;  %v1616_v40 = vadd.f32 %v1615_v61, %v2687_v42  ;;  %v1686_v10 = vadd.f32 %v1685_v21, %v1684_v16  ;;  %v1698_v58 = vmul.f32 %v1680_v25, %v2641_v59 }
 0x1b7   :  { %v1624_v30 = vadd.f32 %v1623_v4, %v2751_v20  ;;  %v1706_v12 = vmul.f32 %v1680_v25, %v2741_v8  ;;  %v1751_v55 = vmul.f32 %v1750_v45, %v3848_v35  ;;  %v1691_v2 = vadd.f32 %v1690_v1, %v1689_v47 }
 0x1b8   :  { %v1609_v17 = vadd.f32 %v1608_v43, %v3640_v11  ;;  %v1617_v62 = vadd.f32 %v1616_v40, %v3644_v3  ;;  %v1687_v13 = vrot.slane %v1686_v10, 1  ;;  %v1699_v51 = vadd.f32 %v1698_v58, %v1697_v31 }
 0x1b9   :  { %v1625_v28 = vadd.f32 %v1624_v30, %v3651_v37  ;;  %v1707_v41 = vadd.f32 %v1706_v12, %v1705_v15  ;;  %v1752_v26 = vsel %vm759_vm5, %v1751_v55, 0.0  ;;  %v1759_v27 = vmul.f32 %v1750_v45, %v3853_v44 }
 0x1ba   :  { %1610 = vst.msk [vmem:[%s4937_s21] sm:$0x10] %vm635_vm11, %v1609_v17  ;;  %2249 = vst.msk [vmem:[%s4937_s21 + $0x8] sm:$0x10] %vm635_vm11, %v1617_v62  ;;  %v1688_v22 = vadd.f32 %v1687_v13, %v1686_v10  ;;  %v1753_v38 = vrot.slane %v1752_v26, 4  ;;  %v1767_v6 = vmul.f32 %v1750_v45, %v3857_v29  ;;  %v1831_v60 = vadd.f32 %v1830_v19, %v1829_v24 }
 0x1bb   :  { %2250 = vst.msk [vmem:[%s4937_s21 + $0x10] sm:$0x10] %vm635_vm11, %v1625_v28  ;;  %v1760_v46 = vsel %vm759_vm5, %v1759_v27, 0.0 }
 0x1bc   :  { %v1692_v32 = vmul.f32 %v1688_v22, %v2604_v48  ;;  %v1700_v57 = vmul.f32 %v1688_v22, %v2644_v0  ;;  %v1708_v14 = vmul.f32 %v1688_v22, %v2744_v63  ;;  %v1754_v53 = vadd.f32 %v1753_v38, %v1752_v26 }
 0x1bd   :  { %v1768_v33 = vsel %vm759_vm5, %v1767_v6, 0.0  ;;  %v1832_v16 = vrot.slane %v1831_v60, 1  ;;  %v1761_v54 = vrot.slane %v1760_v46, 4 }
 0x1be   :  { %v1693_v5 = vadd.f32 %v1692_v32, %v1691_v2  ;;  %v1701_v18 = vadd.f32 %v1700_v57, %v1699_v51  ;;  %v1709_v47 = vadd.f32 %v1708_v14, %v1707_v41  ;;  %v1755_v31 = vrot.slane %v1754_v53, 2 }
 0x1bf   :  { %v1769_v61 = vrot.slane %v1768_v33, 4  ;;  %v1833_v25 = vadd.f32 %v1832_v16, %v1831_v60  ;;  %v1762_v45 = vadd.f32 %v1761_v54, %v1760_v46 }
 0x1c0   :  { %v1694_v24 = vadd.f32 %v1693_v5, %v2607_v49  ;;  %v1702_v21 = vadd.f32 %v1701_v18, %v2687_v42  ;;  %v1710_v4 = vadd.f32 %v1709_v47, %v2751_v20  ;;  %v1756_v15 = vadd.f32 %v1755_v31, %v1754_v53 }
 0x1c1   :  { %v1770_v19 = vadd.f32 %v1769_v61, %v1768_v33  ;;  %2326 = vrcp.f32 %v1833_v25  ;;  %v1763_v30 = vrot.slane %v1762_v45, 2 }
 0x1c2   :  { %v1695_v43 = vadd.f32 %v1694_v24, %v3640_v11  ;;  %v1703_v40 = vadd.f32 %v1702_v21, %v3644_v3  ;;  %v1711_v10 = vadd.f32 %v1710_v4, %v3651_v37  ;;  %v1757_v1 = vrot.slane %v1756_v15, 1 }
 0x1c3   :  { %v1771_v58 = vrot.slane %v1770_v19, 2  ;;  %v1764_v55 = vadd.f32 %v1763_v30, %v1762_v45 }
 0x1c4   :  { %1696 = vst.msk [vmem:[%s4937_s21] sm:$0x20] %vm723_vm12, %v1695_v43  ;;  %2251 = vst.msk [vmem:[%s4937_s21 + $0x8] sm:$0x20] %vm723_vm12, %v1703_v40  ;;  %v1758_v12 = vadd.f32 %v1757_v1, %v1756_v15 }
 0x1c5   :  { %2252 = vst.msk [vmem:[%s4937_s21 + $0x10] sm:$0x20] %vm723_vm12, %v1711_v10  ;;  %v1772_v17 = vadd.f32 %v1771_v58, %v1770_v19  ;;  %v1765_v62 = vrot.slane %v1764_v55, 1 }
 0x1c6   :  { %v1775_v51 = vmul.f32 %v1758_v12, %v2592_v36  ;;  %v1783_v41 = vmul.f32 %v1758_v12, %v2610_v50  ;;  %v1791_v26 = vmul.f32 %v1758_v12, %v2736_v56 }
 0x1c7   :  { %v1773_v13 = vrot.slane %v1772_v17, 1  ;;  %v1766_v2 = vadd.f32 %v1765_v62, %v1764_v55 }
 0x1c9   :  { %v1774_v28 = vadd.f32 %v1773_v13, %v1772_v17  ;;  %v1776_v38 = vmul.f32 %v1766_v2, %v2595_v39  ;;  %v1784_v27 = vmul.f32 %v1766_v2, %v2641_v59  ;;  %v1792_v60 = vmul.f32 %v1766_v2, %v2741_v8 }
 0x1cb   :  { %v2327_v22 = vpop.eup %2326  ;;  %v1778_v6 = vmul.f32 %v1774_v28, %v2604_v48  ;;  %v1777_v57 = vadd.f32 %v1776_v38, %v1775_v51  ;;  %v1785_v14 = vadd.f32 %v1784_v27, %v1783_v41  ;;  %v1786_v53 = vmul.f32 %v1774_v28, %v2644_v0 }
 0x1cc   :  { %v1836_v32 = vmul.f32 %v2327_v22, %v3941_v7  ;;  %v1794_v46 = vmul.f32 %v1774_v28, %v2744_v63  ;;  %v1793_v33 = vadd.f32 %v1792_v60, %v1791_v26 }
 0x1cd   :  { %v1779_v47 = vadd.f32 %v1778_v6, %v1777_v57  ;;  %v1787_v31 = vadd.f32 %v1786_v53, %v1785_v14 }
 0x1ce   :  { %v1837_v16 = vmul.f32 %v1836_v32, %v3848_v35  ;;  %v1845_v5 = vmul.f32 %v1836_v32, %v3853_v44  ;;  %v1853_v18 = vmul.f32 %v1836_v32, %v3857_v29  ;;  %v1795_v54 = vadd.f32 %v1794_v46, %v1793_v33 }
 0x1cf   :  { %v1780_v24 = vadd.f32 %v1779_v47, %v2607_v49  ;;  %v1788_v21 = vadd.f32 %v1787_v31, %v2687_v42 }
 0x1d0   :  { %v1838_v61 = vsel %vm847_vm6, %v1837_v16, 0.0  ;;  %v1846_v7 = vsel %vm847_vm6, %v1845_v5, 0.0  ;;  %v1854_v25 = vsel %vm847_vm6, %v1853_v18, 0.0  ;;  %v1796_v35 = vadd.f32 %v1795_v54, %v2751_v20 }
 0x1d1   :  { %v1839_v4 = vrot.slane %v1838_v61, 4  ;;  %v1847_v15 = vrot.slane %v1846_v7, 4  ;;  %v1855_v44 = vrot.slane %v1854_v25, 4  ;;  %v1781_v29 = vadd.f32 %v1780_v24, %v3640_v11 }
 0x1d2   :  { %v1789_v45 = vadd.f32 %v1788_v21, %v3644_v3  ;;  %v1797_v40 = vadd.f32 %v1796_v35, %v3651_v37 }
 0x1d3   :  { %v1840_v19 = vadd.f32 %v1839_v4, %v1838_v61  ;;  %v1848_v43 = vadd.f32 %v1847_v15, %v1846_v7  ;;  %v1856_v10 = vadd.f32 %v1855_v44, %v1854_v25  ;;  %1782 = vst.msk [vmem:[%s4937_s21] sm:$0x40] %vm811_vm13, %v1781_v29  ;;  %v1903_v4 = vstv %s2215_s24  ;;  %s4948_s24 = sld [smem:[#allocation38_spill]] }
 0x1d4   :  { %2253 = vst.msk [vmem:[%s4937_s21 + $0x8] sm:$0x40] %vm811_vm13, %v1789_v45  ;;  %2254 = vst.msk [vmem:[%s4937_s21 + $0x10] sm:$0x40] %vm811_vm13, %v1797_v40  ;;  %v1908_v15 = vstv %s2216_s25  ;;  %v1913_v45 = vstv %s2217_s4  ;;  %s4950_s25 = sld [smem:[#allocation51_spill]]  ;;  %s4952_s4 = sld [smem:[#allocation39_spill]] }
 0x1d5   :  { %v1841_v1 = vrot.slane %v1840_v19, 2  ;;  %v1849_v30 = vrot.slane %v1848_v43, 2  ;;  %v1857_v58 = vrot.slane %v1856_v10, 2 }
 0x1d7   :  { %v1842_v12 = vadd.f32 %v1841_v1, %v1840_v19  ;;  %v1850_v55 = vadd.f32 %v1849_v30, %v1848_v43  ;;  %v1858_v17 = vadd.f32 %v1857_v58, %v1856_v10  ;;  %v1905_v19 = vstv %s2218_s1  ;;  %s4954_s1 = sld [smem:[#allocation53_spill]] }
 0x1d8   :  { %v1910_v43 = vstv %s2219_s10  ;;  %s4955_s10 = sld [smem:[#allocation60_spill]] }
 0x1d9   :  { %v1843_v62 = vrot.slane %v1842_v12, 1  ;;  %v1851_v13 = vrot.slane %v1850_v55, 1  ;;  %v1859_v2 = vrot.slane %v1858_v17, 1 }
 0x1db   :  { %v1844_v28 = vadd.f32 %v1843_v62, %v1842_v12  ;;  %v1852_v51 = vadd.f32 %v1851_v13, %v1850_v55  ;;  %v1860_v41 = vadd.f32 %v1859_v2, %v1858_v17  ;;  %v1915_v12 = vstv %s2220_s23  ;;  %s4960_s23 = sld [smem:[#allocation40_spill]] }
 0x1dc   :  { %v4949_v55 = vstv %s4938_s15  ;;  %v4951_v62 = vstv %s4939_s12  ;;  %v4953_v2 = vstv %s4940_s22  ;;  %s4962_s15 = sld [smem:[#allocation54_spill]]  ;;  %s4963_s12 = sld [smem:[#allocation61_spill]] }
 0x1dd   :  { %v1861_v26 = vmul.f32 %v1844_v28, %v2592_v36  ;;  %v1862_v22 = vmul.f32 %v1852_v51, %v2595_v39  ;;  %v1869_v38 = vmul.f32 %v1844_v28, %v2610_v50  ;;  %v1870_v27 = vmul.f32 %v1852_v51, %v2641_v59  ;;  %s4967_s22 = sld [smem:[#allocation62_spill]] }
 0x1de   :  { %v1877_v6 = vmul.f32 %v1844_v28, %v2736_v56  ;;  %v1878_v60 = vmul.f32 %v1852_v51, %v2741_v8  ;;  %v1864_v57 = vmul.f32 %v1860_v41, %v2604_v48  ;;  %v1872_v53 = vmul.f32 %v1860_v41, %v2644_v0 }
 0x1df   :  { %v1863_v32 = vadd.f32 %v1862_v22, %v1861_v26  ;;  %v1871_v14 = vadd.f32 %v1870_v27, %v1869_v38  ;;  %v1880_v33 = vmul.f32 %v1860_v41, %v2744_v63  ;;  %v4956_v41 = vstv %s4941_s14  ;;  %s4969_s14 = sld [smem:[#allocation41_spill]] }
 0x1e0   :  { %v1879_v46 = vadd.f32 %v1878_v60, %v1877_v6  ;;  %v4957_v22 = vstv %s4942_s2  ;;  %v4958_v27 = vstv %s4943_s9  ;;  %v4959_v60 = vstv %s4944_s20  ;;  %s4971_s2 = sld [smem:[#allocation55_spill]]  ;;  %s4973_s9 = sld [smem:[#allocation64_spill]] }
 0x1e1   :  { %v1865_v36 = vadd.f32 %v1864_v57, %v1863_v32  ;;  %v1873_v16 = vadd.f32 %v1872_v53, %v1871_v14  ;;  %v4961_v57 = vstv %s4945_s3  ;;  %s4976_s20 = sld [smem:[#allocation63_spill]]  ;;  %s4977_s3 = sld [smem:[#allocation42_spill]] }
 0x1e2   :  { %v1881_v39 = vadd.f32 %v1880_v33, %v1879_v46  ;;  %v4964_v33 = vstv %s4946_s18  ;;  %s4979_s18 = sld [smem:[#allocation56_spill]] }
 0x1e3   :  { %v1866_v50 = vadd.f32 %v1865_v36, %v2607_v49  ;;  %v1874_v59 = vadd.f32 %v1873_v16, %v2687_v42 }
 0x1e4   :  { %v1882_v56 = vadd.f32 %v1881_v39, %v2751_v20 }
 0x1e5   :  { %v1867_v8 = vadd.f32 %v1866_v50, %v3640_v11  ;;  %v1875_v5 = vadd.f32 %v1874_v59, %v3644_v3  ;;  %v4966_v59 = vstv %s4948_s24  ;;  %s4981_s24 = sld [smem:[#allocation43_spill]] }
 0x1e6   :  { %v1883_v48 = vadd.f32 %v1882_v56, %v3651_v37 }
 0x1e7   :  { %1868 = vst.msk [vmem:[%s4937_s21] sm:$0x80] %vm899_vm14, %v1867_v8  ;;  %2255 = vst.msk [vmem:[%s4937_s21 + $0x8] sm:$0x80] %vm899_vm14, %v1875_v5  ;;  %v4968_v8 = vstv %s4950_s25  ;;  %s4983_s25 = sld [smem:[#allocation57_spill]] }
 0x1e8   :  { %2256 = vst.msk [vmem:[%s4937_s21 + $0x10] sm:$0x80] %vm899_vm14, %v1883_v48  ;;  %v4970_v48 = vstv %s4952_s4  ;;  %s4984_s4 = sld [smem:[#allocation66_spill]] }
 0x1ee   :  { %v4178_v42 = vld [vmem:[%s4937_s21] sm:$0xff]  ;;  %v4183_v49 = vld [vmem:[%s4937_s21 + $0x8] sm:$0xff] }
 0x1ef   :  { %v1888_v0 = vadd.f32 %v4183_v49, %v4178_v42  ;;  %v4190_v63 = vld [vmem:[%s4937_s21 + $0x10] sm:$0xff]  ;;  %s4947_s21 = sld [smem:[#allocation52_spill]] }
 0x1f1   :  { %v1889_v20 = vadd.f32 %v4190_v63, %v1888_v0 }
 0x1f3   :  { %v1890_v11 = vmul.f32 0.33333334, %v1889_v20  ;;  %v4972_v20 = vstv %s4954_s1  ;;  %s4985_s1 = sld [smem:[#allocation69_spill]] }
 0x1f5   :  { %v1891_v3 = vsub.f32 %v4178_v42, %v1890_v11  ;;  %v1892_v37 = vsub.f32 %v4183_v49, %v1890_v11  ;;  %v1893_v18 = vsub.f32 %v4190_v63, %v1890_v11  ;;  %v4965_v16 = vstv %s4947_s21  ;;  %s4975_s21 = sld [smem:[#allocation65_spill]] }
 0x1f7   :  { %v1894_v47 = vmul.f32 %v1891_v3, %v1891_v3  ;;  %v1895_v31 = vmul.f32 %v1892_v37, %v1892_v37  ;;  %v1897_v61 = vmul.f32 %v1893_v18, %v1893_v18 }
 0x1f9   :  { %v1896_v54 = vadd.f32 %v1895_v31, %v1894_v47 }
 0x1fb   :  { %v1898_v7 = vadd.f32 %v1897_v61, %v1896_v54  ;;  %v4978_v54 = vstv %s4960_s23  ;;  %s4991_s23 = sld [smem:[#allocation70_spill]] }
 0x1fd   :  { %v1899_v25 = vmul.f32 0.33333334, %v1898_v7  ;;  %v4980_v7 = vstv %s4962_s15  ;;  %s4998_s15 = sld [smem:[#allocation68_spill]] }
 0x1ff   :  { %v1900_v24 = vadd.f32 1e-05, %v1899_v25 }
 0x201   :  { %2328 = vrsqrt.f32 %v1900_v24  ;;  %v4982_v24 = vstv %s4963_s12  ;;  %s5000_s12 = sld [smem:[#allocation71_spill]] }
 0x20b   :  { %v2329_v21 = vpop.eup %2328 }
 0x20c   :  { %v1902_v35 = vmul.f32 %v2329_v21, %v1891_v3  ;;  %v1907_v44 = vmul.f32 %v2329_v21, %v1892_v37  ;;  %v1912_v29 = vmul.f32 %v2329_v21, %v1893_v18  ;;  %v4974_v3 = vstv %s4955_s10  ;;  %s4987_s10 = sld [smem:[#allocation67_spill]] }
 0x20e   :  { %v1904_v40 = vmul.f32 %v1903_v4, %v1902_v35  ;;  %v1909_v10 = vmul.f32 %v1908_v15, %v1907_v44  ;;  %v1914_v1 = vmul.f32 %v1913_v45, %v1912_v29  ;;  %v4986_v29 = vstv %s4967_s22  ;;  %s5003_s22 = sld [smem:[#allocation73_spill]] }
 0x210   :  { %v4196_v30 = vadd.f32 %v1905_v19, %v1904_v40  ;;  %v4198_v58 = vadd.f32 %v1910_v43, %v1909_v10  ;;  %v4209_v51 = vadd.f32 %v1915_v12, %v1914_v1  ;;  %v4988_v19 = vstv %s4969_s14  ;;  %s5004_s14 = sld [smem:[#allocation45_spill]] }
 0x211   :  { %v4989_v40 = vstv %s4971_s2  ;;  %v4990_v1 = vstv %s4973_s9  ;;  %s5005_s2 = sld [smem:[#allocation59_spill]] }
 0x212   :  { %v1917_v17 = vmul.f32 %v4196_v30, %v4949_v55  ;;  %v1918_v13 = vmul.f32 %v4198_v58, %v4951_v62  ;;  %v1923_v28 = vmul.f32 %v4196_v30, %v4953_v2  ;;  %v1924_v26 = vmul.f32 %v4198_v58, %v4956_v41  ;;  %s5010_s9 = sld [smem:[#allocation75_spill]] }
 0x213   :  { %v1929_v38 = vmul.f32 %v4196_v30, %v4957_v22  ;;  %v1930_v6 = vmul.f32 %v4198_v58, %v4958_v27  ;;  %v1935_v32 = vmul.f32 %v4196_v30, %v4959_v60  ;;  %v1936_v14 = vmul.f32 %v4198_v58, %v4961_v57 }
 0x214   :  { %v1919_v53 = vadd.f32 %v1918_v13, %v1917_v17  ;;  %v1925_v46 = vadd.f32 %v1924_v26, %v1923_v28  ;;  %v1920_v36 = vmul.f32 %v4209_v51, %v4964_v33  ;;  %v1926_v39 = vmul.f32 %v4209_v51, %v4965_v16 }
 0x215   :  { %v1931_v50 = vadd.f32 %v1930_v6, %v1929_v38  ;;  %v1941_v56 = vmul.f32 %v4196_v30, %v4966_v59  ;;  %v1942_v5 = vmul.f32 %v4198_v58, %v4968_v8  ;;  %v1947_v0 = vmul.f32 %v4196_v30, %v4970_v48 }
 0x216   :  { %v1948_v11 = vmul.f32 %v4198_v58, %v4972_v20  ;;  %v1932_v37 = vmul.f32 %v4209_v51, %v4974_v3  ;;  %v1937_v18 = vadd.f32 %v1936_v14, %v1935_v32  ;;  %v1921_v47 = vadd.f32 %v1920_v36, %v1919_v53 }
 0x217   :  { %v1927_v31 = vadd.f32 %v1926_v39, %v1925_v46  ;;  %v1953_v61 = vmul.f32 %v4196_v30, %v4978_v54  ;;  %v1954_v25 = vmul.f32 %v4198_v58, %v4980_v7  ;;  %v1938_v21 = vmul.f32 %v4209_v51, %v4982_v24 }
 0x218   :  { %v1933_v4 = vadd.f32 %v1932_v37, %v1931_v50  ;;  %v1943_v15 = vadd.f32 %v1942_v5, %v1941_v56  ;;  %v1949_v35 = vadd.f32 %v1948_v11, %v1947_v0  ;;  %v1944_v45 = vmul.f32 %v4209_v51, %v4986_v29 }
 0x219   :  { %v1939_v44 = vadd.f32 %v1938_v21, %v1937_v18  ;;  %v1959_v43 = vmul.f32 %v4196_v30, %v4988_v19  ;;  %v1960_v10 = vmul.f32 %v4198_v58, %v4989_v40  ;;  %v1922_v12 = vadd.f32 %v1921_v47, %v4990_v1 }
 0x21a   :  { %v4992_v55 = vstv %s4975_s21  ;;  %v4993_v62 = vstv %s4976_s20  ;;  %v1955_v2 = vadd.f32 %v1954_v25, %v1953_v61  ;;  %v4994_v28 = vstv %s4977_s3  ;;  %s5013_s21 = sld [smem:[#allocation84_spill]]  ;;  %s5024_s20 = sld [smem:[#allocation86_spill]] }
 0x21b   :  { %v1928_v17 = vadd.f32 %v1927_v31, %v4992_v55  ;;  %v1950_v13 = vmul.f32 %v4209_v51, %v4993_v62  ;;  %v1965_v41 = vmul.f32 %v4196_v30, %v4994_v28  ;;  %v4995_v26 = vstv %s4979_s18  ;;  %s5033_s3 = sld [smem:[#allocation102_spill]]  ;;  %s5036_s18 = sld [smem:[#allocation95_spill]] }
 0x21c   :  { %v1966_v22 = vmul.f32 %v4198_v58, %v4995_v26  ;;  %v4996_v38 = vstv %s4981_s24  ;;  %v4997_v6 = vstv %s4983_s25  ;;  %v4999_v32 = vstv %s4984_s4  ;;  %s5046_s24 = sld [smem:[#allocation89_spill]]  ;;  %s5050_s25 = sld [smem:[#allocation44_spill]] }
 0x21d   :  { %v1971_v27 = vmul.f32 %v4196_v30, %v4996_v38  ;;  %v1972_v60 = vmul.f32 %v4198_v58, %v4997_v6  ;;  %v1934_v57 = vadd.f32 %v1933_v4, %v4999_v32  ;;  %v1945_v14 = vadd.f32 %v1944_v45, %v1943_v15  ;;  %s5055_s4 = sld [smem:[#allocation58_spill]] }
 0x21e   :  { %v1951_v53 = vadd.f32 %v1950_v13, %v1949_v35  ;;  %v5001_v46 = vstv %s4985_s1  ;;  %v5002_v36 = vstv %s4987_s10  ;;  %v1961_v39 = vadd.f32 %v1960_v10, %v1959_v43  ;;  %s5057_s1 = sld [smem:[#allocation91_spill]] }
 0x21f   :  { %v1956_v33 = vmul.f32 %v4209_v51, %v5001_v46  ;;  %v1940_v16 = vadd.f32 %v1939_v44, %v5002_v36  ;;  %v5006_v59 = vstv %s4991_s23  ;;  %v1989_v8 = vmax.f32 %v1922_v12, 0.0  ;;  %s5058_s10 = sld [smem:[#allocation99_spill]]  ;;  %s5064_s23 = sld [smem:[#allocation101_spill]] }
 0x220   :  { %v1962_v56 = vmul.f32 %v4209_v51, %v5006_v59  ;;  %v1990_v5 = vmax.f32 %v1928_v17, 0.0  ;;  %v1967_v48 = vadd.f32 %v1966_v22, %v1965_v41  ;;  %v1973_v0 = vadd.f32 %v1972_v60, %v1971_v27 }
 0x221   :  { %v1957_v50 = vadd.f32 %v1956_v33, %v1955_v2  ;;  %v5007_v20 = vstv %s4815_s11  ;;  %v5008_v3 = vstv %s4817_s6  ;;  %v5009_v18 = vstv %s4998_s15  ;;  %s5016_s6 = sld [smem:[#allocation77_spill]]  ;;  %s5067_s15 = sld [smem:[#allocation82_spill]] }
 0x222   :  { %v1977_v11 = vmul.f32 %v4196_v30, %v5007_v20  ;;  %v1978_v37 = vmul.f32 %v4198_v58, %v5008_v3  ;;  %v1946_v47 = vadd.f32 %v1945_v14, %v5009_v18  ;;  %v5011_v31 = vstv %s4819_s0  ;;  %s5022_s0 = sld [smem:[#allocation79_spill]]  ;;  %s5086_s11 = sld [smem:[#allocation105_spill]] }
 0x223   :  { %v1952_v54 = vadd.f32 %v1951_v53, %v5011_v31  ;;  %v5012_v61 = vstv %s5000_s12  ;;  %v1991_v25 = vmax.f32 %v1934_v57, 0.0  ;;  %v1963_v24 = vadd.f32 %v1962_v56, %v1961_v39  ;;  %s5068_s12 = sld [smem:[#allocation83_spill]] }
 0x224   :  { %v1968_v7 = vmul.f32 %v4209_v51, %v5012_v61  ;;  %v5014_v21 = vstv %s5003_s22  ;;  %v5015_v15 = vstv %s5004_s14  ;;  %v5017_v44 = vstv %s5005_s2  ;;  %s5072_s22 = sld [smem:[#allocation74_spill]]  ;;  %s5073_s14 = sld [smem:[#allocation76_spill]] }
 0x225   :  { %v1974_v4 = vmul.f32 %v4209_v51, %v5014_v21  ;;  %v1983_v35 = vmul.f32 %v4196_v30, %v5015_v15  ;;  %v1984_v29 = vmul.f32 %v4198_v58, %v5017_v44  ;;  %v1992_v45 = vmax.f32 %v1940_v16, 0.0  ;;  %s5074_s2 = sld [smem:[#allocation78_spill]] }
 0x226   :  { %v5018_v19 = vstv %s4821_s29  ;;  %v5019_v40 = vstv %s4822_s19  ;;  %v5020_v1 = vstv %s4824_s8  ;;  %v1969_v55 = vadd.f32 %v1968_v7, %v1967_v48  ;;  %s5031_s29 = sld [smem:[#allocation100_spill]]  ;;  %s5092_s19 = sld [smem:[#allocation106_spill]] }
 0x227   :  { %v2001_v43 = vmul.f32 %v1989_v8, %v5018_v19  ;;  %v2002_v10 = vmul.f32 %v1990_v5, %v5019_v40  ;;  %v1958_v12 = vadd.f32 %v1957_v50, %v5020_v1  ;;  %v1975_v17 = vadd.f32 %v1974_v4, %v1973_v0 }
 0x228   :  { %v1979_v62 = vadd.f32 %v1978_v37, %v1977_v11  ;;  %v5023_v13 = vstv %s5010_s9  ;;  %v1993_v2 = vmax.f32 %v1946_v47, 0.0  ;;  %v5025_v28 = vstv %s5013_s21  ;;  %s5079_s9 = sld [smem:[#allocation80_spill]]  ;;  %s5081_s21 = sld [smem:[#allocation90_spill]] }
 0x229   :  { %v1980_v30 = vmul.f32 %v4209_v51, %v5023_v13  ;;  %v2003_v58 = vadd.f32 %v2002_v10, %v2001_v43  ;;  %v2004_v41 = vmul.f32 %v1991_v25, %v5025_v28  ;;  %v5026_v26 = vstv %s4830_s30  ;;  %s5035_s30 = sld [smem:[#allocation87_spill]] }
 0x22a   :  { %v1964_v22 = vadd.f32 %v1963_v24, %v5026_v26  ;;  %v1985_v38 = vadd.f32 %v1984_v29, %v1983_v35  ;;  %v5028_v27 = vstv %s5016_s6  ;;  %v1994_v60 = vmax.f32 %v1952_v54, 0.0  ;;  %s5083_s6 = sld [smem:[#allocation81_spill]] }
 0x22b   :  { %v1986_v6 = vmul.f32 %v4209_v51, %v5028_v27  ;;  %v2005_v32 = vadd.f32 %v2004_v41, %v2003_v58  ;;  %v5030_v57 = vstv %s4836_s16  ;;  %v2025_v53 = vmul.f32 %v1989_v8, %v1089_v23  ;;  %s5038_s16 = sld [smem:[#allocation103_spill]] }
 0x22c   :  { %v2006_v14 = vmul.f32 %v1992_v45, %v5030_v57  ;;  %v2026_v46 = vmul.f32 %v1990_v5, %v1091_v52  ;;  %v5032_v33 = vstv %s4839_s5  ;;  %v5034_v16 = vstv %s5022_s0  ;;  %s5044_s5 = sld [smem:[#allocation104_spill]] }
 0x22d   :  { %v1970_v36 = vadd.f32 %v1969_v55, %v5032_v33  ;;  %v1976_v39 = vadd.f32 %v1975_v17, %v5034_v16  ;;  %v1981_v50 = vadd.f32 %v1980_v30, %v1979_v62  ;;  %v1995_v51 = vmax.f32 %v1958_v12, 0.0 }
 0x22e   :  { %v2007_v59 = vadd.f32 %v2006_v14, %v2005_v32  ;;  %v5037_v56 = vstv %s5024_s20  ;;  %v2027_v0 = vadd.f32 %v2026_v46, %v2025_v53  ;;  %v2028_v20 = vmul.f32 %v1991_v25, %v1094_v9 }
 0x22f   :  { %v2008_v48 = vmul.f32 %v1993_v2, %v5037_v56  ;;  %v1987_v23 = vadd.f32 %v1986_v6, %v1985_v38  ;;  %v1996_v52 = vmax.f32 %v1964_v22, 0.0  ;;  %v5039_v11 = vstv %s3267_s13  ;;  %s5048_s13 = sld [smem:[#allocation97_spill]] }
 0x230   :  { %v2010_v3 = vmul.f32 %v1994_v60, %v5039_v11  ;;  %v2030_v37 = vmul.f32 %v1992_v45, %v1097_v34  ;;  %v2029_v47 = vadd.f32 %v2028_v20, %v2027_v0  ;;  %v5041_v31 = vstv %s5031_s29 }
 0x231   :  { %v2009_v18 = vadd.f32 %v2008_v48, %v2007_v59  ;;  %v2049_v54 = vmul.f32 %v1989_v8, %v5041_v31  ;;  %v5042_v61 = vstv %s5033_s3  ;;  %v5043_v24 = vstv %s4849_s7  ;;  %s5053_s7 = sld [smem:[#allocation98_spill]] }
 0x232   :  { %v2050_v7 = vmul.f32 %v1990_v5, %v5042_v61  ;;  %v1982_v21 = vadd.f32 %v1981_v50, %v5043_v24  ;;  %v1997_v9 = vmax.f32 %v1970_v36, 0.0  ;;  %v5045_v4 = vstv %s5035_s30 }
 0x233   :  { %v2012_v15 = vmul.f32 %v1995_v51, %v5045_v4  ;;  %v5047_v35 = vstv %s5036_s18  ;;  %v2011_v29 = vadd.f32 %v2010_v3, %v2009_v18  ;;  %v2031_v19 = vadd.f32 %v2030_v37, %v2029_v47 }
 0x234   :  { %v2032_v44 = vmul.f32 %v1993_v2, %v5047_v35  ;;  %v2051_v34 = vadd.f32 %v2050_v7, %v2049_v54  ;;  %v5049_v43 = vstv %s5038_s16  ;;  %v5051_v10 = vstv %s4853_s17  ;;  %s5061_s17 = sld [smem:[#allocation72_spill]] }
 0x235   :  { %v2052_v40 = vmul.f32 %v1991_v25, %v5049_v43  ;;  %v1988_v8 = vadd.f32 %v1987_v23, %v5051_v10  ;;  %v1998_v5 = vmax.f32 %v1976_v39, 0.0  ;;  %v5052_v1 = vstv %s3292_s27  ;;  %s5062_s27 = sld [smem:[#allocation93_spill]] }
 0x236   :  { %v2014_v12 = vmul.f32 %v1996_v52, %v5052_v1  ;;  %v5054_v55 = vstv %s5040_s28  ;;  %v2013_v62 = vadd.f32 %v2012_v15, %v2011_v29  ;;  %v2033_v13 = vadd.f32 %v2032_v44, %v2031_v19 }
 0x237   :  { %v2034_v17 = vmul.f32 %v1994_v60, %v5054_v55  ;;  %v2053_v30 = vadd.f32 %v2052_v40, %v2051_v34  ;;  %v5056_v58 = vstv %s5044_s5  ;;  %v1999_v41 = vmax.f32 %v1982_v21, 0.0 }
 0x238   :  { %v2054_v28 = vmul.f32 %v1992_v45, %v5056_v58  ;;  %v5059_v26 = vstv %s5046_s24  ;;  %v5060_v22 = vstv %s5048_s13  ;;  %v2015_v27 = vadd.f32 %v2014_v12, %v2013_v62 }
 0x239   :  { %v2016_v25 = vmul.f32 %v1997_v9, %v5059_v26  ;;  %v2036_v38 = vmul.f32 %v1995_v51, %v5060_v22  ;;  %v2035_v6 = vadd.f32 %v2034_v17, %v2033_v13  ;;  %v5063_v57 = vstv %s5050_s25 }
 0x23a   :  { %v2055_v32 = vadd.f32 %v2054_v28, %v2053_v30  ;;  %v2056_v14 = vmul.f32 %v1993_v2, %v5063_v57  ;;  %v2000_v53 = vmax.f32 %v1988_v8, 0.0  ;;  %v5065_v46 = vstv %s4864_s26  ;;  %s5077_s26 = sld [smem:[#allocation85_spill]] }
 0x23b   :  { %v2018_v33 = vmul.f32 %v1998_v5, %v5065_v46  ;;  %v5066_v36 = vstv %s5053_s7  ;;  %v2017_v45 = vadd.f32 %v2016_v25, %v2015_v27  ;;  %v2037_v39 = vadd.f32 %v2036_v38, %v2035_v6 }
 0x23c   :  { %v2038_v16 = vmul.f32 %v1996_v52, %v5066_v36  ;;  %v2057_v50 = vadd.f32 %v2056_v14, %v2055_v32  ;;  %v5069_v59 = vstv %s5055_s4  ;;  %v5070_v48 = vstv %s5057_s1 }
 0x23d   :  { %v2058_v56 = vmul.f32 %v1994_v60, %v5069_v59  ;;  %v2020_v0 = vmul.f32 %v1999_v41, %v5070_v48  ;;  %v5071_v20 = vstv %s5058_s10  ;;  %v2019_v11 = vadd.f32 %v2018_v33, %v2017_v45 }
 0x23e   :  { %v2040_v23 = vmul.f32 %v1997_v9, %v5071_v20  ;;  %v2039_v2 = vadd.f32 %v2038_v16, %v2037_v39  ;;  %v5075_v37 = vstv %s5061_s17  ;;  %v5076_v47 = vstv %s5062_s27 }
 0x23f   :  { %v2059_v3 = vadd.f32 %v2058_v56, %v2057_v50  ;;  %v2060_v18 = vmul.f32 %v1995_v51, %v5075_v37  ;;  %v2022_v31 = vmul.f32 %v2000_v53, %v5076_v47  ;;  %v5078_v54 = vstv %s5064_s23 }
 0x240   :  { %v2042_v61 = vmul.f32 %v1998_v5, %v5078_v54  ;;  %v2021_v7 = vadd.f32 %v2020_v0, %v2019_v11  ;;  %v2041_v60 = vadd.f32 %v2040_v23, %v2039_v2  ;;  %v5080_v21 = vstv %s5067_s15 }
 0x241   :  { %v2061_v24 = vadd.f32 %v2060_v18, %v2059_v3  ;;  %v2062_v4 = vmul.f32 %v1996_v52, %v5080_v21  ;;  %v5082_v15 = vstv %s5068_s12  ;;  %v5084_v34 = vstv %s5072_s22 }
 0x242   :  { %v2044_v35 = vmul.f32 %v1999_v41, %v5082_v15  ;;  %v2023_v44 = vadd.f32 %v2022_v31, %v2021_v7  ;;  %v2043_v29 = vadd.f32 %v2042_v61, %v2041_v60  ;;  %v2064_v51 = vmul.f32 %v1997_v9, %v5084_v34 }
 0x243   :  { %v2063_v19 = vadd.f32 %v2062_v4, %v2061_v24  ;;  %v5085_v43 = vstv %s5073_s14  ;;  %v5087_v10 = vstv %s5074_s2  ;;  %v5088_v55 = vstv %s5077_s26 }
 0x244   :  { %v2046_v40 = vmul.f32 %v2000_v53, %v5085_v43  ;;  %v2024_v8 = vadd.f32 %v2023_v44, %v5087_v10  ;;  %v2045_v1 = vadd.f32 %v2044_v35, %v2043_v29  ;;  %v2066_v17 = vmul.f32 %v1998_v5, %v5088_v55 }
 0x245   :  { %v2065_v12 = vadd.f32 %v2064_v51, %v2063_v19  ;;  %v5089_v52 = vstv %s5079_s9  ;;  %v5090_v28 = vstv %s5081_s21  ;;  %v5091_v22 = vstv %s5083_s6 }
 0x246   :  { %v2047_v62 = vadd.f32 %v2046_v40, %v2045_v1  ;;  %v2068_v30 = vmul.f32 %v1999_v41, %v5089_v52  ;;  %v2073_v58 = vadd.f32 %v2024_v8, %v4178_v42  ;;  %v2070_v9 = vmul.f32 %v2000_v53, %v5091_v22 }
 0x247   :  { %v2067_v13 = vadd.f32 %v2066_v17, %v2065_v12  ;;  %v5093_v5 = vstv %s5086_s11 }
 0x248   :  { %v2048_v26 = vadd.f32 %v2047_v62, %v5090_v28  ;;  %2074 = vst.msk [vmem:[%s5092_s19] sm:$0xff] %vm847_vm6, %v2073_v58 }
 0x249   :  { %v2069_v25 = vadd.f32 %v2068_v30, %v2067_v13 }
 0x24a   :  { %v2075_v27 = vadd.f32 %v4183_v49, %v2048_v26 }
 0x24b   :  { %v2071_v38 = vadd.f32 %v2070_v9, %v2069_v25 }
 0x24c   :  { %2259 = vst.msk [vmem:[%s5092_s19 + $0x8] sm:$0xff] %vm847_vm6, %v2075_v27 }
 0x24d   :  { %v2072_v6 = vadd.f32 %v2071_v38, %v5093_v5 }
 0x24f   :  { %v2077_v42 = vadd.f32 %v4190_v63, %v2072_v6 }
 0x251   :  { %2260 = vst.msk [vmem:[%s5092_s19 + $0x10] sm:$0xff] %vm847_vm6, %v2077_v42 }
 0x252   :  { %2083 = vsyncpa [#allocation4], 1 }

</bundles_post_ra>
